<compile_context>
chip_gen: v6e
topology: v6e:2x2x1
jax: 0.10.0
libtpu: 0.0.40
codegen_flags: <defaults>
</compile_context>

<pallas_src>
import functools
import math

import jax
import jax.numpy as jnp
from jax.experimental import pallas as pl
from jax.experimental.pallas import tpu as pltpu


# ---------------------------------------------------------------------------
# Fused conv (as matmul) + InstanceNorm + residual + activation Pallas kernel
# ---------------------------------------------------------------------------
def _conv_in_act_kernel(x_ref, w_ref, gamma_ref, beta_ref, *rest,
                        apply_norm, activation, has_residual, eps):
    """One batch sample, one K-tile of the im2col matmul.

    x_ref     : (1, M, TK)   patches tile
    w_ref     : (TK, C_out)  weight tile
    gamma_ref : (1, C_out)   IN scale
    beta_ref  : (1, C_out)   IN shift
    res_ref   : (1, M, C_out) optional residual (second conv of a ResBlock)
    out_ref   : (1, M, C_out)
    acc_ref   : (M, C_out) f32 VMEM scratch accumulator
    """
    if has_residual:
        res_ref, out_ref, acc_ref = rest
    else:
        res_ref = None
        out_ref, acc_ref = rest

    kt = pl.program_id(1)

    @pl.when(kt == 0)
    def _init():
        acc_ref[...] = jnp.zeros_like(acc_ref)

    # (M, TK) @ (TK, C_out) on the MXU, accumulate in f32.
    acc_ref[...] += jnp.dot(x_ref[0], w_ref[...],
                            preferred_element_type=jnp.float32)

    @pl.when(kt == pl.num_programs(1) - 1)
    def _finalize():
        y = acc_ref[...]
        if apply_norm:
            # PyTorch InstanceNorm2d (train mode): per-channel stats over H*W,
            # biased variance, then affine.
            mean = jnp.mean(y, axis=0, keepdims=True)
            var = jnp.mean(jnp.square(y - mean), axis=0, keepdims=True)
            y = (y - mean) * jax.lax.rsqrt(var + eps)
            y = y * gamma_ref[...] + beta_ref[...]
        if has_residual:
            y = y + res_ref[0]
        if activation == "relu":
            y = jnp.maximum(y, 0.0)
        elif activation == "tanh":
            y = jnp.tanh(y)
        out_ref[0] = y.astype(out_ref.dtype)


def _round_up(x, m):
    return (x + m - 1) // m * m


def _choose_k_tiling(k_total, tk_max=512):
    """Pad K to a lane-aligned size and pick the K tile."""
    k_pad = _round_up(k_total, 128)
    if k_pad <= tk_max:
        return k_pad, k_pad
    return _round_up(k_total, tk_max), tk_max


def _pallas_conv_layer(patches, w_flat, gamma, beta, residual=None, *,
                       apply_norm, activation, eps=1e-5, tk_max=512):
    """patches: (B, M, K) ; w_flat: (K, C_out) ; residual: (B, M, C_out)|None."""
    b, m, k_total = patches.shape
    c_out = w_flat.shape[-1]

    k_pad, tk = _choose_k_tiling(k_total, tk_max)
    if k_pad != k_total:  # zero pad: exact for the matmul
        patches = jnp.pad(patches, ((0, 0), (0, 0), (0, k_pad - k_total)))
        w_flat = jnp.pad(w_flat, ((0, k_pad - k_total), (0, 0)))
    num_kt = k_pad // tk

    kernel = functools.partial(
        _conv_in_act_kernel,
        apply_norm=apply_norm,
        activation=activation,
        has_residual=residual is not None,
        eps=eps,
    )

    in_specs = [
        pl.BlockSpec((1, m, tk), lambda bi, ki: (bi, 0, ki)),
        pl.BlockSpec((tk, c_out), lambda bi, ki: (ki, 0)),
        pl.BlockSpec((1, c_out), lambda bi, ki: (0, 0)),
        pl.BlockSpec((1, c_out), lambda bi, ki: (0, 0)),
    ]
    inputs = [patches,
              w_flat,
              gamma.reshape(1, c_out).astype(jnp.float32),
              beta.reshape(1, c_out).astype(jnp.float32)]
    if residual is not None:
        in_specs.append(pl.BlockSpec((1, m, c_out), lambda bi, ki: (bi, 0, 0)))
        inputs.append(residual)

    out = pl.pallas_call(
        kernel,
        out_shape=jax.ShapeDtypeStruct((b, m, c_out), jnp.float32),
        grid=(b, num_kt),
        in_specs=in_specs,
        out_specs=pl.BlockSpec((1, m, c_out), lambda bi, ki: (bi, 0, 0)),
        scratch_shapes=[pltpu.VMEM((m, c_out), jnp.float32)],
        compiler_params=pltpu.CompilerParams(
            dimension_semantics=("parallel", "arbitrary"),
            vmem_limit_bytes=48 * 1024 * 1024,
        ),
    )(*inputs)
    return out


# ---------------------------------------------------------------------------
# Pure-JAX reference for the same per-layer math (for correctness checking)
# ---------------------------------------------------------------------------
def _ref_conv_layer(patches, w_flat, gamma, beta, residual=None, *,
                    apply_norm, activation, eps=1e-5):
    y = jnp.einsum("bmk,kc->bmc", patches, w_flat,
                   precision=jax.lax.Precision.HIGHEST)
    if apply_norm:
        mean = jnp.mean(y, axis=1, keepdims=True)
        var = jnp.mean(jnp.square(y - mean), axis=1, keepdims=True)
        y = (y - mean) * jax.lax.rsqrt(var + eps)
        y = y * gamma[None, None, :] + beta[None, None, :]
    if residual is not None:
        y = y + residual
    if activation == "relu":
        y = jnp.maximum(y, 0.0)
    elif activation == "tanh":
        y = jnp.tanh(y)
    return y


# ---------------------------------------------------------------------------
# Layout glue: im2col and zero-insertion dilation (data movement only)
# ---------------------------------------------------------------------------
def _im2col(x_nhwc, ksize, stride, pad):
    """NHWC -> (B, Ho*Wo, ksize*ksize*C); feature order (kh, kw, c_in)."""
    b, h, w, c = x_nhwc.shape
    xp = jnp.pad(x_nhwc, ((0, 0), (pad, pad), (pad, pad), (0, 0)))
    ho = (h + 2 * pad - ksize) // stride + 1
    wo = (w + 2 * pad - ksize) // stride + 1
    cols = []
    for kh in range(ksize):
        for kw in range(ksize):
            cols.append(xp[:, kh:kh + stride * ho:stride,
                           kw:kw + stride * wo:stride, :])
    patches = jnp.concatenate(cols, axis=-1)
    return patches.reshape(b, ho * wo, ksize * ksize * c), ho, wo


def _dilate2x(x_nhwc):
    """Insert one zero between spatial elements (stride-2 transposed conv)."""
    b, h, w, c = x_nhwc.shape
    y = jnp.zeros((b, h, 2, w, 2, c), x_nhwc.dtype)
    y = y.at[:, :, 0, :, 0, :].set(x_nhwc)
    y = y.reshape(b, 2 * h, 2 * w, c)
    return y[:, : 2 * h - 1, : 2 * w - 1, :]


# ---------------------------------------------------------------------------
# Generator2 forward
# ---------------------------------------------------------------------------
def generator2_forward(x, c, params, *, repeat_num, use_pallas=True):
    """x: (B, 3, H, W) NCHW, c: (B, c_dim). Returns (B, 3, H, W)."""
    b, _, h, w = x.shape
    c_dim = c.shape[1]

    compute = _pallas_conv_layer if use_pallas else _ref_conv_layer

    def run_layer(h_in, p, *, k, stride, pad, norm, act,
                  residual=None, conv_transpose=False):
        if conv_transpose:
            # ConvTranspose2d(k, s=2, p) == conv(k, s=1, pad=k-1-p) on the
            # zero-dilated input with flipped/transposed weights; the weight is
            # stored directly in that conv-equivalent (kh, kw, Cin, Cout) form
            # (an exact reparameterization, since weights are fresh random).
            h_in = _dilate2x(h_in)
            stride_eff, pad_eff = 1, k - 1 - pad
        else:
            stride_eff, pad_eff = stride, pad
        patches, ho, wo = _im2col(h_in, k, stride_eff, pad_eff)
        w_flat = p["w"].reshape(-1, p["w"].shape[-1])
        c_out = w_flat.shape[-1]
        res_flat = None
        if residual is not None:
            res_flat = residual.reshape(h_in.shape[0], ho * wo, c_out)
        y = compute(patches, w_flat, p["gamma"], p["beta"], res_flat,
                    apply_norm=norm, activation=act)
        return y.reshape(h_in.shape[0], ho, wo, c_out)

    # NCHW -> NHWC, tile the condition vector over space, concat on channels.
    hid = jnp.transpose(x, (0, 2, 3, 1))
    c_map = jnp.broadcast_to(c[:, None, None, :].astype(hid.dtype),
                             (b, h, w, c_dim))
    hid = jnp.concatenate([hid, c_map], axis=-1)

    # Stem: 7x7 conv -> IN -> ReLU
    hid = run_layer(hid, params["stem"], k=7, stride=1, pad=3,
                    norm=True, act="relu")
    # Downsampling: 2x [4x4 s2 conv -> IN -> ReLU]
    for i in range(2):
        hid = run_layer(hid, params[f"down{i}"], k=4, stride=2, pad=1,
                        norm=True, act="relu")
    # Residual blocks: x + IN(conv(ReLU(IN(conv(x)))))
    for i in range(repeat_num):
        skip = hid
        hid = run_layer(hid, params[f"res{i}_a"], k=3, stride=1, pad=1,
                        norm=True, act="relu")
        hid = run_layer(hid, params[f"res{i}_b"], k=3, stride=1, pad=1,
                        norm=True, act=None, residual=skip)
    # Upsampling: 2x [4x4 s2 conv-transpose -> IN -> ReLU]
    for i in range(2):
        hid = run_layer(hid, params[f"up{i}"], k=4, stride=2, pad=1,
                        norm=True, act="relu", conv_transpose=True)
    # Head: 7x7 conv -> tanh
    hid = run_layer(hid, params["head"], k=7, stride=1, pad=3,
                    norm=False, act="tanh")

    return jnp.transpose(hid, (0, 3, 1, 2))  # back to NCHW


def init_generator2_params(key, conv_dim=8, c_dim=5, repeat_num=2):
    """Fresh random parameters (weights NHWC-style: (kh, kw, Cin, Cout))."""
    counter = [0]

    def nextkey():
        counter[0] += 1
        return jax.random.fold_in(key, counter[0])

    def conv_params(k, cin, cout):
        w = jax.random.normal(nextkey(), (k, k, cin, cout), jnp.float32)
        w = w / math.sqrt(k * k * cin)
        gamma = 1.0 + 0.1 * jax.random.normal(nextkey(), (cout,), jnp.float32)
        beta = 0.1 * jax.random.normal(nextkey(), (cout,), jnp.float32)
        return {"w": w, "gamma": gamma, "beta": beta}

    params = {}
    cur = conv_dim
    params["stem"] = conv_params(7, 3 + c_dim, conv_dim)
    for i in range(2):
        params[f"down{i}"] = conv_params(4, cur, cur * 2)
        cur *= 2
    for i in range(repeat_num):
        params[f"res{i}_a"] = conv_params(3, cur, cur)
        params[f"res{i}_b"] = conv_params(3, cur, cur)
    for i in range(2):
        params[f"up{i}"] = conv_params(4, cur, cur // 2)
        cur //= 2
    head = conv_params(7, cur, 3)
    head["gamma"] = jnp.ones((3,), jnp.float32)   # unused (no norm on head)
    head["beta"] = jnp.zeros((3,), jnp.float32)
    params["head"] = head
    return params


if __name__ == "__main__":
    # Small shapes consistent with the module: batch=2, 3-channel 16x16 image,
    # c_dim=5 condition vector, conv_dim=8, repeat_num=2.
    B, H, W = 2, 16, 16
    conv_dim, c_dim, repeat_num = 8, 5, 2

    key = jax.random.PRNGKey(0)
    kp, kx, kc = jax.random.split(key, 3)
    params = init_generator2_params(kp, conv_dim=conv_dim, c_dim=c_dim,
                                    repeat_num=repeat_num)
    x = jax.random.normal(kx, (B, 3, H, W), dtype=jnp.float32)
    c = jax.random.normal(kc, (B, c_dim), dtype=jnp.float32)

    fwd_pallas = jax.jit(functools.partial(
        generator2_forward, repeat_num=repeat_num, use_pallas=True))
    fwd_ref = jax.jit(functools.partial(
        generator2_forward, repeat_num=repeat_num, use_pallas=False))

    out = jax.block_until_ready(fwd_pallas(x, c, params))
    ref = jax.block_until_ready(fwd_ref(x, c, params))

    assert out.shape == (B, 3, H, W), out.shape
    assert bool(jnp.all(jnp.isfinite(out)))
    max_err = float(jnp.max(jnp.abs(out - ref)))
    assert jnp.allclose(out, ref, rtol=2e-3, atol=2e-3), max_err
    print("KERNEL_OK")
</pallas_src>

<mosaic_0001>
module attributes {stable_mosaic.version = 11 : i64} {
  func.func @_conv_in_act_kernel(%arg0: i32, %arg1: i32, %arg2: memref<1x256x512xf32, #tpu.memory_space<vmem>>, %arg3: memref<512x8xf32, #tpu.memory_space<vmem>>, %arg4: memref<1x8xf32, #tpu.memory_space<vmem>>, %arg5: memref<1x8xf32, #tpu.memory_space<vmem>>, %arg6: memref<1x256x8xf32, #tpu.memory_space<vmem>>, %arg7: memref<256x8xf32, #tpu.memory_space<vmem>>) attributes {dimension_semantics = [#tpu.dimension_semantics<parallel>, #tpu.dimension_semantics<arbitrary>], iteration_bounds = array<i64: 2, 1>, scalar_prefetch = 0 : i64, scratch_operands = 1 : i64, tpu.core_type = #tpu.core_type<tc>, window_params = [{transform_indices = @transform_0, window_bounds = array<i64: 1, 256, 512>}, {transform_indices = @transform_1, window_bounds = array<i64: 512, 8>}, {pipeline_mode = #tpu.pipeline_mode<synchronous>, transform_indices = @transform_2, window_bounds = array<i64: 1, 8>}, {pipeline_mode = #tpu.pipeline_mode<synchronous>, transform_indices = @transform_3, window_bounds = array<i64: 1, 8>}, {transform_indices = @transform_4, window_bounds = array<i64: 1, 256, 8>}]} {
    %c0_i32 = arith.constant 0 : i32
    %0 = arith.cmpi eq, %arg1, %c0_i32 : i32
    %1 = arith.extui %0 : i1 to i32
    %c0_i32_0 = arith.constant 0 : i32
    %2 = arith.cmpi ne, %1, %c0_i32_0 : i32
    scf.if %2 {
      %cst_11 = arith.constant 0.000000e+00 : f32
      %13 = vector.broadcast %cst_11 : f32 to vector<256x8xf32>
      %c0_12 = arith.constant 0 : index
      %c0_13 = arith.constant 0 : index
      %14 = vector.load %arg7[%c0_12, %c0_13] : memref<256x8xf32, #tpu.memory_space<vmem>>, vector<256x8xf32>
      tpu.vector_store %arg7[%c0_12, %c0_13], %13 {strides = array<i32>} : memref<256x8xf32, #tpu.memory_space<vmem>>, vector<256x8xf32>,
    } else {
    }
    %c0 = arith.constant 0 : index
    %c0_1 = arith.constant 0 : index
    %3 = vector.load %arg7[%c0, %c0_1] : memref<256x8xf32, #tpu.memory_space<vmem>>, vector<256x8xf32>
    %c0_2 = arith.constant 0 : index
    %c0_3 = arith.constant 0 : index
    %c0_4 = arith.constant 0 : index
    %4 = vector.load %arg2[%c0_2, %c0_3, %c0_4] : memref<1x256x512xf32, #tpu.memory_space<vmem>>, vector<1x256x512xf32>
    %5 = vector.shape_cast %4 : vector<1x256x512xf32> to vector<256x512xf32>
    %c0_5 = arith.constant 0 : index
    %c0_6 = arith.constant 0 : index
    %6 = vector.load %arg3[%c0_5, %c0_6] : memref<512x8xf32, #tpu.memory_space<vmem>>, vector<512x8xf32>
    %cst = arith.constant dense<0.000000e+00> : vector<256x8xf32>
    %7 = tpu.matmul %5, %6, %cst {dimension_numbers = #tpu.dot_dimension_numbers<[1], [0], [0], [1], [0, 0, 1, 1], [], []>} : vector<256x512xf32>, vector<512x8xf32>, vector<256x8xf32> -> vector<256x8xf32>
    %8 = arith.addf %3, %7 : vector<256x8xf32>
    %c0_7 = arith.constant 0 : index
    %c0_8 = arith.constant 0 : index
    %9 = vector.load %arg7[%c0_7, %c0_8] : memref<256x8xf32, #tpu.memory_space<vmem>>, vector<256x8xf32>
    tpu.vector_store %arg7[%c0_7, %c0_8], %8 {strides = array<i32>} : memref<256x8xf32, #tpu.memory_space<vmem>>, vector<256x8xf32>,
    %c0_i32_9 = arith.constant 0 : i32
    %10 = arith.cmpi eq, %arg1, %c0_i32_9 : i32
    %11 = arith.extui %10 : i1 to i32
    %c0_i32_10 = arith.constant 0 : i32
    %12 = arith.cmpi ne, %11, %c0_i32_10 : i32
    scf.if %12 {
      %c0_11 = arith.constant 0 : index
      %c0_12 = arith.constant 0 : index
      %13 = vector.load %arg7[%c0_11, %c0_12] : memref<256x8xf32, #tpu.memory_space<vmem>>, vector<256x8xf32>
      %cst_13 = arith.constant dense<0.000000e+00> : vector<8xf32>
      %14 = vector.multi_reduction <add>, %13, %cst_13 [0] : vector<256x8xf32> to vector<8xf32>
      %15 = vector.shape_cast %14 : vector<8xf32> to vector<1x8xf32>
      %cst_14 = arith.constant 2.560000e+02 : f32
      %16 = vector.broadcast %cst_14 : f32 to vector<1x8xf32>
      %17 = arith.divf %15, %16 : vector<1x8xf32>
      %18 = vector.broadcast %17 : vector<1x8xf32> to vector<256x8xf32>
      %19 = arith.subf %13, %18 : vector<256x8xf32>
      %20 = arith.mulf %19, %19 : vector<256x8xf32>
      %cst_15 = arith.constant dense<0.000000e+00> : vector<8xf32>
      %21 = vector.multi_reduction <add>, %20, %cst_15 [0] : vector<256x8xf32> to vector<8xf32>
      %22 = vector.shape_cast %21 : vector<8xf32> to vector<1x8xf32>
      %cst_16 = arith.constant 2.560000e+02 : f32
      %23 = vector.broadcast %cst_16 : f32 to vector<1x8xf32>
      %24 = arith.divf %22, %23 : vector<1x8xf32>
      %25 = vector.broadcast %17 : vector<1x8xf32> to vector<256x8xf32>
      %26 = arith.subf %13, %25 : vector<256x8xf32>
      %cst_17 = arith.constant 9.99999974E-6 : f32
      %27 = vector.broadcast %cst_17 : f32 to vector<1x8xf32>
      %28 = arith.addf %24, %27 : vector<1x8xf32>
      %29 = math.rsqrt %28 : vector<1x8xf32>
      %30 = vector.broadcast %29 : vector<1x8xf32> to vector<256x8xf32>
      %31 = arith.mulf %26, %30 : vector<256x8xf32>
      %c0_18 = arith.constant 0 : index
      %c0_19 = arith.constant 0 : index
      %32 = vector.load %arg4[%c0_18, %c0_19] : memref<1x8xf32, #tpu.memory_space<vmem>>, vector<1x8xf32>
      %33 = vector.broadcast %32 : vector<1x8xf32> to vector<256x8xf32>
      %34 = arith.mulf %31, %33 : vector<256x8xf32>
      %c0_20 = arith.constant 0 : index
      %c0_21 = arith.constant 0 : index
      %35 = vector.load %arg5[%c0_20, %c0_21] : memref<1x8xf32, #tpu.memory_space<vmem>>, vector<1x8xf32>
      %36 = vector.broadcast %35 : vector<1x8xf32> to vector<256x8xf32>
      %37 = arith.addf %34, %36 : vector<256x8xf32>
      %cst_22 = arith.constant 0.000000e+00 : f32
      %38 = vector.broadcast %cst_22 : f32 to vector<256x8xf32>
      %39 = arith.maximumf %37, %38 : vector<256x8xf32>
      %c0_23 = arith.constant 0 : index
      %c0_24 = arith.constant 0 : index
      %c0_25 = arith.constant 0 : index
      %40 = vector.load %arg6[%c0_23, %c0_24, %c0_25] : memref<1x256x8xf32, #tpu.memory_space<vmem>>, vector<1x256x8xf32>
      %41 = vector.shape_cast %40 : vector<1x256x8xf32> to vector<256x8xf32>
      %42 = vector.shape_cast %39 : vector<256x8xf32> to vector<1x256x8xf32>
      tpu.vector_store %arg6[%c0_23, %c0_24, %c0_25], %42 {strides = array<i32>} : memref<1x256x8xf32, #tpu.memory_space<vmem>>, vector<1x256x8xf32>,
    } else {
    }
    return
  }
  func.func @transform_0(%arg0: i32, %arg1: i32) -> (i32, i32, i32) {
    %c0_i32 = arith.constant 0 : i32
    %c0_i32_0 = arith.constant 0 : i32
    return %arg0, %c0_i32, %arg1 : i32, i32, i32
  }
  func.func @transform_1(%arg0: i32, %arg1: i32) -> (i32, i32) {
    %c0_i32 = arith.constant 0 : i32
    %c0_i32_0 = arith.constant 0 : i32
    return %arg1, %c0_i32 : i32, i32
  }
  func.func @transform_2(%arg0: i32, %arg1: i32) -> (i32, i32) {
    %c0_i32 = arith.constant 0 : i32
    %c0_i32_0 = arith.constant 0 : i32
    %c0_i32_1 = arith.constant 0 : i32
    return %c0_i32, %c0_i32_0 : i32, i32
  }
  func.func @transform_3(%arg0: i32, %arg1: i32) -> (i32, i32) {
    %c0_i32 = arith.constant 0 : i32
    %c0_i32_0 = arith.constant 0 : i32
    %c0_i32_1 = arith.constant 0 : i32
    return %c0_i32, %c0_i32_0 : i32, i32
  }
  func.func @transform_4(%arg0: i32, %arg1: i32) -> (i32, i32, i32) {
    %c0_i32 = arith.constant 0 : i32
    %c0_i32_0 = arith.constant 0 : i32
    %c0_i32_1 = arith.constant 0 : i32
    return %arg0, %c0_i32, %c0_i32_0 : i32, i32, i32
  }
}

module attributes {stable_mosaic.version = 11 : i64} {
  func.func @_conv_in_act_kernel(%arg0: i32, %arg1: i32, %arg2: memref<1x64x128xf32, #tpu.memory_space<vmem>>, %arg3: memref<128x16xf32, #tpu.memory_space<vmem>>, %arg4: memref<1x16xf32, #tpu.memory_space<vmem>>, %arg5: memref<1x16xf32, #tpu.memory_space<vmem>>, %arg6: memref<1x64x16xf32, #tpu.memory_space<vmem>>, %arg7: memref<64x16xf32, #tpu.memory_space<vmem>>) attributes {dimension_semantics = [#tpu.dimension_semantics<parallel>, #tpu.dimension_semantics<arbitrary>], iteration_bounds = array<i64: 2, 1>, scalar_prefetch = 0 : i64, scratch_operands = 1 : i64, tpu.core_type = #tpu.core_type<tc>, window_params = [{transform_indices = @transform_0, window_bounds = array<i64: 1, 64, 128>}, {transform_indices = @transform_1, window_bounds = array<i64: 128, 16>}, {pipeline_mode = #tpu.pipeline_mode<synchronous>, transform_indices = @transform_2, window_bounds = array<i64: 1, 16>}, {pipeline_mode = #tpu.pipeline_mode<synchronous>, transform_indices = @transform_3, window_bounds = array<i64: 1, 16>}, {transform_indices = @transform_4, window_bounds = array<i64: 1, 64, 16>}]} {
    %c0_i32 = arith.constant 0 : i32
    %0 = arith.cmpi eq, %arg1, %c0_i32 : i32
    %1 = arith.extui %0 : i1 to i32
    %c0_i32_0 = arith.constant 0 : i32
    %2 = arith.cmpi ne, %1, %c0_i32_0 : i32
    scf.if %2 {
      %cst_11 = arith.constant 0.000000e+00 : f32
      %13 = vector.broadcast %cst_11 : f32 to vector<64x16xf32>
      %c0_12 = arith.constant 0 : index
      %c0_13 = arith.constant 0 : index
      %14 = vector.load %arg7[%c0_12, %c0_13] : memref<64x16xf32, #tpu.memory_space<vmem>>, vector<64x16xf32>
      tpu.vector_store %arg7[%c0_12, %c0_13], %13 {strides = array<i32>} : memref<64x16xf32, #tpu.memory_space<vmem>>, vector<64x16xf32>,
    } else {
    }
    %c0 = arith.constant 0 : index
    %c0_1 = arith.constant 0 : index
    %3 = vector.load %arg7[%c0, %c0_1] : memref<64x16xf32, #tpu.memory_space<vmem>>, vector<64x16xf32>
    %c0_2 = arith.constant 0 : index
    %c0_3 = arith.constant 0 : index
    %c0_4 = arith.constant 0 : index
    %4 = vector.load %arg2[%c0_2, %c0_3, %c0_4] : memref<1x64x128xf32, #tpu.memory_space<vmem>>, vector<1x64x128xf32>
    %5 = vector.shape_cast %4 : vector<1x64x128xf32> to vector<64x128xf32>
    %c0_5 = arith.constant 0 : index
    %c0_6 = arith.constant 0 : index
    %6 = vector.load %arg3[%c0_5, %c0_6] : memref<128x16xf32, #tpu.memory_space<vmem>>, vector<128x16xf32>
    %cst = arith.constant dense<0.000000e+00> : vector<64x16xf32>
    %7 = tpu.matmul %5, %6, %cst {dimension_numbers = #tpu.dot_dimension_numbers<[1], [0], [0], [1], [0, 0, 1, 1], [], []>} : vector<64x128xf32>, vector<128x16xf32>, vector<64x16xf32> -> vector<64x16xf32>
    %8 = arith.addf %3, %7 : vector<64x16xf32>
    %c0_7 = arith.constant 0 : index
    %c0_8 = arith.constant 0 : index
    %9 = vector.load %arg7[%c0_7, %c0_8] : memref<64x16xf32, #tpu.memory_space<vmem>>, vector<64x16xf32>
    tpu.vector_store %arg7[%c0_7, %c0_8], %8 {strides = array<i32>} : memref<64x16xf32, #tpu.memory_space<vmem>>, vector<64x16xf32>,
    %c0_i32_9 = arith.constant 0 : i32
    %10 = arith.cmpi eq, %arg1, %c0_i32_9 : i32
    %11 = arith.extui %10 : i1 to i32
    %c0_i32_10 = arith.constant 0 : i32
    %12 = arith.cmpi ne, %11, %c0_i32_10 : i32
    scf.if %12 {
      %c0_11 = arith.constant 0 : index
      %c0_12 = arith.constant 0 : index
      %13 = vector.load %arg7[%c0_11, %c0_12] : memref<64x16xf32, #tpu.memory_space<vmem>>, vector<64x16xf32>
      %cst_13 = arith.constant dense<0.000000e+00> : vector<16xf32>
      %14 = vector.multi_reduction <add>, %13, %cst_13 [0] : vector<64x16xf32> to vector<16xf32>
      %15 = vector.shape_cast %14 : vector<16xf32> to vector<1x16xf32>
      %cst_14 = arith.constant 6.400000e+01 : f32
      %16 = vector.broadcast %cst_14 : f32 to vector<1x16xf32>
      %17 = arith.divf %15, %16 : vector<1x16xf32>
      %18 = vector.broadcast %17 : vector<1x16xf32> to vector<64x16xf32>
      %19 = arith.subf %13, %18 : vector<64x16xf32>
      %20 = arith.mulf %19, %19 : vector<64x16xf32>
      %cst_15 = arith.constant dense<0.000000e+00> : vector<16xf32>
      %21 = vector.multi_reduction <add>, %20, %cst_15 [0] : vector<64x16xf32> to vector<16xf32>
      %22 = vector.shape_cast %21 : vector<16xf32> to vector<1x16xf32>
      %cst_16 = arith.constant 6.400000e+01 : f32
      %23 = vector.broadcast %cst_16 : f32 to vector<1x16xf32>
      %24 = arith.divf %22, %23 : vector<1x16xf32>
      %25 = vector.broadcast %17 : vector<1x16xf32> to vector<64x16xf32>
      %26 = arith.subf %13, %25 : vector<64x16xf32>
      %cst_17 = arith.constant 9.99999974E-6 : f32
      %27 = vector.broadcast %cst_17 : f32 to vector<1x16xf32>
      %28 = arith.addf %24, %27 : vector<1x16xf32>
      %29 = math.rsqrt %28 : vector<1x16xf32>
      %30 = vector.broadcast %29 : vector<1x16xf32> to vector<64x16xf32>
      %31 = arith.mulf %26, %30 : vector<64x16xf32>
      %c0_18 = arith.constant 0 : index
      %c0_19 = arith.constant 0 : index
      %32 = vector.load %arg4[%c0_18, %c0_19] : memref<1x16xf32, #tpu.memory_space<vmem>>, vector<1x16xf32>
      %33 = vector.broadcast %32 : vector<1x16xf32> to vector<64x16xf32>
      %34 = arith.mulf %31, %33 : vector<64x16xf32>
      %c0_20 = arith.constant 0 : index
      %c0_21 = arith.constant 0 : index
      %35 = vector.load %arg5[%c0_20, %c0_21] : memref<1x16xf32, #tpu.memory_space<vmem>>, vector<1x16xf32>
      %36 = vector.broadcast %35 : vector<1x16xf32> to vector<64x16xf32>
      %37 = arith.addf %34, %36 : vector<64x16xf32>
      %cst_22 = arith.constant 0.000000e+00 : f32
      %38 = vector.broadcast %cst_22 : f32 to vector<64x16xf32>
      %39 = arith.maximumf %37, %38 : vector<64x16xf32>
      %c0_23 = arith.constant 0 : index
      %c0_24 = arith.constant 0 : index
      %c0_25 = arith.constant 0 : index
      %40 = vector.load %arg6[%c0_23, %c0_24, %c0_25] : memref<1x64x16xf32, #tpu.memory_space<vmem>>, vector<1x64x16xf32>
      %41 = vector.shape_cast %40 : vector<1x64x16xf32> to vector<64x16xf32>
      %42 = vector.shape_cast %39 : vector<64x16xf32> to vector<1x64x16xf32>
      tpu.vector_store %arg6[%c0_23, %c0_24, %c0_25], %42 {strides = array<i32>} : memref<1x64x16xf32, #tpu.memory_space<vmem>>, vector<1x64x16xf32>,
    } else {
    }
    return
  }
  func.func @transform_0(%arg0: i32, %arg1: i32) -> (i32, i32, i32) {
    %c0_i32 = arith.constant 0 : i32
    %c0_i32_0 = arith.constant 0 : i32
    return %arg0, %c0_i32, %arg1 : i32, i32, i32
  }
  func.func @transform_1(%arg0: i32, %arg1: i32) -> (i32, i32) {
    %c0_i32 = arith.constant 0 : i32
    %c0_i32_0 = arith.constant 0 : i32
    return %arg1, %c0_i32 : i32, i32
  }
  func.func @transform_2(%arg0: i32, %arg1: i32) -> (i32, i32) {
    %c0_i32 = arith.constant 0 : i32
    %c0_i32_0 = arith.constant 0 : i32
    %c0_i32_1 = arith.constant 0 : i32
    return %c0_i32, %c0_i32_0 : i32, i32
  }
  func.func @transform_3(%arg0: i32, %arg1: i32) -> (i32, i32) {
    %c0_i32 = arith.constant 0 : i32
    %c0_i32_0 = arith.constant 0 : i32
    %c0_i32_1 = arith.constant 0 : i32
    return %c0_i32, %c0_i32_0 : i32, i32
  }
  func.func @transform_4(%arg0: i32, %arg1: i32) -> (i32, i32, i32) {
    %c0_i32 = arith.constant 0 : i32
    %c0_i32_0 = arith.constant 0 : i32
    %c0_i32_1 = arith.constant 0 : i32
    return %arg0, %c0_i32, %c0_i32_0 : i32, i32, i32
  }
}

module attributes {stable_mosaic.version = 11 : i64} {
  func.func @_conv_in_act_kernel(%arg0: i32, %arg1: i32, %arg2: memref<1x16x256xf32, #tpu.memory_space<vmem>>, %arg3: memref<256x32xf32, #tpu.memory_space<vmem>>, %arg4: memref<1x32xf32, #tpu.memory_space<vmem>>, %arg5: memref<1x32xf32, #tpu.memory_space<vmem>>, %arg6: memref<1x16x32xf32, #tpu.memory_space<vmem>>, %arg7: memref<16x32xf32, #tpu.memory_space<vmem>>) attributes {dimension_semantics = [#tpu.dimension_semantics<parallel>, #tpu.dimension_semantics<arbitrary>], iteration_bounds = array<i64: 2, 1>, scalar_prefetch = 0 : i64, scratch_operands = 1 : i64, tpu.core_type = #tpu.core_type<tc>, window_params = [{transform_indices = @transform_0, window_bounds = array<i64: 1, 16, 256>}, {transform_indices = @transform_1, window_bounds = array<i64: 256, 32>}, {pipeline_mode = #tpu.pipeline_mode<synchronous>, transform_indices = @transform_2, window_bounds = array<i64: 1, 32>}, {pipeline_mode = #tpu.pipeline_mode<synchronous>, transform_indices = @transform_3, window_bounds = array<i64: 1, 32>}, {transform_indices = @transform_4, window_bounds = array<i64: 1, 16, 32>}]} {
    %c0_i32 = arith.constant 0 : i32
    %0 = arith.cmpi eq, %arg1, %c0_i32 : i32
    %1 = arith.extui %0 : i1 to i32
    %c0_i32_0 = arith.constant 0 : i32
    %2 = arith.cmpi ne, %1, %c0_i32_0 : i32
    scf.if %2 {
      %cst_11 = arith.constant 0.000000e+00 : f32
      %13 = vector.broadcast %cst_11 : f32 to vector<16x32xf32>
      %c0_12 = arith.constant 0 : index
      %c0_13 = arith.constant 0 : index
      %14 = vector.load %arg7[%c0_12, %c0_13] : memref<16x32xf32, #tpu.memory_space<vmem>>, vector<16x32xf32>
      tpu.vector_store %arg7[%c0_12, %c0_13], %13 {strides = array<i32>} : memref<16x32xf32, #tpu.memory_space<vmem>>, vector<16x32xf32>,
    } else {
    }
    %c0 = arith.constant 0 : index
    %c0_1 = arith.constant 0 : index
    %3 = vector.load %arg7[%c0, %c0_1] : memref<16x32xf32, #tpu.memory_space<vmem>>, vector<16x32xf32>
    %c0_2 = arith.constant 0 : index
    %c0_3 = arith.constant 0 : index
    %c0_4 = arith.constant 0 : index
    %4 = vector.load %arg2[%c0_2, %c0_3, %c0_4] : memref<1x16x256xf32, #tpu.memory_space<vmem>>, vector<1x16x256xf32>
    %5 = vector.shape_cast %4 : vector<1x16x256xf32> to vector<16x256xf32>
    %c0_5 = arith.constant 0 : index
    %c0_6 = arith.constant 0 : index
    %6 = vector.load %arg3[%c0_5, %c0_6] : memref<256x32xf32, #tpu.memory_space<vmem>>, vector<256x32xf32>
    %cst = arith.constant dense<0.000000e+00> : vector<16x32xf32>
    %7 = tpu.matmul %5, %6, %cst {dimension_numbers = #tpu.dot_dimension_numbers<[1], [0], [0], [1], [0, 0, 1, 1], [], []>} : vector<16x256xf32>, vector<256x32xf32>, vector<16x32xf32> -> vector<16x32xf32>
    %8 = arith.addf %3, %7 : vector<16x32xf32>
    %c0_7 = arith.constant 0 : index
    %c0_8 = arith.constant 0 : index
    %9 = vector.load %arg7[%c0_7, %c0_8] : memref<16x32xf32, #tpu.memory_space<vmem>>, vector<16x32xf32>
    tpu.vector_store %arg7[%c0_7, %c0_8], %8 {strides = array<i32>} : memref<16x32xf32, #tpu.memory_space<vmem>>, vector<16x32xf32>,
    %c0_i32_9 = arith.constant 0 : i32
    %10 = arith.cmpi eq, %arg1, %c0_i32_9 : i32
    %11 = arith.extui %10 : i1 to i32
    %c0_i32_10 = arith.constant 0 : i32
    %12 = arith.cmpi ne, %11, %c0_i32_10 : i32
    scf.if %12 {
      %c0_11 = arith.constant 0 : index
      %c0_12 = arith.constant 0 : index
      %13 = vector.load %arg7[%c0_11, %c0_12] : memref<16x32xf32, #tpu.memory_space<vmem>>, vector<16x32xf32>
      %cst_13 = arith.constant dense<0.000000e+00> : vector<32xf32>
      %14 = vector.multi_reduction <add>, %13, %cst_13 [0] : vector<16x32xf32> to vector<32xf32>
      %15 = vector.shape_cast %14 : vector<32xf32> to vector<1x32xf32>
      %cst_14 = arith.constant 1.600000e+01 : f32
      %16 = vector.broadcast %cst_14 : f32 to vector<1x32xf32>
      %17 = arith.divf %15, %16 : vector<1x32xf32>
      %18 = vector.broadcast %17 : vector<1x32xf32> to vector<16x32xf32>
      %19 = arith.subf %13, %18 : vector<16x32xf32>
      %20 = arith.mulf %19, %19 : vector<16x32xf32>
      %cst_15 = arith.constant dense<0.000000e+00> : vector<32xf32>
      %21 = vector.multi_reduction <add>, %20, %cst_15 [0] : vector<16x32xf32> to vector<32xf32>
      %22 = vector.shape_cast %21 : vector<32xf32> to vector<1x32xf32>
      %cst_16 = arith.constant 1.600000e+01 : f32
      %23 = vector.broadcast %cst_16 : f32 to vector<1x32xf32>
      %24 = arith.divf %22, %23 : vector<1x32xf32>
      %25 = vector.broadcast %17 : vector<1x32xf32> to vector<16x32xf32>
      %26 = arith.subf %13, %25 : vector<16x32xf32>
      %cst_17 = arith.constant 9.99999974E-6 : f32
      %27 = vector.broadcast %cst_17 : f32 to vector<1x32xf32>
      %28 = arith.addf %24, %27 : vector<1x32xf32>
      %29 = math.rsqrt %28 : vector<1x32xf32>
      %30 = vector.broadcast %29 : vector<1x32xf32> to vector<16x32xf32>
      %31 = arith.mulf %26, %30 : vector<16x32xf32>
      %c0_18 = arith.constant 0 : index
      %c0_19 = arith.constant 0 : index
      %32 = vector.load %arg4[%c0_18, %c0_19] : memref<1x32xf32, #tpu.memory_space<vmem>>, vector<1x32xf32>
      %33 = vector.broadcast %32 : vector<1x32xf32> to vector<16x32xf32>
      %34 = arith.mulf %31, %33 : vector<16x32xf32>
      %c0_20 = arith.constant 0 : index
      %c0_21 = arith.constant 0 : index
      %35 = vector.load %arg5[%c0_20, %c0_21] : memref<1x32xf32, #tpu.memory_space<vmem>>, vector<1x32xf32>
      %36 = vector.broadcast %35 : vector<1x32xf32> to vector<16x32xf32>
      %37 = arith.addf %34, %36 : vector<16x32xf32>
      %cst_22 = arith.constant 0.000000e+00 : f32
      %38 = vector.broadcast %cst_22 : f32 to vector<16x32xf32>
      %39 = arith.maximumf %37, %38 : vector<16x32xf32>
      %c0_23 = arith.constant 0 : index
      %c0_24 = arith.constant 0 : index
      %c0_25 = arith.constant 0 : index
      %40 = vector.load %arg6[%c0_23, %c0_24, %c0_25] : memref<1x16x32xf32, #tpu.memory_space<vmem>>, vector<1x16x32xf32>
      %41 = vector.shape_cast %40 : vector<1x16x32xf32> to vector<16x32xf32>
      %42 = vector.shape_cast %39 : vector<16x32xf32> to vector<1x16x32xf32>
      tpu.vector_store %arg6[%c0_23, %c0_24, %c0_25], %42 {strides = array<i32>} : memref<1x16x32xf32, #tpu.memory_space<vmem>>, vector<1x16x32xf32>,
    } else {
    }
    return
  }
  func.func @transform_0(%arg0: i32, %arg1: i32) -> (i32, i32, i32) {
    %c0_i32 = arith.constant 0 : i32
    %c0_i32_0 = arith.constant 0 : i32
    return %arg0, %c0_i32, %arg1 : i32, i32, i32
  }
  func.func @transform_1(%arg0: i32, %arg1: i32) -> (i32, i32) {
    %c0_i32 = arith.constant 0 : i32
    %c0_i32_0 = arith.constant 0 : i32
    return %arg1, %c0_i32 : i32, i32
  }
  func.func @transform_2(%arg0: i32, %arg1: i32) -> (i32, i32) {
    %c0_i32 = arith.constant 0 : i32
    %c0_i32_0 = arith.constant 0 : i32
    %c0_i32_1 = arith.constant 0 : i32
    return %c0_i32, %c0_i32_0 : i32, i32
  }
  func.func @transform_3(%arg0: i32, %arg1: i32) -> (i32, i32) {
    %c0_i32 = arith.constant 0 : i32
    %c0_i32_0 = arith.constant 0 : i32
    %c0_i32_1 = arith.constant 0 : i32
    return %c0_i32, %c0_i32_0 : i32, i32
  }
  func.func @transform_4(%arg0: i32, %arg1: i32) -> (i32, i32, i32) {
    %c0_i32 = arith.constant 0 : i32
    %c0_i32_0 = arith.constant 0 : i32
    %c0_i32_1 = arith.constant 0 : i32
    return %arg0, %c0_i32, %c0_i32_0 : i32, i32, i32
  }
}

module attributes {stable_mosaic.version = 11 : i64} {
  func.func @_conv_in_act_kernel(%arg0: i32, %arg1: i32, %arg2: memref<1x16x384xf32, #tpu.memory_space<vmem>>, %arg3: memref<384x32xf32, #tpu.memory_space<vmem>>, %arg4: memref<1x32xf32, #tpu.memory_space<vmem>>, %arg5: memref<1x32xf32, #tpu.memory_space<vmem>>, %arg6: memref<1x16x32xf32, #tpu.memory_space<vmem>>, %arg7: memref<16x32xf32, #tpu.memory_space<vmem>>) attributes {dimension_semantics = [#tpu.dimension_semantics<parallel>, #tpu.dimension_semantics<arbitrary>], iteration_bounds = array<i64: 2, 1>, scalar_prefetch = 0 : i64, scratch_operands = 1 : i64, tpu.core_type = #tpu.core_type<tc>, window_params = [{transform_indices = @transform_0, window_bounds = array<i64: 1, 16, 384>}, {transform_indices = @transform_1, window_bounds = array<i64: 384, 32>}, {pipeline_mode = #tpu.pipeline_mode<synchronous>, transform_indices = @transform_2, window_bounds = array<i64: 1, 32>}, {pipeline_mode = #tpu.pipeline_mode<synchronous>, transform_indices = @transform_3, window_bounds = array<i64: 1, 32>}, {transform_indices = @transform_4, window_bounds = array<i64: 1, 16, 32>}]} {
    %c0_i32 = arith.constant 0 : i32
    %0 = arith.cmpi eq, %arg1, %c0_i32 : i32
    %1 = arith.extui %0 : i1 to i32
    %c0_i32_0 = arith.constant 0 : i32
    %2 = arith.cmpi ne, %1, %c0_i32_0 : i32
    scf.if %2 {
      %cst_11 = arith.constant 0.000000e+00 : f32
      %13 = vector.broadcast %cst_11 : f32 to vector<16x32xf32>
      %c0_12 = arith.constant 0 : index
      %c0_13 = arith.constant 0 : index
      %14 = vector.load %arg7[%c0_12, %c0_13] : memref<16x32xf32, #tpu.memory_space<vmem>>, vector<16x32xf32>
      tpu.vector_store %arg7[%c0_12, %c0_13], %13 {strides = array<i32>} : memref<16x32xf32, #tpu.memory_space<vmem>>, vector<16x32xf32>,
    } else {
    }
    %c0 = arith.constant 0 : index
    %c0_1 = arith.constant 0 : index
    %3 = vector.load %arg7[%c0, %c0_1] : memref<16x32xf32, #tpu.memory_space<vmem>>, vector<16x32xf32>
    %c0_2 = arith.constant 0 : index
    %c0_3 = arith.constant 0 : index
    %c0_4 = arith.constant 0 : index
    %4 = vector.load %arg2[%c0_2, %c0_3, %c0_4] : memref<1x16x384xf32, #tpu.memory_space<vmem>>, vector<1x16x384xf32>
    %5 = vector.shape_cast %4 : vector<1x16x384xf32> to vector<16x384xf32>
    %c0_5 = arith.constant 0 : index
    %c0_6 = arith.constant 0 : index
    %6 = vector.load %arg3[%c0_5, %c0_6] : memref<384x32xf32, #tpu.memory_space<vmem>>, vector<384x32xf32>
    %cst = arith.constant dense<0.000000e+00> : vector<16x32xf32>
    %7 = tpu.matmul %5, %6, %cst {dimension_numbers = #tpu.dot_dimension_numbers<[1], [0], [0], [1], [0, 0, 1, 1], [], []>} : vector<16x384xf32>, vector<384x32xf32>, vector<16x32xf32> -> vector<16x32xf32>
    %8 = arith.addf %3, %7 : vector<16x32xf32>
    %c0_7 = arith.constant 0 : index
    %c0_8 = arith.constant 0 : index
    %9 = vector.load %arg7[%c0_7, %c0_8] : memref<16x32xf32, #tpu.memory_space<vmem>>, vector<16x32xf32>
    tpu.vector_store %arg7[%c0_7, %c0_8], %8 {strides = array<i32>} : memref<16x32xf32, #tpu.memory_space<vmem>>, vector<16x32xf32>,
    %c0_i32_9 = arith.constant 0 : i32
    %10 = arith.cmpi eq, %arg1, %c0_i32_9 : i32
    %11 = arith.extui %10 : i1 to i32
    %c0_i32_10 = arith.constant 0 : i32
    %12 = arith.cmpi ne, %11, %c0_i32_10 : i32
    scf.if %12 {
      %c0_11 = arith.constant 0 : index
      %c0_12 = arith.constant 0 : index
      %13 = vector.load %arg7[%c0_11, %c0_12] : memref<16x32xf32, #tpu.memory_space<vmem>>, vector<16x32xf32>
      %cst_13 = arith.constant dense<0.000000e+00> : vector<32xf32>
      %14 = vector.multi_reduction <add>, %13, %cst_13 [0] : vector<16x32xf32> to vector<32xf32>
      %15 = vector.shape_cast %14 : vector<32xf32> to vector<1x32xf32>
      %cst_14 = arith.constant 1.600000e+01 : f32
      %16 = vector.broadcast %cst_14 : f32 to vector<1x32xf32>
      %17 = arith.divf %15, %16 : vector<1x32xf32>
      %18 = vector.broadcast %17 : vector<1x32xf32> to vector<16x32xf32>
      %19 = arith.subf %13, %18 : vector<16x32xf32>
      %20 = arith.mulf %19, %19 : vector<16x32xf32>
      %cst_15 = arith.constant dense<0.000000e+00> : vector<32xf32>
      %21 = vector.multi_reduction <add>, %20, %cst_15 [0] : vector<16x32xf32> to vector<32xf32>
      %22 = vector.shape_cast %21 : vector<32xf32> to vector<1x32xf32>
      %cst_16 = arith.constant 1.600000e+01 : f32
      %23 = vector.broadcast %cst_16 : f32 to vector<1x32xf32>
      %24 = arith.divf %22, %23 : vector<1x32xf32>
      %25 = vector.broadcast %17 : vector<1x32xf32> to vector<16x32xf32>
      %26 = arith.subf %13, %25 : vector<16x32xf32>
      %cst_17 = arith.constant 9.99999974E-6 : f32
      %27 = vector.broadcast %cst_17 : f32 to vector<1x32xf32>
      %28 = arith.addf %24, %27 : vector<1x32xf32>
      %29 = math.rsqrt %28 : vector<1x32xf32>
      %30 = vector.broadcast %29 : vector<1x32xf32> to vector<16x32xf32>
      %31 = arith.mulf %26, %30 : vector<16x32xf32>
      %c0_18 = arith.constant 0 : index
      %c0_19 = arith.constant 0 : index
      %32 = vector.load %arg4[%c0_18, %c0_19] : memref<1x32xf32, #tpu.memory_space<vmem>>, vector<1x32xf32>
      %33 = vector.broadcast %32 : vector<1x32xf32> to vector<16x32xf32>
      %34 = arith.mulf %31, %33 : vector<16x32xf32>
      %c0_20 = arith.constant 0 : index
      %c0_21 = arith.constant 0 : index
      %35 = vector.load %arg5[%c0_20, %c0_21] : memref<1x32xf32, #tpu.memory_space<vmem>>, vector<1x32xf32>
      %36 = vector.broadcast %35 : vector<1x32xf32> to vector<16x32xf32>
      %37 = arith.addf %34, %36 : vector<16x32xf32>
      %cst_22 = arith.constant 0.000000e+00 : f32
      %38 = vector.broadcast %cst_22 : f32 to vector<16x32xf32>
      %39 = arith.maximumf %37, %38 : vector<16x32xf32>
      %c0_23 = arith.constant 0 : index
      %c0_24 = arith.constant 0 : index
      %c0_25 = arith.constant 0 : index
      %40 = vector.load %arg6[%c0_23, %c0_24, %c0_25] : memref<1x16x32xf32, #tpu.memory_space<vmem>>, vector<1x16x32xf32>
      %41 = vector.shape_cast %40 : vector<1x16x32xf32> to vector<16x32xf32>
      %42 = vector.shape_cast %39 : vector<16x32xf32> to vector<1x16x32xf32>
      tpu.vector_store %arg6[%c0_23, %c0_24, %c0_25], %42 {strides = array<i32>} : memref<1x16x32xf32, #tpu.memory_space<vmem>>, vector<1x16x32xf32>,
    } else {
    }
    return
  }
  func.func @transform_0(%arg0: i32, %arg1: i32) -> (i32, i32, i32) {
    %c0_i32 = arith.constant 0 : i32
    %c0_i32_0 = arith.constant 0 : i32
    return %arg0, %c0_i32, %arg1 : i32, i32, i32
  }
  func.func @transform_1(%arg0: i32, %arg1: i32) -> (i32, i32) {
    %c0_i32 = arith.constant 0 : i32
    %c0_i32_0 = arith.constant 0 : i32
    return %arg1, %c0_i32 : i32, i32
  }
  func.func @transform_2(%arg0: i32, %arg1: i32) -> (i32, i32) {
    %c0_i32 = arith.constant 0 : i32
    %c0_i32_0 = arith.constant 0 : i32
    %c0_i32_1 = arith.constant 0 : i32
    return %c0_i32, %c0_i32_0 : i32, i32
  }
  func.func @transform_3(%arg0: i32, %arg1: i32) -> (i32, i32) {
    %c0_i32 = arith.constant 0 : i32
    %c0_i32_0 = arith.constant 0 : i32
    %c0_i32_1 = arith.constant 0 : i32
    return %c0_i32, %c0_i32_0 : i32, i32
  }
  func.func @transform_4(%arg0: i32, %arg1: i32) -> (i32, i32, i32) {
    %c0_i32 = arith.constant 0 : i32
    %c0_i32_0 = arith.constant 0 : i32
    %c0_i32_1 = arith.constant 0 : i32
    return %arg0, %c0_i32, %c0_i32_0 : i32, i32, i32
  }
}

module attributes {stable_mosaic.version = 11 : i64} {
  func.func @_conv_in_act_kernel(%arg0: i32, %arg1: i32, %arg2: memref<1x16x384xf32, #tpu.memory_space<vmem>>, %arg3: memref<384x32xf32, #tpu.memory_space<vmem>>, %arg4: memref<1x32xf32, #tpu.memory_space<vmem>>, %arg5: memref<1x32xf32, #tpu.memory_space<vmem>>, %arg6: memref<1x16x32xf32, #tpu.memory_space<vmem>>, %arg7: memref<1x16x32xf32, #tpu.memory_space<vmem>>, %arg8: memref<16x32xf32, #tpu.memory_space<vmem>>) attributes {dimension_semantics = [#tpu.dimension_semantics<parallel>, #tpu.dimension_semantics<arbitrary>], iteration_bounds = array<i64: 2, 1>, scalar_prefetch = 0 : i64, scratch_operands = 1 : i64, tpu.core_type = #tpu.core_type<tc>, window_params = [{transform_indices = @transform_0, window_bounds = array<i64: 1, 16, 384>}, {transform_indices = @transform_1, window_bounds = array<i64: 384, 32>}, {pipeline_mode = #tpu.pipeline_mode<synchronous>, transform_indices = @transform_2, window_bounds = array<i64: 1, 32>}, {pipeline_mode = #tpu.pipeline_mode<synchronous>, transform_indices = @transform_3, window_bounds = array<i64: 1, 32>}, {transform_indices = @transform_4, window_bounds = array<i64: 1, 16, 32>}, {transform_indices = @transform_5, window_bounds = array<i64: 1, 16, 32>}]} {
    %c0_i32 = arith.constant 0 : i32
    %0 = arith.cmpi eq, %arg1, %c0_i32 : i32
    %1 = arith.extui %0 : i1 to i32
    %c0_i32_0 = arith.constant 0 : i32
    %2 = arith.cmpi ne, %1, %c0_i32_0 : i32
    scf.if %2 {
      %cst_11 = arith.constant 0.000000e+00 : f32
      %13 = vector.broadcast %cst_11 : f32 to vector<16x32xf32>
      %c0_12 = arith.constant 0 : index
      %c0_13 = arith.constant 0 : index
      %14 = vector.load %arg8[%c0_12, %c0_13] : memref<16x32xf32, #tpu.memory_space<vmem>>, vector<16x32xf32>
      tpu.vector_store %arg8[%c0_12, %c0_13], %13 {strides = array<i32>} : memref<16x32xf32, #tpu.memory_space<vmem>>, vector<16x32xf32>,
    } else {
    }
    %c0 = arith.constant 0 : index
    %c0_1 = arith.constant 0 : index
    %3 = vector.load %arg8[%c0, %c0_1] : memref<16x32xf32, #tpu.memory_space<vmem>>, vector<16x32xf32>
    %c0_2 = arith.constant 0 : index
    %c0_3 = arith.constant 0 : index
    %c0_4 = arith.constant 0 : index
    %4 = vector.load %arg2[%c0_2, %c0_3, %c0_4] : memref<1x16x384xf32, #tpu.memory_space<vmem>>, vector<1x16x384xf32>
    %5 = vector.shape_cast %4 : vector<1x16x384xf32> to vector<16x384xf32>
    %c0_5 = arith.constant 0 : index
    %c0_6 = arith.constant 0 : index
    %6 = vector.load %arg3[%c0_5, %c0_6] : memref<384x32xf32, #tpu.memory_space<vmem>>, vector<384x32xf32>
    %cst = arith.constant dense<0.000000e+00> : vector<16x32xf32>
    %7 = tpu.matmul %5, %6, %cst {dimension_numbers = #tpu.dot_dimension_numbers<[1], [0], [0], [1], [0, 0, 1, 1], [], []>} : vector<16x384xf32>, vector<384x32xf32>, vector<16x32xf32> -> vector<16x32xf32>
    %8 = arith.addf %3, %7 : vector<16x32xf32>
    %c0_7 = arith.constant 0 : index
    %c0_8 = arith.constant 0 : index
    %9 = vector.load %arg8[%c0_7, %c0_8] : memref<16x32xf32, #tpu.memory_space<vmem>>, vector<16x32xf32>
    tpu.vector_store %arg8[%c0_7, %c0_8], %8 {strides = array<i32>} : memref<16x32xf32, #tpu.memory_space<vmem>>, vector<16x32xf32>,
    %c0_i32_9 = arith.constant 0 : i32
    %10 = arith.cmpi eq, %arg1, %c0_i32_9 : i32
    %11 = arith.extui %10 : i1 to i32
    %c0_i32_10 = arith.constant 0 : i32
    %12 = arith.cmpi ne, %11, %c0_i32_10 : i32
    scf.if %12 {
      %c0_11 = arith.constant 0 : index
      %c0_12 = arith.constant 0 : index
      %13 = vector.load %arg8[%c0_11, %c0_12] : memref<16x32xf32, #tpu.memory_space<vmem>>, vector<16x32xf32>
      %cst_13 = arith.constant dense<0.000000e+00> : vector<32xf32>
      %14 = vector.multi_reduction <add>, %13, %cst_13 [0] : vector<16x32xf32> to vector<32xf32>
      %15 = vector.shape_cast %14 : vector<32xf32> to vector<1x32xf32>
      %cst_14 = arith.constant 1.600000e+01 : f32
      %16 = vector.broadcast %cst_14 : f32 to vector<1x32xf32>
      %17 = arith.divf %15, %16 : vector<1x32xf32>
      %18 = vector.broadcast %17 : vector<1x32xf32> to vector<16x32xf32>
      %19 = arith.subf %13, %18 : vector<16x32xf32>
      %20 = arith.mulf %19, %19 : vector<16x32xf32>
      %cst_15 = arith.constant dense<0.000000e+00> : vector<32xf32>
      %21 = vector.multi_reduction <add>, %20, %cst_15 [0] : vector<16x32xf32> to vector<32xf32>
      %22 = vector.shape_cast %21 : vector<32xf32> to vector<1x32xf32>
      %cst_16 = arith.constant 1.600000e+01 : f32
      %23 = vector.broadcast %cst_16 : f32 to vector<1x32xf32>
      %24 = arith.divf %22, %23 : vector<1x32xf32>
      %25 = vector.broadcast %17 : vector<1x32xf32> to vector<16x32xf32>
      %26 = arith.subf %13, %25 : vector<16x32xf32>
      %cst_17 = arith.constant 9.99999974E-6 : f32
      %27 = vector.broadcast %cst_17 : f32 to vector<1x32xf32>
      %28 = arith.addf %24, %27 : vector<1x32xf32>
      %29 = math.rsqrt %28 : vector<1x32xf32>
      %30 = vector.broadcast %29 : vector<1x32xf32> to vector<16x32xf32>
      %31 = arith.mulf %26, %30 : vector<16x32xf32>
      %c0_18 = arith.constant 0 : index
      %c0_19 = arith.constant 0 : index
      %32 = vector.load %arg4[%c0_18, %c0_19] : memref<1x32xf32, #tpu.memory_space<vmem>>, vector<1x32xf32>
      %33 = vector.broadcast %32 : vector<1x32xf32> to vector<16x32xf32>
      %34 = arith.mulf %31, %33 : vector<16x32xf32>
      %c0_20 = arith.constant 0 : index
      %c0_21 = arith.constant 0 : index
      %35 = vector.load %arg5[%c0_20, %c0_21] : memref<1x32xf32, #tpu.memory_space<vmem>>, vector<1x32xf32>
      %36 = vector.broadcast %35 : vector<1x32xf32> to vector<16x32xf32>
      %37 = arith.addf %34, %36 : vector<16x32xf32>
      %c0_22 = arith.constant 0 : index
      %c0_23 = arith.constant 0 : index
      %c0_24 = arith.constant 0 : index
      %38 = vector.load %arg6[%c0_22, %c0_23, %c0_24] : memref<1x16x32xf32, #tpu.memory_space<vmem>>, vector<1x16x32xf32>
      %39 = vector.shape_cast %38 : vector<1x16x32xf32> to vector<16x32xf32>
      %40 = arith.addf %37, %39 : vector<16x32xf32>
      %c0_25 = arith.constant 0 : index
      %c0_26 = arith.constant 0 : index
      %c0_27 = arith.constant 0 : index
      %41 = vector.load %arg7[%c0_25, %c0_26, %c0_27] : memref<1x16x32xf32, #tpu.memory_space<vmem>>, vector<1x16x32xf32>
      %42 = vector.shape_cast %41 : vector<1x16x32xf32> to vector<16x32xf32>
      %43 = vector.shape_cast %40 : vector<16x32xf32> to vector<1x16x32xf32>
      tpu.vector_store %arg7[%c0_25, %c0_26, %c0_27], %43 {strides = array<i32>} : memref<1x16x32xf32, #tpu.memory_space<vmem>>, vector<1x16x32xf32>,
    } else {
    }
    return
  }
  func.func @transform_0(%arg0: i32, %arg1: i32) -> (i32, i32, i32) {
    %c0_i32 = arith.constant 0 : i32
    %c0_i32_0 = arith.constant 0 : i32
    return %arg0, %c0_i32, %arg1 : i32, i32, i32
  }
  func.func @transform_1(%arg0: i32, %arg1: i32) -> (i32, i32) {
    %c0_i32 = arith.constant 0 : i32
    %c0_i32_0 = arith.constant 0 : i32
    return %arg1, %c0_i32 : i32, i32
  }
  func.func @transform_2(%arg0: i32, %arg1: i32) -> (i32, i32) {
    %c0_i32 = arith.constant 0 : i32
    %c0_i32_0 = arith.constant 0 : i32
    %c0_i32_1 = arith.constant 0 : i32
    return %c0_i32, %c0_i32_0 : i32, i32
  }
  func.func @transform_3(%arg0: i32, %arg1: i32) -> (i32, i32) {
    %c0_i32 = arith.constant 0 : i32
    %c0_i32_0 = arith.constant 0 : i32
    %c0_i32_1 = arith.constant 0 : i32
    return %c0_i32, %c0_i32_0 : i32, i32
  }
  func.func @transform_4(%arg0: i32, %arg1: i32) -> (i32, i32, i32) {
    %c0_i32 = arith.constant 0 : i32
    %c0_i32_0 = arith.constant 0 : i32
    %c0_i32_1 = arith.constant 0 : i32
    return %arg0, %c0_i32, %c0_i32_0 : i32, i32, i32
  }
  func.func @transform_5(%arg0: i32, %arg1: i32) -> (i32, i32, i32) {
    %c0_i32 = arith.constant 0 : i32
    %c0_i32_0 = arith.constant 0 : i32
    %c0_i32_1 = arith.constant 0 : i32
    return %arg0, %c0_i32, %c0_i32_0 : i32, i32, i32
  }
}

module attributes {stable_mosaic.version = 11 : i64} {
  func.func @_conv_in_act_kernel(%arg0: i32, %arg1: i32, %arg2: memref<1x64x512xf32, #tpu.memory_space<vmem>>, %arg3: memref<512x16xf32, #tpu.memory_space<vmem>>, %arg4: memref<1x16xf32, #tpu.memory_space<vmem>>, %arg5: memref<1x16xf32, #tpu.memory_space<vmem>>, %arg6: memref<1x64x16xf32, #tpu.memory_space<vmem>>, %arg7: memref<64x16xf32, #tpu.memory_space<vmem>>) attributes {dimension_semantics = [#tpu.dimension_semantics<parallel>, #tpu.dimension_semantics<arbitrary>], iteration_bounds = array<i64: 2, 1>, scalar_prefetch = 0 : i64, scratch_operands = 1 : i64, tpu.core_type = #tpu.core_type<tc>, window_params = [{transform_indices = @transform_0, window_bounds = array<i64: 1, 64, 512>}, {transform_indices = @transform_1, window_bounds = array<i64: 512, 16>}, {pipeline_mode = #tpu.pipeline_mode<synchronous>, transform_indices = @transform_2, window_bounds = array<i64: 1, 16>}, {pipeline_mode = #tpu.pipeline_mode<synchronous>, transform_indices = @transform_3, window_bounds = array<i64: 1, 16>}, {transform_indices = @transform_4, window_bounds = array<i64: 1, 64, 16>}]} {
    %c0_i32 = arith.constant 0 : i32
    %0 = arith.cmpi eq, %arg1, %c0_i32 : i32
    %1 = arith.extui %0 : i1 to i32
    %c0_i32_0 = arith.constant 0 : i32
    %2 = arith.cmpi ne, %1, %c0_i32_0 : i32
    scf.if %2 {
      %cst_11 = arith.constant 0.000000e+00 : f32
      %13 = vector.broadcast %cst_11 : f32 to vector<64x16xf32>
      %c0_12 = arith.constant 0 : index
      %c0_13 = arith.constant 0 : index
      %14 = vector.load %arg7[%c0_12, %c0_13] : memref<64x16xf32, #tpu.memory_space<vmem>>, vector<64x16xf32>
      tpu.vector_store %arg7[%c0_12, %c0_13], %13 {strides = array<i32>} : memref<64x16xf32, #tpu.memory_space<vmem>>, vector<64x16xf32>,
    } else {
    }
    %c0 = arith.constant 0 : index
    %c0_1 = arith.constant 0 : index
    %3 = vector.load %arg7[%c0, %c0_1] : memref<64x16xf32, #tpu.memory_space<vmem>>, vector<64x16xf32>
    %c0_2 = arith.constant 0 : index
    %c0_3 = arith.constant 0 : index
    %c0_4 = arith.constant 0 : index
    %4 = vector.load %arg2[%c0_2, %c0_3, %c0_4] : memref<1x64x512xf32, #tpu.memory_space<vmem>>, vector<1x64x512xf32>
    %5 = vector.shape_cast %4 : vector<1x64x512xf32> to vector<64x512xf32>
    %c0_5 = arith.constant 0 : index
    %c0_6 = arith.constant 0 : index
    %6 = vector.load %arg3[%c0_5, %c0_6] : memref<512x16xf32, #tpu.memory_space<vmem>>, vector<512x16xf32>
    %cst = arith.constant dense<0.000000e+00> : vector<64x16xf32>
    %7 = tpu.matmul %5, %6, %cst {dimension_numbers = #tpu.dot_dimension_numbers<[1], [0], [0], [1], [0, 0, 1, 1], [], []>} : vector<64x512xf32>, vector<512x16xf32>, vector<64x16xf32> -> vector<64x16xf32>
    %8 = arith.addf %3, %7 : vector<64x16xf32>
    %c0_7 = arith.constant 0 : index
    %c0_8 = arith.constant 0 : index
    %9 = vector.load %arg7[%c0_7, %c0_8] : memref<64x16xf32, #tpu.memory_space<vmem>>, vector<64x16xf32>
    tpu.vector_store %arg7[%c0_7, %c0_8], %8 {strides = array<i32>} : memref<64x16xf32, #tpu.memory_space<vmem>>, vector<64x16xf32>,
    %c0_i32_9 = arith.constant 0 : i32
    %10 = arith.cmpi eq, %arg1, %c0_i32_9 : i32
    %11 = arith.extui %10 : i1 to i32
    %c0_i32_10 = arith.constant 0 : i32
    %12 = arith.cmpi ne, %11, %c0_i32_10 : i32
    scf.if %12 {
      %c0_11 = arith.constant 0 : index
      %c0_12 = arith.constant 0 : index
      %13 = vector.load %arg7[%c0_11, %c0_12] : memref<64x16xf32, #tpu.memory_space<vmem>>, vector<64x16xf32>
      %cst_13 = arith.constant dense<0.000000e+00> : vector<16xf32>
      %14 = vector.multi_reduction <add>, %13, %cst_13 [0] : vector<64x16xf32> to vector<16xf32>
      %15 = vector.shape_cast %14 : vector<16xf32> to vector<1x16xf32>
      %cst_14 = arith.constant 6.400000e+01 : f32
      %16 = vector.broadcast %cst_14 : f32 to vector<1x16xf32>
      %17 = arith.divf %15, %16 : vector<1x16xf32>
      %18 = vector.broadcast %17 : vector<1x16xf32> to vector<64x16xf32>
      %19 = arith.subf %13, %18 : vector<64x16xf32>
      %20 = arith.mulf %19, %19 : vector<64x16xf32>
      %cst_15 = arith.constant dense<0.000000e+00> : vector<16xf32>
      %21 = vector.multi_reduction <add>, %20, %cst_15 [0] : vector<64x16xf32> to vector<16xf32>
      %22 = vector.shape_cast %21 : vector<16xf32> to vector<1x16xf32>
      %cst_16 = arith.constant 6.400000e+01 : f32
      %23 = vector.broadcast %cst_16 : f32 to vector<1x16xf32>
      %24 = arith.divf %22, %23 : vector<1x16xf32>
      %25 = vector.broadcast %17 : vector<1x16xf32> to vector<64x16xf32>
      %26 = arith.subf %13, %25 : vector<64x16xf32>
      %cst_17 = arith.constant 9.99999974E-6 : f32
      %27 = vector.broadcast %cst_17 : f32 to vector<1x16xf32>
      %28 = arith.addf %24, %27 : vector<1x16xf32>
      %29 = math.rsqrt %28 : vector<1x16xf32>
      %30 = vector.broadcast %29 : vector<1x16xf32> to vector<64x16xf32>
      %31 = arith.mulf %26, %30 : vector<64x16xf32>
      %c0_18 = arith.constant 0 : index
      %c0_19 = arith.constant 0 : index
      %32 = vector.load %arg4[%c0_18, %c0_19] : memref<1x16xf32, #tpu.memory_space<vmem>>, vector<1x16xf32>
      %33 = vector.broadcast %32 : vector<1x16xf32> to vector<64x16xf32>
      %34 = arith.mulf %31, %33 : vector<64x16xf32>
      %c0_20 = arith.constant 0 : index
      %c0_21 = arith.constant 0 : index
      %35 = vector.load %arg5[%c0_20, %c0_21] : memref<1x16xf32, #tpu.memory_space<vmem>>, vector<1x16xf32>
      %36 = vector.broadcast %35 : vector<1x16xf32> to vector<64x16xf32>
      %37 = arith.addf %34, %36 : vector<64x16xf32>
      %cst_22 = arith.constant 0.000000e+00 : f32
      %38 = vector.broadcast %cst_22 : f32 to vector<64x16xf32>
      %39 = arith.maximumf %37, %38 : vector<64x16xf32>
      %c0_23 = arith.constant 0 : index
      %c0_24 = arith.constant 0 : index
      %c0_25 = arith.constant 0 : index
      %40 = vector.load %arg6[%c0_23, %c0_24, %c0_25] : memref<1x64x16xf32, #tpu.memory_space<vmem>>, vector<1x64x16xf32>
      %41 = vector.shape_cast %40 : vector<1x64x16xf32> to vector<64x16xf32>
      %42 = vector.shape_cast %39 : vector<64x16xf32> to vector<1x64x16xf32>
      tpu.vector_store %arg6[%c0_23, %c0_24, %c0_25], %42 {strides = array<i32>} : memref<1x64x16xf32, #tpu.memory_space<vmem>>, vector<1x64x16xf32>,
    } else {
    }
    return
  }
  func.func @transform_0(%arg0: i32, %arg1: i32) -> (i32, i32, i32) {
    %c0_i32 = arith.constant 0 : i32
    %c0_i32_0 = arith.constant 0 : i32
    return %arg0, %c0_i32, %arg1 : i32, i32, i32
  }
  func.func @transform_1(%arg0: i32, %arg1: i32) -> (i32, i32) {
    %c0_i32 = arith.constant 0 : i32
    %c0_i32_0 = arith.constant 0 : i32
    return %arg1, %c0_i32 : i32, i32
  }
  func.func @transform_2(%arg0: i32, %arg1: i32) -> (i32, i32) {
    %c0_i32 = arith.constant 0 : i32
    %c0_i32_0 = arith.constant 0 : i32
    %c0_i32_1 = arith.constant 0 : i32
    return %c0_i32, %c0_i32_0 : i32, i32
  }
  func.func @transform_3(%arg0: i32, %arg1: i32) -> (i32, i32) {
    %c0_i32 = arith.constant 0 : i32
    %c0_i32_0 = arith.constant 0 : i32
    %c0_i32_1 = arith.constant 0 : i32
    return %c0_i32, %c0_i32_0 : i32, i32
  }
  func.func @transform_4(%arg0: i32, %arg1: i32) -> (i32, i32, i32) {
    %c0_i32 = arith.constant 0 : i32
    %c0_i32_0 = arith.constant 0 : i32
    %c0_i32_1 = arith.constant 0 : i32
    return %arg0, %c0_i32, %c0_i32_0 : i32, i32, i32
  }
}

module attributes {stable_mosaic.version = 11 : i64} {
  func.func @_conv_in_act_kernel(%arg0: i32, %arg1: i32, %arg2: memref<1x256x256xf32, #tpu.memory_space<vmem>>, %arg3: memref<256x8xf32, #tpu.memory_space<vmem>>, %arg4: memref<1x8xf32, #tpu.memory_space<vmem>>, %arg5: memref<1x8xf32, #tpu.memory_space<vmem>>, %arg6: memref<1x256x8xf32, #tpu.memory_space<vmem>>, %arg7: memref<256x8xf32, #tpu.memory_space<vmem>>) attributes {dimension_semantics = [#tpu.dimension_semantics<parallel>, #tpu.dimension_semantics<arbitrary>], iteration_bounds = array<i64: 2, 1>, scalar_prefetch = 0 : i64, scratch_operands = 1 : i64, tpu.core_type = #tpu.core_type<tc>, window_params = [{transform_indices = @transform_0, window_bounds = array<i64: 1, 256, 256>}, {transform_indices = @transform_1, window_bounds = array<i64: 256, 8>}, {pipeline_mode = #tpu.pipeline_mode<synchronous>, transform_indices = @transform_2, window_bounds = array<i64: 1, 8>}, {pipeline_mode = #tpu.pipeline_mode<synchronous>, transform_indices = @transform_3, window_bounds = array<i64: 1, 8>}, {transform_indices = @transform_4, window_bounds = array<i64: 1, 256, 8>}]} {
    %c0_i32 = arith.constant 0 : i32
    %0 = arith.cmpi eq, %arg1, %c0_i32 : i32
    %1 = arith.extui %0 : i1 to i32
    %c0_i32_0 = arith.constant 0 : i32
    %2 = arith.cmpi ne, %1, %c0_i32_0 : i32
    scf.if %2 {
      %cst_11 = arith.constant 0.000000e+00 : f32
      %13 = vector.broadcast %cst_11 : f32 to vector<256x8xf32>
      %c0_12 = arith.constant 0 : index
      %c0_13 = arith.constant 0 : index
      %14 = vector.load %arg7[%c0_12, %c0_13] : memref<256x8xf32, #tpu.memory_space<vmem>>, vector<256x8xf32>
      tpu.vector_store %arg7[%c0_12, %c0_13], %13 {strides = array<i32>} : memref<256x8xf32, #tpu.memory_space<vmem>>, vector<256x8xf32>,
    } else {
    }
    %c0 = arith.constant 0 : index
    %c0_1 = arith.constant 0 : index
    %3 = vector.load %arg7[%c0, %c0_1] : memref<256x8xf32, #tpu.memory_space<vmem>>, vector<256x8xf32>
    %c0_2 = arith.constant 0 : index
    %c0_3 = arith.constant 0 : index
    %c0_4 = arith.constant 0 : index
    %4 = vector.load %arg2[%c0_2, %c0_3, %c0_4] : memref<1x256x256xf32, #tpu.memory_space<vmem>>, vector<1x256x256xf32>
    %5 = vector.shape_cast %4 : vector<1x256x256xf32> to vector<256x256xf32>
    %c0_5 = arith.constant 0 : index
    %c0_6 = arith.constant 0 : index
    %6 = vector.load %arg3[%c0_5, %c0_6] : memref<256x8xf32, #tpu.memory_space<vmem>>, vector<256x8xf32>
    %cst = arith.constant dense<0.000000e+00> : vector<256x8xf32>
    %7 = tpu.matmul %5, %6, %cst {dimension_numbers = #tpu.dot_dimension_numbers<[1], [0], [0], [1], [0, 0, 1, 1], [], []>} : vector<256x256xf32>, vector<256x8xf32>, vector<256x8xf32> -> vector<256x8xf32>
    %8 = arith.addf %3, %7 : vector<256x8xf32>
    %c0_7 = arith.constant 0 : index
    %c0_8 = arith.constant 0 : index
    %9 = vector.load %arg7[%c0_7, %c0_8] : memref<256x8xf32, #tpu.memory_space<vmem>>, vector<256x8xf32>
    tpu.vector_store %arg7[%c0_7, %c0_8], %8 {strides = array<i32>} : memref<256x8xf32, #tpu.memory_space<vmem>>, vector<256x8xf32>,
    %c0_i32_9 = arith.constant 0 : i32
    %10 = arith.cmpi eq, %arg1, %c0_i32_9 : i32
    %11 = arith.extui %10 : i1 to i32
    %c0_i32_10 = arith.constant 0 : i32
    %12 = arith.cmpi ne, %11, %c0_i32_10 : i32
    scf.if %12 {
      %c0_11 = arith.constant 0 : index
      %c0_12 = arith.constant 0 : index
      %13 = vector.load %arg7[%c0_11, %c0_12] : memref<256x8xf32, #tpu.memory_space<vmem>>, vector<256x8xf32>
      %cst_13 = arith.constant dense<0.000000e+00> : vector<8xf32>
      %14 = vector.multi_reduction <add>, %13, %cst_13 [0] : vector<256x8xf32> to vector<8xf32>
      %15 = vector.shape_cast %14 : vector<8xf32> to vector<1x8xf32>
      %cst_14 = arith.constant 2.560000e+02 : f32
      %16 = vector.broadcast %cst_14 : f32 to vector<1x8xf32>
      %17 = arith.divf %15, %16 : vector<1x8xf32>
      %18 = vector.broadcast %17 : vector<1x8xf32> to vector<256x8xf32>
      %19 = arith.subf %13, %18 : vector<256x8xf32>
      %20 = arith.mulf %19, %19 : vector<256x8xf32>
      %cst_15 = arith.constant dense<0.000000e+00> : vector<8xf32>
      %21 = vector.multi_reduction <add>, %20, %cst_15 [0] : vector<256x8xf32> to vector<8xf32>
      %22 = vector.shape_cast %21 : vector<8xf32> to vector<1x8xf32>
      %cst_16 = arith.constant 2.560000e+02 : f32
      %23 = vector.broadcast %cst_16 : f32 to vector<1x8xf32>
      %24 = arith.divf %22, %23 : vector<1x8xf32>
      %25 = vector.broadcast %17 : vector<1x8xf32> to vector<256x8xf32>
      %26 = arith.subf %13, %25 : vector<256x8xf32>
      %cst_17 = arith.constant 9.99999974E-6 : f32
      %27 = vector.broadcast %cst_17 : f32 to vector<1x8xf32>
      %28 = arith.addf %24, %27 : vector<1x8xf32>
      %29 = math.rsqrt %28 : vector<1x8xf32>
      %30 = vector.broadcast %29 : vector<1x8xf32> to vector<256x8xf32>
      %31 = arith.mulf %26, %30 : vector<256x8xf32>
      %c0_18 = arith.constant 0 : index
      %c0_19 = arith.constant 0 : index
      %32 = vector.load %arg4[%c0_18, %c0_19] : memref<1x8xf32, #tpu.memory_space<vmem>>, vector<1x8xf32>
      %33 = vector.broadcast %32 : vector<1x8xf32> to vector<256x8xf32>
      %34 = arith.mulf %31, %33 : vector<256x8xf32>
      %c0_20 = arith.constant 0 : index
      %c0_21 = arith.constant 0 : index
      %35 = vector.load %arg5[%c0_20, %c0_21] : memref<1x8xf32, #tpu.memory_space<vmem>>, vector<1x8xf32>
      %36 = vector.broadcast %35 : vector<1x8xf32> to vector<256x8xf32>
      %37 = arith.addf %34, %36 : vector<256x8xf32>
      %cst_22 = arith.constant 0.000000e+00 : f32
      %38 = vector.broadcast %cst_22 : f32 to vector<256x8xf32>
      %39 = arith.maximumf %37, %38 : vector<256x8xf32>
      %c0_23 = arith.constant 0 : index
      %c0_24 = arith.constant 0 : index
      %c0_25 = arith.constant 0 : index
      %40 = vector.load %arg6[%c0_23, %c0_24, %c0_25] : memref<1x256x8xf32, #tpu.memory_space<vmem>>, vector<1x256x8xf32>
      %41 = vector.shape_cast %40 : vector<1x256x8xf32> to vector<256x8xf32>
      %42 = vector.shape_cast %39 : vector<256x8xf32> to vector<1x256x8xf32>
      tpu.vector_store %arg6[%c0_23, %c0_24, %c0_25], %42 {strides = array<i32>} : memref<1x256x8xf32, #tpu.memory_space<vmem>>, vector<1x256x8xf32>,
    } else {
    }
    return
  }
  func.func @transform_0(%arg0: i32, %arg1: i32) -> (i32, i32, i32) {
    %c0_i32 = arith.constant 0 : i32
    %c0_i32_0 = arith.constant 0 : i32
    return %arg0, %c0_i32, %arg1 : i32, i32, i32
  }
  func.func @transform_1(%arg0: i32, %arg1: i32) -> (i32, i32) {
    %c0_i32 = arith.constant 0 : i32
    %c0_i32_0 = arith.constant 0 : i32
    return %arg1, %c0_i32 : i32, i32
  }
  func.func @transform_2(%arg0: i32, %arg1: i32) -> (i32, i32) {
    %c0_i32 = arith.constant 0 : i32
    %c0_i32_0 = arith.constant 0 : i32
    %c0_i32_1 = arith.constant 0 : i32
    return %c0_i32, %c0_i32_0 : i32, i32
  }
  func.func @transform_3(%arg0: i32, %arg1: i32) -> (i32, i32) {
    %c0_i32 = arith.constant 0 : i32
    %c0_i32_0 = arith.constant 0 : i32
    %c0_i32_1 = arith.constant 0 : i32
    return %c0_i32, %c0_i32_0 : i32, i32
  }
  func.func @transform_4(%arg0: i32, %arg1: i32) -> (i32, i32, i32) {
    %c0_i32 = arith.constant 0 : i32
    %c0_i32_0 = arith.constant 0 : i32
    %c0_i32_1 = arith.constant 0 : i32
    return %arg0, %c0_i32, %c0_i32_0 : i32, i32, i32
  }
}

module attributes {stable_mosaic.version = 11 : i64} {
  func.func @_conv_in_act_kernel(%arg0: i32, %arg1: i32, %arg2: memref<1x256x512xf32, #tpu.memory_space<vmem>>, %arg3: memref<512x3xf32, #tpu.memory_space<vmem>>, %arg4: memref<1x3xf32, #tpu.memory_space<vmem>>, %arg5: memref<1x3xf32, #tpu.memory_space<vmem>>, %arg6: memref<1x256x3xf32, #tpu.memory_space<vmem>>, %arg7: memref<256x3xf32, #tpu.memory_space<vmem>>) attributes {dimension_semantics = [#tpu.dimension_semantics<parallel>, #tpu.dimension_semantics<arbitrary>], iteration_bounds = array<i64: 2, 1>, scalar_prefetch = 0 : i64, scratch_operands = 1 : i64, tpu.core_type = #tpu.core_type<tc>, window_params = [{transform_indices = @transform_0, window_bounds = array<i64: 1, 256, 512>}, {transform_indices = @transform_1, window_bounds = array<i64: 512, 3>}, {pipeline_mode = #tpu.pipeline_mode<synchronous>, transform_indices = @transform_2, window_bounds = array<i64: 1, 3>}, {pipeline_mode = #tpu.pipeline_mode<synchronous>, transform_indices = @transform_3, window_bounds = array<i64: 1, 3>}, {transform_indices = @transform_4, window_bounds = array<i64: 1, 256, 3>}]} {
    %c0_i32 = arith.constant 0 : i32
    %0 = arith.cmpi eq, %arg1, %c0_i32 : i32
    %1 = arith.extui %0 : i1 to i32
    %c0_i32_0 = arith.constant 0 : i32
    %2 = arith.cmpi ne, %1, %c0_i32_0 : i32
    scf.if %2 {
      %cst_11 = arith.constant 0.000000e+00 : f32
      %13 = vector.broadcast %cst_11 : f32 to vector<256x3xf32>
      %c0_12 = arith.constant 0 : index
      %c0_13 = arith.constant 0 : index
      %14 = vector.load %arg7[%c0_12, %c0_13] : memref<256x3xf32, #tpu.memory_space<vmem>>, vector<256x3xf32>
      tpu.vector_store %arg7[%c0_12, %c0_13], %13 {strides = array<i32>} : memref<256x3xf32, #tpu.memory_space<vmem>>, vector<256x3xf32>,
    } else {
    }
    %c0 = arith.constant 0 : index
    %c0_1 = arith.constant 0 : index
    %3 = vector.load %arg7[%c0, %c0_1] : memref<256x3xf32, #tpu.memory_space<vmem>>, vector<256x3xf32>
    %c0_2 = arith.constant 0 : index
    %c0_3 = arith.constant 0 : index
    %c0_4 = arith.constant 0 : index
    %4 = vector.load %arg2[%c0_2, %c0_3, %c0_4] : memref<1x256x512xf32, #tpu.memory_space<vmem>>, vector<1x256x512xf32>
    %5 = vector.shape_cast %4 : vector<1x256x512xf32> to vector<256x512xf32>
    %c0_5 = arith.constant 0 : index
    %c0_6 = arith.constant 0 : index
    %6 = vector.load %arg3[%c0_5, %c0_6] : memref<512x3xf32, #tpu.memory_space<vmem>>, vector<512x3xf32>
    %cst = arith.constant dense<0.000000e+00> : vector<256x3xf32>
    %7 = tpu.matmul %5, %6, %cst {dimension_numbers = #tpu.dot_dimension_numbers<[1], [0], [0], [1], [0, 0, 1, 1], [], []>} : vector<256x512xf32>, vector<512x3xf32>, vector<256x3xf32> -> vector<256x3xf32>
    %8 = arith.addf %3, %7 : vector<256x3xf32>
    %c0_7 = arith.constant 0 : index
    %c0_8 = arith.constant 0 : index
    %9 = vector.load %arg7[%c0_7, %c0_8] : memref<256x3xf32, #tpu.memory_space<vmem>>, vector<256x3xf32>
    tpu.vector_store %arg7[%c0_7, %c0_8], %8 {strides = array<i32>} : memref<256x3xf32, #tpu.memory_space<vmem>>, vector<256x3xf32>,
    %c0_i32_9 = arith.constant 0 : i32
    %10 = arith.cmpi eq, %arg1, %c0_i32_9 : i32
    %11 = arith.extui %10 : i1 to i32
    %c0_i32_10 = arith.constant 0 : i32
    %12 = arith.cmpi ne, %11, %c0_i32_10 : i32
    scf.if %12 {
      %c0_11 = arith.constant 0 : index
      %c0_12 = arith.constant 0 : index
      %13 = vector.load %arg7[%c0_11, %c0_12] : memref<256x3xf32, #tpu.memory_space<vmem>>, vector<256x3xf32>
      %14 = math.tanh %13 : vector<256x3xf32>
      %c0_13 = arith.constant 0 : index
      %c0_14 = arith.constant 0 : index
      %c0_15 = arith.constant 0 : index
      %15 = vector.load %arg6[%c0_13, %c0_14, %c0_15] : memref<1x256x3xf32, #tpu.memory_space<vmem>>, vector<1x256x3xf32>
      %16 = vector.shape_cast %15 : vector<1x256x3xf32> to vector<256x3xf32>
      %17 = vector.shape_cast %14 : vector<256x3xf32> to vector<1x256x3xf32>
      tpu.vector_store %arg6[%c0_13, %c0_14, %c0_15], %17 {strides = array<i32>} : memref<1x256x3xf32, #tpu.memory_space<vmem>>, vector<1x256x3xf32>,
    } else {
    }
    return
  }
  func.func @transform_0(%arg0: i32, %arg1: i32) -> (i32, i32, i32) {
    %c0_i32 = arith.constant 0 : i32
    %c0_i32_0 = arith.constant 0 : i32
    return %arg0, %c0_i32, %arg1 : i32, i32, i32
  }
  func.func @transform_1(%arg0: i32, %arg1: i32) -> (i32, i32) {
    %c0_i32 = arith.constant 0 : i32
    %c0_i32_0 = arith.constant 0 : i32
    return %arg1, %c0_i32 : i32, i32
  }
  func.func @transform_2(%arg0: i32, %arg1: i32) -> (i32, i32) {
    %c0_i32 = arith.constant 0 : i32
    %c0_i32_0 = arith.constant 0 : i32
    %c0_i32_1 = arith.constant 0 : i32
    return %c0_i32, %c0_i32_0 : i32, i32
  }
  func.func @transform_3(%arg0: i32, %arg1: i32) -> (i32, i32) {
    %c0_i32 = arith.constant 0 : i32
    %c0_i32_0 = arith.constant 0 : i32
    %c0_i32_1 = arith.constant 0 : i32
    return %c0_i32, %c0_i32_0 : i32, i32
  }
  func.func @transform_4(%arg0: i32, %arg1: i32) -> (i32, i32, i32) {
    %c0_i32 = arith.constant 0 : i32
    %c0_i32_0 = arith.constant 0 : i32
    %c0_i32_1 = arith.constant 0 : i32
    return %arg0, %c0_i32, %c0_i32_0 : i32, i32, i32
  }
}

</mosaic_0001>

<bundles_post_ra>
// kernel: generator2_forward.11
= control target key start
LH: loop header
LB: loop body
LE: loop exit
PB: predicated region body
PF: predicated region fallthrough
CT: control target
= control target key end

     0   :  { %s816_s15 = smov 0   ;;  %s818_s16 = smov 0   ;;  %s964_s0 = inlined_call_operand.vmem [shape: f32[2,64,128], index: 0, kind: input, shape index: {}]   ;;  %s965_s1 = inlined_call_operand.vmem [shape: f32[128,16], index: 1, kind: input, shape index: {}]   ;;  %s966_s2 = inlined_call_operand.vmem [shape: f32[1,16], index: 2, kind: input, shape index: {}]   ;;  %s967_s3 = inlined_call_operand.vmem [shape: f32[1,16], index: 3, kind: input, shape index: {}]   ;;  %s968_s4 = inlined_call_operand.vmem [shape: f32[2,64,16], index: 4, kind: output, shape index: {}]  }
   0x1   :  { %s820_s17 = smov 0  }
   0x2 LB: > { %s26_s18 = sadd.s32 1, %s784_s16  ;;  %p628_p0 = scmp.ge.s32.totalorder %s788_s17, 1  ;;  %s788_s17 = sphi %s820_s17, %s14_s17   ;;  %s784_s16 = sphi %s818_s16, %s970_s16   ;;  %s780_s15 = sphi %s816_s15, %s969_s15  }
   0x3   : > { %p28_p1 = scmp.ge.s32.totalorder %s26_s18, 2  ;;  %p190_p2 = scmp.lt.s32.totalorder %s788_s17, 3 }
   0x5   : > { %s972_s18 = smov (%p28_p1, %s26_s18), 0  ;;  %p191_p3 = pnand %p628_p0, %p190_p2 }
   0x6   : > { %p224_p4 = scmp.lt.s32.totalorder (!%p191_p3), %s780_s15, 1 }
   0x7   : > { %194 = sbr.rel (%p191_p3) target bundleno = 342 (0x156), region = 36 }
   0xc   : > { %v287_v0 = vld [vmem:[%s965_s1 + $0x78] sm:$0xff]  ;;  %v286_v1 = vld [vmem:[%s965_s1 + $0x70] sm:$0xff]  ;;  %vm247_vm0 = vcmask 130048   ;;  %v790_v2 = vmov 0.0   ;;  %v285_v3 = vld [vmem:[%s965_s1 + $0x68] sm:$0xff]  ;;  %s974_s15 = smov (!%p224_p4, %s780_s15), 1 }
   0xd   : > { %663 = vmatprep.subr.mxu0 %v287_v0  ;;  %707 = vmatprep.subr.mxu1 %v287_v0  ;;  %249 = vst.msk [vmem:[#allocation2 + $0x8] sm:$0xff] %vm247_vm0, %v790_v2  ;;  %248 = vst.msk [vmem:[#allocation2] sm:$0xff] %vm247_vm0, %v790_v2  ;;  %v284_v4 = vld [vmem:[%s965_s1 + $0x60] sm:$0xff]  ;;  %v283_v5 = vld [vmem:[%s965_s1 + $0x58] sm:$0xff]  ;;  %s637_s19 = sshll.u32 %s974_s15, 6 }
   0xe   : > { %250 = vst.msk [vmem:[#allocation2 + $0x10] sm:$0xff] %vm247_vm0, %v790_v2  ;;  %251 = vst.msk [vmem:[#allocation2 + $0x18] sm:$0xff] %vm247_vm0, %v790_v2  ;;  %664 = vmatpush3.msra.mxu0 %v287_v0  ;;  %723 = vmatpush3.msra.mxu1 %v287_v0  ;;  %v282_v6 = vld [vmem:[%s965_s1 + $0x50] sm:$0xff]  ;;  %v281_v7 = vld [vmem:[%s965_s1 + $0x48] sm:$0xff]  ;;  %s890_s24 = scalar_lea.vmem %s964_s0, %s637_s19  ;;  %s242_s13 = scalar_lea.vmem %s968_s4, %s637_s19 }
   0xf   : > { %252 = vst.msk [vmem:[#allocation2 + $0x20] sm:$0xff] %vm247_vm0, %v790_v2  ;;  %253 = vst.msk [vmem:[#allocation2 + $0x28] sm:$0xff] %vm247_vm0, %v790_v2  ;;  %665 = vmatprep.subr.mxu0 %v286_v1  ;;  %708 = vmatprep.subr.mxu1 %v286_v1  ;;  %v280_v8 = vld [vmem:[%s965_s1 + $0x40] sm:$0xff]  ;;  %v279_v9 = vld [vmem:[%s965_s1 + $0x38] sm:$0xff] }
  0x10   : > { %254 = vst.msk [vmem:[#allocation2 + $0x30] sm:$0xff] %vm247_vm0, %v790_v2  ;;  %255 = vst.msk [vmem:[#allocation2 + $0x38] sm:$0xff] %vm247_vm0, %v790_v2  ;;  %666 = vmatpush3.msra.mxu0 %v286_v1  ;;  %724 = vmatpush3.msra.mxu1 %v286_v1  ;;  %v278_v10 = vld [vmem:[%s965_s1 + $0x30] sm:$0xff]  ;;  %v277_v11 = vld [vmem:[%s965_s1 + $0x28] sm:$0xff] }
  0x11   : > { %667 = vmatprep.subr.mxu0 %v285_v3  ;;  %709 = vmatprep.subr.mxu1 %v285_v3  ;;  %v276_v12 = vld [vmem:[%s965_s1 + $0x20] sm:$0xff]  ;;  %v275_v13 = vld [vmem:[%s965_s1 + $0x18] sm:$0xff]  ;;  %v274_v14 = vld [vmem:[%s965_s1 + $0x10] sm:$0xff] }
  0x12   : > { %668 = vmatpush3.msra.mxu0 %v285_v3  ;;  %725 = vmatpush3.msra.mxu1 %v285_v3  ;;  %v264_v15 = vld [vmem:[%s890_s24] sm:$0xff]  ;;  %v273_v16 = vld [vmem:[%s965_s1 + $0x8] sm:$0xff]  ;;  %v266_v19 = vld [vmem:[%s890_s24 + $0x10] sm:$0xff] }
  0x13   : > { %669 = vmatprep.subr.mxu0 %v284_v4  ;;  %710 = vmatprep.subr.mxu1 %v284_v4  ;;  %v272_v17 = vld [vmem:[%s965_s1] sm:$0xff]  ;;  %v265_v18 = vld [vmem:[%s890_s24 + $0x8] sm:$0xff]  ;;  %v270_v22 = vld [vmem:[%s890_s24 + $0x30] sm:$0xff] }
  0x14   : > { %670 = vmatpush3.msra.mxu0 %v284_v4  ;;  %726 = vmatpush3.msra.mxu1 %v284_v4  ;;  %v268_v20 = vld [vmem:[%s890_s24 + $0x20] sm:$0xff]  ;;  %v269_v21 = vld [vmem:[%s890_s24 + $0x28] sm:$0xff]  ;;  %v267_v23 = vld [vmem:[%s890_s24 + $0x18] sm:$0xff] }
  0x15   : > { %671 = vmatprep.subr.mxu0 %v283_v5  ;;  %711 = vmatprep.subr.mxu1 %v283_v5  ;;  %v271_v24 = vld [vmem:[%s890_s24 + $0x38] sm:$0xff]  ;;  %v257_v25 = vld [vmem:[#allocation2 + $0x8] sm:$0xff]  ;;  %v256_v27 = vld [vmem:[#allocation2] sm:$0xff] }
  0x16   : > { %672 = vmatpush3.msra.mxu0 %v283_v5  ;;  %727 = vmatpush3.msra.mxu1 %v283_v5  ;;  %v261_v28 = vld [vmem:[#allocation2 + $0x28] sm:$0xff]  ;;  %v259_v31 = vld [vmem:[#allocation2 + $0x18] sm:$0xff]  ;;  %v260_v33 = vld [vmem:[#allocation2 + $0x20] sm:$0xff] }
  0x17   : > { %673 = vmatprep.subr.mxu0 %v282_v6  ;;  %712 = vmatprep.subr.mxu1 %v282_v6  ;;  %v258_v37 = vld [vmem:[#allocation2 + $0x10] sm:$0xff]  ;;  %v263_v39 = vld [vmem:[#allocation2 + $0x38] sm:$0xff] }
  0x18   : > { %674 = vmatpush3.msra.mxu0 %v282_v6  ;;  %728 = vmatpush3.msra.mxu1 %v282_v6  ;;  %v262_v44 = vld [vmem:[#allocation2 + $0x30] sm:$0xff] }
  0x19   : > { %675 = vmatprep.subr.mxu0 %v281_v7  ;;  %713 = vmatprep.subr.mxu1 %v281_v7 }
  0x1a   : > { %676 = vmatpush3.msra.mxu0 %v281_v7  ;;  %729 = vmatpush3.msra.mxu1 %v281_v7 }
  0x1b   : > { %677 = vmatprep.subr.mxu0 %v280_v8  ;;  %714 = vmatprep.subr.mxu1 %v280_v8 }
  0x1c   : > { %678 = vmatpush3.msra.mxu0 %v280_v8  ;;  %730 = vmatpush3.msra.mxu1 %v280_v8 }
  0x1d   : > { %679 = vmatprep.subr.mxu0 %v279_v9  ;;  %715 = vmatprep.subr.mxu1 %v279_v9 }
  0x1e   : > { %680 = vmatpush3.msra.mxu0 %v279_v9  ;;  %731 = vmatpush3.msra.mxu1 %v279_v9 }
  0x1f   : > { %681 = vmatprep.subr.mxu0 %v278_v10  ;;  %716 = vmatprep.subr.mxu1 %v278_v10 }
  0x20   : > { %682 = vmatpush3.msra.mxu0 %v278_v10  ;;  %732 = vmatpush3.msra.mxu1 %v278_v10 }
  0x21   : > { %683 = vmatprep.subr.mxu0 %v277_v11  ;;  %717 = vmatprep.subr.mxu1 %v277_v11 }
  0x22   : > { %684 = vmatpush3.msra.mxu0 %v277_v11  ;;  %733 = vmatpush3.msra.mxu1 %v277_v11 }
  0x23   : > { %685 = vmatprep.subr.mxu0 %v276_v12  ;;  %718 = vmatprep.subr.mxu1 %v276_v12 }
  0x24   : > { %686 = vmatpush3.msra.mxu0 %v276_v12  ;;  %734 = vmatpush3.msra.mxu1 %v276_v12 }
  0x25   : > { %687 = vmatprep.subr.mxu0 %v275_v13  ;;  %719 = vmatprep.subr.mxu1 %v275_v13 }
  0x26   : > { %688 = vmatpush3.msra.mxu0 %v275_v13  ;;  %735 = vmatpush3.msra.mxu1 %v275_v13 }
  0x27   : > { %689 = vmatprep.subr.mxu0 %v274_v14  ;;  %695 = vmatprep.mubr.f32.mxu0 %v264_v15 }
  0x28   : > { %690 = vmatpush3.msra.mxu0 %v274_v14  ;;  %720 = vmatprep.subr.mxu1 %v274_v14 }
  0x29   : > { %691 = vmatprep.subr.mxu0 %v273_v16  ;;  %736 = vmatpush3.msra.mxu1 %v274_v14 }
  0x2a   : > { %692 = vmatpush3.msra.mxu0 %v273_v16  ;;  %721 = vmatprep.subr.mxu1 %v273_v16 }
  0x2b   : > { %693 = vmatprep.subr.mxu0 %v272_v17  ;;  %737 = vmatpush3.msra.mxu1 %v273_v16 }
  0x2c   : > { %694 = vmatpush3.msra.mxu0 %v272_v17  ;;  %722 = vmatprep.subr.mxu1 %v272_v17 }
  0x2d   : > { %696 = vmatmul.mubr.f32.vlgmr.msra.gmra.mxu0 %v265_v18  ;;  %738 = vmatpush3.msra.mxu1 %v272_v17 }
  0x2e   : > { %698 = vmatprep.mubr.f32.mxu0 %v266_v19  ;;  %701 = vmatprep.mubr.f32.mxu1 %v268_v20 }
  0x2f   : > { %702 = vmatmul.mubr.f32.vlgmr.msra.gmra.mxu1 %v269_v21 }
  0x30   : > { %704 = vmatprep.mubr.f32.mxu1 %v270_v22 }
  0x31   : > { %699 = vmatmul.mubr.f32.gmra.mxu0 %v267_v23 }
  0x33   : > { %705 = vmatmul.mubr.f32.gmra.mxu1 %v271_v24 }
  0xed   : > { %v697_v26 = vpop.f32.mrf.mxu0 }
  0xee   : > { %v394_v29 = vadd.f32 %v697_v26, %v257_v25 }
  0xef   : > { %v354_v30 = vpop.f32.mrf.mxu0  ;;  %v703_v32 = vpop.f32.mrf.mxu1 }
  0xf0   : > { %403 = vst.msk [vmem:[#allocation2 + $0x8] sm:$0xff] %vm247_vm0, %v394_v29  ;;  %v393_v34 = vadd.f32 %v354_v30, %v256_v27  ;;  %v398_v35 = vadd.f32 %v703_v32, %v261_v28 }
  0xf1   : > { %v700_v36 = vpop.f32.mrf.mxu0  ;;  %v374_v38 = vpop.f32.mrf.mxu1 }
  0xf2   : > { %402 = vst.msk [vmem:[#allocation2] sm:$0xff] %vm247_vm0, %v393_v34  ;;  %v396_v40 = vadd.f32 %v700_v36, %v259_v31  ;;  %407 = vst.msk [vmem:[#allocation2 + $0x28] sm:$0xff] %vm247_vm0, %v398_v35  ;;  %v397_v41 = vadd.f32 %v374_v38, %v260_v33 }
  0xf3   : > { %v364_v42 = vpop.f32.mrf.mxu0  ;;  %v706_v43 = vpop.f32.mrf.mxu1 }
  0xf4   : > { %405 = vst.msk [vmem:[#allocation2 + $0x18] sm:$0xff] %vm247_vm0, %v396_v40  ;;  %v395_v45 = vadd.f32 %v364_v42, %v258_v37  ;;  %406 = vst.msk [vmem:[#allocation2 + $0x20] sm:$0xff] %vm247_vm0, %v397_v41  ;;  %v400_v46 = vadd.f32 %v706_v43, %v263_v39 }
  0xf5   : > { %v384_v47 = vpop.f32.mrf.mxu1 }
  0xf6   : > { %404 = vst.msk [vmem:[#allocation2 + $0x10] sm:$0xff] %vm247_vm0, %v395_v45  ;;  %409 = vst.msk [vmem:[#allocation2 + $0x38] sm:$0xff] %vm247_vm0, %v400_v46  ;;  %v399_v48 = vadd.f32 %v384_v47, %v262_v44 }
  0xf7   : > { %v414_v49 = vld [vmem:[#allocation2 + $0x8] sm:$0xff] }
  0xf8   : > { %408 = vst.msk [vmem:[#allocation2 + $0x30] sm:$0xff] %vm247_vm0, %v399_v48  ;;  %v422_v52 = vsel %vm247_vm0, %v414_v49, 0.0 }
  0xf9   : > { %v413_v50 = vld [vmem:[#allocation2] sm:$0xff]  ;;  %v418_v60 = vld [vmem:[#allocation2 + $0x28] sm:$0xff] }
  0xfa   : > { %v421_v51 = vsel %vm247_vm0, %v413_v50, 0.0  ;;  %v430_v1 = vsel %vm247_vm0, %v418_v60, 0.0 }
  0xfb   : > { %v423_v53 = vadd.f32 %v422_v52, %v421_v51  ;;  %v416_v54 = vld [vmem:[#allocation2 + $0x18] sm:$0xff]  ;;  %v417_v58 = vld [vmem:[#allocation2 + $0x20] sm:$0xff] }
  0xfc   : > { %v426_v59 = vsel %vm247_vm0, %v416_v54, 0.0  ;;  %v428_v62 = vsel %vm247_vm0, %v417_v58, 0.0 }
  0xfd   : > { %v415_v55 = vld [vmem:[#allocation2 + $0x10] sm:$0xff]  ;;  %v420_v2 = vld [vmem:[#allocation2 + $0x38] sm:$0xff] }
  0xfe   : > { %v424_v56 = vsel %vm247_vm0, %v415_v55, 0.0  ;;  %v434_v6 = vsel %vm247_vm0, %v420_v2, 0.0 }
  0xff   : > { %v425_v57 = vadd.f32 %v424_v56, %v423_v53  ;;  %v419_v0 = vld [vmem:[#allocation2 + $0x30] sm:$0xff] }
 0x100   : > { %v432_v4 = vsel %vm247_vm0, %v419_v0, 0.0 }
 0x101   : > { %v427_v61 = vadd.f32 %v426_v59, %v425_v57 }
 0x103   : > { %v429_v63 = vadd.f32 %v428_v62, %v427_v61 }
 0x105   : > { %v431_v3 = vadd.f32 %v430_v1, %v429_v63 }
 0x107   : > { %v433_v5 = vadd.f32 %v432_v4, %v431_v3 }
 0x109   : > { %v435_v7 = vadd.f32 %v434_v6, %v433_v5 }
 0x10b   : > { %v436_v8 = vrot.slane %v435_v7, 4 }
 0x10d   : > { %v437_v9 = vadd.f32 %v436_v8, %v435_v7 }
 0x10f   : > { %v438_v10 = vrot.slane %v437_v9, 2 }
 0x111   : > { %v439_v11 = vadd.f32 %v438_v10, %v437_v9 }
 0x113   : > { %v440_v12 = vrot.slane %v439_v11, 1 }
 0x115   : > { %v441_v13 = vadd.f32 %v440_v12, %v439_v11 }
 0x117   : > { %v443_v14 = vmul.f32 0.015625, %v441_v13 }
 0x119   : > { %v444_v15 = vsub.f32 %v413_v50, %v443_v14  ;;  %v445_v16 = vsub.f32 %v414_v49, %v443_v14  ;;  %v446_v17 = vsub.f32 %v415_v55, %v443_v14  ;;  %v447_v18 = vsub.f32 %v416_v54, %v443_v14  ;;  %v633_v55 = vld [vmem:[%s966_s2] ss:$0 sm:$0xff] }
 0x11a   : > { %v448_v19 = vsub.f32 %v417_v58, %v443_v14  ;;  %v449_v23 = vsub.f32 %v418_v60, %v443_v14  ;;  %v450_v28 = vsub.f32 %v419_v0, %v443_v14  ;;  %v451_v32 = vsub.f32 %v420_v2, %v443_v14  ;;  %v634_v0 = vld [vmem:[%s967_s3] ss:$0 sm:$0xff] }
 0x11b   : > { %v452_v20 = vmul.f32 %v444_v15, %v444_v15  ;;  %v453_v21 = vmul.f32 %v445_v16, %v445_v16  ;;  %v454_v22 = vmul.f32 %v446_v17, %v446_v17  ;;  %v455_v24 = vmul.f32 %v447_v18, %v447_v18 }
 0x11c   : > { %v456_v29 = vmul.f32 %v448_v19, %v448_v19  ;;  %v457_v33 = vmul.f32 %v449_v23, %v449_v23  ;;  %v458_v36 = vmul.f32 %v450_v28, %v450_v28  ;;  %v459_v39 = vmul.f32 %v451_v32, %v451_v32 }
 0x11d   : > { %v460_v25 = vsel %vm247_vm0, %v452_v20, 0.0  ;;  %v461_v26 = vsel %vm247_vm0, %v453_v21, 0.0  ;;  %v463_v30 = vsel %vm247_vm0, %v454_v22, 0.0  ;;  %v465_v34 = vsel %vm247_vm0, %v455_v24, 0.0 }
 0x11e   : > { %v462_v27 = vadd.f32 %v461_v26, %v460_v25  ;;  %v467_v37 = vsel %vm247_vm0, %v456_v29, 0.0  ;;  %v469_v40 = vsel %vm247_vm0, %v457_v33, 0.0  ;;  %v471_v42 = vsel %vm247_vm0, %v458_v36, 0.0 }
 0x11f   : > { %v473_v44 = vsel %vm247_vm0, %v459_v39, 0.0 }
 0x120   : > { %v464_v31 = vadd.f32 %v463_v30, %v462_v27 }
 0x122   : > { %v466_v35 = vadd.f32 %v465_v34, %v464_v31 }
 0x124   : > { %v468_v38 = vadd.f32 %v467_v37, %v466_v35 }
 0x126   : > { %v470_v41 = vadd.f32 %v469_v40, %v468_v38 }
 0x128   : > { %v472_v43 = vadd.f32 %v471_v42, %v470_v41 }
 0x12a   : > { %v474_v45 = vadd.f32 %v473_v44, %v472_v43 }
 0x12c   : > { %v475_v46 = vrot.slane %v474_v45, 4 }
 0x12e   : > { %v476_v47 = vadd.f32 %v475_v46, %v474_v45 }
 0x130   : > { %v477_v48 = vrot.slane %v476_v47, 2 }
 0x132   : > { %v478_v49 = vadd.f32 %v477_v48, %v476_v47 }
 0x134   : > { %v479_v50 = vrot.slane %v478_v49, 1 }
 0x136   : > { %v480_v51 = vadd.f32 %v479_v50, %v478_v49 }
 0x138   : > { %v481_v52 = vmul.f32 0.015625, %v480_v51 }
 0x13a   : > { %v482_v53 = vadd.f32 1e-05, %v481_v52 }
 0x13c   : > { %764 = vrsqrt.f32 %v482_v53 }
 0x149   : > { %v765_v54 = vpop.eup %764 }
 0x14a   : > { %v484_v56 = vmul.f32 %v765_v54, %v444_v15  ;;  %v485_v57 = vmul.f32 %v765_v54, %v445_v16  ;;  %v486_v58 = vmul.f32 %v765_v54, %v446_v17  ;;  %v487_v59 = vmul.f32 %v765_v54, %v447_v18 }
 0x14b   : > { %v488_v60 = vmul.f32 %v765_v54, %v448_v19  ;;  %v489_v61 = vmul.f32 %v765_v54, %v449_v23  ;;  %v490_v62 = vmul.f32 %v765_v54, %v450_v28  ;;  %v491_v63 = vmul.f32 %v765_v54, %v451_v32 }
 0x14c   : > { %v499_v1 = vmul.f32 %v633_v55, %v484_v56  ;;  %v500_v2 = vmul.f32 %v633_v55, %v485_v57  ;;  %v501_v3 = vmul.f32 %v633_v55, %v486_v58  ;;  %v502_v4 = vmul.f32 %v633_v55, %v487_v59 }
 0x14d   : > { %v503_v5 = vmul.f32 %v633_v55, %v488_v60  ;;  %v504_v6 = vmul.f32 %v633_v55, %v489_v61  ;;  %v505_v7 = vmul.f32 %v633_v55, %v490_v62  ;;  %v506_v8 = vmul.f32 %v633_v55, %v491_v63 }
 0x14e   : > { %v514_v9 = vadd.f32 %v634_v0, %v499_v1  ;;  %v515_v10 = vadd.f32 %v634_v0, %v500_v2  ;;  %v516_v11 = vadd.f32 %v634_v0, %v501_v3  ;;  %v517_v12 = vadd.f32 %v634_v0, %v502_v4 }
 0x14f   : > { %v518_v13 = vadd.f32 %v634_v0, %v503_v5  ;;  %v519_v14 = vadd.f32 %v634_v0, %v504_v6  ;;  %v520_v15 = vadd.f32 %v634_v0, %v505_v7  ;;  %v521_v16 = vadd.f32 %v634_v0, %v506_v8 }
 0x150   : > { %v522_v17 = vmax.f32 %v514_v9, 0.0  ;;  %v523_v18 = vmax.f32 %v515_v10, 0.0  ;;  %v524_v19 = vmax.f32 %v516_v11, 0.0  ;;  %v525_v20 = vmax.f32 %v517_v12, 0.0 }
 0x151   : > { %v526_v21 = vmax.f32 %v518_v13, 0.0  ;;  %v527_v22 = vmax.f32 %v519_v14, 0.0  ;;  %v528_v23 = vmax.f32 %v520_v15, 0.0  ;;  %v529_v24 = vmax.f32 %v521_v16, 0.0 }
 0x152   : > { %530 = vst.msk [vmem:[%s242_s13] sm:$0xff] %vm247_vm0, %v522_v17  ;;  %531 = vst.msk [vmem:[%s242_s13 + $0x8] sm:$0xff] %vm247_vm0, %v523_v18 }
 0x153   : > { %532 = vst.msk [vmem:[%s242_s13 + $0x10] sm:$0xff] %vm247_vm0, %v524_v19  ;;  %533 = vst.msk [vmem:[%s242_s13 + $0x18] sm:$0xff] %vm247_vm0, %v525_v20 }
 0x154   : > { %534 = vst.msk [vmem:[%s242_s13 + $0x20] sm:$0xff] %vm247_vm0, %v526_v21  ;;  %535 = vst.msk [vmem:[%s242_s13 + $0x28] sm:$0xff] %vm247_vm0, %v527_v22 }
 0x155   : > { %536 = vst.msk [vmem:[%s242_s13 + $0x30] sm:$0xff] %vm247_vm0, %v528_v23  ;;  %537 = vst.msk [vmem:[%s242_s13 + $0x38] sm:$0xff] %vm247_vm0, %v529_v24 }
 0x156 PF: > { %s14_s17 = sadd.s32 1, %s788_s17   ;;  %s969_s15 = smov %s784_s16 }
 0x157   : > { %p11_p5 = scmp.ge.s32.totalorder %s14_s17, 4   ;;  %s970_s16 = smov %s972_s18 }
 0x159   :  { %13 = sbr.rel (!%p11_p5) target bundleno = 2 (0x2), region = 77 }

// kernel: generator2_forward.10
= control target key start
LH: loop header
LB: loop body
LE: loop exit
PB: predicated region body
PF: predicated region fallthrough
CT: control target
= control target key end

     0   :  { %s1618_s15 = smov 0   ;;  %s1620_s16 = smov 0   ;;  %s2620_s0 = inlined_call_operand.vmem [shape: f32[2,256,512], index: 0, kind: input, shape index: {}]   ;;  %s2621_s1 = inlined_call_operand.vmem [shape: f32[512,8], index: 1, kind: input, shape index: {}]   ;;  %s2622_s2 = inlined_call_operand.vmem [shape: f32[1,8], index: 2, kind: input, shape index: {}]   ;;  %s2623_s3 = inlined_call_operand.vmem [shape: f32[1,8], index: 3, kind: input, shape index: {}]   ;;  %s2624_s4 = inlined_call_operand.vmem [shape: f32[2,256,8], index: 4, kind: output, shape index: {}]  }
   0x1   :  { %s1622_s17 = smov 0  }
   0x2 LB: > { %s26_s18 = sadd.s32 1, %s1586_s16  ;;  %p1530_p0 = scmp.ge.s32.totalorder %s1590_s17, 1  ;;  %s1590_s17 = sphi %s1622_s17, %s14_s17   ;;  %s1586_s16 = sphi %s1620_s16, %s2626_s16   ;;  %s1582_s15 = sphi %s1618_s15, %s2625_s15  }
   0x3   : > { %p28_p1 = scmp.ge.s32.totalorder %s26_s18, 2  ;;  %p192_p2 = scmp.lt.s32.totalorder %s1590_s17, 3 }
   0x5   : > { %s2628_s18 = smov (%p28_p1, %s26_s18), 0  ;;  %p193_p3 = pnand %p1530_p0, %p192_p2 }
   0x6   : > { %p228_p4 = scmp.lt.s32.totalorder (!%p193_p3), %s1582_s15, 1 }
   0x7   : > { %196 = sbr.rel (%p193_p3) target bundleno = 563 (0x233), region = 36 }
   0xc   : > { %v460_v0 = vld [vmem:[%s2621_s1 + $0x78] sm:$0xff]  ;;  %v1592_v2 = vmov 0.0   ;;  %v459_v3 = vld [vmem:[%s2621_s1 + $0x70] sm:$0xff]  ;;  %v458_v5 = vld [vmem:[%s2621_s1 + $0x68] sm:$0xff]  ;;  %s2630_s15 = smov (!%p228_p4, %s1582_s15), 1  ;;  %vm252_vm0 = vcmask 64512  }
   0xd   : > { %v492_v1 = vld [vmem:[%s2621_s1 + $0x178] sm:$0xff]  ;;  %509 = vmatprep.subr.mxu0 %v1592_v2  ;;  %734 = vmatprep.subr.mxu1 %v1592_v2  ;;  %v491_v4 = vld [vmem:[%s2621_s1 + $0x170] sm:$0xff]  ;;  %v490_v6 = vld [vmem:[%s2621_s1 + $0x168] sm:$0xff]  ;;  %s1539_s25 = sshll.u32 %s2630_s15, 10  ;;  %253 = vst.msk [vmem:[#allocation2] sm:$0xff] %vm252_vm0, %v1592_v2  ;;  %s1540_s23 = sshll.u32 %s2630_s15, 8 }
   0xe   : > { %510 = vmatpush1.msra.mxu0 %v460_v0  ;;  %735 = vmatpush1.msra.mxu1 %v492_v1  ;;  %v457_v7 = vld [vmem:[%s2621_s1 + $0x60] sm:$0xff]  ;;  %v456_v9 = vld [vmem:[%s2621_s1 + $0x58] sm:$0xff]  ;;  %v455_v11 = vld [vmem:[%s2621_s1 + $0x50] sm:$0xff]  ;;  %s1884_s6 = scalar_lea.vmem %s2620_s0, %s1539_s25  ;;  %254 = vst.msk [vmem:[#allocation2 + $0x8] sm:$0xff] %vm252_vm0, %v1592_v2  ;;  %s2525_s25 = scalar_lea.vmem %s2624_s4, %s1540_s23 }
   0xf   : > { %511 = vmatprep.subr.mxu0 %v1592_v2  ;;  %736 = vmatprep.subr.mxu1 %v1592_v2  ;;  %v489_v8 = vld [vmem:[%s2621_s1 + $0x160] sm:$0xff]  ;;  %v488_v10 = vld [vmem:[%s2621_s1 + $0x158] sm:$0xff]  ;;  %v487_v12 = vld [vmem:[%s2621_s1 + $0x150] sm:$0xff]  ;;  %255 = vst.msk [vmem:[#allocation2 + $0x10] sm:$0xff] %vm252_vm0, %v1592_v2 }
  0x10   : > { %512 = vmatpush1.msra.mxu0 %v459_v3  ;;  %737 = vmatpush1.msra.mxu1 %v491_v4  ;;  %v454_v13 = vld [vmem:[%s2621_s1 + $0x48] sm:$0xff]  ;;  %v453_v15 = vld [vmem:[%s2621_s1 + $0x40] sm:$0xff]  ;;  %v452_v17 = vld [vmem:[%s2621_s1 + $0x38] sm:$0xff]  ;;  %256 = vst.msk [vmem:[#allocation2 + $0x18] sm:$0xff] %vm252_vm0, %v1592_v2 }
  0x11   : > { %513 = vmatprep.subr.mxu0 %v1592_v2  ;;  %738 = vmatprep.subr.mxu1 %v1592_v2  ;;  %v486_v14 = vld [vmem:[%s2621_s1 + $0x148] sm:$0xff]  ;;  %v485_v16 = vld [vmem:[%s2621_s1 + $0x140] sm:$0xff]  ;;  %v484_v18 = vld [vmem:[%s2621_s1 + $0x138] sm:$0xff]  ;;  %257 = vst.msk [vmem:[#allocation2 + $0x20] sm:$0xff] %vm252_vm0, %v1592_v2 }
  0x12   : > { %514 = vmatpush1.msra.mxu0 %v458_v5  ;;  %739 = vmatpush1.msra.mxu1 %v490_v6  ;;  %v451_v19 = vld [vmem:[%s2621_s1 + $0x30] sm:$0xff]  ;;  %v450_v21 = vld [vmem:[%s2621_s1 + $0x28] sm:$0xff]  ;;  %v449_v23 = vld [vmem:[%s2621_s1 + $0x20] sm:$0xff]  ;;  %258 = vst.msk [vmem:[#allocation2 + $0x28] sm:$0xff] %vm252_vm0, %v1592_v2 }
  0x13   : > { %515 = vmatprep.subr.mxu0 %v1592_v2  ;;  %740 = vmatprep.subr.mxu1 %v1592_v2  ;;  %v483_v20 = vld [vmem:[%s2621_s1 + $0x130] sm:$0xff]  ;;  %v482_v22 = vld [vmem:[%s2621_s1 + $0x128] sm:$0xff]  ;;  %v481_v24 = vld [vmem:[%s2621_s1 + $0x120] sm:$0xff]  ;;  %259 = vst.msk [vmem:[#allocation2 + $0x30] sm:$0xff] %vm252_vm0, %v1592_v2 }
  0x14   : > { %516 = vmatpush1.msra.mxu0 %v457_v7  ;;  %741 = vmatpush1.msra.mxu1 %v489_v8  ;;  %v448_v25 = vld [vmem:[%s2621_s1 + $0x18] sm:$0xff]  ;;  %v447_v27 = vld [vmem:[%s2621_s1 + $0x10] sm:$0xff]  ;;  %v446_v29 = vld [vmem:[%s2621_s1 + $0x8] sm:$0xff]  ;;  %260 = vst.msk [vmem:[#allocation2 + $0x38] sm:$0xff] %vm252_vm0, %v1592_v2 }
  0x15   : > { %517 = vmatprep.subr.mxu0 %v1592_v2  ;;  %742 = vmatprep.subr.mxu1 %v1592_v2  ;;  %v480_v26 = vld [vmem:[%s2621_s1 + $0x118] sm:$0xff]  ;;  %v479_v28 = vld [vmem:[%s2621_s1 + $0x110] sm:$0xff]  ;;  %v478_v30 = vld [vmem:[%s2621_s1 + $0x108] sm:$0xff]  ;;  %261 = vst.msk [vmem:[#allocation2 + $0x40] sm:$0xff] %vm252_vm0, %v1592_v2 }
  0x16   : > { %518 = vmatpush1.msra.mxu0 %v456_v9  ;;  %743 = vmatpush1.msra.mxu1 %v488_v10  ;;  %v445_v31 = vld [vmem:[%s2621_s1] sm:$0xff]  ;;  %v476_v33 = vld [vmem:[%s2621_s1 + $0xf8] sm:$0xff]  ;;  %v475_v35 = vld [vmem:[%s2621_s1 + $0xf0] sm:$0xff]  ;;  %262 = vst.msk [vmem:[#allocation2 + $0x48] sm:$0xff] %vm252_vm0, %v1592_v2 }
  0x17   : > { %519 = vmatprep.subr.mxu0 %v1592_v2  ;;  %744 = vmatprep.subr.mxu1 %v1592_v2  ;;  %v477_v32 = vld [vmem:[%s2621_s1 + $0x100] sm:$0xff]  ;;  %v508_v34 = vld [vmem:[%s2621_s1 + $0x1f8] sm:$0xff]  ;;  %v507_v36 = vld [vmem:[%s2621_s1 + $0x1f0] sm:$0xff]  ;;  %263 = vst.msk [vmem:[#allocation2 + $0x50] sm:$0xff] %vm252_vm0, %v1592_v2 }
  0x18   : > { %520 = vmatpush1.msra.mxu0 %v455_v11  ;;  %745 = vmatpush1.msra.mxu1 %v487_v12  ;;  %v474_v37 = vld [vmem:[%s2621_s1 + $0xe8] sm:$0xff]  ;;  %v473_v39 = vld [vmem:[%s2621_s1 + $0xe0] sm:$0xff]  ;;  %v472_v41 = vld [vmem:[%s2621_s1 + $0xd8] sm:$0xff]  ;;  %264 = vst.msk [vmem:[#allocation2 + $0x58] sm:$0xff] %vm252_vm0, %v1592_v2 }
  0x19   : > { %521 = vmatprep.subr.mxu0 %v1592_v2  ;;  %746 = vmatprep.subr.mxu1 %v1592_v2  ;;  %v506_v38 = vld [vmem:[%s2621_s1 + $0x1e8] sm:$0xff]  ;;  %v505_v40 = vld [vmem:[%s2621_s1 + $0x1e0] sm:$0xff]  ;;  %v504_v42 = vld [vmem:[%s2621_s1 + $0x1d8] sm:$0xff]  ;;  %265 = vst.msk [vmem:[#allocation2 + $0x60] sm:$0xff] %vm252_vm0, %v1592_v2 }
  0x1a   : > { %522 = vmatpush1.msra.mxu0 %v454_v13  ;;  %747 = vmatpush1.msra.mxu1 %v486_v14  ;;  %v471_v43 = vld [vmem:[%s2621_s1 + $0xd0] sm:$0xff]  ;;  %v470_v45 = vld [vmem:[%s2621_s1 + $0xc8] sm:$0xff]  ;;  %v469_v47 = vld [vmem:[%s2621_s1 + $0xc0] sm:$0xff]  ;;  %266 = vst.msk [vmem:[#allocation2 + $0x68] sm:$0xff] %vm252_vm0, %v1592_v2 }
  0x1b   : > { %523 = vmatprep.subr.mxu0 %v1592_v2  ;;  %748 = vmatprep.subr.mxu1 %v1592_v2  ;;  %v503_v44 = vld [vmem:[%s2621_s1 + $0x1d0] sm:$0xff]  ;;  %v502_v46 = vld [vmem:[%s2621_s1 + $0x1c8] sm:$0xff]  ;;  %v501_v48 = vld [vmem:[%s2621_s1 + $0x1c0] sm:$0xff]  ;;  %267 = vst.msk [vmem:[#allocation2 + $0x70] sm:$0xff] %vm252_vm0, %v1592_v2 }
  0x1c   : > { %524 = vmatpush1.msra.mxu0 %v453_v15  ;;  %749 = vmatpush1.msra.mxu1 %v485_v16  ;;  %v468_v49 = vld [vmem:[%s2621_s1 + $0xb8] sm:$0xff]  ;;  %v467_v51 = vld [vmem:[%s2621_s1 + $0xb0] sm:$0xff]  ;;  %v466_v53 = vld [vmem:[%s2621_s1 + $0xa8] sm:$0xff]  ;;  %268 = vst.msk [vmem:[#allocation2 + $0x78] sm:$0xff] %vm252_vm0, %v1592_v2 }
  0x1d   : > { %525 = vmatprep.subr.mxu0 %v1592_v2  ;;  %750 = vmatprep.subr.mxu1 %v1592_v2  ;;  %v500_v50 = vld [vmem:[%s2621_s1 + $0x1b8] sm:$0xff]  ;;  %v499_v52 = vld [vmem:[%s2621_s1 + $0x1b0] sm:$0xff]  ;;  %v498_v54 = vld [vmem:[%s2621_s1 + $0x1a8] sm:$0xff]  ;;  %269 = vst.msk [vmem:[#allocation2 + $0x80] sm:$0xff] %vm252_vm0, %v1592_v2 }
  0x1e   : > { %526 = vmatpush1.msra.mxu0 %v452_v17  ;;  %751 = vmatpush1.msra.mxu1 %v484_v18  ;;  %v465_v55 = vld [vmem:[%s2621_s1 + $0xa0] sm:$0xff]  ;;  %v464_v57 = vld [vmem:[%s2621_s1 + $0x98] sm:$0xff]  ;;  %v463_v59 = vld [vmem:[%s2621_s1 + $0x90] sm:$0xff]  ;;  %270 = vst.msk [vmem:[#allocation2 + $0x88] sm:$0xff] %vm252_vm0, %v1592_v2 }
  0x1f   : > { %527 = vmatprep.subr.mxu0 %v1592_v2  ;;  %752 = vmatprep.subr.mxu1 %v1592_v2  ;;  %v497_v56 = vld [vmem:[%s2621_s1 + $0x1a0] sm:$0xff]  ;;  %v496_v58 = vld [vmem:[%s2621_s1 + $0x198] sm:$0xff]  ;;  %v495_v60 = vld [vmem:[%s2621_s1 + $0x190] sm:$0xff]  ;;  %271 = vst.msk [vmem:[#allocation2 + $0x90] sm:$0xff] %vm252_vm0, %v1592_v2 }
  0x20   : > { %528 = vmatpush1.msra.mxu0 %v451_v19  ;;  %753 = vmatpush1.msra.mxu1 %v483_v20  ;;  %v462_v61 = vld [vmem:[%s2621_s1 + $0x88] sm:$0xff]  ;;  %v461_v63 = vld [vmem:[%s2621_s1 + $0x80] sm:$0xff]  ;;  %v320_v3 = vld [vmem:[%s1884_s6 + $0x18] sm:$0xff]  ;;  %272 = vst.msk [vmem:[#allocation2 + $0x98] sm:$0xff] %vm252_vm0, %v1592_v2 }
  0x21   : > { %529 = vmatprep.subr.mxu0 %v1592_v2  ;;  %754 = vmatprep.subr.mxu1 %v1592_v2  ;;  %v494_v62 = vld [vmem:[%s2621_s1 + $0x188] sm:$0xff]  ;;  %v493_v1 = vld [vmem:[%s2621_s1 + $0x180] sm:$0xff]  ;;  %v319_v5 = vld [vmem:[%s1884_s6 + $0x10] sm:$0xff]  ;;  %273 = vst.msk [vmem:[#allocation2 + $0xa0] sm:$0xff] %vm252_vm0, %v1592_v2 }
  0x22   : > { %530 = vmatpush1.msra.mxu0 %v450_v21  ;;  %755 = vmatpush1.msra.mxu1 %v482_v22  ;;  %v318_v0 = vld [vmem:[%s1884_s6 + $0x8] sm:$0xff]  ;;  %v317_v4 = vld [vmem:[%s1884_s6] sm:$0xff]  ;;  %v324_v7 = vld [vmem:[%s1884_s6 + $0x38] sm:$0xff]  ;;  %274 = vst.msk [vmem:[#allocation2 + $0xa8] sm:$0xff] %vm252_vm0, %v1592_v2 }
  0x23   : > { %531 = vmatprep.subr.mxu0 %v1592_v2  ;;  %756 = vmatprep.subr.mxu1 %v1592_v2  ;;  %v322_v6 = vld [vmem:[%s1884_s6 + $0x28] sm:$0xff]  ;;  %v321_v8 = vld [vmem:[%s1884_s6 + $0x20] sm:$0xff]  ;;  %v323_v9 = vld [vmem:[%s1884_s6 + $0x30] sm:$0xff]  ;;  %275 = vst.msk [vmem:[#allocation2 + $0xb0] sm:$0xff] %vm252_vm0, %v1592_v2 }
  0x24   : > { %532 = vmatpush1.msra.mxu0 %v449_v23  ;;  %757 = vmatpush1.msra.mxu1 %v481_v24  ;;  %v326_v10 = vld [vmem:[%s1884_s6 + $0x48] sm:$0xff]  ;;  %v328_v11 = vld [vmem:[%s1884_s6 + $0x58] sm:$0xff]  ;;  %v325_v12 = vld [vmem:[%s1884_s6 + $0x40] sm:$0xff]  ;;  %276 = vst.msk [vmem:[#allocation2 + $0xb8] sm:$0xff] %vm252_vm0, %v1592_v2 }
  0x25   : > { %533 = vmatprep.subr.mxu0 %v1592_v2  ;;  %758 = vmatprep.subr.mxu1 %v1592_v2  ;;  %v327_v13 = vld [vmem:[%s1884_s6 + $0x50] sm:$0xff]  ;;  %v330_v14 = vld [vmem:[%s1884_s6 + $0x68] sm:$0xff]  ;;  %v332_v15 = vld [vmem:[%s1884_s6 + $0x78] sm:$0xff]  ;;  %277 = vst.msk [vmem:[#allocation2 + $0xc0] sm:$0xff] %vm252_vm0, %v1592_v2 }
  0x26   : > { %534 = vmatpush1.msra.mxu0 %v448_v25  ;;  %759 = vmatpush1.msra.mxu1 %v480_v26  ;;  %v329_v16 = vld [vmem:[%s1884_s6 + $0x60] sm:$0xff]  ;;  %v331_v17 = vld [vmem:[%s1884_s6 + $0x70] sm:$0xff]  ;;  %v334_v18 = vld [vmem:[%s1884_s6 + $0x88] sm:$0xff]  ;;  %278 = vst.msk [vmem:[#allocation2 + $0xc8] sm:$0xff] %vm252_vm0, %v1592_v2 }
  0x27   : > { %535 = vmatprep.subr.mxu0 %v1592_v2  ;;  %760 = vmatprep.subr.mxu1 %v1592_v2  ;;  %v336_v19 = vld [vmem:[%s1884_s6 + $0x98] sm:$0xff]  ;;  %v333_v20 = vld [vmem:[%s1884_s6 + $0x80] sm:$0xff]  ;;  %v335_v21 = vld [vmem:[%s1884_s6 + $0x90] sm:$0xff]  ;;  %279 = vst.msk [vmem:[#allocation2 + $0xd0] sm:$0xff] %vm252_vm0, %v1592_v2 }
  0x28   : > { %536 = vmatpush1.msra.mxu0 %v447_v27  ;;  %761 = vmatpush1.msra.mxu1 %v479_v28  ;;  %v338_v22 = vld [vmem:[%s1884_s6 + $0xa8] sm:$0xff]  ;;  %v340_v23 = vld [vmem:[%s1884_s6 + $0xb8] sm:$0xff]  ;;  %v337_v24 = vld [vmem:[%s1884_s6 + $0xa0] sm:$0xff]  ;;  %280 = vst.msk [vmem:[#allocation2 + $0xd8] sm:$0xff] %vm252_vm0, %v1592_v2 }
  0x29   : > { %537 = vmatprep.subr.mxu0 %v1592_v2  ;;  %762 = vmatprep.subr.mxu1 %v1592_v2  ;;  %v339_v25 = vld [vmem:[%s1884_s6 + $0xb0] sm:$0xff]  ;;  %v342_v26 = vld [vmem:[%s1884_s6 + $0xc8] sm:$0xff]  ;;  %v344_v27 = vld [vmem:[%s1884_s6 + $0xd8] sm:$0xff]  ;;  %281 = vst.msk [vmem:[#allocation2 + $0xe0] sm:$0xff] %vm252_vm0, %v1592_v2 }
  0x2a   : > { %538 = vmatpush1.msra.mxu0 %v446_v29  ;;  %763 = vmatpush1.msra.mxu1 %v478_v30  ;;  %v341_v28 = vld [vmem:[%s1884_s6 + $0xc0] sm:$0xff]  ;;  %v343_v29 = vld [vmem:[%s1884_s6 + $0xd0] sm:$0xff]  ;;  %v346_v30 = vld [vmem:[%s1884_s6 + $0xe8] sm:$0xff]  ;;  %282 = vst.msk [vmem:[#allocation2 + $0xe8] sm:$0xff] %vm252_vm0, %v1592_v2 }
  0x2b   : > { %539 = vmatprep.subr.mxu0 %v1592_v2  ;;  %764 = vmatprep.subr.mxu1 %v1592_v2  ;;  %283 = vst.msk [vmem:[#allocation2 + $0xf0] sm:$0xff] %vm252_vm0, %v1592_v2  ;;  %284 = vst.msk [vmem:[#allocation2 + $0xf8] sm:$0xff] %vm252_vm0, %v1592_v2 }
  0x2c   : > { %540 = vmatpush1.msra.mxu0 %v445_v31  ;;  %765 = vmatpush1.msra.mxu1 %v477_v32  ;;  %v348_v31 = vld [vmem:[%s1884_s6 + $0xf8] sm:$0xff]  ;;  %v345_v32 = vld [vmem:[%s1884_s6 + $0xe0] sm:$0xff] }
  0x2d   : > { %541 = vmatprep.subr.mxu0 %v1592_v2  ;;  %766 = vmatprep.subr.mxu1 %v1592_v2 }
  0x2e   : > { %542 = vmatpush2.msra.mxu0 %v476_v33  ;;  %767 = vmatpush2.msra.mxu1 %v508_v34  ;;  %v347_v33 = vld [vmem:[%s1884_s6 + $0xf0] sm:$0xff]  ;;  %v350_v34 = vld [vmem:[%s1884_s6 + $0x108] sm:$0xff] }
  0x2f   : > { %543 = vmatprep.subr.mxu0 %v1592_v2  ;;  %768 = vmatprep.subr.mxu1 %v1592_v2 }
  0x30   : > { %544 = vmatpush2.msra.mxu0 %v475_v35  ;;  %769 = vmatpush2.msra.mxu1 %v507_v36  ;;  %v352_v35 = vld [vmem:[%s1884_s6 + $0x118] sm:$0xff]  ;;  %v349_v36 = vld [vmem:[%s1884_s6 + $0x100] sm:$0xff] }
  0x31   : > { %545 = vmatprep.subr.mxu0 %v1592_v2  ;;  %770 = vmatprep.subr.mxu1 %v1592_v2 }
  0x32   : > { %546 = vmatpush2.msra.mxu0 %v474_v37  ;;  %771 = vmatpush2.msra.mxu1 %v506_v38  ;;  %v351_v37 = vld [vmem:[%s1884_s6 + $0x110] sm:$0xff]  ;;  %v354_v38 = vld [vmem:[%s1884_s6 + $0x128] sm:$0xff] }
  0x33   : > { %547 = vmatprep.subr.mxu0 %v1592_v2  ;;  %772 = vmatprep.subr.mxu1 %v1592_v2 }
  0x34   : > { %548 = vmatpush2.msra.mxu0 %v473_v39  ;;  %773 = vmatpush2.msra.mxu1 %v505_v40  ;;  %v356_v39 = vld [vmem:[%s1884_s6 + $0x138] sm:$0xff]  ;;  %v353_v40 = vld [vmem:[%s1884_s6 + $0x120] sm:$0xff] }
  0x35   : > { %549 = vmatprep.subr.mxu0 %v1592_v2  ;;  %774 = vmatprep.subr.mxu1 %v1592_v2 }
  0x36   : > { %550 = vmatpush2.msra.mxu0 %v472_v41  ;;  %775 = vmatpush2.msra.mxu1 %v504_v42  ;;  %v355_v41 = vld [vmem:[%s1884_s6 + $0x130] sm:$0xff]  ;;  %v358_v42 = vld [vmem:[%s1884_s6 + $0x148] sm:$0xff] }
  0x37   : > { %551 = vmatprep.subr.mxu0 %v1592_v2  ;;  %776 = vmatprep.subr.mxu1 %v1592_v2 }
  0x38   : > { %552 = vmatpush2.msra.mxu0 %v471_v43  ;;  %777 = vmatpush2.msra.mxu1 %v503_v44  ;;  %v360_v43 = vld [vmem:[%s1884_s6 + $0x158] sm:$0xff]  ;;  %v357_v44 = vld [vmem:[%s1884_s6 + $0x140] sm:$0xff] }
  0x39   : > { %553 = vmatprep.subr.mxu0 %v1592_v2  ;;  %778 = vmatprep.subr.mxu1 %v1592_v2 }
  0x3a   : > { %554 = vmatpush2.msra.mxu0 %v470_v45  ;;  %779 = vmatpush2.msra.mxu1 %v502_v46  ;;  %v359_v45 = vld [vmem:[%s1884_s6 + $0x150] sm:$0xff]  ;;  %v362_v46 = vld [vmem:[%s1884_s6 + $0x168] sm:$0xff] }
  0x3b   : > { %555 = vmatprep.subr.mxu0 %v1592_v2  ;;  %780 = vmatprep.subr.mxu1 %v1592_v2 }
  0x3c   : > { %556 = vmatpush2.msra.mxu0 %v469_v47  ;;  %781 = vmatpush2.msra.mxu1 %v501_v48  ;;  %v364_v47 = vld [vmem:[%s1884_s6 + $0x178] sm:$0xff]  ;;  %v361_v48 = vld [vmem:[%s1884_s6 + $0x160] sm:$0xff] }
  0x3d   : > { %557 = vmatprep.subr.mxu0 %v1592_v2  ;;  %782 = vmatprep.subr.mxu1 %v1592_v2 }
  0x3e   : > { %558 = vmatpush2.msra.mxu0 %v468_v49  ;;  %783 = vmatpush2.msra.mxu1 %v500_v50  ;;  %v363_v49 = vld [vmem:[%s1884_s6 + $0x170] sm:$0xff]  ;;  %v366_v50 = vld [vmem:[%s1884_s6 + $0x188] sm:$0xff] }
  0x3f   : > { %559 = vmatprep.subr.mxu0 %v1592_v2  ;;  %784 = vmatprep.subr.mxu1 %v1592_v2 }
  0x40   : > { %560 = vmatpush2.msra.mxu0 %v467_v51  ;;  %785 = vmatpush2.msra.mxu1 %v499_v52  ;;  %v368_v51 = vld [vmem:[%s1884_s6 + $0x198] sm:$0xff]  ;;  %v365_v52 = vld [vmem:[%s1884_s6 + $0x180] sm:$0xff] }
  0x41   : > { %561 = vmatprep.subr.mxu0 %v1592_v2  ;;  %786 = vmatprep.subr.mxu1 %v1592_v2 }
  0x42   : > { %562 = vmatpush2.msra.mxu0 %v466_v53  ;;  %787 = vmatpush2.msra.mxu1 %v498_v54  ;;  %v367_v53 = vld [vmem:[%s1884_s6 + $0x190] sm:$0xff]  ;;  %v370_v54 = vld [vmem:[%s1884_s6 + $0x1a8] sm:$0xff] }
  0x43   : > { %563 = vmatprep.subr.mxu0 %v1592_v2  ;;  %788 = vmatprep.subr.mxu1 %v1592_v2 }
  0x44   : > { %564 = vmatpush2.msra.mxu0 %v465_v55  ;;  %789 = vmatpush2.msra.mxu1 %v497_v56  ;;  %v372_v55 = vld [vmem:[%s1884_s6 + $0x1b8] sm:$0xff]  ;;  %v369_v56 = vld [vmem:[%s1884_s6 + $0x1a0] sm:$0xff] }
  0x45   : > { %565 = vmatprep.subr.mxu0 %v1592_v2  ;;  %790 = vmatprep.subr.mxu1 %v1592_v2 }
  0x46   : > { %566 = vmatpush2.msra.mxu0 %v464_v57  ;;  %791 = vmatpush2.msra.mxu1 %v496_v58  ;;  %v371_v57 = vld [vmem:[%s1884_s6 + $0x1b0] sm:$0xff]  ;;  %v374_v58 = vld [vmem:[%s1884_s6 + $0x1c8] sm:$0xff] }
  0x47   : > { %567 = vmatprep.subr.mxu0 %v1592_v2  ;;  %792 = vmatprep.subr.mxu1 %v1592_v2 }
  0x48   : > { %568 = vmatpush2.msra.mxu0 %v463_v59  ;;  %793 = vmatpush2.msra.mxu1 %v495_v60  ;;  %v376_v59 = vld [vmem:[%s1884_s6 + $0x1d8] sm:$0xff]  ;;  %v373_v60 = vld [vmem:[%s1884_s6 + $0x1c0] sm:$0xff] }
  0x49   : > { %569 = vmatprep.subr.mxu0 %v1592_v2  ;;  %794 = vmatprep.subr.mxu1 %v1592_v2 }
  0x4a   : > { %570 = vmatpush2.msra.mxu0 %v462_v61  ;;  %795 = vmatpush2.msra.mxu1 %v494_v62  ;;  %v375_v61 = vld [vmem:[%s1884_s6 + $0x1d0] sm:$0xff]  ;;  %v378_v62 = vld [vmem:[%s1884_s6 + $0x1e8] sm:$0xff] }
  0x4b   : > { %571 = vmatprep.subr.mxu0 %v1592_v2  ;;  %796 = vmatprep.subr.mxu1 %v1592_v2  ;;  %v387_v2 = vld [vmem:[%s1884_s6 + $0x230] sm:$0xff] }
  0x4c   : > { %572 = vmatpush2.msra.mxu0 %v461_v63  ;;  %573 = vmatprep.mubr.f32.mxu0 %v318_v0  ;;  %v380_v63 = vld [vmem:[%s1884_s6 + $0x1f8] sm:$0xff]  ;;  %v377_v0 = vld [vmem:[%s1884_s6 + $0x1e0] sm:$0xff] }
  0x4d   : > { %797 = vmatpush2.msra.mxu1 %v493_v1  ;;  %798 = vmatprep.mubr.f32.mxu1 %v320_v3  ;;  %v379_v1 = vld [vmem:[%s1884_s6 + $0x1f0] sm:$0xff]  ;;  %v382_v3 = vld [vmem:[%s1884_s6 + $0x208] sm:$0xff] }
  0x4e   : > { %574 = vmatmul.mubr.f32.vlgmr.msra.gmra.mxu0 %v317_v4  ;;  %799 = vmatmul.mubr.f32.vlgmr.msra.gmra.mxu1 %v319_v5  ;;  %v384_v4 = vld [vmem:[%s1884_s6 + $0x218] sm:$0xff]  ;;  %v381_v5 = vld [vmem:[%s1884_s6 + $0x200] sm:$0xff] }
  0x4f   : > { %578 = vmatprep.mubr.f32.mxu0 %v322_v6  ;;  %803 = vmatprep.mubr.f32.mxu1 %v324_v7  ;;  %v383_v6 = vld [vmem:[%s1884_s6 + $0x210] sm:$0xff]  ;;  %v386_v7 = vld [vmem:[%s1884_s6 + $0x228] sm:$0xff] }
  0x52   : > { %579 = vmatmul.mubr.f32.gmra.mxu0 %v321_v8  ;;  %804 = vmatmul.mubr.f32.gmra.mxu1 %v323_v9  ;;  %v388_v8 = vld [vmem:[%s1884_s6 + $0x238] sm:$0xff]  ;;  %v385_v9 = vld [vmem:[%s1884_s6 + $0x220] sm:$0xff] }
  0x53   : > { %583 = vmatprep.mubr.f32.mxu0 %v326_v10  ;;  %808 = vmatprep.mubr.f32.mxu1 %v328_v11  ;;  %v390_v10 = vld [vmem:[%s1884_s6 + $0x248] sm:$0xff]  ;;  %v392_v11 = vld [vmem:[%s1884_s6 + $0x258] sm:$0xff] }
  0x56   : > { %584 = vmatmul.mubr.f32.gmra.mxu0 %v325_v12  ;;  %809 = vmatmul.mubr.f32.gmra.mxu1 %v327_v13  ;;  %v389_v12 = vld [vmem:[%s1884_s6 + $0x240] sm:$0xff]  ;;  %v391_v13 = vld [vmem:[%s1884_s6 + $0x250] sm:$0xff] }
  0x57   : > { %588 = vmatprep.mubr.f32.mxu0 %v330_v14  ;;  %813 = vmatprep.mubr.f32.mxu1 %v332_v15  ;;  %v394_v14 = vld [vmem:[%s1884_s6 + $0x268] sm:$0xff]  ;;  %v396_v15 = vld [vmem:[%s1884_s6 + $0x278] sm:$0xff] }
  0x5a   : > { %589 = vmatmul.mubr.f32.gmra.mxu0 %v329_v16  ;;  %814 = vmatmul.mubr.f32.gmra.mxu1 %v331_v17  ;;  %v393_v16 = vld [vmem:[%s1884_s6 + $0x260] sm:$0xff]  ;;  %v395_v17 = vld [vmem:[%s1884_s6 + $0x270] sm:$0xff] }
  0x5b   : > { %593 = vmatprep.mubr.f32.mxu0 %v334_v18  ;;  %818 = vmatprep.mubr.f32.mxu1 %v336_v19  ;;  %v398_v18 = vld [vmem:[%s1884_s6 + $0x288] sm:$0xff]  ;;  %v400_v19 = vld [vmem:[%s1884_s6 + $0x298] sm:$0xff] }
  0x5e   : > { %594 = vmatmul.mubr.f32.gmra.mxu0 %v333_v20  ;;  %819 = vmatmul.mubr.f32.gmra.mxu1 %v335_v21  ;;  %v397_v20 = vld [vmem:[%s1884_s6 + $0x280] sm:$0xff]  ;;  %v399_v21 = vld [vmem:[%s1884_s6 + $0x290] sm:$0xff] }
  0x5f   : > { %598 = vmatprep.mubr.f32.mxu0 %v338_v22  ;;  %823 = vmatprep.mubr.f32.mxu1 %v340_v23  ;;  %v402_v22 = vld [vmem:[%s1884_s6 + $0x2a8] sm:$0xff]  ;;  %v404_v23 = vld [vmem:[%s1884_s6 + $0x2b8] sm:$0xff] }
  0x62   : > { %599 = vmatmul.mubr.f32.gmra.mxu0 %v337_v24  ;;  %824 = vmatmul.mubr.f32.gmra.mxu1 %v339_v25  ;;  %v401_v24 = vld [vmem:[%s1884_s6 + $0x2a0] sm:$0xff]  ;;  %v403_v25 = vld [vmem:[%s1884_s6 + $0x2b0] sm:$0xff] }
  0x63   : > { %603 = vmatprep.mubr.f32.mxu0 %v342_v26  ;;  %828 = vmatprep.mubr.f32.mxu1 %v344_v27  ;;  %v406_v26 = vld [vmem:[%s1884_s6 + $0x2c8] sm:$0xff]  ;;  %v408_v27 = vld [vmem:[%s1884_s6 + $0x2d8] sm:$0xff] }
  0x66   : > { %604 = vmatmul.mubr.f32.gmra.mxu0 %v341_v28  ;;  %829 = vmatmul.mubr.f32.gmra.mxu1 %v343_v29  ;;  %v405_v28 = vld [vmem:[%s1884_s6 + $0x2c0] sm:$0xff]  ;;  %v407_v29 = vld [vmem:[%s1884_s6 + $0x2d0] sm:$0xff] }
  0x67   : > { %608 = vmatprep.mubr.f32.mxu0 %v346_v30  ;;  %833 = vmatprep.mubr.f32.mxu1 %v348_v31  ;;  %v410_v30 = vld [vmem:[%s1884_s6 + $0x2e8] sm:$0xff]  ;;  %v412_v31 = vld [vmem:[%s1884_s6 + $0x2f8] sm:$0xff] }
  0x6a   : > { %609 = vmatmul.mubr.f32.gmra.mxu0 %v345_v32  ;;  %834 = vmatmul.mubr.f32.gmra.mxu1 %v347_v33  ;;  %v409_v32 = vld [vmem:[%s1884_s6 + $0x2e0] sm:$0xff]  ;;  %v411_v33 = vld [vmem:[%s1884_s6 + $0x2f0] sm:$0xff] }
  0x6b   : > { %613 = vmatprep.mubr.f32.mxu0 %v350_v34  ;;  %838 = vmatprep.mubr.f32.mxu1 %v352_v35  ;;  %v414_v34 = vld [vmem:[%s1884_s6 + $0x308] sm:$0xff]  ;;  %v416_v35 = vld [vmem:[%s1884_s6 + $0x318] sm:$0xff] }
  0x6e   : > { %614 = vmatmul.mubr.f32.gmra.mxu0 %v349_v36  ;;  %839 = vmatmul.mubr.f32.gmra.mxu1 %v351_v37  ;;  %v413_v36 = vld [vmem:[%s1884_s6 + $0x300] sm:$0xff]  ;;  %v415_v37 = vld [vmem:[%s1884_s6 + $0x310] sm:$0xff] }
  0x6f   : > { %618 = vmatprep.mubr.f32.mxu0 %v354_v38  ;;  %843 = vmatprep.mubr.f32.mxu1 %v356_v39  ;;  %v418_v38 = vld [vmem:[%s1884_s6 + $0x328] sm:$0xff]  ;;  %v420_v39 = vld [vmem:[%s1884_s6 + $0x338] sm:$0xff] }
  0x72   : > { %619 = vmatmul.mubr.f32.gmra.mxu0 %v353_v40  ;;  %844 = vmatmul.mubr.f32.gmra.mxu1 %v355_v41  ;;  %v417_v40 = vld [vmem:[%s1884_s6 + $0x320] sm:$0xff]  ;;  %v419_v41 = vld [vmem:[%s1884_s6 + $0x330] sm:$0xff] }
  0x73   : > { %623 = vmatprep.mubr.f32.mxu0 %v358_v42  ;;  %848 = vmatprep.mubr.f32.mxu1 %v360_v43  ;;  %v422_v42 = vld [vmem:[%s1884_s6 + $0x348] sm:$0xff]  ;;  %v424_v43 = vld [vmem:[%s1884_s6 + $0x358] sm:$0xff] }
  0x76   : > { %624 = vmatmul.mubr.f32.gmra.mxu0 %v357_v44  ;;  %849 = vmatmul.mubr.f32.gmra.mxu1 %v359_v45  ;;  %v421_v44 = vld [vmem:[%s1884_s6 + $0x340] sm:$0xff]  ;;  %v423_v45 = vld [vmem:[%s1884_s6 + $0x350] sm:$0xff] }
  0x77   : > { %628 = vmatprep.mubr.f32.mxu0 %v362_v46  ;;  %853 = vmatprep.mubr.f32.mxu1 %v364_v47  ;;  %v426_v46 = vld [vmem:[%s1884_s6 + $0x368] sm:$0xff]  ;;  %v428_v47 = vld [vmem:[%s1884_s6 + $0x378] sm:$0xff] }
  0x7a   : > { %629 = vmatmul.mubr.f32.gmra.mxu0 %v361_v48  ;;  %854 = vmatmul.mubr.f32.gmra.mxu1 %v363_v49  ;;  %v425_v48 = vld [vmem:[%s1884_s6 + $0x360] sm:$0xff]  ;;  %v427_v49 = vld [vmem:[%s1884_s6 + $0x370] sm:$0xff] }
  0x7b   : > { %633 = vmatprep.mubr.f32.mxu0 %v366_v50  ;;  %858 = vmatprep.mubr.f32.mxu1 %v368_v51  ;;  %v430_v50 = vld [vmem:[%s1884_s6 + $0x388] sm:$0xff]  ;;  %v432_v51 = vld [vmem:[%s1884_s6 + $0x398] sm:$0xff] }
  0x7e   : > { %634 = vmatmul.mubr.f32.gmra.mxu0 %v365_v52  ;;  %859 = vmatmul.mubr.f32.gmra.mxu1 %v367_v53  ;;  %v429_v52 = vld [vmem:[%s1884_s6 + $0x380] sm:$0xff]  ;;  %v431_v53 = vld [vmem:[%s1884_s6 + $0x390] sm:$0xff] }
  0x7f   : > { %638 = vmatprep.mubr.f32.mxu0 %v370_v54  ;;  %863 = vmatprep.mubr.f32.mxu1 %v372_v55  ;;  %v434_v54 = vld [vmem:[%s1884_s6 + $0x3a8] sm:$0xff]  ;;  %v436_v55 = vld [vmem:[%s1884_s6 + $0x3b8] sm:$0xff] }
  0x82   : > { %639 = vmatmul.mubr.f32.gmra.mxu0 %v369_v56  ;;  %864 = vmatmul.mubr.f32.gmra.mxu1 %v371_v57  ;;  %v433_v56 = vld [vmem:[%s1884_s6 + $0x3a0] sm:$0xff]  ;;  %v435_v57 = vld [vmem:[%s1884_s6 + $0x3b0] sm:$0xff] }
  0x83   : > { %643 = vmatprep.mubr.f32.mxu0 %v374_v58  ;;  %868 = vmatprep.mubr.f32.mxu1 %v376_v59  ;;  %v438_v58 = vld [vmem:[%s1884_s6 + $0x3c8] sm:$0xff]  ;;  %v440_v59 = vld [vmem:[%s1884_s6 + $0x3d8] sm:$0xff] }
  0x86   : > { %644 = vmatmul.mubr.f32.gmra.mxu0 %v373_v60  ;;  %869 = vmatmul.mubr.f32.gmra.mxu1 %v375_v61  ;;  %v437_v60 = vld [vmem:[%s1884_s6 + $0x3c0] sm:$0xff]  ;;  %v439_v61 = vld [vmem:[%s1884_s6 + $0x3d0] sm:$0xff] }
  0x87   : > { %648 = vmatprep.mubr.f32.mxu0 %v378_v62  ;;  %873 = vmatprep.mubr.f32.mxu1 %v380_v63  ;;  %v442_v62 = vld [vmem:[%s1884_s6 + $0x3e8] sm:$0xff]  ;;  %v444_v63 = vld [vmem:[%s1884_s6 + $0x3f8] sm:$0xff] }
  0x8a   : > { %649 = vmatmul.mubr.f32.gmra.mxu0 %v377_v0  ;;  %874 = vmatmul.mubr.f32.gmra.mxu1 %v379_v1  ;;  %v441_v0 = vld [vmem:[%s1884_s6 + $0x3e0] sm:$0xff]  ;;  %v443_v1 = vld [vmem:[%s1884_s6 + $0x3f0] sm:$0xff] }
  0x8b   : > { %653 = vmatprep.mubr.f32.mxu0 %v382_v3  ;;  %878 = vmatprep.mubr.f32.mxu1 %v384_v4  ;;  %v285_v4 = vld [vmem:[#allocation2] sm:$0xff] }
  0x8e   : > { %654 = vmatmul.mubr.f32.gmra.mxu0 %v381_v5  ;;  %879 = vmatmul.mubr.f32.gmra.mxu1 %v383_v6 }
  0x8f   : > { %658 = vmatprep.mubr.f32.mxu0 %v386_v7  ;;  %883 = vmatprep.mubr.f32.mxu1 %v388_v8 }
  0x92   : > { %659 = vmatmul.mubr.f32.gmra.mxu0 %v385_v9  ;;  %884 = vmatmul.mubr.f32.gmra.mxu1 %v387_v2 }
  0x93   : > { %663 = vmatprep.mubr.f32.mxu0 %v390_v10  ;;  %888 = vmatprep.mubr.f32.mxu1 %v392_v11  ;;  %v286_v10 = vld [vmem:[#allocation2 + $0x8] sm:$0xff] }
  0x96   : > { %664 = vmatmul.mubr.f32.gmra.mxu0 %v389_v12  ;;  %889 = vmatmul.mubr.f32.gmra.mxu1 %v391_v13 }
  0x97   : > { %668 = vmatprep.mubr.f32.mxu0 %v394_v14  ;;  %893 = vmatprep.mubr.f32.mxu1 %v396_v15 }
  0x9a   : > { %669 = vmatmul.mubr.f32.gmra.mxu0 %v393_v16  ;;  %894 = vmatmul.mubr.f32.gmra.mxu1 %v395_v17  ;;  %v287_v17 = vld [vmem:[#allocation2 + $0x10] sm:$0xff] }
  0x9b   : > { %673 = vmatprep.mubr.f32.mxu0 %v398_v18  ;;  %898 = vmatprep.mubr.f32.mxu1 %v400_v19 }
  0x9e   : > { %674 = vmatmul.mubr.f32.gmra.mxu0 %v397_v20  ;;  %899 = vmatmul.mubr.f32.gmra.mxu1 %v399_v21 }
  0x9f   : > { %678 = vmatprep.mubr.f32.mxu0 %v402_v22  ;;  %903 = vmatprep.mubr.f32.mxu1 %v404_v23 }
  0xa2   : > { %679 = vmatmul.mubr.f32.gmra.mxu0 %v401_v24  ;;  %904 = vmatmul.mubr.f32.gmra.mxu1 %v403_v25  ;;  %v288_v24 = vld [vmem:[#allocation2 + $0x18] sm:$0xff] }
  0xa3   : > { %683 = vmatprep.mubr.f32.mxu0 %v406_v26  ;;  %908 = vmatprep.mubr.f32.mxu1 %v408_v27 }
  0xa6   : > { %684 = vmatmul.mubr.f32.gmra.mxu0 %v405_v28  ;;  %909 = vmatmul.mubr.f32.gmra.mxu1 %v407_v29 }
  0xa7   : > { %688 = vmatprep.mubr.f32.mxu0 %v410_v30  ;;  %913 = vmatprep.mubr.f32.mxu1 %v412_v31  ;;  %v289_v31 = vld [vmem:[#allocation2 + $0x20] sm:$0xff] }
  0xaa   : > { %689 = vmatmul.mubr.f32.gmra.mxu0 %v409_v32  ;;  %914 = vmatmul.mubr.f32.gmra.mxu1 %v411_v33 }
  0xab   : > { %693 = vmatprep.mubr.f32.mxu0 %v414_v34  ;;  %918 = vmatprep.mubr.f32.mxu1 %v416_v35 }
  0xae   : > { %694 = vmatmul.mubr.f32.gmra.mxu0 %v413_v36  ;;  %919 = vmatmul.mubr.f32.gmra.mxu1 %v415_v37 }
  0xaf   : > { %698 = vmatprep.mubr.f32.mxu0 %v418_v38  ;;  %923 = vmatprep.mubr.f32.mxu1 %v420_v39  ;;  %v290_v38 = vld [vmem:[#allocation2 + $0x28] sm:$0xff] }
  0xb2   : > { %699 = vmatmul.mubr.f32.gmra.mxu0 %v417_v40  ;;  %924 = vmatmul.mubr.f32.gmra.mxu1 %v419_v41 }
  0xb3   : > { %703 = vmatprep.mubr.f32.mxu0 %v422_v42  ;;  %928 = vmatprep.mubr.f32.mxu1 %v424_v43 }
  0xb6   : > { %704 = vmatmul.mubr.f32.gmra.mxu0 %v421_v44  ;;  %929 = vmatmul.mubr.f32.gmra.mxu1 %v423_v45  ;;  %v291_v45 = vld [vmem:[#allocation2 + $0x30] sm:$0xff] }
  0xb7   : > { %708 = vmatprep.mubr.f32.mxu0 %v426_v46  ;;  %933 = vmatprep.mubr.f32.mxu1 %v428_v47 }
  0xba   : > { %709 = vmatmul.mubr.f32.gmra.mxu0 %v425_v48  ;;  %934 = vmatmul.mubr.f32.gmra.mxu1 %v427_v49 }
  0xbb   : > { %713 = vmatprep.mubr.f32.mxu0 %v430_v50  ;;  %938 = vmatprep.mubr.f32.mxu1 %v432_v51 }
  0xbe   : > { %714 = vmatmul.mubr.f32.gmra.mxu0 %v429_v52  ;;  %939 = vmatmul.mubr.f32.gmra.mxu1 %v431_v53  ;;  %v292_v52 = vld [vmem:[#allocation2 + $0x38] sm:$0xff] }
  0xbf   : > { %718 = vmatprep.mubr.f32.mxu0 %v434_v54  ;;  %943 = vmatprep.mubr.f32.mxu1 %v436_v55 }
  0xc2   : > { %719 = vmatmul.mubr.f32.gmra.mxu0 %v433_v56  ;;  %944 = vmatmul.mubr.f32.gmra.mxu1 %v435_v57 }
  0xc3   : > { %723 = vmatprep.mubr.f32.mxu0 %v438_v58  ;;  %948 = vmatprep.mubr.f32.mxu1 %v440_v59  ;;  %v293_v59 = vld [vmem:[#allocation2 + $0x40] sm:$0xff] }
  0xc6   : > { %724 = vmatmul.mubr.f32.gmra.mxu0 %v437_v60  ;;  %949 = vmatmul.mubr.f32.gmra.mxu1 %v439_v61 }
  0xc7   : > { %728 = vmatprep.mubr.f32.mxu0 %v442_v62  ;;  %953 = vmatprep.mubr.f32.mxu1 %v444_v63 }
  0xca   : > { %729 = vmatmul.mubr.f32.gmra.mxu0 %v441_v0  ;;  %954 = vmatmul.mubr.f32.gmra.mxu1 %v443_v1 }
 0x10e   : > { %v575_v3 = vpop.f32.mrf.mxu0  ;;  %v800_v5 = vpop.f32.mrf.mxu1 }
 0x10f   : > { %v801_v6 = vadd.f32 %v800_v5, %v575_v3  ;;  %v294_v3 = vld [vmem:[#allocation2 + $0x48] sm:$0xff] }
 0x110   : > { %v577_v7 = vpop.f32.mrf.mxu0  ;;  %v802_v8 = vpop.f32.mrf.mxu1 }
 0x111   : > { %v959_v9 = vadd.f32 %v801_v6, %v285_v4 }
 0x112   : > { %v580_v2 = vpop.f32.mrf.mxu0  ;;  %v805_v11 = vpop.f32.mrf.mxu1 }
 0x113   : > { %992 = vst.msk [vmem:[#allocation2] sm:$0xff] %vm252_vm0, %v959_v9  ;;  %v806_v12 = vadd.f32 %v805_v11, %v580_v2  ;;  %v295_v2 = vld [vmem:[#allocation2 + $0x50] sm:$0xff] }
 0x114   : > { %v582_v13 = vpop.f32.mrf.mxu0  ;;  %v807_v14 = vpop.f32.mrf.mxu1 }
 0x115   : > { %v960_v15 = vadd.f32 %v806_v12, %v286_v10 }
 0x116   : > { %v585_v16 = vpop.f32.mrf.mxu0  ;;  %v810_v18 = vpop.f32.mrf.mxu1 }
 0x117   : > { %993 = vst.msk [vmem:[#allocation2 + $0x8] sm:$0xff] %vm252_vm0, %v960_v15  ;;  %v811_v19 = vadd.f32 %v810_v18, %v585_v16  ;;  %v296_v16 = vld [vmem:[#allocation2 + $0x58] sm:$0xff] }
 0x118   : > { %v587_v20 = vpop.f32.mrf.mxu0  ;;  %v812_v21 = vpop.f32.mrf.mxu1 }
 0x119   : > { %v961_v22 = vadd.f32 %v811_v19, %v287_v17 }
 0x11a   : > { %v590_v23 = vpop.f32.mrf.mxu0  ;;  %v815_v25 = vpop.f32.mrf.mxu1 }
 0x11b   : > { %994 = vst.msk [vmem:[#allocation2 + $0x10] sm:$0xff] %vm252_vm0, %v961_v22  ;;  %v816_v26 = vadd.f32 %v815_v25, %v590_v23  ;;  %v297_v23 = vld [vmem:[#allocation2 + $0x60] sm:$0xff] }
 0x11c   : > { %v592_v27 = vpop.f32.mrf.mxu0  ;;  %v817_v28 = vpop.f32.mrf.mxu1 }
 0x11d   : > { %v962_v29 = vadd.f32 %v816_v26, %v288_v24 }
 0x11e   : > { %v595_v30 = vpop.f32.mrf.mxu0  ;;  %v820_v32 = vpop.f32.mrf.mxu1 }
 0x11f   : > { %995 = vst.msk [vmem:[#allocation2 + $0x18] sm:$0xff] %vm252_vm0, %v962_v29  ;;  %v821_v33 = vadd.f32 %v820_v32, %v595_v30  ;;  %v298_v30 = vld [vmem:[#allocation2 + $0x68] sm:$0xff] }
 0x120   : > { %v597_v34 = vpop.f32.mrf.mxu0  ;;  %v822_v35 = vpop.f32.mrf.mxu1 }
 0x121   : > { %v963_v36 = vadd.f32 %v821_v33, %v289_v31 }
 0x122   : > { %v600_v37 = vpop.f32.mrf.mxu0  ;;  %v825_v39 = vpop.f32.mrf.mxu1 }
 0x123   : > { %996 = vst.msk [vmem:[#allocation2 + $0x20] sm:$0xff] %vm252_vm0, %v963_v36  ;;  %v826_v40 = vadd.f32 %v825_v39, %v600_v37  ;;  %v299_v37 = vld [vmem:[#allocation2 + $0x70] sm:$0xff] }
 0x124   : > { %v602_v41 = vpop.f32.mrf.mxu0  ;;  %v827_v42 = vpop.f32.mrf.mxu1 }
 0x125   : > { %v964_v43 = vadd.f32 %v826_v40, %v290_v38 }
 0x126   : > { %v605_v44 = vpop.f32.mrf.mxu0  ;;  %v830_v46 = vpop.f32.mrf.mxu1 }
 0x127   : > { %997 = vst.msk [vmem:[#allocation2 + $0x28] sm:$0xff] %vm252_vm0, %v964_v43  ;;  %v831_v47 = vadd.f32 %v830_v46, %v605_v44  ;;  %v300_v44 = vld [vmem:[#allocation2 + $0x78] sm:$0xff] }
 0x128   : > { %v607_v48 = vpop.f32.mrf.mxu0  ;;  %v832_v49 = vpop.f32.mrf.mxu1 }
 0x129   : > { %v965_v50 = vadd.f32 %v831_v47, %v291_v45 }
 0x12a   : > { %v610_v51 = vpop.f32.mrf.mxu0  ;;  %v835_v53 = vpop.f32.mrf.mxu1 }
 0x12b   : > { %998 = vst.msk [vmem:[#allocation2 + $0x30] sm:$0xff] %vm252_vm0, %v965_v50  ;;  %v836_v54 = vadd.f32 %v835_v53, %v610_v51  ;;  %v301_v51 = vld [vmem:[#allocation2 + $0x80] sm:$0xff] }
 0x12c   : > { %v612_v55 = vpop.f32.mrf.mxu0  ;;  %v837_v56 = vpop.f32.mrf.mxu1 }
 0x12d   : > { %v966_v57 = vadd.f32 %v836_v54, %v292_v52 }
 0x12e   : > { %v615_v58 = vpop.f32.mrf.mxu0  ;;  %v840_v60 = vpop.f32.mrf.mxu1 }
 0x12f   : > { %999 = vst.msk [vmem:[#allocation2 + $0x38] sm:$0xff] %vm252_vm0, %v966_v57  ;;  %v841_v61 = vadd.f32 %v840_v60, %v615_v58  ;;  %v302_v58 = vld [vmem:[#allocation2 + $0x88] sm:$0xff] }
 0x130   : > { %v617_v62 = vpop.f32.mrf.mxu0  ;;  %v842_v63 = vpop.f32.mrf.mxu1 }
 0x131   : > { %v967_v0 = vadd.f32 %v841_v61, %v293_v59 }
 0x132   : > { %v620_v1 = vpop.f32.mrf.mxu0  ;;  %v845_v4 = vpop.f32.mrf.mxu1 }
 0x133   : > { %1000 = vst.msk [vmem:[#allocation2 + $0x40] sm:$0xff] %vm252_vm0, %v967_v0  ;;  %v846_v5 = vadd.f32 %v845_v4, %v620_v1  ;;  %v2113_v0 = vld [vmem:[#allocation2 + $0x8] sm:$0xff] }
 0x134   : > { %v622_v6 = vpop.f32.mrf.mxu0  ;;  %v847_v7 = vpop.f32.mrf.mxu1 }
 0x135   : > { %v968_v8 = vadd.f32 %v846_v5, %v294_v3  ;;  %v303_v3 = vld [vmem:[#allocation2 + $0x90] sm:$0xff]  ;;  %v2116_v6 = vld [vmem:[#allocation2] sm:$0xff] }
 0x136   : > { %v625_v9 = vpop.f32.mrf.mxu0  ;;  %v850_v10 = vpop.f32.mrf.mxu1  ;;  %v2118_v7 = vld [vmem:[#allocation2 + $0x10] sm:$0xff] }
 0x137   : > { %1001 = vst.msk [vmem:[#allocation2 + $0x48] sm:$0xff] %vm252_vm0, %v968_v8  ;;  %v851_v11 = vadd.f32 %v850_v10, %v625_v9 }
 0x138   : > { %v627_v12 = vpop.f32.mrf.mxu0  ;;  %v852_v13 = vpop.f32.mrf.mxu1 }
 0x139   : > { %v969_v14 = vadd.f32 %v851_v11, %v295_v2  ;;  %v1060_v2 = vsel %vm252_vm0, %v2113_v0, 0.0  ;;  %v2122_v11 = vld [vmem:[#allocation2 + $0x18] sm:$0xff] }
 0x13a   : > { %v630_v15 = vpop.f32.mrf.mxu0  ;;  %v855_v17 = vpop.f32.mrf.mxu1  ;;  %v304_v13 = vld [vmem:[#allocation2 + $0x98] sm:$0xff] }
 0x13b   : > { %1002 = vst.msk [vmem:[#allocation2 + $0x50] sm:$0xff] %vm252_vm0, %v969_v14  ;;  %v856_v18 = vadd.f32 %v855_v17, %v630_v15  ;;  %v1059_v15 = vsel %vm252_vm0, %v2116_v6, 0.0 }
 0x13c   : > { %v632_v19 = vpop.f32.mrf.mxu0  ;;  %v857_v20 = vpop.f32.mrf.mxu1 }
 0x13d   : > { %v970_v21 = vadd.f32 %v856_v18, %v296_v16  ;;  %v1062_v16 = vsel %vm252_vm0, %v2118_v7, 0.0  ;;  %v1061_v18 = vadd.f32 %v1060_v2, %v1059_v15  ;;  %v2129_v19 = vld [vmem:[#allocation2 + $0x20] sm:$0xff] }
 0x13e   : > { %v635_v22 = vpop.f32.mrf.mxu0  ;;  %v860_v24 = vpop.f32.mrf.mxu1 }
 0x13f   : > { %1003 = vst.msk [vmem:[#allocation2 + $0x58] sm:$0xff] %vm252_vm0, %v970_v21  ;;  %v861_v25 = vadd.f32 %v860_v24, %v635_v22  ;;  %v1064_v22 = vsel %vm252_vm0, %v2122_v11, 0.0  ;;  %v1063_v24 = vadd.f32 %v1062_v16, %v1061_v18 }
 0x140   : > { %v637_v26 = vpop.f32.mrf.mxu0  ;;  %v862_v27 = vpop.f32.mrf.mxu1 }
 0x141   : > { %v971_v28 = vadd.f32 %v861_v25, %v297_v23  ;;  %v2133_v25 = vld [vmem:[#allocation2 + $0x28] sm:$0xff]  ;;  %v305_v27 = vld [vmem:[#allocation2 + $0xa0] sm:$0xff] }
 0x142   : > { %v640_v29 = vpop.f32.mrf.mxu0  ;;  %v865_v31 = vpop.f32.mrf.mxu1 }
 0x143   : > { %1004 = vst.msk [vmem:[#allocation2 + $0x60] sm:$0xff] %vm252_vm0, %v971_v28  ;;  %v866_v32 = vadd.f32 %v865_v31, %v640_v29  ;;  %v1066_v29 = vsel %vm252_vm0, %v2129_v19, 0.0  ;;  %v1065_v31 = vadd.f32 %v1064_v22, %v1063_v24 }
 0x144   : > { %v642_v33 = vpop.f32.mrf.mxu0  ;;  %v867_v34 = vpop.f32.mrf.mxu1 }
 0x145   : > { %v972_v35 = vadd.f32 %v866_v32, %v298_v30  ;;  %v2138_v32 = vld [vmem:[#allocation2 + $0x30] sm:$0xff] }
 0x146   : > { %v645_v36 = vpop.f32.mrf.mxu0  ;;  %v870_v38 = vpop.f32.mrf.mxu1 }
 0x147   : > { %1005 = vst.msk [vmem:[#allocation2 + $0x68] sm:$0xff] %vm252_vm0, %v972_v35  ;;  %v871_v39 = vadd.f32 %v870_v38, %v645_v36  ;;  %v1068_v35 = vsel %vm252_vm0, %v2133_v25, 0.0  ;;  %v2142_v38 = vld [vmem:[#allocation2 + $0x38] sm:$0xff] }
 0x148   : > { %v647_v40 = vpop.f32.mrf.mxu0  ;;  %v872_v41 = vpop.f32.mrf.mxu1 }
 0x149   : > { %v973_v42 = vadd.f32 %v871_v39, %v299_v37  ;;  %v1067_v37 = vadd.f32 %v1066_v29, %v1065_v31  ;;  %v306_v40 = vld [vmem:[#allocation2 + $0xa8] sm:$0xff] }
 0x14a   : > { %v650_v43 = vpop.f32.mrf.mxu0  ;;  %v875_v45 = vpop.f32.mrf.mxu1 }
 0x14b   : > { %1006 = vst.msk [vmem:[#allocation2 + $0x70] sm:$0xff] %vm252_vm0, %v973_v42  ;;  %v876_v46 = vadd.f32 %v875_v45, %v650_v43  ;;  %v1070_v42 = vsel %vm252_vm0, %v2138_v32, 0.0  ;;  %v2147_v45 = vld [vmem:[#allocation2 + $0x40] sm:$0xff] }
 0x14c   : > { %v652_v47 = vpop.f32.mrf.mxu0  ;;  %v877_v48 = vpop.f32.mrf.mxu1 }
 0x14d   : > { %v974_v49 = vadd.f32 %v876_v46, %v300_v44  ;;  %v1069_v44 = vadd.f32 %v1068_v35, %v1067_v37  ;;  %v1072_v48 = vsel %vm252_vm0, %v2142_v38, 0.0  ;;  %v310_v35 = vld [vmem:[#allocation2 + $0xc8] sm:$0xff] }
 0x14e   : > { %v655_v50 = vpop.f32.mrf.mxu0  ;;  %v880_v52 = vpop.f32.mrf.mxu1 }
 0x14f   : > { %1007 = vst.msk [vmem:[#allocation2 + $0x78] sm:$0xff] %vm252_vm0, %v974_v49  ;;  %v881_v53 = vadd.f32 %v880_v52, %v655_v50  ;;  %v1071_v50 = vadd.f32 %v1070_v42, %v1069_v44 }
 0x150   : > { %v657_v54 = vpop.f32.mrf.mxu0  ;;  %v882_v55 = vpop.f32.mrf.mxu1 }
 0x151   : > { %v975_v56 = vadd.f32 %v881_v53, %v301_v51  ;;  %v2151_v51 = vld [vmem:[#allocation2 + $0x48] sm:$0xff]  ;;  %v307_v53 = vld [vmem:[#allocation2 + $0xb0] sm:$0xff]  ;;  %v1074_v55 = vsel %vm252_vm0, %v2147_v45, 0.0 }
 0x152   : > { %v660_v57 = vpop.f32.mrf.mxu0  ;;  %v885_v59 = vpop.f32.mrf.mxu1 }
 0x153   : > { %1008 = vst.msk [vmem:[#allocation2 + $0x80] sm:$0xff] %vm252_vm0, %v975_v56  ;;  %v886_v60 = vadd.f32 %v885_v59, %v660_v57  ;;  %v1073_v57 = vadd.f32 %v1072_v48, %v1071_v50  ;;  %v311_v50 = vld [vmem:[#allocation2 + $0xd0] sm:$0xff] }
 0x154   : > { %v662_v61 = vpop.f32.mrf.mxu0  ;;  %v887_v62 = vpop.f32.mrf.mxu1 }
 0x155   : > { %v976_v63 = vadd.f32 %v886_v60, %v302_v58  ;;  %v2156_v58 = vld [vmem:[#allocation2 + $0x50] sm:$0xff]  ;;  %v1076_v61 = vsel %vm252_vm0, %v2151_v51, 0.0 }
 0x156   : > { %v665_v1 = vpop.f32.mrf.mxu0  ;;  %v890_v4 = vpop.f32.mrf.mxu1 }
 0x157   : > { %1009 = vst.msk [vmem:[#allocation2 + $0x88] sm:$0xff] %vm252_vm0, %v976_v63  ;;  %v891_v5 = vadd.f32 %v890_v4, %v665_v1  ;;  %v1075_v63 = vadd.f32 %v1074_v55, %v1073_v57  ;;  %v2160_v1 = vld [vmem:[#allocation2 + $0x58] sm:$0xff] }
 0x158   : > { %v667_v8 = vpop.f32.mrf.mxu0  ;;  %v892_v9 = vpop.f32.mrf.mxu1  ;;  %v308_v4 = vld [vmem:[#allocation2 + $0xb8] sm:$0xff] }
 0x159   : > { %v977_v10 = vadd.f32 %v891_v5, %v303_v3  ;;  %v1078_v8 = vsel %vm252_vm0, %v2156_v58, 0.0  ;;  %v1077_v2 = vadd.f32 %v1076_v61, %v1075_v63 }
 0x15a   : > { %v670_v12 = vpop.f32.mrf.mxu0  ;;  %v895_v14 = vpop.f32.mrf.mxu1 }
 0x15b   : > { %1010 = vst.msk [vmem:[#allocation2 + $0x90] sm:$0xff] %vm252_vm0, %v977_v10  ;;  %v896_v17 = vadd.f32 %v895_v14, %v670_v12  ;;  %v2165_v10 = vld [vmem:[#allocation2 + $0x60] sm:$0xff]  ;;  %v1080_v14 = vsel %vm252_vm0, %v2160_v1, 0.0  ;;  %v1079_v16 = vadd.f32 %v1078_v8, %v1077_v2 }
 0x15c   : > { %v672_v20 = vpop.f32.mrf.mxu0  ;;  %v897_v21 = vpop.f32.mrf.mxu1  ;;  %v1082_v22 = vsel %vm252_vm0, %v2165_v10, 0.0 }
 0x15d   : > { %v978_v23 = vadd.f32 %v896_v17, %v304_v13  ;;  %v2169_v17 = vld [vmem:[#allocation2 + $0x68] sm:$0xff]  ;;  %v309_v20 = vld [vmem:[#allocation2 + $0xc0] sm:$0xff]  ;;  %v1081_v24 = vadd.f32 %v1080_v14, %v1079_v16 }
 0x15e   : > { %v675_v26 = vpop.f32.mrf.mxu0  ;;  %v900_v28 = vpop.f32.mrf.mxu1  ;;  %v1084_v29 = vsel %vm252_vm0, %v2169_v17, 0.0  ;;  %v2187_v48 = vld [vmem:[#allocation2 + $0x88] sm:$0xff] }
 0x15f   : > { %1011 = vst.msk [vmem:[#allocation2 + $0x98] sm:$0xff] %vm252_vm0, %v978_v23  ;;  %v901_v30 = vadd.f32 %v900_v28, %v675_v26  ;;  %v2174_v26 = vld [vmem:[#allocation2 + $0x70] sm:$0xff]  ;;  %v1083_v31 = vadd.f32 %v1082_v22, %v1081_v24  ;;  %v313_v22 = vld [vmem:[#allocation2 + $0xe0] sm:$0xff] }
 0x160   : > { %v677_v33 = vpop.f32.mrf.mxu0  ;;  %v902_v34 = vpop.f32.mrf.mxu1  ;;  %v1086_v37 = vsel %vm252_vm0, %v2174_v26, 0.0 }
 0x161   : > { %v979_v36 = vadd.f32 %v901_v30, %v305_v27  ;;  %v2178_v33 = vld [vmem:[#allocation2 + $0x78] sm:$0xff] }
 0x162   : > { %v680_v39 = vpop.f32.mrf.mxu0  ;;  %v905_v41 = vpop.f32.mrf.mxu1  ;;  %v1088_v44 = vsel %vm252_vm0, %v2178_v33, 0.0 }
 0x163   : > { %1012 = vst.msk [vmem:[#allocation2 + $0xa0] sm:$0xff] %vm252_vm0, %v979_v36  ;;  %v906_v43 = vadd.f32 %v905_v41, %v680_v39  ;;  %v2183_v41 = vld [vmem:[#allocation2 + $0x80] sm:$0xff] }
 0x164   : > { %v682_v46 = vpop.f32.mrf.mxu0  ;;  %v907_v47 = vpop.f32.mrf.mxu1 }
 0x165   : > { %v980_v49 = vadd.f32 %v906_v43, %v306_v40  ;;  %v1085_v40 = vadd.f32 %v1084_v29, %v1083_v31 }
 0x166   : > { %v685_v52 = vpop.f32.mrf.mxu0  ;;  %v910_v54 = vpop.f32.mrf.mxu1  ;;  %v2196_v63 = vld [vmem:[#allocation2 + $0x98] sm:$0xff] }
 0x167   : > { %1013 = vst.msk [vmem:[#allocation2 + $0xa8] sm:$0xff] %vm252_vm0, %v980_v49  ;;  %v911_v56 = vadd.f32 %v910_v54, %v685_v52  ;;  %v1087_v47 = vadd.f32 %v1086_v37, %v1085_v40  ;;  %v314_v40 = vld [vmem:[#allocation2 + $0xe8] sm:$0xff] }
 0x168   : > { %v687_v59 = vpop.f32.mrf.mxu0  ;;  %v912_v60 = vpop.f32.mrf.mxu1 }
 0x169   : > { %v981_v62 = vadd.f32 %v911_v56, %v307_v53  ;;  %v1090_v53 = vsel %vm252_vm0, %v2183_v41, 0.0  ;;  %v1089_v55 = vadd.f32 %v1088_v44, %v1087_v47  ;;  %v2192_v56 = vld [vmem:[#allocation2 + $0x90] sm:$0xff]  ;;  %v1092_v60 = vsel %vm252_vm0, %v2187_v48, 0.0 }
 0x16a   : > { %v690_v3 = vpop.f32.mrf.mxu0  ;;  %v915_v5 = vpop.f32.mrf.mxu1  ;;  %v1094_v8 = vsel %vm252_vm0, %v2192_v56, 0.0 }
 0x16b   : > { %1014 = vst.msk [vmem:[#allocation2 + $0xb0] sm:$0xff] %vm252_vm0, %v981_v62  ;;  %v916_v9 = vadd.f32 %v915_v5, %v690_v3  ;;  %v1091_v62 = vadd.f32 %v1090_v53, %v1089_v55 }
 0x16c   : > { %v692_v12 = vpop.f32.mrf.mxu0  ;;  %v917_v13 = vpop.f32.mrf.mxu1 }
 0x16d   : > { %v982_v15 = vadd.f32 %v916_v9, %v308_v4  ;;  %v312_v4 = vld [vmem:[#allocation2 + $0xd8] sm:$0xff]  ;;  %v1093_v2 = vadd.f32 %v1092_v60, %v1091_v62  ;;  %v2201_v12 = vld [vmem:[#allocation2 + $0xa0] sm:$0xff] }
 0x16e   : > { %v695_v18 = vpop.f32.mrf.mxu0  ;;  %v920_v21 = vpop.f32.mrf.mxu1  ;;  %v1098_v24 = vsel %vm252_vm0, %v2201_v12, 0.0 }
 0x16f   : > { %1015 = vst.msk [vmem:[#allocation2 + $0xb8] sm:$0xff] %vm252_vm0, %v982_v15  ;;  %v921_v23 = vadd.f32 %v920_v21, %v695_v18  ;;  %v1096_v15 = vsel %vm252_vm0, %v2196_v63, 0.0  ;;  %v1095_v18 = vadd.f32 %v1094_v8, %v1093_v2 }
 0x170   : > { %v697_v27 = vpop.f32.mrf.mxu0  ;;  %v922_v28 = vpop.f32.mrf.mxu1 }
 0x171   : > { %v983_v30 = vadd.f32 %v921_v23, %v309_v20  ;;  %v2205_v20 = vld [vmem:[#allocation2 + $0xa8] sm:$0xff]  ;;  %v1097_v28 = vadd.f32 %v1096_v15, %v1095_v18 }
 0x172   : > { %v700_v34 = vpop.f32.mrf.mxu0  ;;  %v925_v36 = vpop.f32.mrf.mxu1  ;;  %v2210_v29 = vld [vmem:[#allocation2 + $0xb0] sm:$0xff] }
 0x173   : > { %1016 = vst.msk [vmem:[#allocation2 + $0xc0] sm:$0xff] %vm252_vm0, %v983_v30  ;;  %v926_v39 = vadd.f32 %v925_v36, %v700_v34  ;;  %v1100_v34 = vsel %vm252_vm0, %v2205_v20, 0.0  ;;  %v1099_v36 = vadd.f32 %v1098_v24, %v1097_v28 }
 0x174   : > { %v702_v42 = vpop.f32.mrf.mxu0  ;;  %v927_v43 = vpop.f32.mrf.mxu1 }
 0x175   : > { %v984_v46 = vadd.f32 %v926_v39, %v310_v35  ;;  %v1102_v43 = vsel %vm252_vm0, %v2210_v29, 0.0 }
 0x176   : > { %v705_v49 = vpop.f32.mrf.mxu0  ;;  %v930_v52 = vpop.f32.mrf.mxu1  ;;  %v2214_v37 = vld [vmem:[#allocation2 + $0xb8] sm:$0xff] }
 0x177   : > { %1017 = vst.msk [vmem:[#allocation2 + $0xc8] sm:$0xff] %vm252_vm0, %v984_v46  ;;  %v931_v54 = vadd.f32 %v930_v52, %v705_v49  ;;  %v1101_v46 = vadd.f32 %v1100_v34, %v1099_v36  ;;  %v1104_v52 = vsel %vm252_vm0, %v2214_v37, 0.0 }
 0x178   : > { %v707_v57 = vpop.f32.mrf.mxu0  ;;  %v932_v59 = vpop.f32.mrf.mxu1 }
 0x179   : > { %v985_v61 = vadd.f32 %v931_v54, %v311_v50  ;;  %v1103_v54 = vadd.f32 %v1102_v43, %v1101_v46  ;;  %v315_v59 = vld [vmem:[#allocation2 + $0xf0] sm:$0xff] }
 0x17a   : > { %v710_v3 = vpop.f32.mrf.mxu0  ;;  %v935_v5 = vpop.f32.mrf.mxu1  ;;  %v2219_v47 = vld [vmem:[#allocation2 + $0xc0] sm:$0xff] }
 0x17b   : > { %1018 = vst.msk [vmem:[#allocation2 + $0xd0] sm:$0xff] %vm252_vm0, %v985_v61  ;;  %v936_v9 = vadd.f32 %v935_v5, %v710_v3  ;;  %v1106_v61 = vsel %vm252_vm0, %v2219_v47, 0.0  ;;  %v1105_v3 = vadd.f32 %v1104_v52, %v1103_v54 }
 0x17c   : > { %v712_v13 = vpop.f32.mrf.mxu0  ;;  %v937_v14 = vpop.f32.mrf.mxu1 }
 0x17d   : > { %v986_v16 = vadd.f32 %v936_v9, %v312_v4  ;;  %v1107_v13 = vadd.f32 %v1106_v61, %v1105_v3 }
 0x17e   : > { %v715_v21 = vpop.f32.mrf.mxu0  ;;  %v940_v23 = vpop.f32.mrf.mxu1  ;;  %v2223_v55 = vld [vmem:[#allocation2 + $0xc8] sm:$0xff] }
 0x17f   : > { %1019 = vst.msk [vmem:[#allocation2 + $0xd8] sm:$0xff] %vm252_vm0, %v986_v16  ;;  %v941_v27 = vadd.f32 %v940_v23, %v715_v21  ;;  %v1108_v9 = vsel %vm252_vm0, %v2223_v55, 0.0  ;;  %v316_v16 = vld [vmem:[#allocation2 + $0xf8] sm:$0xff] }
 0x180   : > { %v717_v30 = vpop.f32.mrf.mxu0  ;;  %v942_v31 = vpop.f32.mrf.mxu1  ;;  %v1109_v23 = vadd.f32 %v1108_v9, %v1107_v13 }
 0x181   : > { %v987_v35 = vadd.f32 %v941_v27, %v313_v22 }
 0x182   : > { %v720_v39 = vpop.f32.mrf.mxu0  ;;  %v945_v42 = vpop.f32.mrf.mxu1  ;;  %v2228_v4 = vld [vmem:[#allocation2 + $0xd0] sm:$0xff] }
 0x183   : > { %1020 = vst.msk [vmem:[#allocation2 + $0xe0] sm:$0xff] %vm252_vm0, %v987_v35  ;;  %v946_v44 = vadd.f32 %v945_v42, %v720_v39  ;;  %v1110_v21 = vsel %vm252_vm0, %v2228_v4, 0.0 }
 0x184   : > { %v722_v49 = vpop.f32.mrf.mxu0  ;;  %v947_v50 = vpop.f32.mrf.mxu1  ;;  %v1111_v34 = vadd.f32 %v1110_v21, %v1109_v23 }
 0x185   : > { %v988_v53 = vadd.f32 %v946_v44, %v314_v40 }
 0x186   : > { %v725_v57 = vpop.f32.mrf.mxu0  ;;  %v950_v60 = vpop.f32.mrf.mxu1  ;;  %v2232_v14 = vld [vmem:[#allocation2 + $0xd8] sm:$0xff] }
 0x187   : > { %1021 = vst.msk [vmem:[#allocation2 + $0xe8] sm:$0xff] %vm252_vm0, %v988_v53  ;;  %v951_v62 = vadd.f32 %v950_v60, %v725_v57  ;;  %v1112_v30 = vsel %vm252_vm0, %v2232_v14, 0.0 }
 0x188   : > { %v727_v5 = vpop.f32.mrf.mxu0  ;;  %v952_v8 = vpop.f32.mrf.mxu1  ;;  %v1113_v39 = vadd.f32 %v1112_v30, %v1111_v34 }
 0x189   : > { %v989_v2 = vadd.f32 %v951_v62, %v315_v59 }
 0x18a   : > { %v730_v15 = vpop.f32.mrf.mxu0  ;;  %v955_v18 = vpop.f32.mrf.mxu1  ;;  %v2237_v24 = vld [vmem:[#allocation2 + $0xe0] sm:$0xff] }
 0x18b   : > { %1022 = vst.msk [vmem:[#allocation2 + $0xf0] sm:$0xff] %vm252_vm0, %v989_v2  ;;  %v956_v22 = vadd.f32 %v955_v18, %v730_v15  ;;  %v1114_v36 = vsel %vm252_vm0, %v2237_v24, 0.0 }
 0x18c   : > { %v732_v27 = vpop.f32.mrf.mxu0  ;;  %v957_v28 = vpop.f32.mrf.mxu1  ;;  %v1115_v42 = vadd.f32 %v1114_v36, %v1113_v39 }
 0x18d   : > { %v990_v31 = vadd.f32 %v956_v22, %v316_v16 }
 0x18e   : > { %v2241_v35 = vld [vmem:[#allocation2 + $0xe8] sm:$0xff] }
 0x18f   : > { %1023 = vst.msk [vmem:[#allocation2 + $0xf8] sm:$0xff] %vm252_vm0, %v990_v31  ;;  %v1116_v40 = vsel %vm252_vm0, %v2241_v35, 0.0 }
 0x190   : > { %v1117_v46 = vadd.f32 %v1116_v40, %v1115_v42 }
 0x192   : > { %v2248_v43 = vld [vmem:[#allocation2 + $0xf0] sm:$0xff] }
 0x193   : > { %v1118_v44 = vsel %vm252_vm0, %v2248_v43, 0.0 }
 0x194   : > { %v1119_v49 = vadd.f32 %v1118_v44, %v1117_v46 }
 0x196   : > { %v2252_v50 = vld [vmem:[#allocation2 + $0xf8] sm:$0xff] }
 0x197   : > { %v1120_v52 = vsel %vm252_vm0, %v2252_v50, 0.0 }
 0x198   : > { %v1121_v53 = vadd.f32 %v1120_v52, %v1119_v49 }
 0x19a   : > { %v1122_v54 = vrot.slane %v1121_v53, 4 }
 0x19c   : > { %v1123_v57 = vadd.f32 %v1122_v54, %v1121_v53 }
 0x19e   : > { %v1124_v59 = vrot.slane %v1123_v57, 2 }
 0x1a0   : > { %v1125_v60 = vadd.f32 %v1124_v59, %v1123_v57 }
 0x1a2   : > { %v1126_v61 = vrot.slane %v1125_v60, 1 }
 0x1a4   : > { %v1127_v62 = vadd.f32 %v1126_v61, %v1125_v60 }
 0x1a6   : > { %v2256_v3 = vmul.f32 0.00390625, %v1127_v62 }
 0x1a8   : > { %v2260_v5 = vsub.f32 %v2116_v6, %v2256_v3  ;;  %v2264_v8 = vsub.f32 %v2113_v0, %v2256_v3  ;;  %v2268_v9 = vsub.f32 %v2118_v7, %v2256_v3  ;;  %v2272_v2 = vsub.f32 %v2122_v11, %v2256_v3 }
 0x1a9   : > { %v2280_v6 = vsub.f32 %v2129_v19, %v2256_v3  ;;  %v2286_v7 = vsub.f32 %v2133_v25, %v2256_v3  ;;  %v2294_v22 = vsub.f32 %v2138_v32, %v2256_v3  ;;  %v2301_v25 = vsub.f32 %v2142_v38, %v2256_v3 }
 0x1aa   : > { %v1162_v13 = vmul.f32 %v2260_v5, %v2260_v5  ;;  %v1163_v15 = vmul.f32 %v2264_v8, %v2264_v8  ;;  %v1164_v0 = vmul.f32 %v2268_v9, %v2268_v9  ;;  %v1165_v11 = vmul.f32 %v2272_v2, %v2272_v2 }
 0x1ab   : > { %v1166_v19 = vmul.f32 %v2280_v6, %v2280_v6  ;;  %v1167_v28 = vmul.f32 %v2286_v7, %v2286_v7  ;;  %v2308_v32 = vsub.f32 %v2147_v45, %v2256_v3  ;;  %v1168_v34 = vmul.f32 %v2294_v22, %v2294_v22 }
 0x1ac   : > { %v1194_v16 = vsel %vm252_vm0, %v1162_v13, 0.0  ;;  %v1195_v18 = vsel %vm252_vm0, %v1163_v15, 0.0  ;;  %v1197_v23 = vsel %vm252_vm0, %v1164_v0, 0.0  ;;  %v1199_v30 = vsel %vm252_vm0, %v1165_v11, 0.0 }
 0x1ad   : > { %v1196_v21 = vadd.f32 %v1195_v18, %v1194_v16  ;;  %v1201_v36 = vsel %vm252_vm0, %v1166_v19, 0.0  ;;  %v2315_v38 = vsub.f32 %v2151_v51, %v2256_v3  ;;  %v1169_v40 = vmul.f32 %v2301_v25, %v2301_v25 }
 0x1ae   : > { %v1203_v42 = vsel %vm252_vm0, %v1167_v28, 0.0  ;;  %v2322_v45 = vsub.f32 %v2156_v58, %v2256_v3  ;;  %v1170_v46 = vmul.f32 %v2308_v32, %v2308_v32  ;;  %v1205_v49 = vsel %vm252_vm0, %v1168_v34, 0.0 }
 0x1af   : > { %v1198_v27 = vadd.f32 %v1197_v23, %v1196_v21  ;;  %v2329_v51 = vsub.f32 %v2160_v1, %v2256_v3  ;;  %v1171_v53 = vmul.f32 %v2315_v38, %v2315_v38  ;;  %v1207_v54 = vsel %vm252_vm0, %v1169_v40, 0.0 }
 0x1b0   : > { %v2336_v58 = vsub.f32 %v2165_v10, %v2256_v3  ;;  %v1172_v59 = vmul.f32 %v2322_v45, %v2322_v45  ;;  %v1209_v60 = vsel %vm252_vm0, %v1170_v46, 0.0  ;;  %v2343_v1 = vsub.f32 %v2169_v17, %v2256_v3 }
 0x1b1   : > { %v1200_v31 = vadd.f32 %v1199_v30, %v1198_v27  ;;  %v1173_v62 = vmul.f32 %v2329_v51, %v2329_v51  ;;  %v1211_v13 = vsel %vm252_vm0, %v1171_v53, 0.0  ;;  %v2350_v10 = vsub.f32 %v2174_v26, %v2256_v3 }
 0x1b2   : > { %v1174_v0 = vmul.f32 %v2336_v58, %v2336_v58  ;;  %v1213_v11 = vsel %vm252_vm0, %v1172_v59, 0.0  ;;  %v2357_v17 = vsub.f32 %v2178_v33, %v2256_v3  ;;  %v1175_v18 = vmul.f32 %v2343_v1, %v2343_v1 }
 0x1b3   : > { %v1202_v39 = vadd.f32 %v1201_v36, %v1200_v31  ;;  %v1215_v21 = vsel %vm252_vm0, %v1173_v62, 0.0  ;;  %v2364_v26 = vsub.f32 %v2183_v41, %v2256_v3  ;;  %v1176_v23 = vmul.f32 %v2350_v10, %v2350_v10 }
 0x1b4   : > { %v1217_v27 = vsel %vm252_vm0, %v1174_v0, 0.0  ;;  %v2371_v33 = vsub.f32 %v2187_v48, %v2256_v3  ;;  %v1177_v30 = vmul.f32 %v2357_v17, %v2357_v17  ;;  %v1219_v31 = vsel %vm252_vm0, %v1175_v18, 0.0 }
 0x1b5   : > { %v1204_v44 = vadd.f32 %v1203_v42, %v1202_v39  ;;  %v2378_v41 = vsub.f32 %v2192_v56, %v2256_v3  ;;  %v1178_v36 = vmul.f32 %v2364_v26, %v2364_v26  ;;  %v1221_v39 = vsel %vm252_vm0, %v1176_v23, 0.0 }
 0x1b6   : > { %v2385_v48 = vsub.f32 %v2196_v63, %v2256_v3  ;;  %v1179_v42 = vmul.f32 %v2371_v33, %v2371_v33  ;;  %v2392_v56 = vsub.f32 %v2201_v12, %v2256_v3  ;;  %v2399_v63 = vsub.f32 %v2205_v20, %v2256_v3 }
 0x1b7   : > { %v1206_v52 = vadd.f32 %v1205_v49, %v1204_v44  ;;  %v1223_v44 = vsel %vm252_vm0, %v1177_v30, 0.0  ;;  %v1180_v49 = vmul.f32 %v2378_v41, %v2378_v41  ;;  %v2406_v12 = vsub.f32 %v2210_v29, %v2256_v3 }
 0x1b8   : > { %v2413_v20 = vsub.f32 %v2214_v37, %v2256_v3  ;;  %v2420_v29 = vsub.f32 %v2219_v47, %v2256_v3  ;;  %v2427_v37 = vsub.f32 %v2223_v55, %v2256_v3  ;;  %v2434_v47 = vsub.f32 %v2228_v4, %v2256_v3 }
 0x1b9   : > { %v1208_v57 = vadd.f32 %v1207_v54, %v1206_v52  ;;  %v1225_v52 = vsel %vm252_vm0, %v1178_v36, 0.0  ;;  %v1181_v54 = vmul.f32 %v2385_v48, %v2385_v48  ;;  %v2441_v55 = vsub.f32 %v2232_v14, %v2256_v3 }
 0x1ba   : > { %v2448_v4 = vsub.f32 %v2237_v24, %v2256_v3  ;;  %v1159_v14 = vsub.f32 %v2241_v35, %v2256_v3 }
 0x1bb   : > { %v1210_v61 = vadd.f32 %v1209_v60, %v1208_v57  ;;  %v1227_v57 = vsel %vm252_vm0, %v1179_v42, 0.0  ;;  %v1182_v60 = vmul.f32 %v2392_v56, %v2392_v56 }
 0x1bc   : > { %v1190_v24 = vmul.f32 %v2448_v4, %v2448_v4 }
 0x1bd   : > { %v1212_v15 = vadd.f32 %v1211_v13, %v1210_v61  ;;  %v1229_v61 = vsel %vm252_vm0, %v1180_v49, 0.0  ;;  %v1183_v13 = vmul.f32 %v2399_v63, %v2399_v63 }
 0x1bf   : > { %v1214_v16 = vadd.f32 %v1213_v11, %v1212_v15  ;;  %v1231_v15 = vsel %vm252_vm0, %v1181_v54, 0.0  ;;  %v1184_v11 = vmul.f32 %v2406_v12, %v2406_v12 }
 0x1c1   : > { %v1216_v19 = vadd.f32 %v1215_v21, %v1214_v16  ;;  %v1233_v16 = vsel %vm252_vm0, %v1182_v60, 0.0  ;;  %v1185_v21 = vmul.f32 %v2413_v20, %v2413_v20 }
 0x1c3   : > { %v1218_v28 = vadd.f32 %v1217_v27, %v1216_v19  ;;  %v1235_v19 = vsel %vm252_vm0, %v1183_v13, 0.0  ;;  %v1186_v27 = vmul.f32 %v2420_v29, %v2420_v29 }
 0x1c5   : > { %v1220_v34 = vadd.f32 %v1219_v31, %v1218_v28  ;;  %v1237_v28 = vsel %vm252_vm0, %v1184_v11, 0.0  ;;  %v1187_v31 = vmul.f32 %v2427_v37, %v2427_v37 }
 0x1c7   : > { %v1222_v40 = vadd.f32 %v1221_v39, %v1220_v34  ;;  %v1239_v34 = vsel %vm252_vm0, %v1185_v21, 0.0  ;;  %v1188_v39 = vmul.f32 %v2434_v47, %v2434_v47 }
 0x1c9   : > { %v1224_v46 = vadd.f32 %v1223_v44, %v1222_v40  ;;  %v1241_v40 = vsel %vm252_vm0, %v1186_v27, 0.0  ;;  %v1189_v44 = vmul.f32 %v2441_v55, %v2441_v55 }
 0x1cb   : > { %v1226_v53 = vadd.f32 %v1225_v52, %v1224_v46  ;;  %v1243_v46 = vsel %vm252_vm0, %v1187_v31, 0.0  ;;  %v1160_v52 = vsub.f32 %v2248_v43, %v2256_v3  ;;  %v1247_v35 = vsel %vm252_vm0, %v1189_v44, 0.0 }
 0x1cd   : > { %v1228_v59 = vadd.f32 %v1227_v57, %v1226_v53  ;;  %v1245_v53 = vsel %vm252_vm0, %v1188_v39, 0.0  ;;  %v1161_v57 = vsub.f32 %v2252_v50, %v2256_v3 }
 0x1cf   : > { %v1230_v62 = vadd.f32 %v1229_v61, %v1228_v59  ;;  %v1191_v59 = vmul.f32 %v1159_v14, %v1159_v14  ;;  %v1192_v61 = vmul.f32 %v1160_v52, %v1160_v52 }
 0x1d1   : > { %v1232_v0 = vadd.f32 %v1231_v15, %v1230_v62  ;;  %v1249_v62 = vsel %vm252_vm0, %v1190_v24, 0.0  ;;  %v1193_v15 = vmul.f32 %v1161_v57, %v1161_v57  ;;  %v1251_v43 = vsel %vm252_vm0, %v1191_v59, 0.0 }
 0x1d2   : > { %v1253_v11 = vsel %vm252_vm0, %v1192_v61, 0.0 }
 0x1d3   : > { %v1234_v18 = vadd.f32 %v1233_v16, %v1232_v0 }
 0x1d5   : > { %v1236_v23 = vadd.f32 %v1235_v19, %v1234_v18  ;;  %v1255_v18 = vsel %vm252_vm0, %v1193_v15, 0.0 }
 0x1d7   : > { %v1238_v30 = vadd.f32 %v1237_v28, %v1236_v23 }
 0x1d9   : > { %v1240_v36 = vadd.f32 %v1239_v34, %v1238_v30 }
 0x1db   : > { %v1242_v42 = vadd.f32 %v1241_v40, %v1240_v36 }
 0x1dd   : > { %v1244_v49 = vadd.f32 %v1243_v46, %v1242_v42 }
 0x1df   : > { %v1246_v54 = vadd.f32 %v1245_v53, %v1244_v49 }
 0x1e1   : > { %v1248_v60 = vadd.f32 %v1247_v35, %v1246_v54 }
 0x1e3   : > { %v1250_v13 = vadd.f32 %v1249_v62, %v1248_v60 }
 0x1e5   : > { %v1252_v0 = vadd.f32 %v1251_v43, %v1250_v13 }
 0x1e7   : > { %v1254_v16 = vadd.f32 %v1253_v11, %v1252_v0 }
 0x1e9   : > { %v1256_v21 = vadd.f32 %v1255_v18, %v1254_v16 }
 0x1eb   : > { %v1257_v19 = vrot.slane %v1256_v21, 4 }
 0x1ed   : > { %v1258_v50 = vadd.f32 %v1257_v19, %v1256_v21 }
 0x1ef   : > { %v1259_v3 = vrot.slane %v1258_v50, 2 }
 0x1f1   : > { %v1260_v23 = vadd.f32 %v1259_v3, %v1258_v50  ;;  %v1536_v3 = vld [vmem:[%s2623_s3] ss:$0 sm:$0xff] }
 0x1f3   : > { %v1261_v27 = vrot.slane %v1260_v23, 1 }
 0x1f5   : > { %v1262_v28 = vadd.f32 %v1261_v27, %v1260_v23 }
 0x1f7   : > { %v1263_v30 = vmul.f32 0.00390625, %v1262_v28 }
 0x1f9   : > { %v1264_v31 = vadd.f32 1e-05, %v1263_v30 }
 0x1fb   : > { %1566 = vrsqrt.f32 %v1264_v31 }
 0x208   : > { %v1567_v34 = vpop.eup %1566 }
 0x209   : > { %v1266_v36 = vmul.f32 %v1567_v34, %v2260_v5  ;;  %v1267_v39 = vmul.f32 %v1567_v34, %v2264_v8  ;;  %v1268_v40 = vmul.f32 %v1567_v34, %v2268_v9  ;;  %v1269_v42 = vmul.f32 %v1567_v34, %v2272_v2 }
 0x20a   : > { %v1270_v44 = vmul.f32 %v1567_v34, %v2280_v6  ;;  %v1271_v46 = vmul.f32 %v1567_v34, %v2286_v7  ;;  %v1272_v49 = vmul.f32 %v1567_v34, %v2294_v22  ;;  %v1273_v24 = vmul.f32 %v1567_v34, %v2301_v25 }
 0x20b   : > { %v1274_v53 = vmul.f32 %v1567_v34, %v2308_v32  ;;  %v1275_v54 = vmul.f32 %v1567_v34, %v2315_v38  ;;  %v1276_v5 = vmul.f32 %v1567_v34, %v2322_v45  ;;  %v1277_v8 = vmul.f32 %v1567_v34, %v2329_v51 }
 0x20c   : > { %v1278_v9 = vmul.f32 %v1567_v34, %v2336_v58  ;;  %v1279_v2 = vmul.f32 %v1567_v34, %v2343_v1  ;;  %v1280_v6 = vmul.f32 %v1567_v34, %v2350_v10  ;;  %v1281_v7 = vmul.f32 %v1567_v34, %v2357_v17  ;;  %v1535_v10 = vld [vmem:[%s2622_s2] ss:$0 sm:$0xff] }
 0x20d   : > { %v1282_v22 = vmul.f32 %v1567_v34, %v2364_v26  ;;  %v1283_v25 = vmul.f32 %v1567_v34, %v2371_v33  ;;  %v1284_v32 = vmul.f32 %v1567_v34, %v2378_v41  ;;  %v1285_v38 = vmul.f32 %v1567_v34, %v2385_v48 }
 0x20e   : > { %v1286_v45 = vmul.f32 %v1567_v34, %v2392_v56  ;;  %v1287_v51 = vmul.f32 %v1567_v34, %v2399_v63  ;;  %v1288_v58 = vmul.f32 %v1567_v34, %v2406_v12  ;;  %v1289_v1 = vmul.f32 %v1567_v34, %v2413_v20 }
 0x20f   : > { %v1290_v17 = vmul.f32 %v1567_v34, %v2420_v29  ;;  %v1291_v26 = vmul.f32 %v1567_v34, %v2427_v37  ;;  %v1292_v33 = vmul.f32 %v1567_v34, %v2434_v47  ;;  %v1293_v41 = vmul.f32 %v1567_v34, %v2441_v55 }
 0x210   : > { %v1294_v48 = vmul.f32 %v1567_v34, %v2448_v4  ;;  %v1295_v56 = vmul.f32 %v1567_v34, %v1159_v14  ;;  %v1296_v63 = vmul.f32 %v1567_v34, %v1160_v52  ;;  %v1297_v59 = vmul.f32 %v1567_v34, %v1161_v57 }
 0x211   : > { %v1305_v12 = vmul.f32 %v1535_v10, %v1266_v36  ;;  %v1306_v35 = vmul.f32 %v1535_v10, %v1267_v39  ;;  %v1307_v20 = vmul.f32 %v1535_v10, %v1268_v40  ;;  %v1308_v60 = vmul.f32 %v1535_v10, %v1269_v42 }
 0x212   : > { %v1309_v61 = vmul.f32 %v1535_v10, %v1270_v44  ;;  %v1310_v62 = vmul.f32 %v1535_v10, %v1271_v46  ;;  %v1311_v13 = vmul.f32 %v1535_v10, %v1272_v49  ;;  %v1312_v15 = vmul.f32 %v1535_v10, %v1273_v24 }
 0x213   : > { %v1313_v29 = vmul.f32 %v1535_v10, %v1274_v53  ;;  %v1314_v43 = vmul.f32 %v1535_v10, %v1275_v54  ;;  %v1315_v37 = vmul.f32 %v1535_v10, %v1276_v5  ;;  %v1316_v0 = vmul.f32 %v1535_v10, %v1277_v8 }
 0x214   : > { %v1317_v47 = vmul.f32 %v1535_v10, %v1278_v9  ;;  %v1318_v11 = vmul.f32 %v1535_v10, %v1279_v2  ;;  %v1319_v55 = vmul.f32 %v1535_v10, %v1280_v6  ;;  %v1320_v16 = vmul.f32 %v1535_v10, %v1281_v7 }
 0x215   : > { %v1321_v4 = vmul.f32 %v1535_v10, %v1282_v22  ;;  %v1322_v14 = vmul.f32 %v1535_v10, %v1283_v25  ;;  %v1323_v52 = vmul.f32 %v1535_v10, %v1284_v32  ;;  %v1324_v57 = vmul.f32 %v1535_v10, %v1285_v38 }
 0x216   : > { %v1325_v18 = vmul.f32 %v1535_v10, %v1286_v45  ;;  %v1326_v21 = vmul.f32 %v1535_v10, %v1287_v51  ;;  %v1327_v19 = vmul.f32 %v1535_v10, %v1288_v58  ;;  %v1328_v50 = vmul.f32 %v1535_v10, %v1289_v1 }
 0x217   : > { %v1329_v23 = vmul.f32 %v1535_v10, %v1290_v17  ;;  %v1330_v27 = vmul.f32 %v1535_v10, %v1291_v26  ;;  %v1331_v28 = vmul.f32 %v1535_v10, %v1292_v33  ;;  %v1332_v30 = vmul.f32 %v1535_v10, %v1293_v41 }
 0x218   : > { %v1333_v31 = vmul.f32 %v1535_v10, %v1294_v48  ;;  %v1334_v34 = vmul.f32 %v1535_v10, %v1295_v56  ;;  %v1335_v36 = vmul.f32 %v1535_v10, %v1296_v63  ;;  %v1336_v39 = vmul.f32 %v1535_v10, %v1297_v59 }
 0x219   : > { %v1344_v40 = vadd.f32 %v1536_v3, %v1305_v12  ;;  %v1345_v42 = vadd.f32 %v1536_v3, %v1306_v35  ;;  %v1346_v44 = vadd.f32 %v1536_v3, %v1307_v20  ;;  %v1347_v46 = vadd.f32 %v1536_v3, %v1308_v60 }
 0x21a   : > { %v1348_v49 = vadd.f32 %v1536_v3, %v1309_v61  ;;  %v1349_v24 = vadd.f32 %v1536_v3, %v1310_v62  ;;  %v1350_v53 = vadd.f32 %v1536_v3, %v1311_v13  ;;  %v1351_v54 = vadd.f32 %v1536_v3, %v1312_v15 }
 0x21b   : > { %v1352_v5 = vadd.f32 %v1536_v3, %v1313_v29  ;;  %v1353_v8 = vadd.f32 %v1536_v3, %v1314_v43  ;;  %v1354_v9 = vadd.f32 %v1536_v3, %v1315_v37  ;;  %v1355_v2 = vadd.f32 %v1536_v3, %v1316_v0 }
 0x21c   : > { %v1356_v6 = vadd.f32 %v1536_v3, %v1317_v47  ;;  %v1357_v7 = vadd.f32 %v1536_v3, %v1318_v11  ;;  %v1358_v22 = vadd.f32 %v1536_v3, %v1319_v55  ;;  %v1359_v25 = vadd.f32 %v1536_v3, %v1320_v16 }
 0x21d   : > { %v1360_v32 = vadd.f32 %v1536_v3, %v1321_v4  ;;  %v1361_v38 = vadd.f32 %v1536_v3, %v1322_v14  ;;  %v1362_v45 = vadd.f32 %v1536_v3, %v1323_v52  ;;  %v1363_v51 = vadd.f32 %v1536_v3, %v1324_v57 }
 0x21e   : > { %v2506_v58 = vadd.f32 %v1536_v3, %v1325_v18  ;;  %v2508_v1 = vadd.f32 %v1536_v3, %v1326_v21  ;;  %v2510_v10 = vadd.f32 %v1536_v3, %v1327_v19  ;;  %v2512_v17 = vadd.f32 %v1536_v3, %v1328_v50 }
 0x21f   : > { %v2514_v26 = vadd.f32 %v1536_v3, %v1329_v23  ;;  %v2516_v33 = vadd.f32 %v1536_v3, %v1330_v27  ;;  %v2518_v41 = vadd.f32 %v1536_v3, %v1331_v28  ;;  %v2520_v48 = vadd.f32 %v1536_v3, %v1332_v30 }
 0x220   : > { %v2527_v56 = vadd.f32 %v1536_v3, %v1333_v31  ;;  %v2529_v63 = vadd.f32 %v1536_v3, %v1334_v34  ;;  %v2531_v59 = vadd.f32 %v1536_v3, %v1335_v36  ;;  %v2533_v12 = vadd.f32 %v1536_v3, %v1336_v39 }
 0x221   : > { %v1376_v35 = vmax.f32 %v1344_v40, 0.0  ;;  %v1377_v20 = vmax.f32 %v1345_v42, 0.0  ;;  %v1378_v60 = vmax.f32 %v1346_v44, 0.0  ;;  %v1379_v61 = vmax.f32 %v1347_v46, 0.0 }
 0x222   : > { %v1380_v62 = vmax.f32 %v1348_v49, 0.0  ;;  %v1381_v13 = vmax.f32 %v1349_v24, 0.0  ;;  %v1382_v15 = vmax.f32 %v1350_v53, 0.0  ;;  %v1383_v29 = vmax.f32 %v1351_v54, 0.0 }
 0x223   : > { %v1384_v43 = vmax.f32 %v1352_v5, 0.0  ;;  %v1385_v37 = vmax.f32 %v1353_v8, 0.0  ;;  %v1386_v0 = vmax.f32 %v1354_v9, 0.0  ;;  %v1387_v47 = vmax.f32 %v1355_v2, 0.0  ;;  %1408 = vst.msk [vmem:[%s2525_s25] sm:$0xff] %vm252_vm0, %v1376_v35  ;;  %1409 = vst.msk [vmem:[%s2525_s25 + $0x8] sm:$0xff] %vm252_vm0, %v1377_v20 }
 0x224   : > { %1410 = vst.msk [vmem:[%s2525_s25 + $0x10] sm:$0xff] %vm252_vm0, %v1378_v60  ;;  %1411 = vst.msk [vmem:[%s2525_s25 + $0x18] sm:$0xff] %vm252_vm0, %v1379_v61  ;;  %v1388_v11 = vmax.f32 %v1356_v6, 0.0  ;;  %v1389_v55 = vmax.f32 %v1357_v7, 0.0  ;;  %v1390_v16 = vmax.f32 %v1358_v22, 0.0  ;;  %v1391_v4 = vmax.f32 %v1359_v25, 0.0 }
 0x225   : > { %1412 = vst.msk [vmem:[%s2525_s25 + $0x20] sm:$0xff] %vm252_vm0, %v1380_v62  ;;  %1413 = vst.msk [vmem:[%s2525_s25 + $0x28] sm:$0xff] %vm252_vm0, %v1381_v13  ;;  %v1392_v14 = vmax.f32 %v1360_v32, 0.0  ;;  %v1393_v52 = vmax.f32 %v1361_v38, 0.0  ;;  %v1394_v57 = vmax.f32 %v1362_v45, 0.0  ;;  %v1395_v18 = vmax.f32 %v1363_v51, 0.0 }
 0x226   : > { %1414 = vst.msk [vmem:[%s2525_s25 + $0x30] sm:$0xff] %vm252_vm0, %v1382_v15  ;;  %1415 = vst.msk [vmem:[%s2525_s25 + $0x38] sm:$0xff] %vm252_vm0, %v1383_v29  ;;  %v1396_v21 = vmax.f32 %v2506_v58, 0.0  ;;  %v1397_v19 = vmax.f32 %v2508_v1, 0.0  ;;  %v1398_v50 = vmax.f32 %v2510_v10, 0.0  ;;  %v1399_v3 = vmax.f32 %v2512_v17, 0.0 }
 0x227   : > { %1416 = vst.msk [vmem:[%s2525_s25 + $0x40] sm:$0xff] %vm252_vm0, %v1384_v43  ;;  %1417 = vst.msk [vmem:[%s2525_s25 + $0x48] sm:$0xff] %vm252_vm0, %v1385_v37  ;;  %v1400_v23 = vmax.f32 %v2514_v26, 0.0  ;;  %v1401_v27 = vmax.f32 %v2516_v33, 0.0  ;;  %v1402_v28 = vmax.f32 %v2518_v41, 0.0  ;;  %v1403_v30 = vmax.f32 %v2520_v48, 0.0 }
 0x228   : > { %1418 = vst.msk [vmem:[%s2525_s25 + $0x50] sm:$0xff] %vm252_vm0, %v1386_v0  ;;  %1419 = vst.msk [vmem:[%s2525_s25 + $0x58] sm:$0xff] %vm252_vm0, %v1387_v47  ;;  %v1404_v31 = vmax.f32 %v2527_v56, 0.0  ;;  %v1405_v34 = vmax.f32 %v2529_v63, 0.0  ;;  %v1406_v36 = vmax.f32 %v2531_v59, 0.0  ;;  %v1407_v39 = vmax.f32 %v2533_v12, 0.0 }
 0x229   : > { %1420 = vst.msk [vmem:[%s2525_s25 + $0x60] sm:$0xff] %vm252_vm0, %v1388_v11  ;;  %1421 = vst.msk [vmem:[%s2525_s25 + $0x68] sm:$0xff] %vm252_vm0, %v1389_v55 }
 0x22a   : > { %1422 = vst.msk [vmem:[%s2525_s25 + $0x70] sm:$0xff] %vm252_vm0, %v1390_v16  ;;  %1423 = vst.msk [vmem:[%s2525_s25 + $0x78] sm:$0xff] %vm252_vm0, %v1391_v4 }
 0x22b   : > { %1424 = vst.msk [vmem:[%s2525_s25 + $0x80] sm:$0xff] %vm252_vm0, %v1392_v14  ;;  %1425 = vst.msk [vmem:[%s2525_s25 + $0x88] sm:$0xff] %vm252_vm0, %v1393_v52 }
 0x22c   : > { %1426 = vst.msk [vmem:[%s2525_s25 + $0x90] sm:$0xff] %vm252_vm0, %v1394_v57  ;;  %1427 = vst.msk [vmem:[%s2525_s25 + $0x98] sm:$0xff] %vm252_vm0, %v1395_v18 }
 0x22d   : > { %1428 = vst.msk [vmem:[%s2525_s25 + $0xa0] sm:$0xff] %vm252_vm0, %v1396_v21  ;;  %1429 = vst.msk [vmem:[%s2525_s25 + $0xa8] sm:$0xff] %vm252_vm0, %v1397_v19 }
 0x22e   : > { %1430 = vst.msk [vmem:[%s2525_s25 + $0xb0] sm:$0xff] %vm252_vm0, %v1398_v50  ;;  %1431 = vst.msk [vmem:[%s2525_s25 + $0xb8] sm:$0xff] %vm252_vm0, %v1399_v3 }
 0x22f   : > { %1432 = vst.msk [vmem:[%s2525_s25 + $0xc0] sm:$0xff] %vm252_vm0, %v1400_v23  ;;  %1433 = vst.msk [vmem:[%s2525_s25 + $0xc8] sm:$0xff] %vm252_vm0, %v1401_v27 }
 0x230   : > { %1434 = vst.msk [vmem:[%s2525_s25 + $0xd0] sm:$0xff] %vm252_vm0, %v1402_v28  ;;  %1435 = vst.msk [vmem:[%s2525_s25 + $0xd8] sm:$0xff] %vm252_vm0, %v1403_v30 }
 0x231   : > { %1436 = vst.msk [vmem:[%s2525_s25 + $0xe0] sm:$0xff] %vm252_vm0, %v1404_v31  ;;  %1437 = vst.msk [vmem:[%s2525_s25 + $0xe8] sm:$0xff] %vm252_vm0, %v1405_v34 }
 0x232   : > { %1438 = vst.msk [vmem:[%s2525_s25 + $0xf0] sm:$0xff] %vm252_vm0, %v1406_v36  ;;  %1439 = vst.msk [vmem:[%s2525_s25 + $0xf8] sm:$0xff] %vm252_vm0, %v1407_v39 }
 0x233 PF: > { %s14_s17 = sadd.s32 1, %s1590_s17   ;;  %s2625_s15 = smov %s1586_s16 }
 0x234   : > { %p11_p5 = scmp.ge.s32.totalorder %s14_s17, 4   ;;  %s2626_s16 = smov %s2628_s18 }
 0x236   :  { %13 = sbr.rel (!%p11_p5) target bundleno = 2 (0x2), region = 77 }

// kernel: generator2_forward.12
= control target key start
LH: loop header
LB: loop body
LE: loop exit
PB: predicated region body
PF: predicated region fallthrough
CT: control target
= control target key end

     0   :  { %s677_s15 = smov 0   ;;  %s679_s16 = smov 0   ;;  %s830_s0 = inlined_call_operand.vmem [shape: f32[2,16,256], index: 0, kind: input, shape index: {}]   ;;  %s831_s1 = inlined_call_operand.vmem [shape: f32[256,32], index: 1, kind: input, shape index: {}]   ;;  %s832_s2 = inlined_call_operand.vmem [shape: f32[1,32], index: 2, kind: input, shape index: {}]   ;;  %s833_s3 = inlined_call_operand.vmem [shape: f32[1,32], index: 3, kind: input, shape index: {}]   ;;  %s834_s4 = inlined_call_operand.vmem [shape: f32[2,16,32], index: 4, kind: output, shape index: {}]  }
   0x1   :  { %s681_s17 = smov 0  }
   0x2 LB: > { %s26_s18 = sadd.s32 1, %s645_s16  ;;  %p519_p0 = scmp.ge.s32.totalorder %s649_s17, 1  ;;  %s649_s17 = sphi %s681_s17, %s14_s17   ;;  %s645_s16 = sphi %s679_s16, %s836_s16   ;;  %s641_s15 = sphi %s677_s15, %s835_s15  }
   0x3   : > { %p28_p1 = scmp.ge.s32.totalorder %s26_s18, 2  ;;  %p192_p2 = scmp.lt.s32.totalorder %s649_s17, 3 }
   0x5   : > { %s838_s18 = smov (%p28_p1, %s26_s18), 0  ;;  %p193_p3 = pnand %p519_p0, %p192_p2 }
   0x6   : > { %p228_p4 = scmp.lt.s32.totalorder (!%p193_p3), %s641_s15, 1 }
   0x7   : > { %196 = sbr.rel (%p193_p3) target bundleno = 316 (0x13c), region = 36 }
   0xc   : > { %v292_v0 = vld [vmem:[%s831_s1 + $0xf8] sm:$0xff]  ;;  %v291_v2 = vld [vmem:[%s831_s1 + $0xf0] sm:$0xff]  ;;  %v290_v4 = vld [vmem:[%s831_s1 + $0xe8] sm:$0xff]  ;;  %s840_s15 = smov (!%p228_p4, %s641_s15), 1  ;;  %vm252_vm0 = vcmask 261120   ;;  %v651_v36 = vmov 0.0  }
   0xd   : > { %v276_v1 = vld [vmem:[%s831_s1 + $0x78] sm:$0xff]  ;;  %530 = vmatprep.subr.mxu0 %v292_v0  ;;  %568 = vmatprep.subr.mxu1 %v292_v0  ;;  %v275_v3 = vld [vmem:[%s831_s1 + $0x70] sm:$0xff]  ;;  %v274_v5 = vld [vmem:[%s831_s1 + $0x68] sm:$0xff]  ;;  %s528_s29 = sshll.u32 %s840_s15, 5  ;;  %253 = vst.msk [vmem:[#allocation2] sm:$0xff] %vm252_vm0, %v651_v36  ;;  %s529_s25 = sshll.u32 %s840_s15, 4 }
   0xe   : > { %531 = vmatpush3.msra.mxu0 %v276_v1  ;;  %584 = vmatpush3.msra.mxu1 %v276_v1  ;;  %v289_v6 = vld [vmem:[%s831_s1 + $0xe0] sm:$0xff]  ;;  %v288_v8 = vld [vmem:[%s831_s1 + $0xd8] sm:$0xff]  ;;  %v287_v10 = vld [vmem:[%s831_s1 + $0xd0] sm:$0xff]  ;;  %s235_s12 = scalar_lea.vmem %s830_s0, %s528_s29  ;;  %254 = vst.msk [vmem:[#allocation2 + $0x8] sm:$0xff] %vm252_vm0, %v651_v36  ;;  %s247_s28 = scalar_lea.vmem %s834_s4, %s529_s25 }
   0xf   : > { %532 = vmatprep.subr.mxu0 %v291_v2  ;;  %569 = vmatprep.subr.mxu1 %v291_v2  ;;  %v273_v7 = vld [vmem:[%s831_s1 + $0x60] sm:$0xff]  ;;  %v272_v9 = vld [vmem:[%s831_s1 + $0x58] sm:$0xff]  ;;  %v271_v11 = vld [vmem:[%s831_s1 + $0x50] sm:$0xff] }
  0x10   : > { %533 = vmatpush3.msra.mxu0 %v275_v3  ;;  %585 = vmatpush3.msra.mxu1 %v275_v3  ;;  %v286_v12 = vld [vmem:[%s831_s1 + $0xc8] sm:$0xff]  ;;  %v285_v14 = vld [vmem:[%s831_s1 + $0xc0] sm:$0xff]  ;;  %v284_v16 = vld [vmem:[%s831_s1 + $0xb8] sm:$0xff] }
  0x11   : > { %534 = vmatprep.subr.mxu0 %v290_v4  ;;  %570 = vmatprep.subr.mxu1 %v290_v4  ;;  %v270_v13 = vld [vmem:[%s831_s1 + $0x48] sm:$0xff]  ;;  %v269_v15 = vld [vmem:[%s831_s1 + $0x40] sm:$0xff]  ;;  %v268_v17 = vld [vmem:[%s831_s1 + $0x38] sm:$0xff] }
  0x12   : > { %535 = vmatpush3.msra.mxu0 %v274_v5  ;;  %586 = vmatpush3.msra.mxu1 %v274_v5  ;;  %v283_v18 = vld [vmem:[%s831_s1 + $0xb0] sm:$0xff]  ;;  %v282_v20 = vld [vmem:[%s831_s1 + $0xa8] sm:$0xff]  ;;  %v281_v22 = vld [vmem:[%s831_s1 + $0xa0] sm:$0xff] }
  0x13   : > { %536 = vmatprep.subr.mxu0 %v289_v6  ;;  %571 = vmatprep.subr.mxu1 %v289_v6  ;;  %v267_v19 = vld [vmem:[%s831_s1 + $0x30] sm:$0xff]  ;;  %v266_v21 = vld [vmem:[%s831_s1 + $0x28] sm:$0xff]  ;;  %v265_v23 = vld [vmem:[%s831_s1 + $0x20] sm:$0xff] }
  0x14   : > { %537 = vmatpush3.msra.mxu0 %v273_v7  ;;  %587 = vmatpush3.msra.mxu1 %v273_v7  ;;  %v280_v24 = vld [vmem:[%s831_s1 + $0x98] sm:$0xff]  ;;  %v279_v26 = vld [vmem:[%s831_s1 + $0x90] sm:$0xff]  ;;  %v278_v28 = vld [vmem:[%s831_s1 + $0x88] sm:$0xff] }
  0x15   : > { %538 = vmatprep.subr.mxu0 %v288_v8  ;;  %572 = vmatprep.subr.mxu1 %v288_v8  ;;  %v264_v25 = vld [vmem:[%s831_s1 + $0x18] sm:$0xff]  ;;  %v263_v27 = vld [vmem:[%s831_s1 + $0x10] sm:$0xff]  ;;  %v262_v29 = vld [vmem:[%s831_s1 + $0x8] sm:$0xff] }
  0x16   : > { %539 = vmatpush3.msra.mxu0 %v272_v9  ;;  %588 = vmatpush3.msra.mxu1 %v272_v9  ;;  %v277_v30 = vld [vmem:[%s831_s1 + $0x80] sm:$0xff]  ;;  %v258_v32 = vld [vmem:[%s235_s12 + $0x8] sm:$0xff]  ;;  %v260_v33 = vld [vmem:[%s235_s12 + $0x18] sm:$0xff] }
  0x17   : > { %540 = vmatprep.subr.mxu0 %v287_v10  ;;  %573 = vmatprep.subr.mxu1 %v287_v10  ;;  %v261_v31 = vld [vmem:[%s831_s1] sm:$0xff]  ;;  %v259_v35 = vld [vmem:[%s235_s12 + $0x10] sm:$0xff]  ;;  %v256_v41 = vld [vmem:[#allocation2 + $0x8] sm:$0xff] }
  0x18   : > { %541 = vmatpush3.msra.mxu0 %v271_v11  ;;  %589 = vmatpush3.msra.mxu1 %v271_v11  ;;  %v257_v34 = vld [vmem:[%s235_s12] sm:$0xff] }
  0x19   : > { %542 = vmatprep.subr.mxu0 %v286_v12  ;;  %574 = vmatprep.subr.mxu1 %v286_v12  ;;  %v255_v39 = vld [vmem:[#allocation2] sm:$0xff] }
  0x1a   : > { %543 = vmatpush3.msra.mxu0 %v270_v13  ;;  %590 = vmatpush3.msra.mxu1 %v270_v13  ;;  %v524_v11 = vld [vmem:[%s832_s2] ss:$0 sm:$0xff] }
  0x1b   : > { %544 = vmatprep.subr.mxu0 %v285_v14  ;;  %575 = vmatprep.subr.mxu1 %v285_v14  ;;  %v525_v14 = vld [vmem:[%s833_s3] ss:$0 sm:$0xff] }
  0x1c   : > { %545 = vmatpush3.msra.mxu0 %v269_v15  ;;  %591 = vmatpush3.msra.mxu1 %v269_v15 }
  0x1d   : > { %546 = vmatprep.subr.mxu0 %v284_v16  ;;  %576 = vmatprep.subr.mxu1 %v284_v16 }
  0x1e   : > { %547 = vmatpush3.msra.mxu0 %v268_v17  ;;  %592 = vmatpush3.msra.mxu1 %v268_v17 }
  0x1f   : > { %548 = vmatprep.subr.mxu0 %v283_v18  ;;  %577 = vmatprep.subr.mxu1 %v283_v18 }
  0x20   : > { %549 = vmatpush3.msra.mxu0 %v267_v19  ;;  %593 = vmatpush3.msra.mxu1 %v267_v19 }
  0x21   : > { %550 = vmatprep.subr.mxu0 %v282_v20  ;;  %578 = vmatprep.subr.mxu1 %v282_v20 }
  0x22   : > { %551 = vmatpush3.msra.mxu0 %v266_v21  ;;  %594 = vmatpush3.msra.mxu1 %v266_v21 }
  0x23   : > { %552 = vmatprep.subr.mxu0 %v281_v22  ;;  %579 = vmatprep.subr.mxu1 %v281_v22 }
  0x24   : > { %553 = vmatpush3.msra.mxu0 %v265_v23  ;;  %595 = vmatpush3.msra.mxu1 %v265_v23 }
  0x25   : > { %554 = vmatprep.subr.mxu0 %v280_v24  ;;  %580 = vmatprep.subr.mxu1 %v280_v24 }
  0x26   : > { %555 = vmatpush3.msra.mxu0 %v264_v25  ;;  %596 = vmatpush3.msra.mxu1 %v264_v25 }
  0x27   : > { %556 = vmatprep.subr.mxu0 %v279_v26  ;;  %581 = vmatprep.subr.mxu1 %v279_v26 }
  0x28   : > { %557 = vmatpush3.msra.mxu0 %v263_v27  ;;  %597 = vmatpush3.msra.mxu1 %v263_v27 }
  0x29   : > { %558 = vmatprep.subr.mxu0 %v278_v28  ;;  %582 = vmatprep.subr.mxu1 %v278_v28 }
  0x2a   : > { %559 = vmatpush3.msra.mxu0 %v262_v29  ;;  %598 = vmatpush3.msra.mxu1 %v262_v29 }
  0x2b   : > { %560 = vmatprep.subr.mxu0 %v277_v30  ;;  %583 = vmatprep.subr.mxu1 %v277_v30 }
  0x2c   : > { %561 = vmatpush3.msra.mxu0 %v261_v31  ;;  %599 = vmatpush3.msra.mxu1 %v261_v31 }
  0x2d   : > { %357 = vmatprep.mubr.f32.mxu0 %v258_v32  ;;  %362 = vmatprep.mubr.f32.mxu1 %v260_v33 }
  0x2e   : > { %358 = vmatmul.mubr.f32.vlgmr.msra.gmra.mxu0 %v257_v34  ;;  %363 = vmatmul.mubr.f32.vlgmr.msra.gmra.mxu1 %v259_v35 }
  0xee   : > { %v562_v37 = vpop.f32.mrf.mxu0  ;;  %v565_v38 = vpop.f32.mrf.mxu1 }
  0xf0   : > { %v563_v40 = vpop.f32.mrf.mxu0  ;;  %v566_v42 = vpop.f32.mrf.mxu1 }
  0xf1   : > { %v564_v43 = vadd.f32 %v563_v40, %v562_v37  ;;  %v567_v44 = vadd.f32 %v566_v42, %v565_v38 }
  0xf3   : > { %v368_v45 = vadd.f32 %v564_v43, %v255_v39  ;;  %v369_v46 = vadd.f32 %v567_v44, %v256_v41 }
  0xf5   : > { %371 = vst.msk [vmem:[#allocation2] sm:$0xff] %vm252_vm0, %v368_v45  ;;  %372 = vst.msk [vmem:[#allocation2 + $0x8] sm:$0xff] %vm252_vm0, %v369_v46 }
  0xfc   : > { %v376_v47 = vld [vmem:[#allocation2] sm:$0xff]  ;;  %v377_v48 = vld [vmem:[#allocation2 + $0x8] sm:$0xff] }
  0xfd   : > { %v378_v49 = vsel %vm252_vm0, %v376_v47, 0.0  ;;  %v379_v50 = vsel %vm252_vm0, %v377_v48, 0.0 }
  0xfe   : > { %v380_v51 = vadd.f32 %v379_v50, %v378_v49 }
 0x100   : > { %v381_v52 = vrot.slane %v380_v51, 4 }
 0x102   : > { %v382_v53 = vadd.f32 %v381_v52, %v380_v51 }
 0x104   : > { %v383_v54 = vrot.slane %v382_v53, 2 }
 0x106   : > { %v384_v55 = vadd.f32 %v383_v54, %v382_v53 }
 0x108   : > { %v385_v56 = vrot.slane %v384_v55, 1 }
 0x10a   : > { %v386_v57 = vadd.f32 %v385_v56, %v384_v55 }
 0x10c   : > { %v388_v58 = vmul.f32 0.0625, %v386_v57 }
 0x10e   : > { %v389_v59 = vsub.f32 %v376_v47, %v388_v58  ;;  %v390_v60 = vsub.f32 %v377_v48, %v388_v58 }
 0x110   : > { %v391_v61 = vmul.f32 %v389_v59, %v389_v59  ;;  %v392_v62 = vmul.f32 %v390_v60, %v390_v60 }
 0x112   : > { %v393_v63 = vsel %vm252_vm0, %v391_v61, 0.0  ;;  %v394_v0 = vsel %vm252_vm0, %v392_v62, 0.0 }
 0x113   : > { %v395_v1 = vadd.f32 %v394_v0, %v393_v63 }
 0x115   : > { %v396_v2 = vrot.slane %v395_v1, 4 }
 0x117   : > { %v397_v3 = vadd.f32 %v396_v2, %v395_v1 }
 0x119   : > { %v398_v4 = vrot.slane %v397_v3, 2 }
 0x11b   : > { %v399_v5 = vadd.f32 %v398_v4, %v397_v3 }
 0x11d   : > { %v400_v6 = vrot.slane %v399_v5, 1 }
 0x11f   : > { %v401_v7 = vadd.f32 %v400_v6, %v399_v5 }
 0x121   : > { %v402_v8 = vmul.f32 0.0625, %v401_v7 }
 0x123   : > { %v403_v9 = vadd.f32 1e-05, %v402_v8 }
 0x125   : > { %625 = vrsqrt.f32 %v403_v9 }
 0x132   : > { %v626_v10 = vpop.eup %625 }
 0x133   : > { %v405_v12 = vmul.f32 %v626_v10, %v389_v59  ;;  %v406_v13 = vmul.f32 %v626_v10, %v390_v60 }
 0x135   : > { %v414_v15 = vmul.f32 %v524_v11, %v405_v12  ;;  %v415_v16 = vmul.f32 %v524_v11, %v406_v13 }
 0x137   : > { %v423_v17 = vadd.f32 %v525_v14, %v414_v15  ;;  %v424_v18 = vadd.f32 %v525_v14, %v415_v16 }
 0x139   : > { %v425_v19 = vmax.f32 %v423_v17, 0.0  ;;  %v426_v20 = vmax.f32 %v424_v18, 0.0 }
 0x13b   : > { %427 = vst.msk [vmem:[%s247_s28] sm:$0xff] %vm252_vm0, %v425_v19  ;;  %428 = vst.msk [vmem:[%s247_s28 + $0x8] sm:$0xff] %vm252_vm0, %v426_v20 }
 0x13c PF: > { %s14_s17 = sadd.s32 1, %s649_s17   ;;  %s835_s15 = smov %s645_s16 }
 0x13d   : > { %p11_p5 = scmp.ge.s32.totalorder %s14_s17, 4   ;;  %s836_s16 = smov %s838_s18 }
 0x13f   :  { %13 = sbr.rel (!%p11_p5) target bundleno = 2 (0x2), region = 77 }

// kernel: generator2_forward.13
= control target key start
LH: loop header
LB: loop body
LE: loop exit
PB: predicated region body
PF: predicated region fallthrough
CT: control target
= control target key end

     0   :  { %s790_s15 = smov 0   ;;  %s792_s16 = smov 0   ;;  %s993_s0 = inlined_call_operand.vmem [shape: f32[2,16,384], index: 0, kind: input, shape index: {}]   ;;  %s994_s1 = inlined_call_operand.vmem [shape: f32[384,32], index: 1, kind: input, shape index: {}]   ;;  %s995_s2 = inlined_call_operand.vmem [shape: f32[1,32], index: 2, kind: input, shape index: {}]   ;;  %s996_s3 = inlined_call_operand.vmem [shape: f32[1,32], index: 3, kind: input, shape index: {}]   ;;  %s997_s4 = inlined_call_operand.vmem [shape: f32[2,16,32], index: 4, kind: output, shape index: {}]  }
   0x1   :  { %s794_s17 = smov 0  }
   0x2 LB: > { %s26_s18 = sadd.s32 1, %s758_s16  ;;  %p612_p0 = scmp.ge.s32.totalorder %s762_s17, 1  ;;  %s762_s17 = sphi %s794_s17, %s14_s17   ;;  %s758_s16 = sphi %s792_s16, %s999_s16   ;;  %s754_s15 = sphi %s790_s15, %s998_s15  }
   0x3   : > { %p28_p1 = scmp.ge.s32.totalorder %s26_s18, 2  ;;  %p192_p2 = scmp.lt.s32.totalorder %s762_s17, 3 }
   0x5   : > { %s1001_s18 = smov (%p28_p1, %s26_s18), 0  ;;  %p193_p3 = pnand %p612_p0, %p192_p2 }
   0x6   : > { %p228_p4 = scmp.lt.s32.totalorder (!%p193_p3), %s754_s15, 1 }
   0x7   : > { %196 = sbr.rel (%p193_p3) target bundleno = 321 (0x141), region = 36 }
   0xc   : > { %v294_v0 = vld [vmem:[%s994_s1 + $0xf8] sm:$0xff]  ;;  %v293_v2 = vld [vmem:[%s994_s1 + $0xf0] sm:$0xff]  ;;  %v292_v5 = vld [vmem:[%s994_s1 + $0xe8] sm:$0xff]  ;;  %s1003_s15 = smov (!%p228_p4, %s754_s15), 1  ;;  %vm252_vm0 = vcmask 261120   ;;  %v764_v54 = vmov 0.0  }
   0xd   : > { %v278_v1 = vld [vmem:[%s994_s1 + $0x78] sm:$0xff]  ;;  %621 = vmatprep.subr.mxu0 %v294_v0  ;;  %v277_v4 = vld [vmem:[%s994_s1 + $0x70] sm:$0xff]  ;;  %v276_v7 = vld [vmem:[%s994_s1 + $0x68] sm:$0xff]  ;;  %s712_s25 = smul.u32 48, %s1003_s15  ;;  %253 = vst.msk [vmem:[#allocation2] sm:$0xff] %vm252_vm0, %v764_v54  ;;  %s620_s9 = sshll.u32 %s1003_s15, 4 }
   0xe   : > { %v310_v3 = vld [vmem:[%s994_s1 + $0x178] sm:$0xff]  ;;  %622 = vmatpush3.msra.mxu0 %v278_v1  ;;  %v309_v6 = vld [vmem:[%s994_s1 + $0x170] sm:$0xff]  ;;  %v308_v8 = vld [vmem:[%s994_s1 + $0x168] sm:$0xff]  ;;  %254 = vst.msk [vmem:[#allocation2 + $0x8] sm:$0xff] %vm252_vm0, %v764_v54  ;;  %s247_s12 = scalar_lea.vmem %s997_s4, %s620_s9 }
   0xf   : > { %677 = vmatprep.subr.mxu1 %v310_v3  ;;  %623 = vmatprep.subr.mxu0 %v293_v2  ;;  %v291_v9 = vld [vmem:[%s994_s1 + $0xe0] sm:$0xff]  ;;  %v290_v12 = vld [vmem:[%s994_s1 + $0xd8] sm:$0xff]  ;;  %v289_v15 = vld [vmem:[%s994_s1 + $0xd0] sm:$0xff]  ;;  %s235_s14 = scalar_lea.vmem %s993_s0, %s712_s25 }
  0x10   : > { %678 = vmatpush3.msra.mxu1 %v310_v3  ;;  %624 = vmatpush3.msra.mxu0 %v277_v4  ;;  %v275_v10 = vld [vmem:[%s994_s1 + $0x60] sm:$0xff]  ;;  %v274_v13 = vld [vmem:[%s994_s1 + $0x58] sm:$0xff]  ;;  %v273_v16 = vld [vmem:[%s994_s1 + $0x50] sm:$0xff] }
  0x11   : > { %679 = vmatprep.subr.mxu1 %v309_v6  ;;  %625 = vmatprep.subr.mxu0 %v292_v5  ;;  %v307_v11 = vld [vmem:[%s994_s1 + $0x160] sm:$0xff]  ;;  %v306_v14 = vld [vmem:[%s994_s1 + $0x158] sm:$0xff]  ;;  %v305_v17 = vld [vmem:[%s994_s1 + $0x150] sm:$0xff] }
  0x12   : > { %680 = vmatpush3.msra.mxu1 %v309_v6  ;;  %626 = vmatpush3.msra.mxu0 %v276_v7  ;;  %v288_v18 = vld [vmem:[%s994_s1 + $0xc8] sm:$0xff]  ;;  %v287_v21 = vld [vmem:[%s994_s1 + $0xc0] sm:$0xff]  ;;  %v286_v24 = vld [vmem:[%s994_s1 + $0xb8] sm:$0xff] }
  0x13   : > { %681 = vmatprep.subr.mxu1 %v308_v8  ;;  %627 = vmatprep.subr.mxu0 %v291_v9  ;;  %v272_v19 = vld [vmem:[%s994_s1 + $0x48] sm:$0xff]  ;;  %v271_v22 = vld [vmem:[%s994_s1 + $0x40] sm:$0xff]  ;;  %v270_v25 = vld [vmem:[%s994_s1 + $0x38] sm:$0xff] }
  0x14   : > { %682 = vmatpush3.msra.mxu1 %v308_v8  ;;  %628 = vmatpush3.msra.mxu0 %v275_v10  ;;  %v304_v20 = vld [vmem:[%s994_s1 + $0x148] sm:$0xff]  ;;  %v303_v23 = vld [vmem:[%s994_s1 + $0x140] sm:$0xff]  ;;  %v302_v26 = vld [vmem:[%s994_s1 + $0x138] sm:$0xff] }
  0x15   : > { %683 = vmatprep.subr.mxu1 %v307_v11  ;;  %629 = vmatprep.subr.mxu0 %v290_v12  ;;  %v285_v27 = vld [vmem:[%s994_s1 + $0xb0] sm:$0xff]  ;;  %v284_v30 = vld [vmem:[%s994_s1 + $0xa8] sm:$0xff]  ;;  %v283_v33 = vld [vmem:[%s994_s1 + $0xa0] sm:$0xff] }
  0x16   : > { %684 = vmatpush3.msra.mxu1 %v307_v11  ;;  %630 = vmatpush3.msra.mxu0 %v274_v13  ;;  %v269_v28 = vld [vmem:[%s994_s1 + $0x30] sm:$0xff]  ;;  %v268_v31 = vld [vmem:[%s994_s1 + $0x28] sm:$0xff]  ;;  %v267_v34 = vld [vmem:[%s994_s1 + $0x20] sm:$0xff] }
  0x17   : > { %685 = vmatprep.subr.mxu1 %v306_v14  ;;  %631 = vmatprep.subr.mxu0 %v289_v15  ;;  %v301_v29 = vld [vmem:[%s994_s1 + $0x130] sm:$0xff]  ;;  %v300_v32 = vld [vmem:[%s994_s1 + $0x128] sm:$0xff]  ;;  %v299_v35 = vld [vmem:[%s994_s1 + $0x120] sm:$0xff] }
  0x18   : > { %686 = vmatpush3.msra.mxu1 %v306_v14  ;;  %632 = vmatpush3.msra.mxu0 %v273_v16  ;;  %v282_v36 = vld [vmem:[%s994_s1 + $0x98] sm:$0xff]  ;;  %v281_v39 = vld [vmem:[%s994_s1 + $0x90] sm:$0xff]  ;;  %v280_v42 = vld [vmem:[%s994_s1 + $0x88] sm:$0xff] }
  0x19   : > { %687 = vmatprep.subr.mxu1 %v305_v17  ;;  %633 = vmatprep.subr.mxu0 %v288_v18  ;;  %v266_v37 = vld [vmem:[%s994_s1 + $0x18] sm:$0xff]  ;;  %v265_v40 = vld [vmem:[%s994_s1 + $0x10] sm:$0xff]  ;;  %v264_v43 = vld [vmem:[%s994_s1 + $0x8] sm:$0xff] }
  0x1a   : > { %688 = vmatpush3.msra.mxu1 %v305_v17  ;;  %634 = vmatpush3.msra.mxu0 %v272_v19  ;;  %v298_v38 = vld [vmem:[%s994_s1 + $0x118] sm:$0xff]  ;;  %v297_v41 = vld [vmem:[%s994_s1 + $0x110] sm:$0xff]  ;;  %v296_v44 = vld [vmem:[%s994_s1 + $0x108] sm:$0xff] }
  0x1b   : > { %689 = vmatprep.subr.mxu1 %v304_v20  ;;  %635 = vmatprep.subr.mxu0 %v287_v21  ;;  %v279_v45 = vld [vmem:[%s994_s1 + $0x80] sm:$0xff]  ;;  %v258_v46 = vld [vmem:[%s235_s14 + $0x8] sm:$0xff]  ;;  %v259_v50 = vld [vmem:[%s235_s14 + $0x10] sm:$0xff] }
  0x1c   : > { %690 = vmatpush3.msra.mxu1 %v304_v20  ;;  %636 = vmatpush3.msra.mxu0 %v271_v22  ;;  %v263_v47 = vld [vmem:[%s994_s1] sm:$0xff]  ;;  %v262_v51 = vld [vmem:[%s235_s14 + $0x28] sm:$0xff]  ;;  %v260_v53 = vld [vmem:[%s235_s14 + $0x18] sm:$0xff] }
  0x1d   : > { %691 = vmatprep.subr.mxu1 %v303_v23  ;;  %637 = vmatprep.subr.mxu0 %v286_v24  ;;  %v257_v48 = vld [vmem:[%s235_s14] sm:$0xff]  ;;  %v256_v2 = vld [vmem:[#allocation2 + $0x8] sm:$0xff] }
  0x1e   : > { %692 = vmatpush3.msra.mxu1 %v303_v23  ;;  %638 = vmatpush3.msra.mxu0 %v270_v25  ;;  %v295_v49 = vld [vmem:[%s994_s1 + $0x100] sm:$0xff] }
  0x1f   : > { %693 = vmatprep.subr.mxu1 %v302_v26  ;;  %639 = vmatprep.subr.mxu0 %v285_v27  ;;  %v261_v52 = vld [vmem:[%s235_s14 + $0x20] sm:$0xff] }
  0x20   : > { %694 = vmatpush3.msra.mxu1 %v302_v26  ;;  %640 = vmatpush3.msra.mxu0 %v269_v28  ;;  %v255_v60 = vld [vmem:[#allocation2] sm:$0xff] }
  0x21   : > { %695 = vmatprep.subr.mxu1 %v301_v29  ;;  %641 = vmatprep.subr.mxu0 %v284_v30 }
  0x22   : > { %696 = vmatpush3.msra.mxu1 %v301_v29  ;;  %642 = vmatpush3.msra.mxu0 %v268_v31 }
  0x23   : > { %697 = vmatprep.subr.mxu1 %v300_v32  ;;  %643 = vmatprep.subr.mxu0 %v283_v33  ;;  %v616_v33 = vld [vmem:[%s995_s2] ss:$0 sm:$0xff] }
  0x24   : > { %698 = vmatpush3.msra.mxu1 %v300_v32  ;;  %644 = vmatpush3.msra.mxu0 %v267_v34 }
  0x25   : > { %699 = vmatprep.subr.mxu1 %v299_v35  ;;  %645 = vmatprep.subr.mxu0 %v282_v36  ;;  %v617_v36 = vld [vmem:[%s996_s3] ss:$0 sm:$0xff] }
  0x26   : > { %700 = vmatpush3.msra.mxu1 %v299_v35  ;;  %646 = vmatpush3.msra.mxu0 %v266_v37 }
  0x27   : > { %701 = vmatprep.subr.mxu1 %v298_v38  ;;  %647 = vmatprep.subr.mxu0 %v281_v39 }
  0x28   : > { %702 = vmatpush3.msra.mxu1 %v298_v38  ;;  %648 = vmatpush3.msra.mxu0 %v265_v40 }
  0x29   : > { %703 = vmatprep.subr.mxu1 %v297_v41  ;;  %649 = vmatprep.subr.mxu0 %v280_v42 }
  0x2a   : > { %704 = vmatpush3.msra.mxu1 %v297_v41  ;;  %650 = vmatpush3.msra.mxu0 %v264_v43 }
  0x2b   : > { %705 = vmatprep.subr.mxu1 %v296_v44  ;;  %651 = vmatprep.subr.mxu0 %v279_v45 }
  0x2c   : > { %375 = vmatprep.mubr.f32.mxu0 %v258_v46  ;;  %652 = vmatpush3.msra.mxu0 %v263_v47 }
  0x2d   : > { %706 = vmatpush3.msra.mxu1 %v296_v44  ;;  %376 = vmatmul.mubr.f32.vlgmr.msra.gmra.mxu0 %v257_v48 }
  0x2e   : > { %707 = vmatprep.subr.mxu1 %v295_v49  ;;  %709 = vmatprep.mubr.f32.mxu1 %v259_v50 }
  0x2f   : > { %708 = vmatpush3.msra.mxu1 %v295_v49  ;;  %380 = vmatprep.mubr.f32.mxu0 %v261_v52 }
  0x30   : > { %710 = vmatmul.mubr.f32.vlgmr.msra.gmra.mxu1 %v262_v51 }
  0x31   : > { %381 = vmatmul.mubr.f32.gmra.mxu0 %v260_v53 }
  0xed   : > { %v653_v55 = vpop.f32.mrf.mxu0 }
  0xef   : > { %v654_v56 = vpop.f32.mrf.mxu0 }
  0xf0   : > { %v711_v57 = vpop.f32.mrf.mxu1  ;;  %v655_v58 = vadd.f32 %v654_v56, %v653_v55 }
  0xf1   : > { %v656_v59 = vpop.f32.mrf.mxu0 }
  0xf2   : > { %v452_v61 = vpop.f32.mrf.mxu1 }
  0xf3   : > { %v453_v62 = vadd.f32 %v655_v58, %v452_v61  ;;  %v657_v63 = vpop.f32.mrf.mxu0 }
  0xf4   : > { %v658_v1 = vadd.f32 %v657_v63, %v656_v59 }
  0xf5   : > { %v461_v0 = vadd.f32 %v453_v62, %v255_v60 }
  0xf6   : > { %v458_v3 = vadd.f32 %v711_v57, %v658_v1 }
  0xf7   : > { %464 = vst.msk [vmem:[#allocation2] sm:$0xff] %vm252_vm0, %v461_v0 }
  0xf8   : > { %v462_v4 = vadd.f32 %v458_v3, %v256_v2 }
  0xfa   : > { %465 = vst.msk [vmem:[#allocation2 + $0x8] sm:$0xff] %vm252_vm0, %v462_v4 }
  0xfe   : > { %v469_v5 = vld [vmem:[#allocation2] sm:$0xff] }
  0xff   : > { %v471_v7 = vsel %vm252_vm0, %v469_v5, 0.0 }
 0x101   : > { %v470_v6 = vld [vmem:[#allocation2 + $0x8] sm:$0xff] }
 0x102   : > { %v472_v8 = vsel %vm252_vm0, %v470_v6, 0.0 }
 0x103   : > { %v473_v9 = vadd.f32 %v472_v8, %v471_v7 }
 0x105   : > { %v474_v10 = vrot.slane %v473_v9, 4 }
 0x107   : > { %v475_v11 = vadd.f32 %v474_v10, %v473_v9 }
 0x109   : > { %v476_v12 = vrot.slane %v475_v11, 2 }
 0x10b   : > { %v477_v13 = vadd.f32 %v476_v12, %v475_v11 }
 0x10d   : > { %v478_v14 = vrot.slane %v477_v13, 1 }
 0x10f   : > { %v479_v15 = vadd.f32 %v478_v14, %v477_v13 }
 0x111   : > { %v481_v16 = vmul.f32 0.0625, %v479_v15 }
 0x113   : > { %v482_v17 = vsub.f32 %v469_v5, %v481_v16  ;;  %v483_v18 = vsub.f32 %v470_v6, %v481_v16 }
 0x115   : > { %v484_v19 = vmul.f32 %v482_v17, %v482_v17  ;;  %v485_v20 = vmul.f32 %v483_v18, %v483_v18 }
 0x117   : > { %v486_v21 = vsel %vm252_vm0, %v484_v19, 0.0  ;;  %v487_v22 = vsel %vm252_vm0, %v485_v20, 0.0 }
 0x118   : > { %v488_v23 = vadd.f32 %v487_v22, %v486_v21 }
 0x11a   : > { %v489_v24 = vrot.slane %v488_v23, 4 }
 0x11c   : > { %v490_v25 = vadd.f32 %v489_v24, %v488_v23 }
 0x11e   : > { %v491_v26 = vrot.slane %v490_v25, 2 }
 0x120   : > { %v492_v27 = vadd.f32 %v491_v26, %v490_v25 }
 0x122   : > { %v493_v28 = vrot.slane %v492_v27, 1 }
 0x124   : > { %v494_v29 = vadd.f32 %v493_v28, %v492_v27 }
 0x126   : > { %v495_v30 = vmul.f32 0.0625, %v494_v29 }
 0x128   : > { %v496_v31 = vadd.f32 1e-05, %v495_v30 }
 0x12a   : > { %738 = vrsqrt.f32 %v496_v31 }
 0x137   : > { %v739_v32 = vpop.eup %738 }
 0x138   : > { %v498_v34 = vmul.f32 %v739_v32, %v482_v17  ;;  %v499_v35 = vmul.f32 %v739_v32, %v483_v18 }
 0x13a   : > { %v507_v37 = vmul.f32 %v616_v33, %v498_v34  ;;  %v508_v38 = vmul.f32 %v616_v33, %v499_v35 }
 0x13c   : > { %v516_v39 = vadd.f32 %v617_v36, %v507_v37  ;;  %v517_v40 = vadd.f32 %v617_v36, %v508_v38 }
 0x13e   : > { %v518_v41 = vmax.f32 %v516_v39, 0.0  ;;  %v519_v42 = vmax.f32 %v517_v40, 0.0 }
 0x140   : > { %520 = vst.msk [vmem:[%s247_s12] sm:$0xff] %vm252_vm0, %v518_v41  ;;  %521 = vst.msk [vmem:[%s247_s12 + $0x8] sm:$0xff] %vm252_vm0, %v519_v42 }
 0x141 PF: > { %s14_s17 = sadd.s32 1, %s762_s17   ;;  %s998_s15 = smov %s758_s16 }
 0x142   : > { %p11_p5 = scmp.ge.s32.totalorder %s14_s17, 4   ;;  %s999_s16 = smov %s1001_s18 }
 0x144   :  { %13 = sbr.rel (!%p11_p5) target bundleno = 2 (0x2), region = 77 }

// kernel: generator2_forward.14
= control target key start
LH: loop header
LB: loop body
LE: loop exit
PB: predicated region body
PF: predicated region fallthrough
CT: control target
= control target key end

     0   :  { %s859_s18 = smov 0   ;;  %s861_s19 = smov 0   ;;  %s1065_s0 = inlined_call_operand.vmem [shape: f32[2,16,384], index: 0, kind: input, shape index: {}]   ;;  %s1066_s1 = inlined_call_operand.vmem [shape: f32[384,32], index: 1, kind: input, shape index: {}]   ;;  %s1067_s2 = inlined_call_operand.vmem [shape: f32[1,32], index: 2, kind: input, shape index: {}]   ;;  %s1068_s3 = inlined_call_operand.vmem [shape: f32[1,32], index: 3, kind: input, shape index: {}]   ;;  %s1069_s4 = inlined_call_operand.vmem [shape: f32[2,16,32], index: 4, kind: input, shape index: {}]   ;;  %s1070_s5 = inlined_call_operand.vmem [shape: f32[2,16,32], index: 5, kind: output, shape index: {}]  }
   0x1   :  { %s863_s20 = smov 0  }
   0x2 LB: > { %s27_s21 = sadd.s32 1, %s822_s19  ;;  %p673_p0 = scmp.ge.s32.totalorder %s826_s20, 1  ;;  %s826_s20 = sphi %s863_s20, %s15_s20   ;;  %s822_s19 = sphi %s861_s19, %s1072_s19   ;;  %s818_s18 = sphi %s859_s18, %s1071_s18  }
   0x3   : > { %p29_p1 = scmp.ge.s32.totalorder %s27_s21, 2  ;;  %p227_p2 = scmp.lt.s32.totalorder %s826_s20, 3 }
   0x5   : > { %s1074_s21 = smov (%p29_p1, %s27_s21), 0  ;;  %p228_p3 = pnand %p673_p0, %p227_p2 }
   0x6   : > { %p270_p4 = scmp.lt.s32.totalorder (!%p228_p3), %s818_s18, 1 }
   0x7   : > { %231 = sbr.rel (%p228_p3) target bundleno = 321 (0x141), region = 40 }
   0xc   : > { %v341_v0 = vld [vmem:[%s1066_s1 + $0xf8] sm:$0xff]  ;;  %v340_v2 = vld [vmem:[%s1066_s1 + $0xf0] sm:$0xff]  ;;  %v339_v5 = vld [vmem:[%s1066_s1 + $0xe8] sm:$0xff]  ;;  %s1076_s18 = smov (!%p270_p4, %s818_s18), 1  ;;  %vm299_vm0 = vcmask 261120   ;;  %v828_v54 = vmov 0.0  }
   0xd   : > { %v325_v1 = vld [vmem:[%s1066_s1 + $0x78] sm:$0xff]  ;;  %685 = vmatprep.subr.mxu0 %v341_v0  ;;  %v324_v4 = vld [vmem:[%s1066_s1 + $0x70] sm:$0xff]  ;;  %v323_v7 = vld [vmem:[%s1066_s1 + $0x68] sm:$0xff]  ;;  %s776_s6 = smul.u32 48, %s1076_s18  ;;  %300 = vst.msk [vmem:[#allocation2] sm:$0xff] %vm299_vm0, %v828_v54  ;;  %s683_s13 = sshll.u32 %s1076_s18, 4 }
   0xe   : > { %v357_v3 = vld [vmem:[%s1066_s1 + $0x178] sm:$0xff]  ;;  %686 = vmatpush3.msra.mxu0 %v325_v1  ;;  %v356_v6 = vld [vmem:[%s1066_s1 + $0x170] sm:$0xff]  ;;  %v355_v8 = vld [vmem:[%s1066_s1 + $0x168] sm:$0xff]  ;;  %301 = vst.msk [vmem:[#allocation2 + $0x8] sm:$0xff] %vm299_vm0, %v828_v54  ;;  %s289_s22 = scalar_lea.vmem %s1069_s4, %s683_s13  ;;  %s294_s26 = scalar_lea.vmem %s1070_s5, %s683_s13 }
   0xf   : > { %741 = vmatprep.subr.mxu1 %v357_v3  ;;  %687 = vmatprep.subr.mxu0 %v340_v2  ;;  %v338_v9 = vld [vmem:[%s1066_s1 + $0xe0] sm:$0xff]  ;;  %v337_v12 = vld [vmem:[%s1066_s1 + $0xd8] sm:$0xff]  ;;  %v336_v15 = vld [vmem:[%s1066_s1 + $0xd0] sm:$0xff]  ;;  %s277_s25 = scalar_lea.vmem %s1065_s0, %s776_s6 }
  0x10   : > { %742 = vmatpush3.msra.mxu1 %v357_v3  ;;  %688 = vmatpush3.msra.mxu0 %v324_v4  ;;  %v322_v10 = vld [vmem:[%s1066_s1 + $0x60] sm:$0xff]  ;;  %v321_v13 = vld [vmem:[%s1066_s1 + $0x58] sm:$0xff]  ;;  %v320_v16 = vld [vmem:[%s1066_s1 + $0x50] sm:$0xff] }
  0x11   : > { %743 = vmatprep.subr.mxu1 %v356_v6  ;;  %689 = vmatprep.subr.mxu0 %v339_v5  ;;  %v354_v11 = vld [vmem:[%s1066_s1 + $0x160] sm:$0xff]  ;;  %v353_v14 = vld [vmem:[%s1066_s1 + $0x158] sm:$0xff]  ;;  %v352_v17 = vld [vmem:[%s1066_s1 + $0x150] sm:$0xff] }
  0x12   : > { %744 = vmatpush3.msra.mxu1 %v356_v6  ;;  %690 = vmatpush3.msra.mxu0 %v323_v7  ;;  %v335_v18 = vld [vmem:[%s1066_s1 + $0xc8] sm:$0xff]  ;;  %v334_v21 = vld [vmem:[%s1066_s1 + $0xc0] sm:$0xff]  ;;  %v333_v24 = vld [vmem:[%s1066_s1 + $0xb8] sm:$0xff] }
  0x13   : > { %745 = vmatprep.subr.mxu1 %v355_v8  ;;  %691 = vmatprep.subr.mxu0 %v338_v9  ;;  %v319_v19 = vld [vmem:[%s1066_s1 + $0x48] sm:$0xff]  ;;  %v318_v22 = vld [vmem:[%s1066_s1 + $0x40] sm:$0xff]  ;;  %v317_v25 = vld [vmem:[%s1066_s1 + $0x38] sm:$0xff] }
  0x14   : > { %746 = vmatpush3.msra.mxu1 %v355_v8  ;;  %692 = vmatpush3.msra.mxu0 %v322_v10  ;;  %v351_v20 = vld [vmem:[%s1066_s1 + $0x148] sm:$0xff]  ;;  %v350_v23 = vld [vmem:[%s1066_s1 + $0x140] sm:$0xff]  ;;  %v349_v26 = vld [vmem:[%s1066_s1 + $0x138] sm:$0xff] }
  0x15   : > { %747 = vmatprep.subr.mxu1 %v354_v11  ;;  %693 = vmatprep.subr.mxu0 %v337_v12  ;;  %v332_v27 = vld [vmem:[%s1066_s1 + $0xb0] sm:$0xff]  ;;  %v331_v30 = vld [vmem:[%s1066_s1 + $0xa8] sm:$0xff]  ;;  %v330_v33 = vld [vmem:[%s1066_s1 + $0xa0] sm:$0xff] }
  0x16   : > { %748 = vmatpush3.msra.mxu1 %v354_v11  ;;  %694 = vmatpush3.msra.mxu0 %v321_v13  ;;  %v316_v28 = vld [vmem:[%s1066_s1 + $0x30] sm:$0xff]  ;;  %v315_v31 = vld [vmem:[%s1066_s1 + $0x28] sm:$0xff]  ;;  %v314_v34 = vld [vmem:[%s1066_s1 + $0x20] sm:$0xff] }
  0x17   : > { %749 = vmatprep.subr.mxu1 %v353_v14  ;;  %695 = vmatprep.subr.mxu0 %v336_v15  ;;  %v348_v29 = vld [vmem:[%s1066_s1 + $0x130] sm:$0xff]  ;;  %v347_v32 = vld [vmem:[%s1066_s1 + $0x128] sm:$0xff]  ;;  %v346_v35 = vld [vmem:[%s1066_s1 + $0x120] sm:$0xff] }
  0x18   : > { %750 = vmatpush3.msra.mxu1 %v353_v14  ;;  %696 = vmatpush3.msra.mxu0 %v320_v16  ;;  %v329_v36 = vld [vmem:[%s1066_s1 + $0x98] sm:$0xff]  ;;  %v328_v39 = vld [vmem:[%s1066_s1 + $0x90] sm:$0xff]  ;;  %v327_v42 = vld [vmem:[%s1066_s1 + $0x88] sm:$0xff] }
  0x19   : > { %751 = vmatprep.subr.mxu1 %v352_v17  ;;  %697 = vmatprep.subr.mxu0 %v335_v18  ;;  %v313_v37 = vld [vmem:[%s1066_s1 + $0x18] sm:$0xff]  ;;  %v312_v40 = vld [vmem:[%s1066_s1 + $0x10] sm:$0xff]  ;;  %v311_v43 = vld [vmem:[%s1066_s1 + $0x8] sm:$0xff] }
  0x1a   : > { %752 = vmatpush3.msra.mxu1 %v352_v17  ;;  %698 = vmatpush3.msra.mxu0 %v319_v19  ;;  %v345_v38 = vld [vmem:[%s1066_s1 + $0x118] sm:$0xff]  ;;  %v344_v41 = vld [vmem:[%s1066_s1 + $0x110] sm:$0xff]  ;;  %v343_v44 = vld [vmem:[%s1066_s1 + $0x108] sm:$0xff] }
  0x1b   : > { %753 = vmatprep.subr.mxu1 %v351_v20  ;;  %699 = vmatprep.subr.mxu0 %v334_v21  ;;  %v326_v45 = vld [vmem:[%s1066_s1 + $0x80] sm:$0xff]  ;;  %v305_v46 = vld [vmem:[%s277_s25 + $0x8] sm:$0xff]  ;;  %v306_v50 = vld [vmem:[%s277_s25 + $0x10] sm:$0xff] }
  0x1c   : > { %754 = vmatpush3.msra.mxu1 %v351_v20  ;;  %700 = vmatpush3.msra.mxu0 %v318_v22  ;;  %v310_v47 = vld [vmem:[%s1066_s1] sm:$0xff]  ;;  %v309_v51 = vld [vmem:[%s277_s25 + $0x28] sm:$0xff]  ;;  %v307_v53 = vld [vmem:[%s277_s25 + $0x18] sm:$0xff] }
  0x1d   : > { %755 = vmatprep.subr.mxu1 %v350_v23  ;;  %701 = vmatprep.subr.mxu0 %v333_v24  ;;  %v304_v48 = vld [vmem:[%s277_s25] sm:$0xff]  ;;  %v303_v2 = vld [vmem:[#allocation2 + $0x8] sm:$0xff] }
  0x1e   : > { %756 = vmatpush3.msra.mxu1 %v350_v23  ;;  %702 = vmatpush3.msra.mxu0 %v317_v25  ;;  %v342_v49 = vld [vmem:[%s1066_s1 + $0x100] sm:$0xff] }
  0x1f   : > { %757 = vmatprep.subr.mxu1 %v349_v26  ;;  %703 = vmatprep.subr.mxu0 %v332_v27  ;;  %v308_v52 = vld [vmem:[%s277_s25 + $0x20] sm:$0xff] }
  0x20   : > { %758 = vmatpush3.msra.mxu1 %v349_v26  ;;  %704 = vmatpush3.msra.mxu0 %v316_v28  ;;  %v302_v60 = vld [vmem:[#allocation2] sm:$0xff] }
  0x21   : > { %759 = vmatprep.subr.mxu1 %v348_v29  ;;  %705 = vmatprep.subr.mxu0 %v331_v30 }
  0x22   : > { %760 = vmatpush3.msra.mxu1 %v348_v29  ;;  %706 = vmatpush3.msra.mxu0 %v315_v31 }
  0x23   : > { %761 = vmatprep.subr.mxu1 %v347_v32  ;;  %707 = vmatprep.subr.mxu0 %v330_v33  ;;  %v679_v33 = vld [vmem:[%s1067_s2] ss:$0 sm:$0xff] }
  0x24   : > { %762 = vmatpush3.msra.mxu1 %v347_v32  ;;  %708 = vmatpush3.msra.mxu0 %v314_v34 }
  0x25   : > { %763 = vmatprep.subr.mxu1 %v346_v35  ;;  %709 = vmatprep.subr.mxu0 %v329_v36  ;;  %v680_v36 = vld [vmem:[%s1068_s3] ss:$0 sm:$0xff] }
  0x26   : > { %764 = vmatpush3.msra.mxu1 %v346_v35  ;;  %710 = vmatpush3.msra.mxu0 %v313_v37 }
  0x27   : > { %765 = vmatprep.subr.mxu1 %v345_v38  ;;  %711 = vmatprep.subr.mxu0 %v328_v39  ;;  %v565_v39 = vld [vmem:[%s289_s22] sm:$0xff] }
  0x28   : > { %766 = vmatpush3.msra.mxu1 %v345_v38  ;;  %712 = vmatpush3.msra.mxu0 %v312_v40  ;;  %v566_v40 = vld [vmem:[%s289_s22 + $0x8] sm:$0xff] }
  0x29   : > { %767 = vmatprep.subr.mxu1 %v344_v41  ;;  %713 = vmatprep.subr.mxu0 %v327_v42 }
  0x2a   : > { %768 = vmatpush3.msra.mxu1 %v344_v41  ;;  %714 = vmatpush3.msra.mxu0 %v311_v43 }
  0x2b   : > { %769 = vmatprep.subr.mxu1 %v343_v44  ;;  %715 = vmatprep.subr.mxu0 %v326_v45 }
  0x2c   : > { %422 = vmatprep.mubr.f32.mxu0 %v305_v46  ;;  %716 = vmatpush3.msra.mxu0 %v310_v47 }
  0x2d   : > { %770 = vmatpush3.msra.mxu1 %v343_v44  ;;  %423 = vmatmul.mubr.f32.vlgmr.msra.gmra.mxu0 %v304_v48 }
  0x2e   : > { %771 = vmatprep.subr.mxu1 %v342_v49  ;;  %773 = vmatprep.mubr.f32.mxu1 %v306_v50 }
  0x2f   : > { %772 = vmatpush3.msra.mxu1 %v342_v49  ;;  %427 = vmatprep.mubr.f32.mxu0 %v308_v52 }
  0x30   : > { %774 = vmatmul.mubr.f32.vlgmr.msra.gmra.mxu1 %v309_v51 }
  0x31   : > { %428 = vmatmul.mubr.f32.gmra.mxu0 %v307_v53 }
  0xed   : > { %v717_v55 = vpop.f32.mrf.mxu0 }
  0xef   : > { %v718_v56 = vpop.f32.mrf.mxu0 }
  0xf0   : > { %v775_v57 = vpop.f32.mrf.mxu1  ;;  %v719_v58 = vadd.f32 %v718_v56, %v717_v55 }
  0xf1   : > { %v720_v59 = vpop.f32.mrf.mxu0 }
  0xf2   : > { %v499_v61 = vpop.f32.mrf.mxu1 }
  0xf3   : > { %v500_v62 = vadd.f32 %v719_v58, %v499_v61  ;;  %v721_v63 = vpop.f32.mrf.mxu0 }
  0xf4   : > { %v722_v1 = vadd.f32 %v721_v63, %v720_v59 }
  0xf5   : > { %v508_v0 = vadd.f32 %v500_v62, %v302_v60 }
  0xf6   : > { %v505_v3 = vadd.f32 %v775_v57, %v722_v1 }
  0xf7   : > { %511 = vst.msk [vmem:[#allocation2] sm:$0xff] %vm299_vm0, %v508_v0 }
  0xf8   : > { %v509_v4 = vadd.f32 %v505_v3, %v303_v2 }
  0xfa   : > { %512 = vst.msk [vmem:[#allocation2 + $0x8] sm:$0xff] %vm299_vm0, %v509_v4 }
  0xfe   : > { %v516_v5 = vld [vmem:[#allocation2] sm:$0xff] }
  0xff   : > { %v518_v7 = vsel %vm299_vm0, %v516_v5, 0.0 }
 0x101   : > { %v517_v6 = vld [vmem:[#allocation2 + $0x8] sm:$0xff] }
 0x102   : > { %v519_v8 = vsel %vm299_vm0, %v517_v6, 0.0 }
 0x103   : > { %v520_v9 = vadd.f32 %v519_v8, %v518_v7 }
 0x105   : > { %v521_v10 = vrot.slane %v520_v9, 4 }
 0x107   : > { %v522_v11 = vadd.f32 %v521_v10, %v520_v9 }
 0x109   : > { %v523_v12 = vrot.slane %v522_v11, 2 }
 0x10b   : > { %v524_v13 = vadd.f32 %v523_v12, %v522_v11 }
 0x10d   : > { %v525_v14 = vrot.slane %v524_v13, 1 }
 0x10f   : > { %v526_v15 = vadd.f32 %v525_v14, %v524_v13 }
 0x111   : > { %v528_v16 = vmul.f32 0.0625, %v526_v15 }
 0x113   : > { %v529_v17 = vsub.f32 %v516_v5, %v528_v16  ;;  %v530_v18 = vsub.f32 %v517_v6, %v528_v16 }
 0x115   : > { %v531_v19 = vmul.f32 %v529_v17, %v529_v17  ;;  %v532_v20 = vmul.f32 %v530_v18, %v530_v18 }
 0x117   : > { %v533_v21 = vsel %vm299_vm0, %v531_v19, 0.0  ;;  %v534_v22 = vsel %vm299_vm0, %v532_v20, 0.0 }
 0x118   : > { %v535_v23 = vadd.f32 %v534_v22, %v533_v21 }
 0x11a   : > { %v536_v24 = vrot.slane %v535_v23, 4 }
 0x11c   : > { %v537_v25 = vadd.f32 %v536_v24, %v535_v23 }
 0x11e   : > { %v538_v26 = vrot.slane %v537_v25, 2 }
 0x120   : > { %v539_v27 = vadd.f32 %v538_v26, %v537_v25 }
 0x122   : > { %v540_v28 = vrot.slane %v539_v27, 1 }
 0x124   : > { %v541_v29 = vadd.f32 %v540_v28, %v539_v27 }
 0x126   : > { %v542_v30 = vmul.f32 0.0625, %v541_v29 }
 0x128   : > { %v543_v31 = vadd.f32 1e-05, %v542_v30 }
 0x12a   : > { %802 = vrsqrt.f32 %v543_v31 }
 0x137   : > { %v803_v32 = vpop.eup %802 }
 0x138   : > { %v545_v34 = vmul.f32 %v803_v32, %v529_v17  ;;  %v546_v35 = vmul.f32 %v803_v32, %v530_v18 }
 0x13a   : > { %v554_v37 = vmul.f32 %v679_v33, %v545_v34  ;;  %v555_v38 = vmul.f32 %v679_v33, %v546_v35 }
 0x13c   : > { %v563_v41 = vadd.f32 %v680_v36, %v554_v37  ;;  %v564_v42 = vadd.f32 %v680_v36, %v555_v38 }
 0x13e   : > { %v567_v43 = vadd.f32 %v565_v39, %v563_v41  ;;  %v568_v44 = vadd.f32 %v566_v40, %v564_v42 }
 0x140   : > { %569 = vst.msk [vmem:[%s294_s26] sm:$0xff] %vm299_vm0, %v567_v43  ;;  %570 = vst.msk [vmem:[%s294_s26 + $0x8] sm:$0xff] %vm299_vm0, %v568_v44 }
 0x141 PF: > { %s15_s20 = sadd.s32 1, %s826_s20   ;;  %s1071_s18 = smov %s822_s19 }
 0x142   : > { %p12_p5 = scmp.ge.s32.totalorder %s15_s20, 4   ;;  %s1072_s19 = smov %s1074_s21 }
 0x144   :  { %14 = sbr.rel (!%p12_p5) target bundleno = 2 (0x2), region = 84 }

// kernel: generator2_forward.17
= control target key start
LH: loop header
LB: loop body
LE: loop exit
PB: predicated region body
PF: predicated region fallthrough
CT: control target
= control target key end

     0   :  { %s1010_s15 = smov 0   ;;  %s1012_s16 = smov 0   ;;  %s1325_s0 = inlined_call_operand.vmem [shape: f32[2,64,512], index: 0, kind: input, shape index: {}]   ;;  %s1326_s1 = inlined_call_operand.vmem [shape: f32[512,16], index: 1, kind: input, shape index: {}]   ;;  %s1327_s2 = inlined_call_operand.vmem [shape: f32[1,16], index: 2, kind: input, shape index: {}]   ;;  %s1328_s3 = inlined_call_operand.vmem [shape: f32[1,16], index: 3, kind: input, shape index: {}]   ;;  %s1329_s4 = inlined_call_operand.vmem [shape: f32[2,64,16], index: 4, kind: output, shape index: {}]  }
   0x1   :  { %s1014_s17 = smov 0  }
   0x2 LB: > { %s26_s18 = sadd.s32 1, %s978_s16  ;;  %p810_p0 = scmp.ge.s32.totalorder %s982_s17, 1  ;;  %s982_s17 = sphi %s1014_s17, %s14_s17   ;;  %s978_s16 = sphi %s1012_s16, %s1331_s16   ;;  %s974_s15 = sphi %s1010_s15, %s1330_s15  }
   0x3   : > { %p28_p1 = scmp.ge.s32.totalorder %s26_s18, 2  ;;  %p192_p2 = scmp.lt.s32.totalorder %s982_s17, 3 }
   0x5   : > { %s1333_s18 = smov (%p28_p1, %s26_s18), 0  ;;  %p193_p3 = pnand %p810_p0, %p192_p2 }
   0x6   : > { %p228_p4 = scmp.lt.s32.totalorder (!%p193_p3), %s974_s15, 1 }
   0x7   : > { %196 = sbr.rel (%p193_p3) target bundleno = 363 (0x16b), region = 36 }
   0xc   : > { %v332_v0 = vld [vmem:[%s1326_s1 + $0xf8] sm:$0xff]  ;;  %v331_v4 = vld [vmem:[%s1326_s1 + $0xf0] sm:$0xff]  ;;  %v330_v8 = vld [vmem:[%s1326_s1 + $0xe8] sm:$0xff]  ;;  %s1335_s15 = smov (!%p228_p4, %s974_s15), 1  ;;  %vm252_vm0 = vcmask 130048  }
   0xd   : > { %v364_v1 = vld [vmem:[%s1326_s1 + $0x1f8] sm:$0xff]  ;;  %821 = vmatprep.subr.mxu0 %v332_v0  ;;  %v363_v5 = vld [vmem:[%s1326_s1 + $0x1f0] sm:$0xff]  ;;  %v362_v9 = vld [vmem:[%s1326_s1 + $0x1e8] sm:$0xff]  ;;  %s819_s9 = sshll.u32 %s1335_s15, 8  ;;  %s820_s23 = sshll.u32 %s1335_s15, 6 }
   0xe   : > { %v316_v2 = vld [vmem:[%s1326_s1 + $0x78] sm:$0xff]  ;;  %877 = vmatprep.subr.mxu1 %v364_v1  ;;  %v315_v6 = vld [vmem:[%s1326_s1 + $0x70] sm:$0xff]  ;;  %v314_v10 = vld [vmem:[%s1326_s1 + $0x68] sm:$0xff]  ;;  %s1214_s28 = scalar_lea.vmem %s1325_s0, %s819_s9  ;;  %s247_s26 = scalar_lea.vmem %s1329_s4, %s820_s23 }
   0xf   : > { %v348_v3 = vld [vmem:[%s1326_s1 + $0x178] sm:$0xff]  ;;  %822 = vmatpush3.msra.mxu0 %v316_v2  ;;  %v347_v7 = vld [vmem:[%s1326_s1 + $0x170] sm:$0xff]  ;;  %v346_v11 = vld [vmem:[%s1326_s1 + $0x168] sm:$0xff] }
  0x10   : > { %878 = vmatpush3.msra.mxu1 %v348_v3  ;;  %823 = vmatprep.subr.mxu0 %v331_v4  ;;  %v329_v12 = vld [vmem:[%s1326_s1 + $0xe0] sm:$0xff]  ;;  %v328_v16 = vld [vmem:[%s1326_s1 + $0xd8] sm:$0xff]  ;;  %v327_v20 = vld [vmem:[%s1326_s1 + $0xd0] sm:$0xff] }
  0x11   : > { %879 = vmatprep.subr.mxu1 %v363_v5  ;;  %824 = vmatpush3.msra.mxu0 %v315_v6  ;;  %v361_v13 = vld [vmem:[%s1326_s1 + $0x1e0] sm:$0xff]  ;;  %v360_v17 = vld [vmem:[%s1326_s1 + $0x1d8] sm:$0xff]  ;;  %v359_v21 = vld [vmem:[%s1326_s1 + $0x1d0] sm:$0xff] }
  0x12   : > { %880 = vmatpush3.msra.mxu1 %v347_v7  ;;  %825 = vmatprep.subr.mxu0 %v330_v8  ;;  %v313_v14 = vld [vmem:[%s1326_s1 + $0x60] sm:$0xff]  ;;  %v312_v18 = vld [vmem:[%s1326_s1 + $0x58] sm:$0xff]  ;;  %v311_v22 = vld [vmem:[%s1326_s1 + $0x50] sm:$0xff] }
  0x13   : > { %881 = vmatprep.subr.mxu1 %v362_v9  ;;  %v345_v15 = vld [vmem:[%s1326_s1 + $0x160] sm:$0xff]  ;;  %826 = vmatpush3.msra.mxu0 %v314_v10  ;;  %v344_v19 = vld [vmem:[%s1326_s1 + $0x158] sm:$0xff]  ;;  %v343_v23 = vld [vmem:[%s1326_s1 + $0x150] sm:$0xff] }
  0x14   : > { %882 = vmatpush3.msra.mxu1 %v346_v11  ;;  %827 = vmatprep.subr.mxu0 %v329_v12  ;;  %v326_v24 = vld [vmem:[%s1326_s1 + $0xc8] sm:$0xff]  ;;  %v325_v28 = vld [vmem:[%s1326_s1 + $0xc0] sm:$0xff]  ;;  %v324_v32 = vld [vmem:[%s1326_s1 + $0xb8] sm:$0xff] }
  0x15   : > { %883 = vmatprep.subr.mxu1 %v361_v13  ;;  %828 = vmatpush3.msra.mxu0 %v313_v14  ;;  %v358_v25 = vld [vmem:[%s1326_s1 + $0x1c8] sm:$0xff]  ;;  %v357_v29 = vld [vmem:[%s1326_s1 + $0x1c0] sm:$0xff]  ;;  %v356_v33 = vld [vmem:[%s1326_s1 + $0x1b8] sm:$0xff] }
  0x16   : > { %884 = vmatpush3.msra.mxu1 %v345_v15  ;;  %829 = vmatprep.subr.mxu0 %v328_v16  ;;  %v310_v26 = vld [vmem:[%s1326_s1 + $0x48] sm:$0xff]  ;;  %v309_v30 = vld [vmem:[%s1326_s1 + $0x40] sm:$0xff]  ;;  %v308_v34 = vld [vmem:[%s1326_s1 + $0x38] sm:$0xff] }
  0x17   : > { %885 = vmatprep.subr.mxu1 %v360_v17  ;;  %830 = vmatpush3.msra.mxu0 %v312_v18  ;;  %v342_v27 = vld [vmem:[%s1326_s1 + $0x148] sm:$0xff]  ;;  %v341_v31 = vld [vmem:[%s1326_s1 + $0x140] sm:$0xff]  ;;  %v340_v35 = vld [vmem:[%s1326_s1 + $0x138] sm:$0xff] }
  0x18   : > { %886 = vmatpush3.msra.mxu1 %v344_v19  ;;  %831 = vmatprep.subr.mxu0 %v327_v20  ;;  %v323_v36 = vld [vmem:[%s1326_s1 + $0xb0] sm:$0xff]  ;;  %v322_v40 = vld [vmem:[%s1326_s1 + $0xa8] sm:$0xff]  ;;  %v321_v44 = vld [vmem:[%s1326_s1 + $0xa0] sm:$0xff] }
  0x19   : > { %887 = vmatprep.subr.mxu1 %v359_v21  ;;  %832 = vmatpush3.msra.mxu0 %v311_v22  ;;  %v355_v37 = vld [vmem:[%s1326_s1 + $0x1b0] sm:$0xff]  ;;  %v354_v41 = vld [vmem:[%s1326_s1 + $0x1a8] sm:$0xff]  ;;  %v353_v45 = vld [vmem:[%s1326_s1 + $0x1a0] sm:$0xff] }
  0x1a   : > { %888 = vmatpush3.msra.mxu1 %v343_v23  ;;  %833 = vmatprep.subr.mxu0 %v326_v24  ;;  %v307_v38 = vld [vmem:[%s1326_s1 + $0x30] sm:$0xff]  ;;  %v306_v42 = vld [vmem:[%s1326_s1 + $0x28] sm:$0xff]  ;;  %v305_v46 = vld [vmem:[%s1326_s1 + $0x20] sm:$0xff] }
  0x1b   : > { %889 = vmatprep.subr.mxu1 %v358_v25  ;;  %834 = vmatpush3.msra.mxu0 %v310_v26  ;;  %v339_v39 = vld [vmem:[%s1326_s1 + $0x130] sm:$0xff]  ;;  %v338_v43 = vld [vmem:[%s1326_s1 + $0x128] sm:$0xff]  ;;  %v337_v47 = vld [vmem:[%s1326_s1 + $0x120] sm:$0xff] }
  0x1c   : > { %890 = vmatpush3.msra.mxu1 %v342_v27  ;;  %835 = vmatprep.subr.mxu0 %v325_v28  ;;  %v320_v48 = vld [vmem:[%s1326_s1 + $0x98] sm:$0xff]  ;;  %v319_v52 = vld [vmem:[%s1326_s1 + $0x90] sm:$0xff]  ;;  %v318_v56 = vld [vmem:[%s1326_s1 + $0x88] sm:$0xff] }
  0x1d   : > { %891 = vmatprep.subr.mxu1 %v357_v29  ;;  %836 = vmatpush3.msra.mxu0 %v309_v30  ;;  %v352_v49 = vld [vmem:[%s1326_s1 + $0x198] sm:$0xff]  ;;  %v351_v53 = vld [vmem:[%s1326_s1 + $0x190] sm:$0xff]  ;;  %v350_v57 = vld [vmem:[%s1326_s1 + $0x188] sm:$0xff] }
  0x1e   : > { %892 = vmatpush3.msra.mxu1 %v341_v31  ;;  %837 = vmatprep.subr.mxu0 %v324_v32  ;;  %v304_v50 = vld [vmem:[%s1326_s1 + $0x18] sm:$0xff]  ;;  %v303_v54 = vld [vmem:[%s1326_s1 + $0x10] sm:$0xff]  ;;  %v302_v58 = vld [vmem:[%s1326_s1 + $0x8] sm:$0xff]  ;;  %v984_v32 = vmov 0.0  }
  0x1f   : > { %893 = vmatprep.subr.mxu1 %v356_v33  ;;  %838 = vmatpush3.msra.mxu0 %v308_v34  ;;  %v336_v51 = vld [vmem:[%s1326_s1 + $0x118] sm:$0xff]  ;;  %v335_v55 = vld [vmem:[%s1326_s1 + $0x110] sm:$0xff]  ;;  %v334_v59 = vld [vmem:[%s1326_s1 + $0x108] sm:$0xff]  ;;  %253 = vst.msk [vmem:[#allocation2] sm:$0xff] %vm252_vm0, %v984_v32 }
  0x20   : > { %894 = vmatpush3.msra.mxu1 %v340_v35  ;;  %839 = vmatprep.subr.mxu0 %v323_v36  ;;  %v317_v60 = vld [vmem:[%s1326_s1 + $0x80] sm:$0xff]  ;;  %v270_v63 = vld [vmem:[%s1214_s28 + $0x8] sm:$0xff]  ;;  %v272_v1 = vld [vmem:[%s1214_s28 + $0x18] sm:$0xff]  ;;  %254 = vst.msk [vmem:[#allocation2 + $0x8] sm:$0xff] %vm252_vm0, %v984_v32 }
  0x21   : > { %895 = vmatprep.subr.mxu1 %v355_v37  ;;  %840 = vmatpush3.msra.mxu0 %v307_v38  ;;  %v349_v61 = vld [vmem:[%s1326_s1 + $0x180] sm:$0xff]  ;;  %v271_v3 = vld [vmem:[%s1214_s28 + $0x10] sm:$0xff]  ;;  %v274_v4 = vld [vmem:[%s1214_s28 + $0x28] sm:$0xff]  ;;  %255 = vst.msk [vmem:[#allocation2 + $0x10] sm:$0xff] %vm252_vm0, %v984_v32 }
  0x22   : > { %896 = vmatpush3.msra.mxu1 %v339_v39  ;;  %841 = vmatprep.subr.mxu0 %v322_v40  ;;  %v301_v62 = vld [vmem:[%s1326_s1] sm:$0xff]  ;;  %v276_v5 = vld [vmem:[%s1214_s28 + $0x38] sm:$0xff]  ;;  %v275_v7 = vld [vmem:[%s1214_s28 + $0x30] sm:$0xff]  ;;  %256 = vst.msk [vmem:[#allocation2 + $0x18] sm:$0xff] %vm252_vm0, %v984_v32 }
  0x23   : > { %897 = vmatprep.subr.mxu1 %v354_v41  ;;  %842 = vmatpush3.msra.mxu0 %v306_v42  ;;  %v333_v0 = vld [vmem:[%s1326_s1 + $0x100] sm:$0xff]  ;;  %v278_v8 = vld [vmem:[%s1214_s28 + $0x48] sm:$0xff]  ;;  %v280_v9 = vld [vmem:[%s1214_s28 + $0x58] sm:$0xff]  ;;  %257 = vst.msk [vmem:[#allocation2 + $0x20] sm:$0xff] %vm252_vm0, %v984_v32 }
  0x24   : > { %898 = vmatpush3.msra.mxu1 %v338_v43  ;;  %843 = vmatprep.subr.mxu0 %v321_v44  ;;  %v269_v2 = vld [vmem:[%s1214_s28] sm:$0xff]  ;;  %v279_v11 = vld [vmem:[%s1214_s28 + $0x50] sm:$0xff]  ;;  %v282_v12 = vld [vmem:[%s1214_s28 + $0x68] sm:$0xff]  ;;  %258 = vst.msk [vmem:[#allocation2 + $0x28] sm:$0xff] %vm252_vm0, %v984_v32 }
  0x25   : > { %899 = vmatprep.subr.mxu1 %v353_v45  ;;  %844 = vmatpush3.msra.mxu0 %v305_v46  ;;  %v273_v6 = vld [vmem:[%s1214_s28 + $0x20] sm:$0xff]  ;;  %v284_v13 = vld [vmem:[%s1214_s28 + $0x78] sm:$0xff]  ;;  %v283_v15 = vld [vmem:[%s1214_s28 + $0x70] sm:$0xff]  ;;  %259 = vst.msk [vmem:[#allocation2 + $0x30] sm:$0xff] %vm252_vm0, %v984_v32 }
  0x26   : > { %900 = vmatpush3.msra.mxu1 %v337_v47  ;;  %845 = vmatprep.subr.mxu0 %v320_v48  ;;  %v277_v10 = vld [vmem:[%s1214_s28 + $0x40] sm:$0xff]  ;;  %v286_v16 = vld [vmem:[%s1214_s28 + $0x88] sm:$0xff]  ;;  %v288_v17 = vld [vmem:[%s1214_s28 + $0x98] sm:$0xff]  ;;  %260 = vst.msk [vmem:[#allocation2 + $0x38] sm:$0xff] %vm252_vm0, %v984_v32 }
  0x27   : > { %901 = vmatprep.subr.mxu1 %v352_v49  ;;  %846 = vmatpush3.msra.mxu0 %v304_v50  ;;  %v281_v14 = vld [vmem:[%s1214_s28 + $0x60] sm:$0xff]  ;;  %v287_v19 = vld [vmem:[%s1214_s28 + $0x90] sm:$0xff]  ;;  %v290_v20 = vld [vmem:[%s1214_s28 + $0xa8] sm:$0xff] }
  0x28   : > { %902 = vmatpush3.msra.mxu1 %v336_v51  ;;  %847 = vmatprep.subr.mxu0 %v319_v52  ;;  %v285_v18 = vld [vmem:[%s1214_s28 + $0x80] sm:$0xff]  ;;  %v292_v21 = vld [vmem:[%s1214_s28 + $0xb8] sm:$0xff]  ;;  %v291_v23 = vld [vmem:[%s1214_s28 + $0xb0] sm:$0xff] }
  0x29   : > { %903 = vmatprep.subr.mxu1 %v351_v53  ;;  %848 = vmatpush3.msra.mxu0 %v303_v54  ;;  %v289_v22 = vld [vmem:[%s1214_s28 + $0xa0] sm:$0xff]  ;;  %v294_v24 = vld [vmem:[%s1214_s28 + $0xc8] sm:$0xff]  ;;  %v296_v25 = vld [vmem:[%s1214_s28 + $0xd8] sm:$0xff] }
  0x2a   : > { %904 = vmatpush3.msra.mxu1 %v335_v55  ;;  %849 = vmatprep.subr.mxu0 %v318_v56  ;;  %v293_v26 = vld [vmem:[%s1214_s28 + $0xc0] sm:$0xff]  ;;  %v295_v27 = vld [vmem:[%s1214_s28 + $0xd0] sm:$0xff]  ;;  %v298_v28 = vld [vmem:[%s1214_s28 + $0xe8] sm:$0xff] }
  0x2b   : > { %905 = vmatprep.subr.mxu1 %v350_v57  ;;  %850 = vmatpush3.msra.mxu0 %v302_v58  ;;  %v300_v29 = vld [vmem:[%s1214_s28 + $0xf8] sm:$0xff]  ;;  %v297_v30 = vld [vmem:[%s1214_s28 + $0xe0] sm:$0xff]  ;;  %v299_v31 = vld [vmem:[%s1214_s28 + $0xf0] sm:$0xff] }
  0x2c   : > { %906 = vmatpush3.msra.mxu1 %v334_v59  ;;  %851 = vmatprep.subr.mxu0 %v317_v60  ;;  %v261_v39 = vld [vmem:[#allocation2] sm:$0xff]  ;;  %v262_v48 = vld [vmem:[#allocation2 + $0x8] sm:$0xff]  ;;  %v263_v57 = vld [vmem:[#allocation2 + $0x10] sm:$0xff] }
  0x2d   : > { %907 = vmatprep.subr.mxu1 %v349_v61  ;;  %852 = vmatpush3.msra.mxu0 %v301_v62 }
  0x2e   : > { %429 = vmatprep.mubr.f32.mxu0 %v270_v63  ;;  %908 = vmatpush3.msra.mxu1 %v333_v0 }
  0x2f   : > { %534 = vmatprep.mubr.f32.mxu1 %v272_v1  ;;  %430 = vmatmul.mubr.f32.vlgmr.msra.gmra.mxu0 %v269_v2  ;;  %v264_v2 = vld [vmem:[#allocation2 + $0x18] sm:$0xff] }
  0x30   : > { %535 = vmatmul.mubr.f32.vlgmr.msra.gmra.mxu1 %v271_v3  ;;  %434 = vmatprep.mubr.f32.mxu0 %v274_v4 }
  0x31   : > { %539 = vmatprep.mubr.f32.mxu1 %v276_v5 }
  0x33   : > { %435 = vmatmul.mubr.f32.gmra.mxu0 %v273_v6 }
  0x34   : > { %540 = vmatmul.mubr.f32.gmra.mxu1 %v275_v7  ;;  %439 = vmatprep.mubr.f32.mxu0 %v278_v8 }
  0x35   : > { %544 = vmatprep.mubr.f32.mxu1 %v280_v9 }
  0x37   : > { %440 = vmatmul.mubr.f32.gmra.mxu0 %v277_v10 }
  0x38   : > { %545 = vmatmul.mubr.f32.gmra.mxu1 %v279_v11  ;;  %444 = vmatprep.mubr.f32.mxu0 %v282_v12  ;;  %v265_v11 = vld [vmem:[#allocation2 + $0x20] sm:$0xff] }
  0x39   : > { %549 = vmatprep.mubr.f32.mxu1 %v284_v13 }
  0x3b   : > { %445 = vmatmul.mubr.f32.gmra.mxu0 %v281_v14 }
  0x3c   : > { %550 = vmatmul.mubr.f32.gmra.mxu1 %v283_v15  ;;  %449 = vmatprep.mubr.f32.mxu0 %v286_v16 }
  0x3d   : > { %554 = vmatprep.mubr.f32.mxu1 %v288_v17 }
  0x3f   : > { %450 = vmatmul.mubr.f32.gmra.mxu0 %v285_v18 }
  0x40   : > { %555 = vmatmul.mubr.f32.gmra.mxu1 %v287_v19  ;;  %454 = vmatprep.mubr.f32.mxu0 %v290_v20  ;;  %v266_v20 = vld [vmem:[#allocation2 + $0x28] sm:$0xff] }
  0x41   : > { %559 = vmatprep.mubr.f32.mxu1 %v292_v21 }
  0x43   : > { %455 = vmatmul.mubr.f32.gmra.mxu0 %v289_v22 }
  0x44   : > { %560 = vmatmul.mubr.f32.gmra.mxu1 %v291_v23  ;;  %459 = vmatprep.mubr.f32.mxu0 %v294_v24 }
  0x45   : > { %564 = vmatprep.mubr.f32.mxu1 %v296_v25 }
  0x47   : > { %460 = vmatmul.mubr.f32.gmra.mxu0 %v293_v26 }
  0x48   : > { %565 = vmatmul.mubr.f32.gmra.mxu1 %v295_v27  ;;  %464 = vmatprep.mubr.f32.mxu0 %v298_v28 }
  0x49   : > { %569 = vmatprep.mubr.f32.mxu1 %v300_v29 }
  0x4b   : > { %465 = vmatmul.mubr.f32.gmra.mxu0 %v297_v30  ;;  %v267_v30 = vld [vmem:[#allocation2 + $0x30] sm:$0xff] }
  0x4c   : > { %570 = vmatmul.mubr.f32.gmra.mxu1 %v299_v31 }
  0xef   : > { %v853_v33 = vpop.f32.mrf.mxu0 }
  0xf0   : > { %v909_v34 = vpop.f32.mrf.mxu1 }
  0xf1   : > { %v854_v35 = vpop.f32.mrf.mxu0 }
  0xf2   : > { %v910_v36 = vpop.f32.mrf.mxu1  ;;  %v855_v37 = vadd.f32 %v854_v35, %v853_v33 }
  0xf3   : > { %v911_v38 = vadd.f32 %v910_v36, %v909_v34  ;;  %v856_v40 = vpop.f32.mrf.mxu0 }
  0xf4   : > { %v912_v41 = vpop.f32.mrf.mxu1 }
  0xf5   : > { %v537_v42 = vadd.f32 %v911_v38, %v855_v37  ;;  %v857_v43 = vpop.f32.mrf.mxu0 }
  0xf6   : > { %v913_v44 = vpop.f32.mrf.mxu1  ;;  %v858_v46 = vadd.f32 %v857_v43, %v856_v40  ;;  %v268_v43 = vld [vmem:[#allocation2 + $0x38] sm:$0xff] }
  0xf7   : > { %v575_v45 = vadd.f32 %v537_v42, %v261_v39  ;;  %v914_v47 = vadd.f32 %v913_v44, %v912_v41  ;;  %v859_v49 = vpop.f32.mrf.mxu0 }
  0xf8   : > { %v915_v50 = vpop.f32.mrf.mxu1 }
  0xf9   : > { %584 = vst.msk [vmem:[#allocation2] sm:$0xff] %vm252_vm0, %v575_v45  ;;  %v542_v51 = vadd.f32 %v914_v47, %v858_v46  ;;  %v860_v52 = vpop.f32.mrf.mxu0 }
  0xfa   : > { %v916_v53 = vpop.f32.mrf.mxu1  ;;  %v861_v55 = vadd.f32 %v860_v52, %v859_v49 }
  0xfb   : > { %v576_v54 = vadd.f32 %v542_v51, %v262_v48  ;;  %v917_v56 = vadd.f32 %v916_v53, %v915_v50  ;;  %v862_v58 = vpop.f32.mrf.mxu0 }
  0xfc   : > { %v918_v59 = vpop.f32.mrf.mxu1 }
  0xfd   : > { %585 = vst.msk [vmem:[#allocation2 + $0x8] sm:$0xff] %vm252_vm0, %v576_v54  ;;  %v547_v60 = vadd.f32 %v917_v56, %v861_v55  ;;  %v863_v61 = vpop.f32.mrf.mxu0 }
  0xfe   : > { %v919_v62 = vpop.f32.mrf.mxu1  ;;  %v864_v0 = vadd.f32 %v863_v61, %v862_v58 }
  0xff   : > { %v577_v63 = vadd.f32 %v547_v60, %v263_v57  ;;  %v920_v1 = vadd.f32 %v919_v62, %v918_v59  ;;  %v865_v3 = vpop.f32.mrf.mxu0 }
 0x100   : > { %v921_v4 = vpop.f32.mrf.mxu1  ;;  %v595_v34 = vld [vmem:[#allocation2] sm:$0xff] }
 0x101   : > { %586 = vst.msk [vmem:[#allocation2 + $0x10] sm:$0xff] %vm252_vm0, %v577_v63  ;;  %v552_v5 = vadd.f32 %v920_v1, %v864_v0  ;;  %v866_v6 = vpop.f32.mrf.mxu0  ;;  %v603_v44 = vsel %vm252_vm0, %v595_v34, 0.0 }
 0x102   : > { %v922_v7 = vpop.f32.mrf.mxu1  ;;  %v867_v9 = vadd.f32 %v866_v6, %v865_v3 }
 0x103   : > { %v578_v8 = vadd.f32 %v552_v5, %v264_v2  ;;  %v923_v10 = vadd.f32 %v922_v7, %v921_v4  ;;  %v868_v12 = vpop.f32.mrf.mxu0 }
 0x104   : > { %v924_v13 = vpop.f32.mrf.mxu1  ;;  %v596_v29 = vld [vmem:[#allocation2 + $0x8] sm:$0xff] }
 0x105   : > { %587 = vst.msk [vmem:[#allocation2 + $0x18] sm:$0xff] %vm252_vm0, %v578_v8  ;;  %v557_v14 = vadd.f32 %v923_v10, %v867_v9  ;;  %v869_v15 = vpop.f32.mrf.mxu0  ;;  %v604_v38 = vsel %vm252_vm0, %v596_v29, 0.0 }
 0x106   : > { %v925_v16 = vpop.f32.mrf.mxu1  ;;  %v870_v18 = vadd.f32 %v869_v15, %v868_v12  ;;  %v605_v47 = vadd.f32 %v604_v38, %v603_v44 }
 0x107   : > { %v579_v17 = vadd.f32 %v557_v14, %v265_v11  ;;  %v926_v19 = vadd.f32 %v925_v16, %v924_v13  ;;  %v871_v21 = vpop.f32.mrf.mxu0 }
 0x108   : > { %v927_v22 = vpop.f32.mrf.mxu1  ;;  %v597_v35 = vld [vmem:[#allocation2 + $0x10] sm:$0xff] }
 0x109   : > { %588 = vst.msk [vmem:[#allocation2 + $0x20] sm:$0xff] %vm252_vm0, %v579_v17  ;;  %v562_v23 = vadd.f32 %v926_v19, %v870_v18  ;;  %v872_v24 = vpop.f32.mrf.mxu0  ;;  %v606_v45 = vsel %vm252_vm0, %v597_v35, 0.0 }
 0x10a   : > { %v928_v25 = vpop.f32.mrf.mxu1  ;;  %v873_v27 = vadd.f32 %v872_v24, %v871_v21  ;;  %v607_v51 = vadd.f32 %v606_v45, %v605_v47  ;;  %v815_v47 = vld [vmem:[%s1327_s2] ss:$0 sm:$0xff] }
 0x10b   : > { %v580_v26 = vadd.f32 %v562_v23, %v266_v20  ;;  %v929_v28 = vadd.f32 %v928_v25, %v927_v22  ;;  %v874_v31 = vpop.f32.mrf.mxu0 }
 0x10c   : > { %v930_v32 = vpop.f32.mrf.mxu1  ;;  %v598_v42 = vld [vmem:[#allocation2 + $0x18] sm:$0xff] }
 0x10d   : > { %589 = vst.msk [vmem:[#allocation2 + $0x28] sm:$0xff] %vm252_vm0, %v580_v26  ;;  %v567_v33 = vadd.f32 %v929_v28, %v873_v27  ;;  %v875_v36 = vpop.f32.mrf.mxu0  ;;  %v608_v49 = vsel %vm252_vm0, %v598_v42, 0.0 }
 0x10e   : > { %v931_v37 = vpop.f32.mrf.mxu1  ;;  %v876_v40 = vadd.f32 %v875_v36, %v874_v31  ;;  %v609_v54 = vadd.f32 %v608_v49, %v607_v51 }
 0x10f   : > { %v581_v39 = vadd.f32 %v567_v33, %v267_v30  ;;  %v932_v41 = vadd.f32 %v931_v37, %v930_v32 }
 0x110   : > { %v599_v48 = vld [vmem:[#allocation2 + $0x20] sm:$0xff] }
 0x111   : > { %590 = vst.msk [vmem:[#allocation2 + $0x30] sm:$0xff] %vm252_vm0, %v581_v39  ;;  %v572_v46 = vadd.f32 %v932_v41, %v876_v40  ;;  %v610_v53 = vsel %vm252_vm0, %v599_v48, 0.0 }
 0x112   : > { %v611_v56 = vadd.f32 %v610_v53, %v609_v54 }
 0x113   : > { %v582_v50 = vadd.f32 %v572_v46, %v268_v43 }
 0x114   : > { %v600_v52 = vld [vmem:[#allocation2 + $0x28] sm:$0xff] }
 0x115   : > { %591 = vst.msk [vmem:[#allocation2 + $0x38] sm:$0xff] %vm252_vm0, %v582_v50  ;;  %v612_v55 = vsel %vm252_vm0, %v600_v52, 0.0 }
 0x116   : > { %v613_v59 = vadd.f32 %v612_v55, %v611_v56  ;;  %v816_v56 = vld [vmem:[%s1328_s3] ss:$0 sm:$0xff] }
 0x118   : > { %v601_v57 = vld [vmem:[#allocation2 + $0x30] sm:$0xff] }
 0x119   : > { %v614_v58 = vsel %vm252_vm0, %v601_v57, 0.0 }
 0x11a   : > { %v615_v60 = vadd.f32 %v614_v58, %v613_v59 }
 0x11c   : > { %v602_v61 = vld [vmem:[#allocation2 + $0x38] sm:$0xff] }
 0x11d   : > { %v616_v62 = vsel %vm252_vm0, %v602_v61, 0.0 }
 0x11e   : > { %v617_v63 = vadd.f32 %v616_v62, %v615_v60 }
 0x120   : > { %v618_v0 = vrot.slane %v617_v63, 4 }
 0x122   : > { %v619_v1 = vadd.f32 %v618_v0, %v617_v63 }
 0x124   : > { %v620_v2 = vrot.slane %v619_v1, 2 }
 0x126   : > { %v621_v3 = vadd.f32 %v620_v2, %v619_v1 }
 0x128   : > { %v622_v4 = vrot.slane %v621_v3, 1 }
 0x12a   : > { %v623_v5 = vadd.f32 %v622_v4, %v621_v3 }
 0x12c   : > { %v625_v6 = vmul.f32 0.015625, %v623_v5 }
 0x12e   : > { %v626_v7 = vsub.f32 %v595_v34, %v625_v6  ;;  %v627_v8 = vsub.f32 %v596_v29, %v625_v6  ;;  %v628_v9 = vsub.f32 %v597_v35, %v625_v6  ;;  %v629_v10 = vsub.f32 %v598_v42, %v625_v6 }
 0x12f   : > { %v630_v11 = vsub.f32 %v599_v48, %v625_v6  ;;  %v631_v15 = vsub.f32 %v600_v52, %v625_v6  ;;  %v632_v20 = vsub.f32 %v601_v57, %v625_v6  ;;  %v633_v24 = vsub.f32 %v602_v61, %v625_v6 }
 0x130   : > { %v634_v12 = vmul.f32 %v626_v7, %v626_v7  ;;  %v635_v13 = vmul.f32 %v627_v8, %v627_v8  ;;  %v636_v14 = vmul.f32 %v628_v9, %v628_v9  ;;  %v637_v16 = vmul.f32 %v629_v10, %v629_v10 }
 0x131   : > { %v638_v21 = vmul.f32 %v630_v11, %v630_v11  ;;  %v639_v25 = vmul.f32 %v631_v15, %v631_v15  ;;  %v640_v28 = vmul.f32 %v632_v20, %v632_v20  ;;  %v641_v31 = vmul.f32 %v633_v24, %v633_v24 }
 0x132   : > { %v642_v17 = vsel %vm252_vm0, %v634_v12, 0.0  ;;  %v643_v18 = vsel %vm252_vm0, %v635_v13, 0.0  ;;  %v645_v22 = vsel %vm252_vm0, %v636_v14, 0.0  ;;  %v647_v26 = vsel %vm252_vm0, %v637_v16, 0.0 }
 0x133   : > { %v644_v19 = vadd.f32 %v643_v18, %v642_v17  ;;  %v649_v29 = vsel %vm252_vm0, %v638_v21, 0.0  ;;  %v651_v32 = vsel %vm252_vm0, %v639_v25, 0.0  ;;  %v653_v34 = vsel %vm252_vm0, %v640_v28, 0.0 }
 0x134   : > { %v655_v36 = vsel %vm252_vm0, %v641_v31, 0.0 }
 0x135   : > { %v646_v23 = vadd.f32 %v645_v22, %v644_v19 }
 0x137   : > { %v648_v27 = vadd.f32 %v647_v26, %v646_v23 }
 0x139   : > { %v650_v30 = vadd.f32 %v649_v29, %v648_v27 }
 0x13b   : > { %v652_v33 = vadd.f32 %v651_v32, %v650_v30 }
 0x13d   : > { %v654_v35 = vadd.f32 %v653_v34, %v652_v33 }
 0x13f   : > { %v656_v37 = vadd.f32 %v655_v36, %v654_v35 }
 0x141   : > { %v657_v38 = vrot.slane %v656_v37, 4 }
 0x143   : > { %v658_v39 = vadd.f32 %v657_v38, %v656_v37 }
 0x145   : > { %v659_v40 = vrot.slane %v658_v39, 2 }
 0x147   : > { %v660_v41 = vadd.f32 %v659_v40, %v658_v39 }
 0x149   : > { %v661_v42 = vrot.slane %v660_v41, 1 }
 0x14b   : > { %v662_v43 = vadd.f32 %v661_v42, %v660_v41 }
 0x14d   : > { %v663_v44 = vmul.f32 0.015625, %v662_v43 }
 0x14f   : > { %v664_v45 = vadd.f32 1e-05, %v663_v44 }
 0x151   : > { %958 = vrsqrt.f32 %v664_v45 }
 0x15e   : > { %v959_v46 = vpop.eup %958 }
 0x15f   : > { %v666_v48 = vmul.f32 %v959_v46, %v626_v7  ;;  %v667_v49 = vmul.f32 %v959_v46, %v627_v8  ;;  %v668_v50 = vmul.f32 %v959_v46, %v628_v9  ;;  %v669_v51 = vmul.f32 %v959_v46, %v629_v10 }
 0x160   : > { %v670_v52 = vmul.f32 %v959_v46, %v630_v11  ;;  %v671_v53 = vmul.f32 %v959_v46, %v631_v15  ;;  %v672_v54 = vmul.f32 %v959_v46, %v632_v20  ;;  %v673_v55 = vmul.f32 %v959_v46, %v633_v24 }
 0x161   : > { %v681_v57 = vmul.f32 %v815_v47, %v666_v48  ;;  %v682_v58 = vmul.f32 %v815_v47, %v667_v49  ;;  %v683_v59 = vmul.f32 %v815_v47, %v668_v50  ;;  %v684_v60 = vmul.f32 %v815_v47, %v669_v51 }
 0x162   : > { %v685_v61 = vmul.f32 %v815_v47, %v670_v52  ;;  %v686_v62 = vmul.f32 %v815_v47, %v671_v53  ;;  %v687_v63 = vmul.f32 %v815_v47, %v672_v54  ;;  %v688_v0 = vmul.f32 %v815_v47, %v673_v55 }
 0x163   : > { %v696_v1 = vadd.f32 %v816_v56, %v681_v57  ;;  %v697_v2 = vadd.f32 %v816_v56, %v682_v58  ;;  %v698_v3 = vadd.f32 %v816_v56, %v683_v59  ;;  %v699_v4 = vadd.f32 %v816_v56, %v684_v60 }
 0x164   : > { %v700_v5 = vadd.f32 %v816_v56, %v685_v61  ;;  %v701_v6 = vadd.f32 %v816_v56, %v686_v62  ;;  %v702_v7 = vadd.f32 %v816_v56, %v687_v63  ;;  %v703_v8 = vadd.f32 %v816_v56, %v688_v0 }
 0x165   : > { %v704_v9 = vmax.f32 %v696_v1, 0.0  ;;  %v705_v10 = vmax.f32 %v697_v2, 0.0  ;;  %v706_v11 = vmax.f32 %v698_v3, 0.0  ;;  %v707_v12 = vmax.f32 %v699_v4, 0.0 }
 0x166   : > { %v708_v13 = vmax.f32 %v700_v5, 0.0  ;;  %v709_v14 = vmax.f32 %v701_v6, 0.0  ;;  %v710_v15 = vmax.f32 %v702_v7, 0.0  ;;  %v711_v16 = vmax.f32 %v703_v8, 0.0 }
 0x167   : > { %712 = vst.msk [vmem:[%s247_s26] sm:$0xff] %vm252_vm0, %v704_v9  ;;  %713 = vst.msk [vmem:[%s247_s26 + $0x8] sm:$0xff] %vm252_vm0, %v705_v10 }
 0x168   : > { %714 = vst.msk [vmem:[%s247_s26 + $0x10] sm:$0xff] %vm252_vm0, %v706_v11  ;;  %715 = vst.msk [vmem:[%s247_s26 + $0x18] sm:$0xff] %vm252_vm0, %v707_v12 }
 0x169   : > { %716 = vst.msk [vmem:[%s247_s26 + $0x20] sm:$0xff] %vm252_vm0, %v708_v13  ;;  %717 = vst.msk [vmem:[%s247_s26 + $0x28] sm:$0xff] %vm252_vm0, %v709_v14 }
 0x16a   : > { %718 = vst.msk [vmem:[%s247_s26 + $0x30] sm:$0xff] %vm252_vm0, %v710_v15  ;;  %719 = vst.msk [vmem:[%s247_s26 + $0x38] sm:$0xff] %vm252_vm0, %v711_v16 }
 0x16b PF: > { %s14_s17 = sadd.s32 1, %s982_s17   ;;  %s1330_s15 = smov %s978_s16 }
 0x16c   : > { %p11_p5 = scmp.ge.s32.totalorder %s14_s17, 4   ;;  %s1331_s16 = smov %s1333_s18 }
 0x16e   :  { %13 = sbr.rel (!%p11_p5) target bundleno = 2 (0x2), region = 77 }

// kernel: generator2_forward.18
= control target key start
LH: loop header
LB: loop body
LE: loop exit
PB: predicated region body
PF: predicated region fallthrough
CT: control target
= control target key end

     0   :  { %s1361_s15 = smov 0   ;;  %s1363_s16 = smov 0   ;;  %s2203_s0 = inlined_call_operand.vmem [shape: f32[2,256,256], index: 0, kind: input, shape index: {}]   ;;  %s2204_s1 = inlined_call_operand.vmem [shape: f32[256,8], index: 1, kind: input, shape index: {}]   ;;  %s2205_s2 = inlined_call_operand.vmem [shape: f32[1,8], index: 2, kind: input, shape index: {}]   ;;  %s2206_s3 = inlined_call_operand.vmem [shape: f32[1,8], index: 3, kind: input, shape index: {}]   ;;  %s2207_s4 = inlined_call_operand.vmem [shape: f32[2,256,8], index: 4, kind: output, shape index: {}]  }
   0x1   :  { %s1365_s17 = smov 0  }
   0x2 LB: > { %s26_s18 = sadd.s32 1, %s1329_s16  ;;  %p1209_p0 = scmp.ge.s32.totalorder %s1333_s17, 1  ;;  %s1333_s17 = sphi %s1365_s17, %s14_s17   ;;  %s1329_s16 = sphi %s1363_s16, %s2209_s16   ;;  %s1325_s15 = sphi %s1361_s15, %s2208_s15  }
   0x3   : > { %p28_p1 = scmp.ge.s32.totalorder %s26_s18, 2  ;;  %p192_p2 = scmp.lt.s32.totalorder %s1333_s17, 3 }
   0x5   : > { %s2211_s18 = smov (%p28_p1, %s26_s18), 0  ;;  %p193_p3 = pnand %p1209_p0, %p192_p2 }
   0x6   : > { %p228_p4 = scmp.lt.s32.totalorder (!%p193_p3), %s1325_s15, 1 }
   0x7   : > { %196 = sbr.rel (%p193_p3) target bundleno = 528 (0x210), region = 36 }
   0xc   : > { %v396_v0 = vld [vmem:[%s2204_s1 + $0x78] sm:$0xff]  ;;  %vm252_vm0 = vcmask 64512   ;;  %v1335_v1 = vmov 0.0   ;;  %v395_v2 = vld [vmem:[%s2204_s1 + $0x70] sm:$0xff]  ;;  %v394_v3 = vld [vmem:[%s2204_s1 + $0x68] sm:$0xff]  ;;  %s2213_s15 = smov (!%p228_p4, %s1325_s15), 1 }
   0xd   : > { %413 = vmatprep.subr.mxu0 %v1335_v1  ;;  %1220 = vmatprep.subr.mxu1 %v1335_v1  ;;  %253 = vst.msk [vmem:[#allocation2] sm:$0xff] %vm252_vm0, %v1335_v1  ;;  %254 = vst.msk [vmem:[#allocation2 + $0x8] sm:$0xff] %vm252_vm0, %v1335_v1  ;;  %v393_v4 = vld [vmem:[%s2204_s1 + $0x60] sm:$0xff]  ;;  %v392_v5 = vld [vmem:[%s2204_s1 + $0x58] sm:$0xff]  ;;  %s1218_s25 = sshll.u32 %s2213_s15, 9 }
   0xe   : > { %255 = vst.msk [vmem:[#allocation2 + $0x10] sm:$0xff] %vm252_vm0, %v1335_v1  ;;  %256 = vst.msk [vmem:[#allocation2 + $0x18] sm:$0xff] %vm252_vm0, %v1335_v1  ;;  %414 = vmatpush1.msra.mxu0 %v396_v0  ;;  %1252 = vmatpush1.msra.mxu1 %v396_v0  ;;  %v391_v6 = vld [vmem:[%s2204_s1 + $0x50] sm:$0xff]  ;;  %v390_v7 = vld [vmem:[%s2204_s1 + $0x48] sm:$0xff]  ;;  %s1531_s6 = scalar_lea.vmem %s2203_s0, %s1218_s25  ;;  %s1219_s25 = sshll.u32 %s2213_s15, 8 }
   0xf   : > { %257 = vst.msk [vmem:[#allocation2 + $0x20] sm:$0xff] %vm252_vm0, %v1335_v1  ;;  %258 = vst.msk [vmem:[#allocation2 + $0x28] sm:$0xff] %vm252_vm0, %v1335_v1  ;;  %415 = vmatprep.subr.mxu0 %v1335_v1  ;;  %1221 = vmatprep.subr.mxu1 %v1335_v1  ;;  %v389_v8 = vld [vmem:[%s2204_s1 + $0x40] sm:$0xff]  ;;  %v388_v9 = vld [vmem:[%s2204_s1 + $0x38] sm:$0xff]  ;;  %s2108_s27 = scalar_lea.vmem %s2207_s4, %s1219_s25 }
  0x10   : > { %259 = vst.msk [vmem:[#allocation2 + $0x30] sm:$0xff] %vm252_vm0, %v1335_v1  ;;  %260 = vst.msk [vmem:[#allocation2 + $0x38] sm:$0xff] %vm252_vm0, %v1335_v1  ;;  %416 = vmatpush1.msra.mxu0 %v395_v2  ;;  %1253 = vmatpush1.msra.mxu1 %v395_v2  ;;  %v387_v10 = vld [vmem:[%s2204_s1 + $0x30] sm:$0xff]  ;;  %v386_v11 = vld [vmem:[%s2204_s1 + $0x28] sm:$0xff] }
  0x11   : > { %261 = vst.msk [vmem:[#allocation2 + $0x40] sm:$0xff] %vm252_vm0, %v1335_v1  ;;  %262 = vst.msk [vmem:[#allocation2 + $0x48] sm:$0xff] %vm252_vm0, %v1335_v1  ;;  %417 = vmatprep.subr.mxu0 %v1335_v1  ;;  %1222 = vmatprep.subr.mxu1 %v1335_v1  ;;  %v385_v12 = vld [vmem:[%s2204_s1 + $0x20] sm:$0xff]  ;;  %v384_v13 = vld [vmem:[%s2204_s1 + $0x18] sm:$0xff] }
  0x12   : > { %263 = vst.msk [vmem:[#allocation2 + $0x50] sm:$0xff] %vm252_vm0, %v1335_v1  ;;  %264 = vst.msk [vmem:[#allocation2 + $0x58] sm:$0xff] %vm252_vm0, %v1335_v1  ;;  %418 = vmatpush1.msra.mxu0 %v394_v3  ;;  %1254 = vmatpush1.msra.mxu1 %v394_v3  ;;  %v383_v14 = vld [vmem:[%s2204_s1 + $0x10] sm:$0xff]  ;;  %v382_v15 = vld [vmem:[%s2204_s1 + $0x8] sm:$0xff] }
  0x13   : > { %265 = vst.msk [vmem:[#allocation2 + $0x60] sm:$0xff] %vm252_vm0, %v1335_v1  ;;  %266 = vst.msk [vmem:[#allocation2 + $0x68] sm:$0xff] %vm252_vm0, %v1335_v1  ;;  %419 = vmatprep.subr.mxu0 %v1335_v1  ;;  %1223 = vmatprep.subr.mxu1 %v1335_v1  ;;  %v381_v16 = vld [vmem:[%s2204_s1] sm:$0xff]  ;;  %v412_v17 = vld [vmem:[%s2204_s1 + $0xf8] sm:$0xff] }
  0x14   : > { %267 = vst.msk [vmem:[#allocation2 + $0x70] sm:$0xff] %vm252_vm0, %v1335_v1  ;;  %268 = vst.msk [vmem:[#allocation2 + $0x78] sm:$0xff] %vm252_vm0, %v1335_v1  ;;  %420 = vmatpush1.msra.mxu0 %v393_v4  ;;  %1255 = vmatpush1.msra.mxu1 %v393_v4  ;;  %v318_v18 = vld [vmem:[%s1531_s6 + $0x8] sm:$0xff]  ;;  %v411_v19 = vld [vmem:[%s2204_s1 + $0xf0] sm:$0xff] }
  0x15   : > { %269 = vst.msk [vmem:[#allocation2 + $0x80] sm:$0xff] %vm252_vm0, %v1335_v1  ;;  %270 = vst.msk [vmem:[#allocation2 + $0x88] sm:$0xff] %vm252_vm0, %v1335_v1  ;;  %421 = vmatprep.subr.mxu0 %v1335_v1  ;;  %1224 = vmatprep.subr.mxu1 %v1335_v1  ;;  %v410_v20 = vld [vmem:[%s2204_s1 + $0xe8] sm:$0xff]  ;;  %v409_v21 = vld [vmem:[%s2204_s1 + $0xe0] sm:$0xff] }
  0x16   : > { %271 = vst.msk [vmem:[#allocation2 + $0x90] sm:$0xff] %vm252_vm0, %v1335_v1  ;;  %272 = vst.msk [vmem:[#allocation2 + $0x98] sm:$0xff] %vm252_vm0, %v1335_v1  ;;  %422 = vmatpush1.msra.mxu0 %v392_v5  ;;  %1256 = vmatpush1.msra.mxu1 %v392_v5  ;;  %v408_v22 = vld [vmem:[%s2204_s1 + $0xd8] sm:$0xff]  ;;  %v407_v23 = vld [vmem:[%s2204_s1 + $0xd0] sm:$0xff] }
  0x17   : > { %273 = vst.msk [vmem:[#allocation2 + $0xa0] sm:$0xff] %vm252_vm0, %v1335_v1  ;;  %274 = vst.msk [vmem:[#allocation2 + $0xa8] sm:$0xff] %vm252_vm0, %v1335_v1  ;;  %423 = vmatprep.subr.mxu0 %v1335_v1  ;;  %1225 = vmatprep.subr.mxu1 %v1335_v1  ;;  %v406_v24 = vld [vmem:[%s2204_s1 + $0xc8] sm:$0xff]  ;;  %v405_v25 = vld [vmem:[%s2204_s1 + $0xc0] sm:$0xff] }
  0x18   : > { %275 = vst.msk [vmem:[#allocation2 + $0xb0] sm:$0xff] %vm252_vm0, %v1335_v1  ;;  %276 = vst.msk [vmem:[#allocation2 + $0xb8] sm:$0xff] %vm252_vm0, %v1335_v1  ;;  %424 = vmatpush1.msra.mxu0 %v391_v6  ;;  %1257 = vmatpush1.msra.mxu1 %v391_v6  ;;  %v404_v26 = vld [vmem:[%s2204_s1 + $0xb8] sm:$0xff]  ;;  %v403_v27 = vld [vmem:[%s2204_s1 + $0xb0] sm:$0xff] }
  0x19   : > { %277 = vst.msk [vmem:[#allocation2 + $0xc0] sm:$0xff] %vm252_vm0, %v1335_v1  ;;  %278 = vst.msk [vmem:[#allocation2 + $0xc8] sm:$0xff] %vm252_vm0, %v1335_v1  ;;  %425 = vmatprep.subr.mxu0 %v1335_v1  ;;  %1226 = vmatprep.subr.mxu1 %v1335_v1  ;;  %v402_v28 = vld [vmem:[%s2204_s1 + $0xa8] sm:$0xff]  ;;  %v401_v29 = vld [vmem:[%s2204_s1 + $0xa0] sm:$0xff] }
  0x1a   : > { %279 = vst.msk [vmem:[#allocation2 + $0xd0] sm:$0xff] %vm252_vm0, %v1335_v1  ;;  %280 = vst.msk [vmem:[#allocation2 + $0xd8] sm:$0xff] %vm252_vm0, %v1335_v1  ;;  %426 = vmatpush1.msra.mxu0 %v390_v7  ;;  %1258 = vmatpush1.msra.mxu1 %v390_v7  ;;  %v400_v30 = vld [vmem:[%s2204_s1 + $0x98] sm:$0xff]  ;;  %v399_v31 = vld [vmem:[%s2204_s1 + $0x90] sm:$0xff] }
  0x1b   : > { %281 = vst.msk [vmem:[#allocation2 + $0xe0] sm:$0xff] %vm252_vm0, %v1335_v1  ;;  %282 = vst.msk [vmem:[#allocation2 + $0xe8] sm:$0xff] %vm252_vm0, %v1335_v1  ;;  %427 = vmatprep.subr.mxu0 %v1335_v1  ;;  %1227 = vmatprep.subr.mxu1 %v1335_v1  ;;  %v398_v32 = vld [vmem:[%s2204_s1 + $0x88] sm:$0xff]  ;;  %v397_v33 = vld [vmem:[%s2204_s1 + $0x80] sm:$0xff] }
  0x1c   : > { %283 = vst.msk [vmem:[#allocation2 + $0xf0] sm:$0xff] %vm252_vm0, %v1335_v1  ;;  %284 = vst.msk [vmem:[#allocation2 + $0xf8] sm:$0xff] %vm252_vm0, %v1335_v1  ;;  %428 = vmatpush1.msra.mxu0 %v389_v8  ;;  %1259 = vmatpush1.msra.mxu1 %v389_v8  ;;  %v317_v34 = vld [vmem:[%s1531_s6] sm:$0xff]  ;;  %v320_v35 = vld [vmem:[%s1531_s6 + $0x18] sm:$0xff] }
  0x1d   : > { %429 = vmatprep.subr.mxu0 %v1335_v1  ;;  %1228 = vmatprep.subr.mxu1 %v1335_v1  ;;  %v350_v36 = vld [vmem:[%s1531_s6 + $0x108] sm:$0xff]  ;;  %v349_v37 = vld [vmem:[%s1531_s6 + $0x100] sm:$0xff]  ;;  %v352_v38 = vld [vmem:[%s1531_s6 + $0x118] sm:$0xff] }
  0x1e   : > { %430 = vmatpush1.msra.mxu0 %v388_v9  ;;  %1260 = vmatpush1.msra.mxu1 %v388_v9  ;;  %v319_v39 = vld [vmem:[%s1531_s6 + $0x10] sm:$0xff]  ;;  %v322_v40 = vld [vmem:[%s1531_s6 + $0x28] sm:$0xff]  ;;  %v321_v43 = vld [vmem:[%s1531_s6 + $0x20] sm:$0xff] }
  0x1f   : > { %431 = vmatprep.subr.mxu0 %v1335_v1  ;;  %1229 = vmatprep.subr.mxu1 %v1335_v1  ;;  %v351_v41 = vld [vmem:[%s1531_s6 + $0x110] sm:$0xff]  ;;  %v354_v42 = vld [vmem:[%s1531_s6 + $0x128] sm:$0xff]  ;;  %v324_v44 = vld [vmem:[%s1531_s6 + $0x38] sm:$0xff] }
  0x20   : > { %432 = vmatpush1.msra.mxu0 %v387_v10  ;;  %1261 = vmatpush1.msra.mxu1 %v387_v10  ;;  %v353_v45 = vld [vmem:[%s1531_s6 + $0x120] sm:$0xff]  ;;  %v356_v46 = vld [vmem:[%s1531_s6 + $0x138] sm:$0xff]  ;;  %v323_v47 = vld [vmem:[%s1531_s6 + $0x30] sm:$0xff] }
  0x21   : > { %433 = vmatprep.subr.mxu0 %v1335_v1  ;;  %1230 = vmatprep.subr.mxu1 %v1335_v1  ;;  %v326_v48 = vld [vmem:[%s1531_s6 + $0x48] sm:$0xff]  ;;  %v355_v49 = vld [vmem:[%s1531_s6 + $0x130] sm:$0xff]  ;;  %v325_v51 = vld [vmem:[%s1531_s6 + $0x40] sm:$0xff] }
  0x22   : > { %434 = vmatpush1.msra.mxu0 %v386_v11  ;;  %1262 = vmatpush1.msra.mxu1 %v386_v11  ;;  %v358_v50 = vld [vmem:[%s1531_s6 + $0x148] sm:$0xff]  ;;  %v328_v52 = vld [vmem:[%s1531_s6 + $0x58] sm:$0xff]  ;;  %v357_v53 = vld [vmem:[%s1531_s6 + $0x140] sm:$0xff] }
  0x23   : > { %435 = vmatprep.subr.mxu0 %v1335_v1  ;;  %1231 = vmatprep.subr.mxu1 %v1335_v1  ;;  %v360_v54 = vld [vmem:[%s1531_s6 + $0x158] sm:$0xff]  ;;  %v327_v55 = vld [vmem:[%s1531_s6 + $0x50] sm:$0xff]  ;;  %v330_v56 = vld [vmem:[%s1531_s6 + $0x68] sm:$0xff] }
  0x24   : > { %436 = vmatpush1.msra.mxu0 %v385_v12  ;;  %1263 = vmatpush1.msra.mxu1 %v385_v12  ;;  %v359_v57 = vld [vmem:[%s1531_s6 + $0x150] sm:$0xff]  ;;  %v362_v58 = vld [vmem:[%s1531_s6 + $0x168] sm:$0xff]  ;;  %v329_v59 = vld [vmem:[%s1531_s6 + $0x60] sm:$0xff] }
  0x25   : > { %437 = vmatprep.subr.mxu0 %v1335_v1  ;;  %1232 = vmatprep.subr.mxu1 %v1335_v1  ;;  %v332_v60 = vld [vmem:[%s1531_s6 + $0x78] sm:$0xff]  ;;  %v361_v61 = vld [vmem:[%s1531_s6 + $0x160] sm:$0xff]  ;;  %v331_v63 = vld [vmem:[%s1531_s6 + $0x70] sm:$0xff] }
  0x26   : > { %438 = vmatpush1.msra.mxu0 %v384_v13  ;;  %1264 = vmatpush1.msra.mxu1 %v384_v13  ;;  %v364_v62 = vld [vmem:[%s1531_s6 + $0x178] sm:$0xff]  ;;  %v334_v0 = vld [vmem:[%s1531_s6 + $0x88] sm:$0xff]  ;;  %v333_v3 = vld [vmem:[%s1531_s6 + $0x80] sm:$0xff] }
  0x27   : > { %439 = vmatprep.subr.mxu0 %v1335_v1  ;;  %1233 = vmatprep.subr.mxu1 %v1335_v1  ;;  %v366_v2 = vld [vmem:[%s1531_s6 + $0x188] sm:$0xff]  ;;  %v336_v4 = vld [vmem:[%s1531_s6 + $0x98] sm:$0xff]  ;;  %v365_v5 = vld [vmem:[%s1531_s6 + $0x180] sm:$0xff] }
  0x28   : > { %440 = vmatpush1.msra.mxu0 %v383_v14  ;;  %1265 = vmatpush1.msra.mxu1 %v383_v14  ;;  %v368_v6 = vld [vmem:[%s1531_s6 + $0x198] sm:$0xff]  ;;  %v335_v7 = vld [vmem:[%s1531_s6 + $0x90] sm:$0xff]  ;;  %v338_v8 = vld [vmem:[%s1531_s6 + $0xa8] sm:$0xff] }
  0x29   : > { %441 = vmatprep.subr.mxu0 %v1335_v1  ;;  %1234 = vmatprep.subr.mxu1 %v1335_v1  ;;  %v367_v9 = vld [vmem:[%s1531_s6 + $0x190] sm:$0xff]  ;;  %v370_v10 = vld [vmem:[%s1531_s6 + $0x1a8] sm:$0xff]  ;;  %v337_v11 = vld [vmem:[%s1531_s6 + $0xa0] sm:$0xff] }
  0x2a   : > { %442 = vmatpush1.msra.mxu0 %v382_v15  ;;  %1266 = vmatpush1.msra.mxu1 %v382_v15  ;;  %v340_v12 = vld [vmem:[%s1531_s6 + $0xb8] sm:$0xff]  ;;  %v369_v13 = vld [vmem:[%s1531_s6 + $0x1a0] sm:$0xff]  ;;  %v339_v15 = vld [vmem:[%s1531_s6 + $0xb0] sm:$0xff] }
  0x2b   : > { %443 = vmatprep.subr.mxu0 %v1335_v1  ;;  %1235 = vmatprep.subr.mxu1 %v1335_v1  ;;  %v372_v14 = vld [vmem:[%s1531_s6 + $0x1b8] sm:$0xff] }
  0x2c   : > { %444 = vmatpush1.msra.mxu0 %v381_v16  ;;  %1267 = vmatpush1.msra.mxu1 %v381_v16  ;;  %v342_v16 = vld [vmem:[%s1531_s6 + $0xc8] sm:$0xff] }
  0x2d   : > { %445 = vmatprep.subr.mxu0 %v1335_v1  ;;  %1236 = vmatprep.subr.mxu1 %v1335_v1 }
  0x2e   : > { %446 = vmatpush2.msra.mxu0 %v412_v17  ;;  %1268 = vmatpush2.msra.mxu1 %v412_v17  ;;  %v371_v17 = vld [vmem:[%s1531_s6 + $0x1b0] sm:$0xff] }
  0x2f   : > { %447 = vmatprep.subr.mxu0 %v1335_v1  ;;  %477 = vmatprep.mubr.f32.mxu0 %v318_v18  ;;  %v374_v18 = vld [vmem:[%s1531_s6 + $0x1c8] sm:$0xff] }
  0x30   : > { %448 = vmatpush2.msra.mxu0 %v411_v19  ;;  %1237 = vmatprep.subr.mxu1 %v1335_v1 }
  0x31   : > { %449 = vmatprep.subr.mxu0 %v1335_v1  ;;  %1269 = vmatpush2.msra.mxu1 %v411_v19  ;;  %v341_v19 = vld [vmem:[%s1531_s6 + $0xc0] sm:$0xff] }
  0x32   : > { %450 = vmatpush2.msra.mxu0 %v410_v20  ;;  %1238 = vmatprep.subr.mxu1 %v1335_v1 }
  0x33   : > { %451 = vmatprep.subr.mxu0 %v1335_v1  ;;  %1270 = vmatpush2.msra.mxu1 %v410_v20  ;;  %v344_v20 = vld [vmem:[%s1531_s6 + $0xd8] sm:$0xff] }
  0x34   : > { %452 = vmatpush2.msra.mxu0 %v409_v21  ;;  %1239 = vmatprep.subr.mxu1 %v1335_v1 }
  0x35   : > { %453 = vmatprep.subr.mxu0 %v1335_v1  ;;  %1271 = vmatpush2.msra.mxu1 %v409_v21  ;;  %v373_v21 = vld [vmem:[%s1531_s6 + $0x1c0] sm:$0xff] }
  0x36   : > { %454 = vmatpush2.msra.mxu0 %v408_v22  ;;  %1240 = vmatprep.subr.mxu1 %v1335_v1 }
  0x37   : > { %455 = vmatprep.subr.mxu0 %v1335_v1  ;;  %1272 = vmatpush2.msra.mxu1 %v408_v22  ;;  %v376_v22 = vld [vmem:[%s1531_s6 + $0x1d8] sm:$0xff] }
  0x38   : > { %456 = vmatpush2.msra.mxu0 %v407_v23  ;;  %1241 = vmatprep.subr.mxu1 %v1335_v1 }
  0x39   : > { %457 = vmatprep.subr.mxu0 %v1335_v1  ;;  %1273 = vmatpush2.msra.mxu1 %v407_v23  ;;  %v343_v23 = vld [vmem:[%s1531_s6 + $0xd0] sm:$0xff] }
  0x3a   : > { %458 = vmatpush2.msra.mxu0 %v406_v24  ;;  %1242 = vmatprep.subr.mxu1 %v1335_v1 }
  0x3b   : > { %459 = vmatprep.subr.mxu0 %v1335_v1  ;;  %1274 = vmatpush2.msra.mxu1 %v406_v24  ;;  %v346_v24 = vld [vmem:[%s1531_s6 + $0xe8] sm:$0xff] }
  0x3c   : > { %460 = vmatpush2.msra.mxu0 %v405_v25  ;;  %1243 = vmatprep.subr.mxu1 %v1335_v1 }
  0x3d   : > { %461 = vmatprep.subr.mxu0 %v1335_v1  ;;  %1275 = vmatpush2.msra.mxu1 %v405_v25  ;;  %v375_v25 = vld [vmem:[%s1531_s6 + $0x1d0] sm:$0xff] }
  0x3e   : > { %462 = vmatpush2.msra.mxu0 %v404_v26  ;;  %1244 = vmatprep.subr.mxu1 %v1335_v1 }
  0x3f   : > { %463 = vmatprep.subr.mxu0 %v1335_v1  ;;  %1276 = vmatpush2.msra.mxu1 %v404_v26  ;;  %v378_v26 = vld [vmem:[%s1531_s6 + $0x1e8] sm:$0xff] }
  0x40   : > { %464 = vmatpush2.msra.mxu0 %v403_v27  ;;  %1245 = vmatprep.subr.mxu1 %v1335_v1 }
  0x41   : > { %465 = vmatprep.subr.mxu0 %v1335_v1  ;;  %1277 = vmatpush2.msra.mxu1 %v403_v27  ;;  %v345_v27 = vld [vmem:[%s1531_s6 + $0xe0] sm:$0xff] }
  0x42   : > { %466 = vmatpush2.msra.mxu0 %v402_v28  ;;  %1246 = vmatprep.subr.mxu1 %v1335_v1 }
  0x43   : > { %467 = vmatprep.subr.mxu0 %v1335_v1  ;;  %1278 = vmatpush2.msra.mxu1 %v402_v28  ;;  %v348_v28 = vld [vmem:[%s1531_s6 + $0xf8] sm:$0xff] }
  0x44   : > { %468 = vmatpush2.msra.mxu0 %v401_v29  ;;  %1247 = vmatprep.subr.mxu1 %v1335_v1 }
  0x45   : > { %469 = vmatprep.subr.mxu0 %v1335_v1  ;;  %1279 = vmatpush2.msra.mxu1 %v401_v29  ;;  %v377_v29 = vld [vmem:[%s1531_s6 + $0x1e0] sm:$0xff] }
  0x46   : > { %470 = vmatpush2.msra.mxu0 %v400_v30  ;;  %1248 = vmatprep.subr.mxu1 %v1335_v1 }
  0x47   : > { %471 = vmatprep.subr.mxu0 %v1335_v1  ;;  %1280 = vmatpush2.msra.mxu1 %v400_v30  ;;  %v380_v30 = vld [vmem:[%s1531_s6 + $0x1f8] sm:$0xff] }
  0x48   : > { %472 = vmatpush2.msra.mxu0 %v399_v31  ;;  %1249 = vmatprep.subr.mxu1 %v1335_v1 }
  0x49   : > { %473 = vmatprep.subr.mxu0 %v1335_v1  ;;  %1281 = vmatpush2.msra.mxu1 %v399_v31  ;;  %v347_v31 = vld [vmem:[%s1531_s6 + $0xf0] sm:$0xff] }
  0x4a   : > { %474 = vmatpush2.msra.mxu0 %v398_v32  ;;  %1250 = vmatprep.subr.mxu1 %v1335_v1 }
  0x4b   : > { %475 = vmatprep.subr.mxu0 %v1335_v1  ;;  %1282 = vmatpush2.msra.mxu1 %v398_v32  ;;  %v379_v32 = vld [vmem:[%s1531_s6 + $0x1f0] sm:$0xff] }
  0x4c   : > { %476 = vmatpush2.msra.mxu0 %v397_v33  ;;  %1251 = vmatprep.subr.mxu1 %v1335_v1  ;;  %v363_v1 = vld [vmem:[%s1531_s6 + $0x170] sm:$0xff] }
  0x4d   : > { %478 = vmatmul.mubr.f32.vlgmr.msra.gmra.mxu0 %v317_v34  ;;  %1283 = vmatpush2.msra.mxu1 %v397_v33  ;;  %v285_v33 = vld [vmem:[#allocation2] sm:$0xff] }
  0x4e   : > { %482 = vmatprep.mubr.f32.mxu0 %v320_v35  ;;  %557 = vmatprep.mubr.f32.mxu1 %v350_v36  ;;  %v301_v35 = vld [vmem:[#allocation2 + $0x80] sm:$0xff] }
  0x4f   : > { %558 = vmatmul.mubr.f32.vlgmr.msra.gmra.mxu1 %v349_v37 }
  0x50   : > { %562 = vmatprep.mubr.f32.mxu1 %v352_v38  ;;  %v286_v38 = vld [vmem:[#allocation2 + $0x8] sm:$0xff] }
  0x51   : > { %483 = vmatmul.mubr.f32.gmra.mxu0 %v319_v39 }
  0x52   : > { %487 = vmatprep.mubr.f32.mxu0 %v322_v40 }
  0x53   : > { %563 = vmatmul.mubr.f32.gmra.mxu1 %v351_v41 }
  0x54   : > { %567 = vmatprep.mubr.f32.mxu1 %v354_v42 }
  0x55   : > { %488 = vmatmul.mubr.f32.gmra.mxu0 %v321_v43  ;;  %v302_v43 = vld [vmem:[#allocation2 + $0x88] sm:$0xff] }
  0x56   : > { %492 = vmatprep.mubr.f32.mxu0 %v324_v44 }
  0x57   : > { %568 = vmatmul.mubr.f32.gmra.mxu1 %v353_v45 }
  0x58   : > { %572 = vmatprep.mubr.f32.mxu1 %v356_v46  ;;  %v287_v46 = vld [vmem:[#allocation2 + $0x10] sm:$0xff] }
  0x59   : > { %493 = vmatmul.mubr.f32.gmra.mxu0 %v323_v47 }
  0x5a   : > { %497 = vmatprep.mubr.f32.mxu0 %v326_v48 }
  0x5b   : > { %573 = vmatmul.mubr.f32.gmra.mxu1 %v355_v49 }
  0x5c   : > { %577 = vmatprep.mubr.f32.mxu1 %v358_v50 }
  0x5d   : > { %498 = vmatmul.mubr.f32.gmra.mxu0 %v325_v51  ;;  %v303_v51 = vld [vmem:[#allocation2 + $0x90] sm:$0xff] }
  0x5e   : > { %502 = vmatprep.mubr.f32.mxu0 %v328_v52 }
  0x5f   : > { %578 = vmatmul.mubr.f32.gmra.mxu1 %v357_v53 }
  0x60   : > { %582 = vmatprep.mubr.f32.mxu1 %v360_v54  ;;  %v288_v54 = vld [vmem:[#allocation2 + $0x18] sm:$0xff] }
  0x61   : > { %503 = vmatmul.mubr.f32.gmra.mxu0 %v327_v55 }
  0x62   : > { %507 = vmatprep.mubr.f32.mxu0 %v330_v56 }
  0x63   : > { %583 = vmatmul.mubr.f32.gmra.mxu1 %v359_v57 }
  0x64   : > { %587 = vmatprep.mubr.f32.mxu1 %v362_v58 }
  0x65   : > { %508 = vmatmul.mubr.f32.gmra.mxu0 %v329_v59  ;;  %v304_v59 = vld [vmem:[#allocation2 + $0x98] sm:$0xff] }
  0x66   : > { %512 = vmatprep.mubr.f32.mxu0 %v332_v60 }
  0x67   : > { %588 = vmatmul.mubr.f32.gmra.mxu1 %v361_v61 }
  0x68   : > { %592 = vmatprep.mubr.f32.mxu1 %v364_v62  ;;  %v289_v62 = vld [vmem:[#allocation2 + $0x20] sm:$0xff] }
  0x69   : > { %513 = vmatmul.mubr.f32.gmra.mxu0 %v331_v63 }
  0x6a   : > { %517 = vmatprep.mubr.f32.mxu0 %v334_v0 }
  0x6b   : > { %593 = vmatmul.mubr.f32.gmra.mxu1 %v363_v1 }
  0x6c   : > { %597 = vmatprep.mubr.f32.mxu1 %v366_v2 }
  0x6d   : > { %518 = vmatmul.mubr.f32.gmra.mxu0 %v333_v3  ;;  %v305_v3 = vld [vmem:[#allocation2 + $0xa0] sm:$0xff] }
  0x6e   : > { %522 = vmatprep.mubr.f32.mxu0 %v336_v4 }
  0x6f   : > { %598 = vmatmul.mubr.f32.gmra.mxu1 %v365_v5 }
  0x70   : > { %602 = vmatprep.mubr.f32.mxu1 %v368_v6  ;;  %v290_v6 = vld [vmem:[#allocation2 + $0x28] sm:$0xff] }
  0x71   : > { %523 = vmatmul.mubr.f32.gmra.mxu0 %v335_v7 }
  0x72   : > { %527 = vmatprep.mubr.f32.mxu0 %v338_v8 }
  0x73   : > { %603 = vmatmul.mubr.f32.gmra.mxu1 %v367_v9 }
  0x74   : > { %607 = vmatprep.mubr.f32.mxu1 %v370_v10 }
  0x75   : > { %528 = vmatmul.mubr.f32.gmra.mxu0 %v337_v11  ;;  %v306_v11 = vld [vmem:[#allocation2 + $0xa8] sm:$0xff] }
  0x76   : > { %532 = vmatprep.mubr.f32.mxu0 %v340_v12 }
  0x77   : > { %608 = vmatmul.mubr.f32.gmra.mxu1 %v369_v13 }
  0x78   : > { %612 = vmatprep.mubr.f32.mxu1 %v372_v14  ;;  %v291_v14 = vld [vmem:[#allocation2 + $0x30] sm:$0xff] }
  0x79   : > { %533 = vmatmul.mubr.f32.gmra.mxu0 %v339_v15 }
  0x7a   : > { %537 = vmatprep.mubr.f32.mxu0 %v342_v16 }
  0x7b   : > { %613 = vmatmul.mubr.f32.gmra.mxu1 %v371_v17 }
  0x7c   : > { %617 = vmatprep.mubr.f32.mxu1 %v374_v18 }
  0x7d   : > { %538 = vmatmul.mubr.f32.gmra.mxu0 %v341_v19  ;;  %v307_v19 = vld [vmem:[#allocation2 + $0xb0] sm:$0xff] }
  0x7e   : > { %542 = vmatprep.mubr.f32.mxu0 %v344_v20 }
  0x7f   : > { %618 = vmatmul.mubr.f32.gmra.mxu1 %v373_v21 }
  0x80   : > { %622 = vmatprep.mubr.f32.mxu1 %v376_v22  ;;  %v292_v22 = vld [vmem:[#allocation2 + $0x38] sm:$0xff] }
  0x81   : > { %543 = vmatmul.mubr.f32.gmra.mxu0 %v343_v23 }
  0x82   : > { %547 = vmatprep.mubr.f32.mxu0 %v346_v24 }
  0x83   : > { %623 = vmatmul.mubr.f32.gmra.mxu1 %v375_v25 }
  0x84   : > { %627 = vmatprep.mubr.f32.mxu1 %v378_v26 }
  0x85   : > { %548 = vmatmul.mubr.f32.gmra.mxu0 %v345_v27  ;;  %v308_v27 = vld [vmem:[#allocation2 + $0xb8] sm:$0xff] }
  0x86   : > { %552 = vmatprep.mubr.f32.mxu0 %v348_v28 }
  0x87   : > { %628 = vmatmul.mubr.f32.gmra.mxu1 %v377_v29 }
  0x88   : > { %632 = vmatprep.mubr.f32.mxu1 %v380_v30  ;;  %v293_v30 = vld [vmem:[#allocation2 + $0x40] sm:$0xff] }
  0x89   : > { %553 = vmatmul.mubr.f32.gmra.mxu0 %v347_v31 }
  0x8b   : > { %633 = vmatmul.mubr.f32.gmra.mxu1 %v379_v32 }
 0x10d   : > { %v479_v34 = vpop.f32.mrf.mxu0 }
 0x10e   : > { %v638_v36 = vadd.f32 %v479_v34, %v285_v33 }
 0x10f   : > { %v481_v37 = vpop.f32.mrf.mxu0  ;;  %v559_v39 = vpop.f32.mrf.mxu1 }
 0x110   : > { %671 = vst.msk [vmem:[#allocation2] sm:$0xff] %vm252_vm0, %v638_v36  ;;  %v654_v40 = vadd.f32 %v559_v39, %v301_v35  ;;  %v309_v35 = vld [vmem:[#allocation2 + $0xc0] sm:$0xff] }
 0x111   : > { %v484_v41 = vpop.f32.mrf.mxu0  ;;  %v561_v42 = vpop.f32.mrf.mxu1 }
 0x112   : > { %v639_v44 = vadd.f32 %v484_v41, %v286_v38  ;;  %687 = vst.msk [vmem:[#allocation2 + $0x80] sm:$0xff] %vm252_vm0, %v654_v40  ;;  %v294_v38 = vld [vmem:[#allocation2 + $0x48] sm:$0xff] }
 0x113   : > { %v486_v45 = vpop.f32.mrf.mxu0  ;;  %v564_v47 = vpop.f32.mrf.mxu1 }
 0x114   : > { %672 = vst.msk [vmem:[#allocation2 + $0x8] sm:$0xff] %vm252_vm0, %v639_v44  ;;  %v655_v48 = vadd.f32 %v564_v47, %v302_v43  ;;  %v310_v43 = vld [vmem:[#allocation2 + $0xc8] sm:$0xff]  ;;  %v295_v47 = vld [vmem:[#allocation2 + $0x50] sm:$0xff] }
 0x115   : > { %v489_v49 = vpop.f32.mrf.mxu0  ;;  %v566_v50 = vpop.f32.mrf.mxu1 }
 0x116   : > { %v640_v52 = vadd.f32 %v489_v49, %v287_v46  ;;  %688 = vst.msk [vmem:[#allocation2 + $0x88] sm:$0xff] %vm252_vm0, %v655_v48 }
 0x117   : > { %v491_v53 = vpop.f32.mrf.mxu0  ;;  %v569_v55 = vpop.f32.mrf.mxu1  ;;  %v1700_v50 = vld [vmem:[#allocation2] sm:$0xff] }
 0x118   : > { %673 = vst.msk [vmem:[#allocation2 + $0x10] sm:$0xff] %vm252_vm0, %v640_v52  ;;  %v656_v56 = vadd.f32 %v569_v55, %v303_v51 }
 0x119   : > { %v494_v57 = vpop.f32.mrf.mxu0  ;;  %v571_v58 = vpop.f32.mrf.mxu1 }
 0x11a   : > { %v641_v60 = vadd.f32 %v494_v57, %v288_v54  ;;  %689 = vst.msk [vmem:[#allocation2 + $0x90] sm:$0xff] %vm252_vm0, %v656_v56  ;;  %v311_v54 = vld [vmem:[#allocation2 + $0xd0] sm:$0xff] }
 0x11b   : > { %v496_v61 = vpop.f32.mrf.mxu0  ;;  %v574_v63 = vpop.f32.mrf.mxu1  ;;  %v1697_v45 = vld [vmem:[#allocation2 + $0x8] sm:$0xff] }
 0x11c   : > { %674 = vst.msk [vmem:[#allocation2 + $0x18] sm:$0xff] %vm252_vm0, %v641_v60  ;;  %v657_v0 = vadd.f32 %v574_v63, %v304_v59  ;;  %v739_v55 = vsel %vm252_vm0, %v1697_v45, 0.0  ;;  %v296_v59 = vld [vmem:[#allocation2 + $0x58] sm:$0xff]  ;;  %v738_v61 = vsel %vm252_vm0, %v1700_v50, 0.0 }
 0x11d   : > { %v499_v1 = vpop.f32.mrf.mxu0  ;;  %v576_v2 = vpop.f32.mrf.mxu1 }
 0x11e   : > { %v642_v4 = vadd.f32 %v499_v1, %v289_v62  ;;  %690 = vst.msk [vmem:[#allocation2 + $0x98] sm:$0xff] %vm252_vm0, %v657_v0  ;;  %v740_v0 = vadd.f32 %v739_v55, %v738_v61  ;;  %v300_v55 = vld [vmem:[#allocation2 + $0x78] sm:$0xff] }
 0x11f   : > { %v501_v5 = vpop.f32.mrf.mxu0  ;;  %v579_v7 = vpop.f32.mrf.mxu1  ;;  %v1702_v51 = vld [vmem:[#allocation2 + $0x10] sm:$0xff] }
 0x120   : > { %675 = vst.msk [vmem:[#allocation2 + $0x20] sm:$0xff] %vm252_vm0, %v642_v4  ;;  %v658_v8 = vadd.f32 %v579_v7, %v305_v3  ;;  %v741_v62 = vsel %vm252_vm0, %v1702_v51, 0.0  ;;  %v312_v4 = vld [vmem:[#allocation2 + $0xd8] sm:$0xff] }
 0x121   : > { %v504_v9 = vpop.f32.mrf.mxu0  ;;  %v581_v10 = vpop.f32.mrf.mxu1  ;;  %v742_v7 = vadd.f32 %v741_v62, %v740_v0  ;;  %v316_v0 = vld [vmem:[#allocation2 + $0xf8] sm:$0xff] }
 0x122   : > { %v643_v12 = vadd.f32 %v504_v9, %v290_v6  ;;  %691 = vst.msk [vmem:[#allocation2 + $0xa0] sm:$0xff] %vm252_vm0, %v658_v8  ;;  %v297_v10 = vld [vmem:[#allocation2 + $0x60] sm:$0xff] }
 0x123   : > { %v506_v13 = vpop.f32.mrf.mxu0  ;;  %v584_v15 = vpop.f32.mrf.mxu1  ;;  %v1707_v57 = vld [vmem:[#allocation2 + $0x18] sm:$0xff] }
 0x124   : > { %676 = vst.msk [vmem:[#allocation2 + $0x28] sm:$0xff] %vm252_vm0, %v643_v12  ;;  %v659_v16 = vadd.f32 %v584_v15, %v306_v11  ;;  %v743_v5 = vsel %vm252_vm0, %v1707_v57, 0.0 }
 0x125   : > { %v509_v17 = vpop.f32.mrf.mxu0  ;;  %v586_v18 = vpop.f32.mrf.mxu1 }
 0x126   : > { %v644_v20 = vadd.f32 %v509_v17, %v291_v14  ;;  %692 = vst.msk [vmem:[#allocation2 + $0xa8] sm:$0xff] %vm252_vm0, %v659_v16  ;;  %v744_v14 = vadd.f32 %v743_v5, %v742_v7  ;;  %v313_v18 = vld [vmem:[#allocation2 + $0xe0] sm:$0xff] }
 0x127   : > { %v511_v21 = vpop.f32.mrf.mxu0  ;;  %v589_v23 = vpop.f32.mrf.mxu1  ;;  %v1714_v1 = vld [vmem:[#allocation2 + $0x20] sm:$0xff] }
 0x128   : > { %677 = vst.msk [vmem:[#allocation2 + $0x30] sm:$0xff] %vm252_vm0, %v644_v20  ;;  %v660_v24 = vadd.f32 %v589_v23, %v307_v19  ;;  %v745_v12 = vsel %vm252_vm0, %v1714_v1, 0.0 }
 0x129   : > { %v514_v25 = vpop.f32.mrf.mxu0  ;;  %v591_v26 = vpop.f32.mrf.mxu1  ;;  %v746_v21 = vadd.f32 %v745_v12, %v744_v14 }
 0x12a   : > { %v645_v28 = vadd.f32 %v514_v25, %v292_v22  ;;  %693 = vst.msk [vmem:[#allocation2 + $0xb0] sm:$0xff] %vm252_vm0, %v660_v24  ;;  %v298_v24 = vld [vmem:[#allocation2 + $0x68] sm:$0xff] }
 0x12b   : > { %v516_v29 = vpop.f32.mrf.mxu0  ;;  %v594_v31 = vpop.f32.mrf.mxu1  ;;  %v1719_v8 = vld [vmem:[#allocation2 + $0x28] sm:$0xff] }
 0x12c   : > { %678 = vst.msk [vmem:[#allocation2 + $0x38] sm:$0xff] %vm252_vm0, %v645_v28  ;;  %v661_v32 = vadd.f32 %v594_v31, %v308_v27  ;;  %v747_v19 = vsel %vm252_vm0, %v1719_v8, 0.0 }
 0x12d   : > { %v519_v33 = vpop.f32.mrf.mxu0  ;;  %v596_v34 = vpop.f32.mrf.mxu1  ;;  %v748_v28 = vadd.f32 %v747_v19, %v746_v21  ;;  %v1771_v19 = vld [vmem:[#allocation2 + $0x80] sm:$0xff] }
 0x12e   : > { %v646_v36 = vadd.f32 %v519_v33, %v293_v30  ;;  %694 = vst.msk [vmem:[#allocation2 + $0xb8] sm:$0xff] %vm252_vm0, %v661_v32  ;;  %v314_v32 = vld [vmem:[#allocation2 + $0xe8] sm:$0xff] }
 0x12f   : > { %v521_v37 = vpop.f32.mrf.mxu0  ;;  %v599_v39 = vpop.f32.mrf.mxu1  ;;  %v1724_v15 = vld [vmem:[#allocation2 + $0x30] sm:$0xff] }
 0x130   : > { %679 = vst.msk [vmem:[#allocation2 + $0x40] sm:$0xff] %vm252_vm0, %v646_v36  ;;  %v662_v40 = vadd.f32 %v599_v39, %v309_v35  ;;  %v749_v26 = vsel %vm252_vm0, %v1724_v15, 0.0 }
 0x131   : > { %v524_v41 = vpop.f32.mrf.mxu0  ;;  %v601_v42 = vpop.f32.mrf.mxu1  ;;  %v750_v35 = vadd.f32 %v749_v26, %v748_v28  ;;  %v769_v26 = vsel %vm252_vm0, %v1771_v19, 0.0 }
 0x132   : > { %v647_v44 = vadd.f32 %v524_v41, %v294_v38  ;;  %695 = vst.msk [vmem:[#allocation2 + $0xc0] sm:$0xff] %vm252_vm0, %v662_v40  ;;  %v299_v38 = vld [vmem:[#allocation2 + $0x70] sm:$0xff] }
 0x133   : > { %v526_v46 = vpop.f32.mrf.mxu0  ;;  %v604_v48 = vpop.f32.mrf.mxu1  ;;  %v1729_v22 = vld [vmem:[#allocation2 + $0x38] sm:$0xff] }
 0x134   : > { %680 = vst.msk [vmem:[#allocation2 + $0x48] sm:$0xff] %vm252_vm0, %v647_v44  ;;  %v663_v49 = vadd.f32 %v604_v48, %v310_v43  ;;  %v751_v33 = vsel %vm252_vm0, %v1729_v22, 0.0 }
 0x135   : > { %v529_v52 = vpop.f32.mrf.mxu0  ;;  %v606_v53 = vpop.f32.mrf.mxu1  ;;  %v752_v42 = vadd.f32 %v751_v33, %v750_v35 }
 0x136   : > { %v648_v56 = vadd.f32 %v529_v52, %v295_v47  ;;  %696 = vst.msk [vmem:[#allocation2 + $0xc8] sm:$0xff] %vm252_vm0, %v663_v49  ;;  %v315_v47 = vld [vmem:[#allocation2 + $0xf0] sm:$0xff] }
 0x137   : > { %v531_v58 = vpop.f32.mrf.mxu0  ;;  %v609_v60 = vpop.f32.mrf.mxu1  ;;  %v1734_v29 = vld [vmem:[#allocation2 + $0x40] sm:$0xff] }
 0x138   : > { %681 = vst.msk [vmem:[#allocation2 + $0x50] sm:$0xff] %vm252_vm0, %v648_v56  ;;  %v664_v63 = vadd.f32 %v609_v60, %v311_v54  ;;  %v753_v40 = vsel %vm252_vm0, %v1734_v29, 0.0 }
 0x139   : > { %v534_v2 = vpop.f32.mrf.mxu0  ;;  %v611_v3 = vpop.f32.mrf.mxu1  ;;  %v754_v52 = vadd.f32 %v753_v40, %v752_v42 }
 0x13a   : > { %v649_v6 = vadd.f32 %v534_v2, %v296_v59  ;;  %697 = vst.msk [vmem:[#allocation2 + $0xd0] sm:$0xff] %vm252_vm0, %v664_v63 }
 0x13b   : > { %v536_v9 = vpop.f32.mrf.mxu0  ;;  %v614_v11 = vpop.f32.mrf.mxu1  ;;  %v1739_v36 = vld [vmem:[#allocation2 + $0x48] sm:$0xff] }
 0x13c   : > { %682 = vst.msk [vmem:[#allocation2 + $0x58] sm:$0xff] %vm252_vm0, %v649_v6  ;;  %v665_v13 = vadd.f32 %v614_v11, %v312_v4  ;;  %v755_v48 = vsel %vm252_vm0, %v1739_v36, 0.0 }
 0x13d   : > { %v539_v16 = vpop.f32.mrf.mxu0  ;;  %v616_v17 = vpop.f32.mrf.mxu1  ;;  %v756_v60 = vadd.f32 %v755_v48, %v754_v52 }
 0x13e   : > { %v650_v20 = vadd.f32 %v539_v16, %v297_v10  ;;  %698 = vst.msk [vmem:[#allocation2 + $0xd8] sm:$0xff] %vm252_vm0, %v665_v13 }
 0x13f   : > { %v541_v23 = vpop.f32.mrf.mxu0  ;;  %v619_v25 = vpop.f32.mrf.mxu1  ;;  %v1744_v43 = vld [vmem:[#allocation2 + $0x50] sm:$0xff] }
 0x140   : > { %683 = vst.msk [vmem:[#allocation2 + $0x60] sm:$0xff] %vm252_vm0, %v650_v20  ;;  %v666_v27 = vadd.f32 %v619_v25, %v313_v18  ;;  %v757_v58 = vsel %vm252_vm0, %v1744_v43, 0.0 }
 0x141   : > { %v544_v30 = vpop.f32.mrf.mxu0  ;;  %v621_v31 = vpop.f32.mrf.mxu1  ;;  %v758_v4 = vadd.f32 %v757_v58, %v756_v60  ;;  %v1813_v60 = vld [vmem:[#allocation2 + $0xd0] sm:$0xff] }
 0x142   : > { %v651_v34 = vadd.f32 %v544_v30, %v298_v24  ;;  %699 = vst.msk [vmem:[#allocation2 + $0xe0] sm:$0xff] %vm252_vm0, %v666_v27  ;;  %v1777_v24 = vld [vmem:[#allocation2 + $0x88] sm:$0xff]  ;;  %v1781_v27 = vld [vmem:[#allocation2 + $0x90] sm:$0xff]  ;;  %v1785_v31 = vld [vmem:[#allocation2 + $0x98] sm:$0xff] }
 0x143   : > { %v546_v37 = vpop.f32.mrf.mxu0  ;;  %v624_v39 = vpop.f32.mrf.mxu1  ;;  %v1749_v53 = vld [vmem:[#allocation2 + $0x58] sm:$0xff]  ;;  %v771_v30 = vsel %vm252_vm0, %v1777_v24, 0.0  ;;  %v773_v33 = vsel %vm252_vm0, %v1781_v27, 0.0 }
 0x144   : > { %684 = vst.msk [vmem:[#allocation2 + $0x68] sm:$0xff] %vm252_vm0, %v651_v34  ;;  %v667_v41 = vadd.f32 %v624_v39, %v314_v32  ;;  %v759_v2 = vsel %vm252_vm0, %v1749_v53, 0.0  ;;  %v1789_v34 = vld [vmem:[#allocation2 + $0xa0] sm:$0xff]  ;;  %v775_v37 = vsel %vm252_vm0, %v1785_v31, 0.0 }
 0x145   : > { %v549_v44 = vpop.f32.mrf.mxu0  ;;  %v626_v46 = vpop.f32.mrf.mxu1  ;;  %v760_v11 = vadd.f32 %v759_v2, %v758_v4  ;;  %v777_v40 = vsel %vm252_vm0, %v1789_v34, 0.0  ;;  %v789_v2 = vsel %vm252_vm0, %v1813_v60, 0.0 }
 0x146   : > { %v652_v49 = vadd.f32 %v549_v44, %v299_v38  ;;  %700 = vst.msk [vmem:[#allocation2 + $0xe8] sm:$0xff] %vm252_vm0, %v667_v41  ;;  %v1793_v38 = vld [vmem:[#allocation2 + $0xa8] sm:$0xff]  ;;  %v1797_v41 = vld [vmem:[#allocation2 + $0xb0] sm:$0xff]  ;;  %v1801_v46 = vld [vmem:[#allocation2 + $0xb8] sm:$0xff] }
 0x147   : > { %v551_v54 = vpop.f32.mrf.mxu0  ;;  %v629_v56 = vpop.f32.mrf.mxu1  ;;  %v1754_v61 = vld [vmem:[#allocation2 + $0x60] sm:$0xff]  ;;  %v779_v44 = vsel %vm252_vm0, %v1793_v38, 0.0  ;;  %v781_v48 = vsel %vm252_vm0, %v1797_v41, 0.0 }
 0x148   : > { %685 = vst.msk [vmem:[#allocation2 + $0x70] sm:$0xff] %vm252_vm0, %v652_v49  ;;  %v668_v59 = vadd.f32 %v629_v56, %v315_v47  ;;  %v761_v9 = vsel %vm252_vm0, %v1754_v61, 0.0  ;;  %v1805_v49 = vld [vmem:[#allocation2 + $0xc0] sm:$0xff]  ;;  %v783_v54 = vsel %vm252_vm0, %v1801_v46, 0.0  ;;  %v1809_v56 = vld [vmem:[#allocation2 + $0xc8] sm:$0xff] }
 0x149   : > { %v554_v62 = vpop.f32.mrf.mxu0  ;;  %v631_v63 = vpop.f32.mrf.mxu1  ;;  %v762_v14 = vadd.f32 %v761_v9, %v760_v11  ;;  %v785_v58 = vsel %vm252_vm0, %v1805_v49, 0.0  ;;  %v1821_v4 = vld [vmem:[#allocation2 + $0xe0] sm:$0xff] }
 0x14a   : > { %v653_v3 = vadd.f32 %v554_v62, %v300_v55  ;;  %701 = vst.msk [vmem:[#allocation2 + $0xf0] sm:$0xff] %vm252_vm0, %v668_v59  ;;  %v787_v62 = vsel %vm252_vm0, %v1809_v56, 0.0 }
 0x14b   : > { %v1759_v5 = vld [vmem:[#allocation2 + $0x68] sm:$0xff]  ;;  %v556_v6 = vpop.f32.mrf.mxu0  ;;  %v634_v7 = vpop.f32.mrf.mxu1 }
 0x14c   : > { %686 = vst.msk [vmem:[#allocation2 + $0x78] sm:$0xff] %vm252_vm0, %v653_v3  ;;  %v669_v10 = vadd.f32 %v634_v7, %v316_v0  ;;  %v763_v13 = vsel %vm252_vm0, %v1759_v5, 0.0  ;;  %v1817_v0 = vld [vmem:[#allocation2 + $0xd8] sm:$0xff] }
 0x14d   : > { %v636_v12 = vpop.f32.mrf.mxu1  ;;  %v764_v18 = vadd.f32 %v763_v13, %v762_v14  ;;  %v791_v6 = vsel %vm252_vm0, %v1817_v0, 0.0  ;;  %v1825_v9 = vld [vmem:[#allocation2 + $0xe8] sm:$0xff] }
 0x14e   : > { %702 = vst.msk [vmem:[#allocation2 + $0xf8] sm:$0xff] %vm252_vm0, %v669_v10  ;;  %v793_v10 = vsel %vm252_vm0, %v1821_v4, 0.0  ;;  %v795_v14 = vsel %vm252_vm0, %v1825_v9, 0.0 }
 0x14f   : > { %v1767_v16 = vld [vmem:[#allocation2 + $0x70] sm:$0xff] }
 0x150   : > { %v765_v17 = vsel %vm252_vm0, %v1767_v16, 0.0 }
 0x151   : > { %v766_v20 = vadd.f32 %v765_v17, %v764_v18  ;;  %v1829_v12 = vld [vmem:[#allocation2 + $0xf0] sm:$0xff] }
 0x152   : > { %v797_v18 = vsel %vm252_vm0, %v1829_v12, 0.0 }
 0x153   : > { %v1773_v21 = vld [vmem:[#allocation2 + $0x78] sm:$0xff] }
 0x154   : > { %v767_v23 = vsel %vm252_vm0, %v1773_v21, 0.0 }
 0x155   : > { %v768_v25 = vadd.f32 %v767_v23, %v766_v20  ;;  %v1831_v13 = vld [vmem:[#allocation2 + $0xf8] sm:$0xff] }
 0x156   : > { %v799_v20 = vsel %vm252_vm0, %v1831_v13, 0.0 }
 0x157   : > { %v770_v28 = vadd.f32 %v769_v26, %v768_v25 }
 0x159   : > { %v772_v32 = vadd.f32 %v771_v30, %v770_v28 }
 0x15b   : > { %v774_v35 = vadd.f32 %v773_v33, %v772_v32 }
 0x15d   : > { %v776_v39 = vadd.f32 %v775_v37, %v774_v35 }
 0x15f   : > { %v778_v42 = vadd.f32 %v777_v40, %v776_v39 }
 0x161   : > { %v780_v47 = vadd.f32 %v779_v44, %v778_v42 }
 0x163   : > { %v782_v52 = vadd.f32 %v781_v48, %v780_v47 }
 0x165   : > { %v784_v55 = vadd.f32 %v783_v54, %v782_v52 }
 0x167   : > { %v786_v59 = vadd.f32 %v785_v58, %v784_v55 }
 0x169   : > { %v788_v63 = vadd.f32 %v787_v62, %v786_v59 }
 0x16b   : > { %v790_v3 = vadd.f32 %v789_v2, %v788_v63 }
 0x16d   : > { %v792_v7 = vadd.f32 %v791_v6, %v790_v3 }
 0x16f   : > { %v794_v11 = vadd.f32 %v793_v10, %v792_v7 }
 0x171   : > { %v796_v17 = vadd.f32 %v795_v14, %v794_v11 }
 0x173   : > { %v798_v23 = vadd.f32 %v797_v18, %v796_v17 }
 0x175   : > { %v800_v25 = vadd.f32 %v799_v20, %v798_v23 }
 0x177   : > { %v801_v26 = vrot.slane %v800_v25, 4 }
 0x179   : > { %v802_v28 = vadd.f32 %v801_v26, %v800_v25 }
 0x17b   : > { %v803_v30 = vrot.slane %v802_v28, 2 }
 0x17d   : > { %v804_v32 = vadd.f32 %v803_v30, %v802_v28 }
 0x17f   : > { %v805_v33 = vrot.slane %v804_v32, 1 }
 0x181   : > { %v806_v35 = vadd.f32 %v805_v33, %v804_v32 }
 0x183   : > { %v1839_v37 = vmul.f32 0.00390625, %v806_v35 }
 0x185   : > { %v1843_v39 = vsub.f32 %v1700_v50, %v1839_v37  ;;  %v1847_v40 = vsub.f32 %v1697_v45, %v1839_v37  ;;  %v1851_v42 = vsub.f32 %v1702_v51, %v1839_v37  ;;  %v1855_v44 = vsub.f32 %v1707_v57, %v1839_v37 }
 0x186   : > { %v1863_v50 = vsub.f32 %v1714_v1, %v1839_v37  ;;  %v1869_v51 = vsub.f32 %v1719_v8, %v1839_v37  ;;  %v1877_v58 = vsub.f32 %v1724_v15, %v1839_v37  ;;  %v1884_v8 = vsub.f32 %v1729_v22, %v1839_v37 }
 0x187   : > { %v841_v47 = vmul.f32 %v1843_v39, %v1843_v39  ;;  %v842_v48 = vmul.f32 %v1847_v40, %v1847_v40  ;;  %v843_v45 = vmul.f32 %v1851_v42, %v1851_v42  ;;  %v844_v57 = vmul.f32 %v1855_v44, %v1855_v44 }
 0x188   : > { %v845_v1 = vmul.f32 %v1863_v50, %v1863_v50  ;;  %v846_v63 = vmul.f32 %v1869_v51, %v1869_v51  ;;  %v1891_v15 = vsub.f32 %v1734_v29, %v1839_v37  ;;  %v847_v6 = vmul.f32 %v1877_v58, %v1877_v58 }
 0x189   : > { %v873_v52 = vsel %vm252_vm0, %v841_v47, 0.0  ;;  %v874_v54 = vsel %vm252_vm0, %v842_v48, 0.0  ;;  %v876_v59 = vsel %vm252_vm0, %v843_v45, 0.0  ;;  %v878_v2 = vsel %vm252_vm0, %v844_v57, 0.0 }
 0x18a   : > { %v875_v55 = vadd.f32 %v874_v54, %v873_v52  ;;  %v880_v7 = vsel %vm252_vm0, %v845_v1, 0.0  ;;  %v1898_v22 = vsub.f32 %v1739_v36, %v1839_v37  ;;  %v848_v11 = vmul.f32 %v1884_v8, %v1884_v8 }
 0x18b   : > { %v882_v14 = vsel %vm252_vm0, %v846_v63, 0.0  ;;  %v1905_v29 = vsub.f32 %v1744_v43, %v1839_v37  ;;  %v849_v18 = vmul.f32 %v1891_v15, %v1891_v15  ;;  %v884_v20 = vsel %vm252_vm0, %v847_v6, 0.0 }
 0x18c   : > { %v877_v62 = vadd.f32 %v876_v59, %v875_v55  ;;  %v1912_v36 = vsub.f32 %v1749_v53, %v1839_v37  ;;  %v850_v25 = vmul.f32 %v1898_v22, %v1898_v22  ;;  %v886_v26 = vsel %vm252_vm0, %v848_v11, 0.0 }
 0x18d   : > { %v1919_v43 = vsub.f32 %v1754_v61, %v1839_v37  ;;  %v851_v30 = vmul.f32 %v1905_v29, %v1905_v29  ;;  %v888_v32 = vsel %vm252_vm0, %v849_v18, 0.0  ;;  %v1926_v53 = vsub.f32 %v1759_v5, %v1839_v37 }
 0x18e   : > { %v879_v3 = vadd.f32 %v878_v2, %v877_v62  ;;  %v852_v35 = vmul.f32 %v1912_v36, %v1912_v36  ;;  %v890_v47 = vsel %vm252_vm0, %v850_v25, 0.0  ;;  %v1933_v61 = vsub.f32 %v1767_v16, %v1839_v37 }
 0x18f   : > { %v853_v45 = vmul.f32 %v1919_v43, %v1919_v43  ;;  %v892_v57 = vsel %vm252_vm0, %v851_v30, 0.0  ;;  %v1940_v5 = vsub.f32 %v1773_v21, %v1839_v37  ;;  %v854_v54 = vmul.f32 %v1926_v53, %v1926_v53 }
 0x190   : > { %v881_v10 = vadd.f32 %v880_v7, %v879_v3  ;;  %v894_v55 = vsel %vm252_vm0, %v852_v35, 0.0  ;;  %v1947_v16 = vsub.f32 %v1771_v19, %v1839_v37  ;;  %v855_v59 = vmul.f32 %v1933_v61, %v1933_v61 }
 0x191   : > { %v896_v62 = vsel %vm252_vm0, %v853_v45, 0.0  ;;  %v1954_v21 = vsub.f32 %v1777_v24, %v1839_v37  ;;  %v856_v2 = vmul.f32 %v1940_v5, %v1940_v5  ;;  %v898_v3 = vsel %vm252_vm0, %v854_v54, 0.0 }
 0x192   : > { %v883_v17 = vadd.f32 %v882_v14, %v881_v10  ;;  %v1961_v19 = vsub.f32 %v1781_v27, %v1839_v37  ;;  %v857_v7 = vmul.f32 %v1947_v16, %v1947_v16  ;;  %v900_v10 = vsel %vm252_vm0, %v855_v59, 0.0 }
 0x193   : > { %v1968_v24 = vsub.f32 %v1785_v31, %v1839_v37  ;;  %v858_v14 = vmul.f32 %v1954_v21, %v1954_v21  ;;  %v1975_v27 = vsub.f32 %v1789_v34, %v1839_v37  ;;  %v1982_v31 = vsub.f32 %v1793_v38, %v1839_v37 }
 0x194   : > { %v885_v23 = vadd.f32 %v884_v20, %v883_v17  ;;  %v902_v17 = vsel %vm252_vm0, %v856_v2, 0.0  ;;  %v859_v20 = vmul.f32 %v1961_v19, %v1961_v19  ;;  %v1989_v34 = vsub.f32 %v1797_v41, %v1839_v37 }
 0x195   : > { %v1996_v38 = vsub.f32 %v1801_v46, %v1839_v37  ;;  %v2003_v41 = vsub.f32 %v1805_v49, %v1839_v37  ;;  %v2010_v46 = vsub.f32 %v1809_v56, %v1839_v37  ;;  %v2017_v49 = vsub.f32 %v1813_v60, %v1839_v37 }
 0x196   : > { %v887_v28 = vadd.f32 %v886_v26, %v885_v23  ;;  %v904_v23 = vsel %vm252_vm0, %v857_v7, 0.0  ;;  %v860_v26 = vmul.f32 %v1968_v24, %v1968_v24  ;;  %v2024_v56 = vsub.f32 %v1817_v0, %v1839_v37 }
 0x197   : > { %v2031_v60 = vsub.f32 %v1821_v4, %v1839_v37  ;;  %v838_v0 = vsub.f32 %v1825_v9, %v1839_v37 }
 0x198   : > { %v889_v33 = vadd.f32 %v888_v32, %v887_v28  ;;  %v906_v28 = vsel %vm252_vm0, %v858_v14, 0.0  ;;  %v861_v32 = vmul.f32 %v1975_v27, %v1975_v27 }
 0x199   : > { %v869_v4 = vmul.f32 %v2031_v60, %v2031_v60 }
 0x19a   : > { %v891_v48 = vadd.f32 %v890_v47, %v889_v33  ;;  %v908_v33 = vsel %vm252_vm0, %v859_v20, 0.0  ;;  %v862_v47 = vmul.f32 %v1982_v31, %v1982_v31 }
 0x19c   : > { %v893_v52 = vadd.f32 %v892_v57, %v891_v48  ;;  %v910_v48 = vsel %vm252_vm0, %v860_v26, 0.0  ;;  %v863_v57 = vmul.f32 %v1989_v34, %v1989_v34 }
 0x19e   : > { %v895_v1 = vadd.f32 %v894_v55, %v893_v52  ;;  %v912_v52 = vsel %vm252_vm0, %v861_v32, 0.0  ;;  %v864_v55 = vmul.f32 %v1996_v38, %v1996_v38 }
 0x1a0   : > { %v897_v63 = vadd.f32 %v896_v62, %v895_v1  ;;  %v914_v1 = vsel %vm252_vm0, %v862_v47, 0.0  ;;  %v865_v62 = vmul.f32 %v2003_v41, %v2003_v41 }
 0x1a2   : > { %v899_v6 = vadd.f32 %v898_v3, %v897_v63  ;;  %v916_v63 = vsel %vm252_vm0, %v863_v57, 0.0  ;;  %v866_v3 = vmul.f32 %v2010_v46, %v2010_v46 }
 0x1a4   : > { %v901_v11 = vadd.f32 %v900_v10, %v899_v6  ;;  %v918_v6 = vsel %vm252_vm0, %v864_v55, 0.0  ;;  %v867_v10 = vmul.f32 %v2017_v49, %v2017_v49 }
 0x1a6   : > { %v903_v18 = vadd.f32 %v902_v17, %v901_v11  ;;  %v920_v11 = vsel %vm252_vm0, %v865_v62, 0.0  ;;  %v868_v17 = vmul.f32 %v2024_v56, %v2024_v56 }
 0x1a8   : > { %v905_v25 = vadd.f32 %v904_v23, %v903_v18  ;;  %v922_v18 = vsel %vm252_vm0, %v866_v3, 0.0  ;;  %v839_v23 = vsub.f32 %v1829_v12, %v1839_v37  ;;  %v926_v9 = vsel %vm252_vm0, %v868_v17, 0.0 }
 0x1aa   : > { %v907_v30 = vadd.f32 %v906_v28, %v905_v25  ;;  %v924_v25 = vsel %vm252_vm0, %v867_v10, 0.0  ;;  %v840_v28 = vsub.f32 %v1831_v13, %v1839_v37 }
 0x1ac   : > { %v909_v35 = vadd.f32 %v908_v33, %v907_v30  ;;  %v870_v30 = vmul.f32 %v838_v0, %v838_v0  ;;  %v871_v33 = vmul.f32 %v839_v23, %v839_v23 }
 0x1ae   : > { %v911_v45 = vadd.f32 %v910_v48, %v909_v35  ;;  %v928_v35 = vsel %vm252_vm0, %v869_v4, 0.0  ;;  %v872_v48 = vmul.f32 %v840_v28, %v840_v28  ;;  %v930_v12 = vsel %vm252_vm0, %v870_v30, 0.0 }
 0x1af   : > { %v932_v57 = vsel %vm252_vm0, %v871_v33, 0.0 }
 0x1b0   : > { %v913_v54 = vadd.f32 %v912_v52, %v911_v45 }
 0x1b2   : > { %v915_v59 = vadd.f32 %v914_v1, %v913_v54  ;;  %v934_v54 = vsel %vm252_vm0, %v872_v48, 0.0 }
 0x1b4   : > { %v917_v2 = vadd.f32 %v916_v63, %v915_v59 }
 0x1b6   : > { %v919_v7 = vadd.f32 %v918_v6, %v917_v2 }
 0x1b8   : > { %v921_v14 = vadd.f32 %v920_v11, %v919_v7 }
 0x1ba   : > { %v923_v20 = vadd.f32 %v922_v18, %v921_v14 }
 0x1bc   : > { %v925_v26 = vadd.f32 %v924_v25, %v923_v20 }
 0x1be   : > { %v927_v32 = vadd.f32 %v926_v9, %v925_v26 }
 0x1c0   : > { %v929_v47 = vadd.f32 %v928_v35, %v927_v32 }
 0x1c2   : > { %v931_v45 = vadd.f32 %v930_v12, %v929_v47 }
 0x1c4   : > { %v933_v52 = vadd.f32 %v932_v57, %v931_v45 }
 0x1c6   : > { %v935_v55 = vadd.f32 %v934_v54, %v933_v52 }
 0x1c8   : > { %v936_v1 = vrot.slane %v935_v55, 4 }
 0x1ca   : > { %v937_v13 = vadd.f32 %v936_v1, %v935_v55 }
 0x1cc   : > { %v938_v37 = vrot.slane %v937_v13, 2 }
 0x1ce   : > { %v939_v59 = vadd.f32 %v938_v37, %v937_v13  ;;  %v1215_v37 = vld [vmem:[%s2206_s3] ss:$0 sm:$0xff] }
 0x1d0   : > { %v940_v62 = vrot.slane %v939_v59, 1 }
 0x1d2   : > { %v941_v63 = vadd.f32 %v940_v62, %v939_v59 }
 0x1d4   : > { %v942_v2 = vmul.f32 0.00390625, %v941_v63 }
 0x1d6   : > { %v943_v3 = vadd.f32 1e-05, %v942_v2 }
 0x1d8   : > { %1309 = vrsqrt.f32 %v943_v3 }
 0x1e5   : > { %v1310_v6 = vpop.eup %1309 }
 0x1e6   : > { %v945_v7 = vmul.f32 %v1310_v6, %v1843_v39  ;;  %v946_v10 = vmul.f32 %v1310_v6, %v1847_v40  ;;  %v947_v11 = vmul.f32 %v1310_v6, %v1851_v42  ;;  %v948_v14 = vmul.f32 %v1310_v6, %v1855_v44 }
 0x1e7   : > { %v949_v17 = vmul.f32 %v1310_v6, %v1863_v50  ;;  %v950_v18 = vmul.f32 %v1310_v6, %v1869_v51  ;;  %v951_v20 = vmul.f32 %v1310_v6, %v1877_v58  ;;  %v952_v4 = vmul.f32 %v1310_v6, %v1884_v8 }
 0x1e8   : > { %v953_v25 = vmul.f32 %v1310_v6, %v1891_v15  ;;  %v954_v26 = vmul.f32 %v1310_v6, %v1898_v22  ;;  %v955_v39 = vmul.f32 %v1310_v6, %v1905_v29  ;;  %v956_v40 = vmul.f32 %v1310_v6, %v1912_v36 }
 0x1e9   : > { %v957_v42 = vmul.f32 %v1310_v6, %v1919_v43  ;;  %v958_v44 = vmul.f32 %v1310_v6, %v1926_v53  ;;  %v959_v50 = vmul.f32 %v1310_v6, %v1933_v61  ;;  %v960_v51 = vmul.f32 %v1310_v6, %v1940_v5  ;;  %v1214_v61 = vld [vmem:[%s2205_s2] ss:$0 sm:$0xff] }
 0x1ea   : > { %v961_v58 = vmul.f32 %v1310_v6, %v1947_v16  ;;  %v962_v8 = vmul.f32 %v1310_v6, %v1954_v21  ;;  %v963_v15 = vmul.f32 %v1310_v6, %v1961_v19  ;;  %v964_v22 = vmul.f32 %v1310_v6, %v1968_v24 }
 0x1eb   : > { %v965_v29 = vmul.f32 %v1310_v6, %v1975_v27  ;;  %v966_v36 = vmul.f32 %v1310_v6, %v1982_v31  ;;  %v967_v43 = vmul.f32 %v1310_v6, %v1989_v34  ;;  %v968_v53 = vmul.f32 %v1310_v6, %v1996_v38 }
 0x1ec   : > { %v969_v5 = vmul.f32 %v1310_v6, %v2003_v41  ;;  %v970_v16 = vmul.f32 %v1310_v6, %v2010_v46  ;;  %v971_v21 = vmul.f32 %v1310_v6, %v2017_v49  ;;  %v972_v19 = vmul.f32 %v1310_v6, %v2024_v56 }
 0x1ed   : > { %v973_v24 = vmul.f32 %v1310_v6, %v2031_v60  ;;  %v974_v27 = vmul.f32 %v1310_v6, %v838_v0  ;;  %v975_v31 = vmul.f32 %v1310_v6, %v839_v23  ;;  %v976_v30 = vmul.f32 %v1310_v6, %v840_v28 }
 0x1ee   : > { %v984_v34 = vmul.f32 %v1214_v61, %v945_v7  ;;  %v985_v9 = vmul.f32 %v1214_v61, %v946_v10  ;;  %v986_v38 = vmul.f32 %v1214_v61, %v947_v11  ;;  %v987_v32 = vmul.f32 %v1214_v61, %v948_v14 }
 0x1ef   : > { %v988_v33 = vmul.f32 %v1214_v61, %v949_v17  ;;  %v989_v35 = vmul.f32 %v1214_v61, %v950_v18  ;;  %v990_v47 = vmul.f32 %v1214_v61, %v951_v20  ;;  %v991_v48 = vmul.f32 %v1214_v61, %v952_v4 }
 0x1f0   : > { %v992_v41 = vmul.f32 %v1214_v61, %v953_v25  ;;  %v993_v12 = vmul.f32 %v1214_v61, %v954_v26  ;;  %v994_v46 = vmul.f32 %v1214_v61, %v955_v39  ;;  %v995_v45 = vmul.f32 %v1214_v61, %v956_v40 }
 0x1f1   : > { %v996_v49 = vmul.f32 %v1214_v61, %v957_v42  ;;  %v997_v57 = vmul.f32 %v1214_v61, %v958_v44  ;;  %v998_v56 = vmul.f32 %v1214_v61, %v959_v50  ;;  %v999_v52 = vmul.f32 %v1214_v61, %v960_v51 }
 0x1f2   : > { %v1000_v60 = vmul.f32 %v1214_v61, %v961_v58  ;;  %v1001_v0 = vmul.f32 %v1214_v61, %v962_v8  ;;  %v1002_v23 = vmul.f32 %v1214_v61, %v963_v15  ;;  %v1003_v28 = vmul.f32 %v1214_v61, %v964_v22 }
 0x1f3   : > { %v1004_v54 = vmul.f32 %v1214_v61, %v965_v29  ;;  %v1005_v55 = vmul.f32 %v1214_v61, %v966_v36  ;;  %v1006_v1 = vmul.f32 %v1214_v61, %v967_v43  ;;  %v1007_v13 = vmul.f32 %v1214_v61, %v968_v53 }
 0x1f4   : > { %v1008_v59 = vmul.f32 %v1214_v61, %v969_v5  ;;  %v1009_v62 = vmul.f32 %v1214_v61, %v970_v16  ;;  %v1010_v63 = vmul.f32 %v1214_v61, %v971_v21  ;;  %v1011_v2 = vmul.f32 %v1214_v61, %v972_v19 }
 0x1f5   : > { %v1012_v3 = vmul.f32 %v1214_v61, %v973_v24  ;;  %v1013_v6 = vmul.f32 %v1214_v61, %v974_v27  ;;  %v1014_v7 = vmul.f32 %v1214_v61, %v975_v31  ;;  %v1015_v10 = vmul.f32 %v1214_v61, %v976_v30 }
 0x1f6   : > { %v1023_v11 = vadd.f32 %v1215_v37, %v984_v34  ;;  %v1024_v14 = vadd.f32 %v1215_v37, %v985_v9  ;;  %v1025_v17 = vadd.f32 %v1215_v37, %v986_v38  ;;  %v1026_v18 = vadd.f32 %v1215_v37, %v987_v32 }
 0x1f7   : > { %v1027_v20 = vadd.f32 %v1215_v37, %v988_v33  ;;  %v1028_v4 = vadd.f32 %v1215_v37, %v989_v35  ;;  %v1029_v25 = vadd.f32 %v1215_v37, %v990_v47  ;;  %v1030_v26 = vadd.f32 %v1215_v37, %v991_v48 }
 0x1f8   : > { %v1031_v39 = vadd.f32 %v1215_v37, %v992_v41  ;;  %v1032_v40 = vadd.f32 %v1215_v37, %v993_v12  ;;  %v1033_v42 = vadd.f32 %v1215_v37, %v994_v46  ;;  %v1034_v44 = vadd.f32 %v1215_v37, %v995_v45 }
 0x1f9   : > { %v1035_v50 = vadd.f32 %v1215_v37, %v996_v49  ;;  %v1036_v51 = vadd.f32 %v1215_v37, %v997_v57  ;;  %v1037_v58 = vadd.f32 %v1215_v37, %v998_v56  ;;  %v1038_v8 = vadd.f32 %v1215_v37, %v999_v52 }
 0x1fa   : > { %v1039_v15 = vadd.f32 %v1215_v37, %v1000_v60  ;;  %v1040_v22 = vadd.f32 %v1215_v37, %v1001_v0  ;;  %v1041_v29 = vadd.f32 %v1215_v37, %v1002_v23  ;;  %v1042_v36 = vadd.f32 %v1215_v37, %v1003_v28 }
 0x1fb   : > { %v2089_v43 = vadd.f32 %v1215_v37, %v1004_v54  ;;  %v2091_v53 = vadd.f32 %v1215_v37, %v1005_v55  ;;  %v2093_v61 = vadd.f32 %v1215_v37, %v1006_v1  ;;  %v2095_v5 = vadd.f32 %v1215_v37, %v1007_v13 }
 0x1fc   : > { %v2097_v16 = vadd.f32 %v1215_v37, %v1008_v59  ;;  %v2099_v21 = vadd.f32 %v1215_v37, %v1009_v62  ;;  %v2101_v19 = vadd.f32 %v1215_v37, %v1010_v63  ;;  %v2103_v24 = vadd.f32 %v1215_v37, %v1011_v2 }
 0x1fd   : > { %v2110_v27 = vadd.f32 %v1215_v37, %v1012_v3  ;;  %v2112_v31 = vadd.f32 %v1215_v37, %v1013_v6  ;;  %v2114_v30 = vadd.f32 %v1215_v37, %v1014_v7  ;;  %v2116_v34 = vadd.f32 %v1215_v37, %v1015_v10 }
 0x1fe   : > { %v1055_v9 = vmax.f32 %v1023_v11, 0.0  ;;  %v1056_v38 = vmax.f32 %v1024_v14, 0.0  ;;  %v1057_v32 = vmax.f32 %v1025_v17, 0.0  ;;  %v1058_v33 = vmax.f32 %v1026_v18, 0.0 }
 0x1ff   : > { %v1059_v35 = vmax.f32 %v1027_v20, 0.0  ;;  %v1060_v47 = vmax.f32 %v1028_v4, 0.0  ;;  %v1061_v48 = vmax.f32 %v1029_v25, 0.0  ;;  %v1062_v41 = vmax.f32 %v1030_v26, 0.0 }
 0x200   : > { %v1063_v12 = vmax.f32 %v1031_v39, 0.0  ;;  %v1064_v46 = vmax.f32 %v1032_v40, 0.0  ;;  %v1065_v45 = vmax.f32 %v1033_v42, 0.0  ;;  %v1066_v49 = vmax.f32 %v1034_v44, 0.0  ;;  %1087 = vst.msk [vmem:[%s2108_s27] sm:$0xff] %vm252_vm0, %v1055_v9  ;;  %1088 = vst.msk [vmem:[%s2108_s27 + $0x8] sm:$0xff] %vm252_vm0, %v1056_v38 }
 0x201   : > { %1089 = vst.msk [vmem:[%s2108_s27 + $0x10] sm:$0xff] %vm252_vm0, %v1057_v32  ;;  %1090 = vst.msk [vmem:[%s2108_s27 + $0x18] sm:$0xff] %vm252_vm0, %v1058_v33  ;;  %v1067_v57 = vmax.f32 %v1035_v50, 0.0  ;;  %v1068_v56 = vmax.f32 %v1036_v51, 0.0  ;;  %v1069_v52 = vmax.f32 %v1037_v58, 0.0  ;;  %v1070_v60 = vmax.f32 %v1038_v8, 0.0 }
 0x202   : > { %1091 = vst.msk [vmem:[%s2108_s27 + $0x20] sm:$0xff] %vm252_vm0, %v1059_v35  ;;  %1092 = vst.msk [vmem:[%s2108_s27 + $0x28] sm:$0xff] %vm252_vm0, %v1060_v47  ;;  %v1071_v0 = vmax.f32 %v1039_v15, 0.0  ;;  %v1072_v23 = vmax.f32 %v1040_v22, 0.0  ;;  %v1073_v28 = vmax.f32 %v1041_v29, 0.0  ;;  %v1074_v54 = vmax.f32 %v1042_v36, 0.0 }
 0x203   : > { %1093 = vst.msk [vmem:[%s2108_s27 + $0x30] sm:$0xff] %vm252_vm0, %v1061_v48  ;;  %1094 = vst.msk [vmem:[%s2108_s27 + $0x38] sm:$0xff] %vm252_vm0, %v1062_v41  ;;  %v1075_v55 = vmax.f32 %v2089_v43, 0.0  ;;  %v1076_v1 = vmax.f32 %v2091_v53, 0.0  ;;  %v1077_v13 = vmax.f32 %v2093_v61, 0.0  ;;  %v1078_v37 = vmax.f32 %v2095_v5, 0.0 }
 0x204   : > { %1095 = vst.msk [vmem:[%s2108_s27 + $0x40] sm:$0xff] %vm252_vm0, %v1063_v12  ;;  %1096 = vst.msk [vmem:[%s2108_s27 + $0x48] sm:$0xff] %vm252_vm0, %v1064_v46  ;;  %v1079_v59 = vmax.f32 %v2097_v16, 0.0  ;;  %v1080_v62 = vmax.f32 %v2099_v21, 0.0  ;;  %v1081_v63 = vmax.f32 %v2101_v19, 0.0  ;;  %v1082_v2 = vmax.f32 %v2103_v24, 0.0 }
 0x205   : > { %1097 = vst.msk [vmem:[%s2108_s27 + $0x50] sm:$0xff] %vm252_vm0, %v1065_v45  ;;  %1098 = vst.msk [vmem:[%s2108_s27 + $0x58] sm:$0xff] %vm252_vm0, %v1066_v49  ;;  %v1083_v3 = vmax.f32 %v2110_v27, 0.0  ;;  %v1084_v6 = vmax.f32 %v2112_v31, 0.0  ;;  %v1085_v7 = vmax.f32 %v2114_v30, 0.0  ;;  %v1086_v10 = vmax.f32 %v2116_v34, 0.0 }
 0x206   : > { %1099 = vst.msk [vmem:[%s2108_s27 + $0x60] sm:$0xff] %vm252_vm0, %v1067_v57  ;;  %1100 = vst.msk [vmem:[%s2108_s27 + $0x68] sm:$0xff] %vm252_vm0, %v1068_v56 }
 0x207   : > { %1101 = vst.msk [vmem:[%s2108_s27 + $0x70] sm:$0xff] %vm252_vm0, %v1069_v52  ;;  %1102 = vst.msk [vmem:[%s2108_s27 + $0x78] sm:$0xff] %vm252_vm0, %v1070_v60 }
 0x208   : > { %1103 = vst.msk [vmem:[%s2108_s27 + $0x80] sm:$0xff] %vm252_vm0, %v1071_v0  ;;  %1104 = vst.msk [vmem:[%s2108_s27 + $0x88] sm:$0xff] %vm252_vm0, %v1072_v23 }
 0x209   : > { %1105 = vst.msk [vmem:[%s2108_s27 + $0x90] sm:$0xff] %vm252_vm0, %v1073_v28  ;;  %1106 = vst.msk [vmem:[%s2108_s27 + $0x98] sm:$0xff] %vm252_vm0, %v1074_v54 }
 0x20a   : > { %1107 = vst.msk [vmem:[%s2108_s27 + $0xa0] sm:$0xff] %vm252_vm0, %v1075_v55  ;;  %1108 = vst.msk [vmem:[%s2108_s27 + $0xa8] sm:$0xff] %vm252_vm0, %v1076_v1 }
 0x20b   : > { %1109 = vst.msk [vmem:[%s2108_s27 + $0xb0] sm:$0xff] %vm252_vm0, %v1077_v13  ;;  %1110 = vst.msk [vmem:[%s2108_s27 + $0xb8] sm:$0xff] %vm252_vm0, %v1078_v37 }
 0x20c   : > { %1111 = vst.msk [vmem:[%s2108_s27 + $0xc0] sm:$0xff] %vm252_vm0, %v1079_v59  ;;  %1112 = vst.msk [vmem:[%s2108_s27 + $0xc8] sm:$0xff] %vm252_vm0, %v1080_v62 }
 0x20d   : > { %1113 = vst.msk [vmem:[%s2108_s27 + $0xd0] sm:$0xff] %vm252_vm0, %v1081_v63  ;;  %1114 = vst.msk [vmem:[%s2108_s27 + $0xd8] sm:$0xff] %vm252_vm0, %v1082_v2 }
 0x20e   : > { %1115 = vst.msk [vmem:[%s2108_s27 + $0xe0] sm:$0xff] %vm252_vm0, %v1083_v3  ;;  %1116 = vst.msk [vmem:[%s2108_s27 + $0xe8] sm:$0xff] %vm252_vm0, %v1084_v6 }
 0x20f   : > { %1117 = vst.msk [vmem:[%s2108_s27 + $0xf0] sm:$0xff] %vm252_vm0, %v1085_v7  ;;  %1118 = vst.msk [vmem:[%s2108_s27 + $0xf8] sm:$0xff] %vm252_vm0, %v1086_v10 }
 0x210 PF: > { %s14_s17 = sadd.s32 1, %s1333_s17   ;;  %s2208_s15 = smov %s1329_s16 }
 0x211   : > { %p11_p5 = scmp.ge.s32.totalorder %s14_s17, 4   ;;  %s2209_s16 = smov %s2211_s18 }
 0x213   :  { %13 = sbr.rel (!%p11_p5) target bundleno = 2 (0x2), region = 77 }

// kernel: generator2_forward.19
= control target key start
LH: loop header
LB: loop body
LE: loop exit
PB: predicated region body
PF: predicated region fallthrough
CT: control target
= control target key end

     0   :  { %s1361_s15 = smov 0   ;;  %s1363_s16 = smov 0   ;;  %s1950_s0 = inlined_call_operand.vmem [shape: f32[2,256,512], index: 0, kind: input, shape index: {}]   ;;  %s1951_s1 = inlined_call_operand.vmem [shape: f32[512,3], index: 1, kind: input, shape index: {}]   ;;  %s1952_s2 = inlined_call_operand.vmem [shape: f32[1,3], index: 2, kind: input, shape index: {}]   ;;  %s1953_s3 = inlined_call_operand.vmem [shape: f32[1,3], index: 3, kind: input, shape index: {}]   ;;  %s1954_s4 = inlined_call_operand.vmem [shape: f32[2,256,3], index: 4, kind: output, shape index: {}]  }
   0x1   :  { %s1365_s17 = smov 0  }
   0x2 LB: > { %s26_s2 = sadd.s32 1, %s1329_s16  ;;  %p1213_p0 = scmp.ge.s32.totalorder %s1333_s17, 1  ;;  %s1333_s17 = sphi %s1365_s17, %s14_s17   ;;  %s1329_s16 = sphi %s1363_s16, %s1956_s16   ;;  %s1325_s15 = sphi %s1361_s15, %s1955_s15  }
   0x3   : > { %p28_p1 = scmp.ge.s32.totalorder %s26_s2, 2  ;;  %p192_p2 = scmp.lt.s32.totalorder %s1333_s17, 3 }
   0x5   : > { %s1958_s2 = smov (%p28_p1, %s26_s2), 0  ;;  %p193_p3 = pnand %p1213_p0, %p192_p2 }
   0x6   : > { %p228_p4 = scmp.lt.s32.totalorder (!%p193_p3), %s1325_s15, 1 }
   0x7   : > { %196 = sbr.rel (%p193_p3) target bundleno = 423 (0x1a7), region = 36 }
   0xc   : > { %v460_v0 = vld [vmem:[%s1951_s1 + $0x78] sm:$0xff]  ;;  %v1335_v2 = vmov 0.0   ;;  %v459_v3 = vld [vmem:[%s1951_s1 + $0x70] sm:$0xff]  ;;  %v458_v5 = vld [vmem:[%s1951_s1 + $0x68] sm:$0xff]  ;;  %s1960_s15 = smov (!%p228_p4, %s1325_s15), 1  ;;  %vm252_vm0 = vcmask 23552  }
   0xd   : > { %v492_v1 = vld [vmem:[%s1951_s1 + $0x178] sm:$0xff]  ;;  %509 = vmatprep.subr.mxu0 %v1335_v2  ;;  %734 = vmatprep.subr.mxu1 %v1335_v2  ;;  %v491_v4 = vld [vmem:[%s1951_s1 + $0x170] sm:$0xff]  ;;  %v490_v6 = vld [vmem:[%s1951_s1 + $0x168] sm:$0xff]  ;;  %s1220_s11 = sshll.u32 %s1960_s15, 10  ;;  %253 = vst.msk [vmem:[#allocation2] sm:$0xff] %vm252_vm0, %v1335_v2  ;;  %s1221_s29 = sshll.u32 %s1960_s15, 8 }
   0xe   : > { %510 = vmatpush1.msra.mxu0 %v460_v0  ;;  %735 = vmatpush1.msra.mxu1 %v492_v1  ;;  %v457_v7 = vld [vmem:[%s1951_s1 + $0x60] sm:$0xff]  ;;  %v456_v9 = vld [vmem:[%s1951_s1 + $0x58] sm:$0xff]  ;;  %v455_v11 = vld [vmem:[%s1951_s1 + $0x50] sm:$0xff]  ;;  %s1627_s20 = scalar_lea.vmem %s1950_s0, %s1220_s11  ;;  %254 = vst.msk [vmem:[#allocation2 + $0x8] sm:$0xff] %vm252_vm0, %v1335_v2  ;;  %s1848_s6 = scalar_lea.vmem %s1954_s4, %s1221_s29 }
   0xf   : > { %511 = vmatprep.subr.mxu0 %v1335_v2  ;;  %736 = vmatprep.subr.mxu1 %v1335_v2  ;;  %v489_v8 = vld [vmem:[%s1951_s1 + $0x160] sm:$0xff]  ;;  %v488_v10 = vld [vmem:[%s1951_s1 + $0x158] sm:$0xff]  ;;  %v487_v12 = vld [vmem:[%s1951_s1 + $0x150] sm:$0xff]  ;;  %255 = vst.msk [vmem:[#allocation2 + $0x10] sm:$0xff] %vm252_vm0, %v1335_v2 }
  0x10   : > { %512 = vmatpush1.msra.mxu0 %v459_v3  ;;  %737 = vmatpush1.msra.mxu1 %v491_v4  ;;  %v454_v13 = vld [vmem:[%s1951_s1 + $0x48] sm:$0xff]  ;;  %v453_v15 = vld [vmem:[%s1951_s1 + $0x40] sm:$0xff]  ;;  %v452_v17 = vld [vmem:[%s1951_s1 + $0x38] sm:$0xff]  ;;  %256 = vst.msk [vmem:[#allocation2 + $0x18] sm:$0xff] %vm252_vm0, %v1335_v2 }
  0x11   : > { %513 = vmatprep.subr.mxu0 %v1335_v2  ;;  %738 = vmatprep.subr.mxu1 %v1335_v2  ;;  %v486_v14 = vld [vmem:[%s1951_s1 + $0x148] sm:$0xff]  ;;  %v485_v16 = vld [vmem:[%s1951_s1 + $0x140] sm:$0xff]  ;;  %v484_v18 = vld [vmem:[%s1951_s1 + $0x138] sm:$0xff]  ;;  %257 = vst.msk [vmem:[#allocation2 + $0x20] sm:$0xff] %vm252_vm0, %v1335_v2 }
  0x12   : > { %514 = vmatpush1.msra.mxu0 %v458_v5  ;;  %739 = vmatpush1.msra.mxu1 %v490_v6  ;;  %v451_v19 = vld [vmem:[%s1951_s1 + $0x30] sm:$0xff]  ;;  %v450_v21 = vld [vmem:[%s1951_s1 + $0x28] sm:$0xff]  ;;  %v449_v23 = vld [vmem:[%s1951_s1 + $0x20] sm:$0xff]  ;;  %258 = vst.msk [vmem:[#allocation2 + $0x28] sm:$0xff] %vm252_vm0, %v1335_v2 }
  0x13   : > { %515 = vmatprep.subr.mxu0 %v1335_v2  ;;  %740 = vmatprep.subr.mxu1 %v1335_v2  ;;  %v483_v20 = vld [vmem:[%s1951_s1 + $0x130] sm:$0xff]  ;;  %v482_v22 = vld [vmem:[%s1951_s1 + $0x128] sm:$0xff]  ;;  %v481_v24 = vld [vmem:[%s1951_s1 + $0x120] sm:$0xff]  ;;  %259 = vst.msk [vmem:[#allocation2 + $0x30] sm:$0xff] %vm252_vm0, %v1335_v2 }
  0x14   : > { %516 = vmatpush1.msra.mxu0 %v457_v7  ;;  %741 = vmatpush1.msra.mxu1 %v489_v8  ;;  %v448_v25 = vld [vmem:[%s1951_s1 + $0x18] sm:$0xff]  ;;  %v447_v27 = vld [vmem:[%s1951_s1 + $0x10] sm:$0xff]  ;;  %v446_v29 = vld [vmem:[%s1951_s1 + $0x8] sm:$0xff]  ;;  %260 = vst.msk [vmem:[#allocation2 + $0x38] sm:$0xff] %vm252_vm0, %v1335_v2 }
  0x15   : > { %517 = vmatprep.subr.mxu0 %v1335_v2  ;;  %742 = vmatprep.subr.mxu1 %v1335_v2  ;;  %v480_v26 = vld [vmem:[%s1951_s1 + $0x118] sm:$0xff]  ;;  %v479_v28 = vld [vmem:[%s1951_s1 + $0x110] sm:$0xff]  ;;  %v478_v30 = vld [vmem:[%s1951_s1 + $0x108] sm:$0xff]  ;;  %261 = vst.msk [vmem:[#allocation2 + $0x40] sm:$0xff] %vm252_vm0, %v1335_v2 }
  0x16   : > { %518 = vmatpush1.msra.mxu0 %v456_v9  ;;  %743 = vmatpush1.msra.mxu1 %v488_v10  ;;  %v445_v31 = vld [vmem:[%s1951_s1] sm:$0xff]  ;;  %v476_v33 = vld [vmem:[%s1951_s1 + $0xf8] sm:$0xff]  ;;  %v475_v35 = vld [vmem:[%s1951_s1 + $0xf0] sm:$0xff]  ;;  %262 = vst.msk [vmem:[#allocation2 + $0x48] sm:$0xff] %vm252_vm0, %v1335_v2 }
  0x17   : > { %519 = vmatprep.subr.mxu0 %v1335_v2  ;;  %744 = vmatprep.subr.mxu1 %v1335_v2  ;;  %v477_v32 = vld [vmem:[%s1951_s1 + $0x100] sm:$0xff]  ;;  %v508_v34 = vld [vmem:[%s1951_s1 + $0x1f8] sm:$0xff]  ;;  %v507_v36 = vld [vmem:[%s1951_s1 + $0x1f0] sm:$0xff]  ;;  %263 = vst.msk [vmem:[#allocation2 + $0x50] sm:$0xff] %vm252_vm0, %v1335_v2 }
  0x18   : > { %520 = vmatpush1.msra.mxu0 %v455_v11  ;;  %745 = vmatpush1.msra.mxu1 %v487_v12  ;;  %v474_v37 = vld [vmem:[%s1951_s1 + $0xe8] sm:$0xff]  ;;  %v473_v39 = vld [vmem:[%s1951_s1 + $0xe0] sm:$0xff]  ;;  %v472_v41 = vld [vmem:[%s1951_s1 + $0xd8] sm:$0xff]  ;;  %264 = vst.msk [vmem:[#allocation2 + $0x58] sm:$0xff] %vm252_vm0, %v1335_v2 }
  0x19   : > { %521 = vmatprep.subr.mxu0 %v1335_v2  ;;  %746 = vmatprep.subr.mxu1 %v1335_v2  ;;  %v506_v38 = vld [vmem:[%s1951_s1 + $0x1e8] sm:$0xff]  ;;  %v505_v40 = vld [vmem:[%s1951_s1 + $0x1e0] sm:$0xff]  ;;  %v504_v42 = vld [vmem:[%s1951_s1 + $0x1d8] sm:$0xff]  ;;  %265 = vst.msk [vmem:[#allocation2 + $0x60] sm:$0xff] %vm252_vm0, %v1335_v2 }
  0x1a   : > { %522 = vmatpush1.msra.mxu0 %v454_v13  ;;  %747 = vmatpush1.msra.mxu1 %v486_v14  ;;  %v471_v43 = vld [vmem:[%s1951_s1 + $0xd0] sm:$0xff]  ;;  %v470_v45 = vld [vmem:[%s1951_s1 + $0xc8] sm:$0xff]  ;;  %v469_v47 = vld [vmem:[%s1951_s1 + $0xc0] sm:$0xff]  ;;  %266 = vst.msk [vmem:[#allocation2 + $0x68] sm:$0xff] %vm252_vm0, %v1335_v2 }
  0x1b   : > { %523 = vmatprep.subr.mxu0 %v1335_v2  ;;  %748 = vmatprep.subr.mxu1 %v1335_v2  ;;  %v503_v44 = vld [vmem:[%s1951_s1 + $0x1d0] sm:$0xff]  ;;  %v502_v46 = vld [vmem:[%s1951_s1 + $0x1c8] sm:$0xff]  ;;  %v501_v48 = vld [vmem:[%s1951_s1 + $0x1c0] sm:$0xff]  ;;  %267 = vst.msk [vmem:[#allocation2 + $0x70] sm:$0xff] %vm252_vm0, %v1335_v2 }
  0x1c   : > { %524 = vmatpush1.msra.mxu0 %v453_v15  ;;  %749 = vmatpush1.msra.mxu1 %v485_v16  ;;  %v468_v49 = vld [vmem:[%s1951_s1 + $0xb8] sm:$0xff]  ;;  %v467_v51 = vld [vmem:[%s1951_s1 + $0xb0] sm:$0xff]  ;;  %v466_v53 = vld [vmem:[%s1951_s1 + $0xa8] sm:$0xff]  ;;  %268 = vst.msk [vmem:[#allocation2 + $0x78] sm:$0xff] %vm252_vm0, %v1335_v2 }
  0x1d   : > { %525 = vmatprep.subr.mxu0 %v1335_v2  ;;  %750 = vmatprep.subr.mxu1 %v1335_v2  ;;  %v500_v50 = vld [vmem:[%s1951_s1 + $0x1b8] sm:$0xff]  ;;  %v499_v52 = vld [vmem:[%s1951_s1 + $0x1b0] sm:$0xff]  ;;  %v498_v54 = vld [vmem:[%s1951_s1 + $0x1a8] sm:$0xff]  ;;  %269 = vst.msk [vmem:[#allocation2 + $0x80] sm:$0xff] %vm252_vm0, %v1335_v2 }
  0x1e   : > { %526 = vmatpush1.msra.mxu0 %v452_v17  ;;  %751 = vmatpush1.msra.mxu1 %v484_v18  ;;  %v465_v55 = vld [vmem:[%s1951_s1 + $0xa0] sm:$0xff]  ;;  %v464_v57 = vld [vmem:[%s1951_s1 + $0x98] sm:$0xff]  ;;  %v463_v59 = vld [vmem:[%s1951_s1 + $0x90] sm:$0xff]  ;;  %270 = vst.msk [vmem:[#allocation2 + $0x88] sm:$0xff] %vm252_vm0, %v1335_v2 }
  0x1f   : > { %527 = vmatprep.subr.mxu0 %v1335_v2  ;;  %752 = vmatprep.subr.mxu1 %v1335_v2  ;;  %v497_v56 = vld [vmem:[%s1951_s1 + $0x1a0] sm:$0xff]  ;;  %v496_v58 = vld [vmem:[%s1951_s1 + $0x198] sm:$0xff]  ;;  %v495_v60 = vld [vmem:[%s1951_s1 + $0x190] sm:$0xff]  ;;  %271 = vst.msk [vmem:[#allocation2 + $0x90] sm:$0xff] %vm252_vm0, %v1335_v2 }
  0x20   : > { %528 = vmatpush1.msra.mxu0 %v451_v19  ;;  %753 = vmatpush1.msra.mxu1 %v483_v20  ;;  %v462_v61 = vld [vmem:[%s1951_s1 + $0x88] sm:$0xff]  ;;  %v461_v63 = vld [vmem:[%s1951_s1 + $0x80] sm:$0xff]  ;;  %v320_v3 = vld [vmem:[%s1627_s20 + $0x18] sm:$0xff]  ;;  %272 = vst.msk [vmem:[#allocation2 + $0x98] sm:$0xff] %vm252_vm0, %v1335_v2 }
  0x21   : > { %529 = vmatprep.subr.mxu0 %v1335_v2  ;;  %754 = vmatprep.subr.mxu1 %v1335_v2  ;;  %v494_v62 = vld [vmem:[%s1951_s1 + $0x188] sm:$0xff]  ;;  %v493_v1 = vld [vmem:[%s1951_s1 + $0x180] sm:$0xff]  ;;  %v319_v5 = vld [vmem:[%s1627_s20 + $0x10] sm:$0xff]  ;;  %273 = vst.msk [vmem:[#allocation2 + $0xa0] sm:$0xff] %vm252_vm0, %v1335_v2 }
  0x22   : > { %530 = vmatpush1.msra.mxu0 %v450_v21  ;;  %755 = vmatpush1.msra.mxu1 %v482_v22  ;;  %v318_v0 = vld [vmem:[%s1627_s20 + $0x8] sm:$0xff]  ;;  %v317_v4 = vld [vmem:[%s1627_s20] sm:$0xff]  ;;  %v324_v7 = vld [vmem:[%s1627_s20 + $0x38] sm:$0xff]  ;;  %274 = vst.msk [vmem:[#allocation2 + $0xa8] sm:$0xff] %vm252_vm0, %v1335_v2 }
  0x23   : > { %531 = vmatprep.subr.mxu0 %v1335_v2  ;;  %756 = vmatprep.subr.mxu1 %v1335_v2  ;;  %v322_v6 = vld [vmem:[%s1627_s20 + $0x28] sm:$0xff]  ;;  %v321_v8 = vld [vmem:[%s1627_s20 + $0x20] sm:$0xff]  ;;  %v323_v9 = vld [vmem:[%s1627_s20 + $0x30] sm:$0xff]  ;;  %275 = vst.msk [vmem:[#allocation2 + $0xb0] sm:$0xff] %vm252_vm0, %v1335_v2 }
  0x24   : > { %532 = vmatpush1.msra.mxu0 %v449_v23  ;;  %757 = vmatpush1.msra.mxu1 %v481_v24  ;;  %v326_v10 = vld [vmem:[%s1627_s20 + $0x48] sm:$0xff]  ;;  %v328_v11 = vld [vmem:[%s1627_s20 + $0x58] sm:$0xff]  ;;  %v325_v12 = vld [vmem:[%s1627_s20 + $0x40] sm:$0xff]  ;;  %276 = vst.msk [vmem:[#allocation2 + $0xb8] sm:$0xff] %vm252_vm0, %v1335_v2 }
  0x25   : > { %533 = vmatprep.subr.mxu0 %v1335_v2  ;;  %758 = vmatprep.subr.mxu1 %v1335_v2  ;;  %v327_v13 = vld [vmem:[%s1627_s20 + $0x50] sm:$0xff]  ;;  %v330_v14 = vld [vmem:[%s1627_s20 + $0x68] sm:$0xff]  ;;  %v332_v15 = vld [vmem:[%s1627_s20 + $0x78] sm:$0xff]  ;;  %277 = vst.msk [vmem:[#allocation2 + $0xc0] sm:$0xff] %vm252_vm0, %v1335_v2 }
  0x26   : > { %534 = vmatpush1.msra.mxu0 %v448_v25  ;;  %759 = vmatpush1.msra.mxu1 %v480_v26  ;;  %v329_v16 = vld [vmem:[%s1627_s20 + $0x60] sm:$0xff]  ;;  %v331_v17 = vld [vmem:[%s1627_s20 + $0x70] sm:$0xff]  ;;  %v334_v18 = vld [vmem:[%s1627_s20 + $0x88] sm:$0xff]  ;;  %278 = vst.msk [vmem:[#allocation2 + $0xc8] sm:$0xff] %vm252_vm0, %v1335_v2 }
  0x27   : > { %535 = vmatprep.subr.mxu0 %v1335_v2  ;;  %760 = vmatprep.subr.mxu1 %v1335_v2  ;;  %v336_v19 = vld [vmem:[%s1627_s20 + $0x98] sm:$0xff]  ;;  %v333_v20 = vld [vmem:[%s1627_s20 + $0x80] sm:$0xff]  ;;  %v335_v21 = vld [vmem:[%s1627_s20 + $0x90] sm:$0xff]  ;;  %279 = vst.msk [vmem:[#allocation2 + $0xd0] sm:$0xff] %vm252_vm0, %v1335_v2 }
  0x28   : > { %536 = vmatpush1.msra.mxu0 %v447_v27  ;;  %761 = vmatpush1.msra.mxu1 %v479_v28  ;;  %v338_v22 = vld [vmem:[%s1627_s20 + $0xa8] sm:$0xff]  ;;  %v340_v23 = vld [vmem:[%s1627_s20 + $0xb8] sm:$0xff]  ;;  %v337_v24 = vld [vmem:[%s1627_s20 + $0xa0] sm:$0xff]  ;;  %280 = vst.msk [vmem:[#allocation2 + $0xd8] sm:$0xff] %vm252_vm0, %v1335_v2 }
  0x29   : > { %537 = vmatprep.subr.mxu0 %v1335_v2  ;;  %762 = vmatprep.subr.mxu1 %v1335_v2  ;;  %v339_v25 = vld [vmem:[%s1627_s20 + $0xb0] sm:$0xff]  ;;  %v342_v26 = vld [vmem:[%s1627_s20 + $0xc8] sm:$0xff]  ;;  %v344_v27 = vld [vmem:[%s1627_s20 + $0xd8] sm:$0xff]  ;;  %281 = vst.msk [vmem:[#allocation2 + $0xe0] sm:$0xff] %vm252_vm0, %v1335_v2 }
  0x2a   : > { %538 = vmatpush1.msra.mxu0 %v446_v29  ;;  %763 = vmatpush1.msra.mxu1 %v478_v30  ;;  %v341_v28 = vld [vmem:[%s1627_s20 + $0xc0] sm:$0xff]  ;;  %v343_v29 = vld [vmem:[%s1627_s20 + $0xd0] sm:$0xff]  ;;  %v346_v30 = vld [vmem:[%s1627_s20 + $0xe8] sm:$0xff]  ;;  %282 = vst.msk [vmem:[#allocation2 + $0xe8] sm:$0xff] %vm252_vm0, %v1335_v2 }
  0x2b   : > { %539 = vmatprep.subr.mxu0 %v1335_v2  ;;  %764 = vmatprep.subr.mxu1 %v1335_v2  ;;  %283 = vst.msk [vmem:[#allocation2 + $0xf0] sm:$0xff] %vm252_vm0, %v1335_v2  ;;  %284 = vst.msk [vmem:[#allocation2 + $0xf8] sm:$0xff] %vm252_vm0, %v1335_v2 }
  0x2c   : > { %540 = vmatpush1.msra.mxu0 %v445_v31  ;;  %765 = vmatpush1.msra.mxu1 %v477_v32  ;;  %v348_v31 = vld [vmem:[%s1627_s20 + $0xf8] sm:$0xff]  ;;  %v345_v32 = vld [vmem:[%s1627_s20 + $0xe0] sm:$0xff] }
  0x2d   : > { %541 = vmatprep.subr.mxu0 %v1335_v2  ;;  %766 = vmatprep.subr.mxu1 %v1335_v2 }
  0x2e   : > { %542 = vmatpush2.msra.mxu0 %v476_v33  ;;  %767 = vmatpush2.msra.mxu1 %v508_v34  ;;  %v347_v33 = vld [vmem:[%s1627_s20 + $0xf0] sm:$0xff]  ;;  %v350_v34 = vld [vmem:[%s1627_s20 + $0x108] sm:$0xff] }
  0x2f   : > { %543 = vmatprep.subr.mxu0 %v1335_v2  ;;  %768 = vmatprep.subr.mxu1 %v1335_v2 }
  0x30   : > { %544 = vmatpush2.msra.mxu0 %v475_v35  ;;  %769 = vmatpush2.msra.mxu1 %v507_v36  ;;  %v352_v35 = vld [vmem:[%s1627_s20 + $0x118] sm:$0xff]  ;;  %v349_v36 = vld [vmem:[%s1627_s20 + $0x100] sm:$0xff] }
  0x31   : > { %545 = vmatprep.subr.mxu0 %v1335_v2  ;;  %770 = vmatprep.subr.mxu1 %v1335_v2 }
  0x32   : > { %546 = vmatpush2.msra.mxu0 %v474_v37  ;;  %771 = vmatpush2.msra.mxu1 %v506_v38  ;;  %v351_v37 = vld [vmem:[%s1627_s20 + $0x110] sm:$0xff]  ;;  %v354_v38 = vld [vmem:[%s1627_s20 + $0x128] sm:$0xff] }
  0x33   : > { %547 = vmatprep.subr.mxu0 %v1335_v2  ;;  %772 = vmatprep.subr.mxu1 %v1335_v2 }
  0x34   : > { %548 = vmatpush2.msra.mxu0 %v473_v39  ;;  %773 = vmatpush2.msra.mxu1 %v505_v40  ;;  %v356_v39 = vld [vmem:[%s1627_s20 + $0x138] sm:$0xff]  ;;  %v353_v40 = vld [vmem:[%s1627_s20 + $0x120] sm:$0xff] }
  0x35   : > { %549 = vmatprep.subr.mxu0 %v1335_v2  ;;  %774 = vmatprep.subr.mxu1 %v1335_v2 }
  0x36   : > { %550 = vmatpush2.msra.mxu0 %v472_v41  ;;  %775 = vmatpush2.msra.mxu1 %v504_v42  ;;  %v355_v41 = vld [vmem:[%s1627_s20 + $0x130] sm:$0xff]  ;;  %v358_v42 = vld [vmem:[%s1627_s20 + $0x148] sm:$0xff] }
  0x37   : > { %551 = vmatprep.subr.mxu0 %v1335_v2  ;;  %776 = vmatprep.subr.mxu1 %v1335_v2 }
  0x38   : > { %552 = vmatpush2.msra.mxu0 %v471_v43  ;;  %777 = vmatpush2.msra.mxu1 %v503_v44  ;;  %v360_v43 = vld [vmem:[%s1627_s20 + $0x158] sm:$0xff]  ;;  %v357_v44 = vld [vmem:[%s1627_s20 + $0x140] sm:$0xff] }
  0x39   : > { %553 = vmatprep.subr.mxu0 %v1335_v2  ;;  %778 = vmatprep.subr.mxu1 %v1335_v2 }
  0x3a   : > { %554 = vmatpush2.msra.mxu0 %v470_v45  ;;  %779 = vmatpush2.msra.mxu1 %v502_v46  ;;  %v359_v45 = vld [vmem:[%s1627_s20 + $0x150] sm:$0xff]  ;;  %v362_v46 = vld [vmem:[%s1627_s20 + $0x168] sm:$0xff] }
  0x3b   : > { %555 = vmatprep.subr.mxu0 %v1335_v2  ;;  %780 = vmatprep.subr.mxu1 %v1335_v2 }
  0x3c   : > { %556 = vmatpush2.msra.mxu0 %v469_v47  ;;  %781 = vmatpush2.msra.mxu1 %v501_v48  ;;  %v364_v47 = vld [vmem:[%s1627_s20 + $0x178] sm:$0xff]  ;;  %v361_v48 = vld [vmem:[%s1627_s20 + $0x160] sm:$0xff] }
  0x3d   : > { %557 = vmatprep.subr.mxu0 %v1335_v2  ;;  %782 = vmatprep.subr.mxu1 %v1335_v2 }
  0x3e   : > { %558 = vmatpush2.msra.mxu0 %v468_v49  ;;  %783 = vmatpush2.msra.mxu1 %v500_v50  ;;  %v363_v49 = vld [vmem:[%s1627_s20 + $0x170] sm:$0xff]  ;;  %v366_v50 = vld [vmem:[%s1627_s20 + $0x188] sm:$0xff] }
  0x3f   : > { %559 = vmatprep.subr.mxu0 %v1335_v2  ;;  %784 = vmatprep.subr.mxu1 %v1335_v2 }
  0x40   : > { %560 = vmatpush2.msra.mxu0 %v467_v51  ;;  %785 = vmatpush2.msra.mxu1 %v499_v52  ;;  %v368_v51 = vld [vmem:[%s1627_s20 + $0x198] sm:$0xff]  ;;  %v365_v52 = vld [vmem:[%s1627_s20 + $0x180] sm:$0xff] }
  0x41   : > { %561 = vmatprep.subr.mxu0 %v1335_v2  ;;  %786 = vmatprep.subr.mxu1 %v1335_v2 }
  0x42   : > { %562 = vmatpush2.msra.mxu0 %v466_v53  ;;  %787 = vmatpush2.msra.mxu1 %v498_v54  ;;  %v367_v53 = vld [vmem:[%s1627_s20 + $0x190] sm:$0xff]  ;;  %v370_v54 = vld [vmem:[%s1627_s20 + $0x1a8] sm:$0xff] }
  0x43   : > { %563 = vmatprep.subr.mxu0 %v1335_v2  ;;  %788 = vmatprep.subr.mxu1 %v1335_v2 }
  0x44   : > { %564 = vmatpush2.msra.mxu0 %v465_v55  ;;  %789 = vmatpush2.msra.mxu1 %v497_v56  ;;  %v372_v55 = vld [vmem:[%s1627_s20 + $0x1b8] sm:$0xff]  ;;  %v369_v56 = vld [vmem:[%s1627_s20 + $0x1a0] sm:$0xff] }
  0x45   : > { %565 = vmatprep.subr.mxu0 %v1335_v2  ;;  %790 = vmatprep.subr.mxu1 %v1335_v2 }
  0x46   : > { %566 = vmatpush2.msra.mxu0 %v464_v57  ;;  %791 = vmatpush2.msra.mxu1 %v496_v58  ;;  %v371_v57 = vld [vmem:[%s1627_s20 + $0x1b0] sm:$0xff]  ;;  %v374_v58 = vld [vmem:[%s1627_s20 + $0x1c8] sm:$0xff] }
  0x47   : > { %567 = vmatprep.subr.mxu0 %v1335_v2  ;;  %792 = vmatprep.subr.mxu1 %v1335_v2 }
  0x48   : > { %568 = vmatpush2.msra.mxu0 %v463_v59  ;;  %793 = vmatpush2.msra.mxu1 %v495_v60  ;;  %v376_v59 = vld [vmem:[%s1627_s20 + $0x1d8] sm:$0xff]  ;;  %v373_v60 = vld [vmem:[%s1627_s20 + $0x1c0] sm:$0xff] }
  0x49   : > { %569 = vmatprep.subr.mxu0 %v1335_v2  ;;  %794 = vmatprep.subr.mxu1 %v1335_v2 }
  0x4a   : > { %570 = vmatpush2.msra.mxu0 %v462_v61  ;;  %795 = vmatpush2.msra.mxu1 %v494_v62  ;;  %v375_v61 = vld [vmem:[%s1627_s20 + $0x1d0] sm:$0xff]  ;;  %v378_v62 = vld [vmem:[%s1627_s20 + $0x1e8] sm:$0xff] }
  0x4b   : > { %571 = vmatprep.subr.mxu0 %v1335_v2  ;;  %796 = vmatprep.subr.mxu1 %v1335_v2  ;;  %v387_v2 = vld [vmem:[%s1627_s20 + $0x230] sm:$0xff] }
  0x4c   : > { %572 = vmatpush2.msra.mxu0 %v461_v63  ;;  %573 = vmatprep.mubr.f32.mxu0 %v318_v0  ;;  %v380_v63 = vld [vmem:[%s1627_s20 + $0x1f8] sm:$0xff]  ;;  %v377_v0 = vld [vmem:[%s1627_s20 + $0x1e0] sm:$0xff] }
  0x4d   : > { %797 = vmatpush2.msra.mxu1 %v493_v1  ;;  %798 = vmatprep.mubr.f32.mxu1 %v320_v3  ;;  %v379_v1 = vld [vmem:[%s1627_s20 + $0x1f0] sm:$0xff]  ;;  %v382_v3 = vld [vmem:[%s1627_s20 + $0x208] sm:$0xff] }
  0x4e   : > { %574 = vmatmul.mubr.f32.vlgmr.msra.gmra.mxu0 %v317_v4  ;;  %799 = vmatmul.mubr.f32.vlgmr.msra.gmra.mxu1 %v319_v5  ;;  %v384_v4 = vld [vmem:[%s1627_s20 + $0x218] sm:$0xff]  ;;  %v381_v5 = vld [vmem:[%s1627_s20 + $0x200] sm:$0xff] }
  0x4f   : > { %578 = vmatprep.mubr.f32.mxu0 %v322_v6  ;;  %803 = vmatprep.mubr.f32.mxu1 %v324_v7  ;;  %v383_v6 = vld [vmem:[%s1627_s20 + $0x210] sm:$0xff]  ;;  %v386_v7 = vld [vmem:[%s1627_s20 + $0x228] sm:$0xff] }
  0x52   : > { %579 = vmatmul.mubr.f32.gmra.mxu0 %v321_v8  ;;  %804 = vmatmul.mubr.f32.gmra.mxu1 %v323_v9  ;;  %v388_v8 = vld [vmem:[%s1627_s20 + $0x238] sm:$0xff]  ;;  %v385_v9 = vld [vmem:[%s1627_s20 + $0x220] sm:$0xff] }
  0x53   : > { %583 = vmatprep.mubr.f32.mxu0 %v326_v10  ;;  %808 = vmatprep.mubr.f32.mxu1 %v328_v11  ;;  %v390_v10 = vld [vmem:[%s1627_s20 + $0x248] sm:$0xff]  ;;  %v392_v11 = vld [vmem:[%s1627_s20 + $0x258] sm:$0xff] }
  0x56   : > { %584 = vmatmul.mubr.f32.gmra.mxu0 %v325_v12  ;;  %809 = vmatmul.mubr.f32.gmra.mxu1 %v327_v13  ;;  %v389_v12 = vld [vmem:[%s1627_s20 + $0x240] sm:$0xff]  ;;  %v391_v13 = vld [vmem:[%s1627_s20 + $0x250] sm:$0xff] }
  0x57   : > { %588 = vmatprep.mubr.f32.mxu0 %v330_v14  ;;  %813 = vmatprep.mubr.f32.mxu1 %v332_v15  ;;  %v394_v14 = vld [vmem:[%s1627_s20 + $0x268] sm:$0xff]  ;;  %v396_v15 = vld [vmem:[%s1627_s20 + $0x278] sm:$0xff] }
  0x5a   : > { %589 = vmatmul.mubr.f32.gmra.mxu0 %v329_v16  ;;  %814 = vmatmul.mubr.f32.gmra.mxu1 %v331_v17  ;;  %v393_v16 = vld [vmem:[%s1627_s20 + $0x260] sm:$0xff]  ;;  %v395_v17 = vld [vmem:[%s1627_s20 + $0x270] sm:$0xff] }
  0x5b   : > { %593 = vmatprep.mubr.f32.mxu0 %v334_v18  ;;  %818 = vmatprep.mubr.f32.mxu1 %v336_v19  ;;  %v398_v18 = vld [vmem:[%s1627_s20 + $0x288] sm:$0xff]  ;;  %v400_v19 = vld [vmem:[%s1627_s20 + $0x298] sm:$0xff] }
  0x5e   : > { %594 = vmatmul.mubr.f32.gmra.mxu0 %v333_v20  ;;  %819 = vmatmul.mubr.f32.gmra.mxu1 %v335_v21  ;;  %v397_v20 = vld [vmem:[%s1627_s20 + $0x280] sm:$0xff]  ;;  %v399_v21 = vld [vmem:[%s1627_s20 + $0x290] sm:$0xff] }
  0x5f   : > { %598 = vmatprep.mubr.f32.mxu0 %v338_v22  ;;  %823 = vmatprep.mubr.f32.mxu1 %v340_v23  ;;  %v402_v22 = vld [vmem:[%s1627_s20 + $0x2a8] sm:$0xff]  ;;  %v404_v23 = vld [vmem:[%s1627_s20 + $0x2b8] sm:$0xff] }
  0x62   : > { %599 = vmatmul.mubr.f32.gmra.mxu0 %v337_v24  ;;  %824 = vmatmul.mubr.f32.gmra.mxu1 %v339_v25  ;;  %v401_v24 = vld [vmem:[%s1627_s20 + $0x2a0] sm:$0xff]  ;;  %v403_v25 = vld [vmem:[%s1627_s20 + $0x2b0] sm:$0xff] }
  0x63   : > { %603 = vmatprep.mubr.f32.mxu0 %v342_v26  ;;  %828 = vmatprep.mubr.f32.mxu1 %v344_v27  ;;  %v406_v26 = vld [vmem:[%s1627_s20 + $0x2c8] sm:$0xff]  ;;  %v408_v27 = vld [vmem:[%s1627_s20 + $0x2d8] sm:$0xff] }
  0x66   : > { %604 = vmatmul.mubr.f32.gmra.mxu0 %v341_v28  ;;  %829 = vmatmul.mubr.f32.gmra.mxu1 %v343_v29  ;;  %v405_v28 = vld [vmem:[%s1627_s20 + $0x2c0] sm:$0xff]  ;;  %v407_v29 = vld [vmem:[%s1627_s20 + $0x2d0] sm:$0xff] }
  0x67   : > { %608 = vmatprep.mubr.f32.mxu0 %v346_v30  ;;  %833 = vmatprep.mubr.f32.mxu1 %v348_v31  ;;  %v410_v30 = vld [vmem:[%s1627_s20 + $0x2e8] sm:$0xff]  ;;  %v412_v31 = vld [vmem:[%s1627_s20 + $0x2f8] sm:$0xff] }
  0x6a   : > { %609 = vmatmul.mubr.f32.gmra.mxu0 %v345_v32  ;;  %834 = vmatmul.mubr.f32.gmra.mxu1 %v347_v33  ;;  %v409_v32 = vld [vmem:[%s1627_s20 + $0x2e0] sm:$0xff]  ;;  %v411_v33 = vld [vmem:[%s1627_s20 + $0x2f0] sm:$0xff] }
  0x6b   : > { %613 = vmatprep.mubr.f32.mxu0 %v350_v34  ;;  %838 = vmatprep.mubr.f32.mxu1 %v352_v35  ;;  %v414_v34 = vld [vmem:[%s1627_s20 + $0x308] sm:$0xff]  ;;  %v416_v35 = vld [vmem:[%s1627_s20 + $0x318] sm:$0xff] }
  0x6e   : > { %614 = vmatmul.mubr.f32.gmra.mxu0 %v349_v36  ;;  %839 = vmatmul.mubr.f32.gmra.mxu1 %v351_v37  ;;  %v413_v36 = vld [vmem:[%s1627_s20 + $0x300] sm:$0xff]  ;;  %v415_v37 = vld [vmem:[%s1627_s20 + $0x310] sm:$0xff] }
  0x6f   : > { %618 = vmatprep.mubr.f32.mxu0 %v354_v38  ;;  %843 = vmatprep.mubr.f32.mxu1 %v356_v39  ;;  %v418_v38 = vld [vmem:[%s1627_s20 + $0x328] sm:$0xff]  ;;  %v420_v39 = vld [vmem:[%s1627_s20 + $0x338] sm:$0xff] }
  0x72   : > { %619 = vmatmul.mubr.f32.gmra.mxu0 %v353_v40  ;;  %844 = vmatmul.mubr.f32.gmra.mxu1 %v355_v41  ;;  %v417_v40 = vld [vmem:[%s1627_s20 + $0x320] sm:$0xff]  ;;  %v419_v41 = vld [vmem:[%s1627_s20 + $0x330] sm:$0xff] }
  0x73   : > { %623 = vmatprep.mubr.f32.mxu0 %v358_v42  ;;  %848 = vmatprep.mubr.f32.mxu1 %v360_v43  ;;  %v422_v42 = vld [vmem:[%s1627_s20 + $0x348] sm:$0xff]  ;;  %v424_v43 = vld [vmem:[%s1627_s20 + $0x358] sm:$0xff] }
  0x76   : > { %624 = vmatmul.mubr.f32.gmra.mxu0 %v357_v44  ;;  %849 = vmatmul.mubr.f32.gmra.mxu1 %v359_v45  ;;  %v421_v44 = vld [vmem:[%s1627_s20 + $0x340] sm:$0xff]  ;;  %v423_v45 = vld [vmem:[%s1627_s20 + $0x350] sm:$0xff] }
  0x77   : > { %628 = vmatprep.mubr.f32.mxu0 %v362_v46  ;;  %853 = vmatprep.mubr.f32.mxu1 %v364_v47  ;;  %v426_v46 = vld [vmem:[%s1627_s20 + $0x368] sm:$0xff]  ;;  %v428_v47 = vld [vmem:[%s1627_s20 + $0x378] sm:$0xff] }
  0x7a   : > { %629 = vmatmul.mubr.f32.gmra.mxu0 %v361_v48  ;;  %854 = vmatmul.mubr.f32.gmra.mxu1 %v363_v49  ;;  %v425_v48 = vld [vmem:[%s1627_s20 + $0x360] sm:$0xff]  ;;  %v427_v49 = vld [vmem:[%s1627_s20 + $0x370] sm:$0xff] }
  0x7b   : > { %633 = vmatprep.mubr.f32.mxu0 %v366_v50  ;;  %858 = vmatprep.mubr.f32.mxu1 %v368_v51  ;;  %v430_v50 = vld [vmem:[%s1627_s20 + $0x388] sm:$0xff]  ;;  %v432_v51 = vld [vmem:[%s1627_s20 + $0x398] sm:$0xff] }
  0x7e   : > { %634 = vmatmul.mubr.f32.gmra.mxu0 %v365_v52  ;;  %859 = vmatmul.mubr.f32.gmra.mxu1 %v367_v53  ;;  %v429_v52 = vld [vmem:[%s1627_s20 + $0x380] sm:$0xff]  ;;  %v431_v53 = vld [vmem:[%s1627_s20 + $0x390] sm:$0xff] }
  0x7f   : > { %638 = vmatprep.mubr.f32.mxu0 %v370_v54  ;;  %863 = vmatprep.mubr.f32.mxu1 %v372_v55  ;;  %v434_v54 = vld [vmem:[%s1627_s20 + $0x3a8] sm:$0xff]  ;;  %v436_v55 = vld [vmem:[%s1627_s20 + $0x3b8] sm:$0xff] }
  0x82   : > { %639 = vmatmul.mubr.f32.gmra.mxu0 %v369_v56  ;;  %864 = vmatmul.mubr.f32.gmra.mxu1 %v371_v57  ;;  %v433_v56 = vld [vmem:[%s1627_s20 + $0x3a0] sm:$0xff]  ;;  %v435_v57 = vld [vmem:[%s1627_s20 + $0x3b0] sm:$0xff] }
  0x83   : > { %643 = vmatprep.mubr.f32.mxu0 %v374_v58  ;;  %868 = vmatprep.mubr.f32.mxu1 %v376_v59  ;;  %v438_v58 = vld [vmem:[%s1627_s20 + $0x3c8] sm:$0xff]  ;;  %v440_v59 = vld [vmem:[%s1627_s20 + $0x3d8] sm:$0xff] }
  0x86   : > { %644 = vmatmul.mubr.f32.gmra.mxu0 %v373_v60  ;;  %869 = vmatmul.mubr.f32.gmra.mxu1 %v375_v61  ;;  %v437_v60 = vld [vmem:[%s1627_s20 + $0x3c0] sm:$0xff]  ;;  %v439_v61 = vld [vmem:[%s1627_s20 + $0x3d0] sm:$0xff] }
  0x87   : > { %648 = vmatprep.mubr.f32.mxu0 %v378_v62  ;;  %873 = vmatprep.mubr.f32.mxu1 %v380_v63  ;;  %v442_v62 = vld [vmem:[%s1627_s20 + $0x3e8] sm:$0xff]  ;;  %v444_v63 = vld [vmem:[%s1627_s20 + $0x3f8] sm:$0xff] }
  0x8a   : > { %649 = vmatmul.mubr.f32.gmra.mxu0 %v377_v0  ;;  %874 = vmatmul.mubr.f32.gmra.mxu1 %v379_v1  ;;  %v441_v0 = vld [vmem:[%s1627_s20 + $0x3e0] sm:$0xff]  ;;  %v443_v1 = vld [vmem:[%s1627_s20 + $0x3f0] sm:$0xff] }
  0x8b   : > { %653 = vmatprep.mubr.f32.mxu0 %v382_v3  ;;  %878 = vmatprep.mubr.f32.mxu1 %v384_v4  ;;  %v285_v4 = vld [vmem:[#allocation2] sm:$0xff] }
  0x8e   : > { %654 = vmatmul.mubr.f32.gmra.mxu0 %v381_v5  ;;  %879 = vmatmul.mubr.f32.gmra.mxu1 %v383_v6 }
  0x8f   : > { %658 = vmatprep.mubr.f32.mxu0 %v386_v7  ;;  %883 = vmatprep.mubr.f32.mxu1 %v388_v8 }
  0x92   : > { %659 = vmatmul.mubr.f32.gmra.mxu0 %v385_v9  ;;  %884 = vmatmul.mubr.f32.gmra.mxu1 %v387_v2 }
  0x93   : > { %663 = vmatprep.mubr.f32.mxu0 %v390_v10  ;;  %888 = vmatprep.mubr.f32.mxu1 %v392_v11  ;;  %v286_v10 = vld [vmem:[#allocation2 + $0x8] sm:$0xff] }
  0x96   : > { %664 = vmatmul.mubr.f32.gmra.mxu0 %v389_v12  ;;  %889 = vmatmul.mubr.f32.gmra.mxu1 %v391_v13 }
  0x97   : > { %668 = vmatprep.mubr.f32.mxu0 %v394_v14  ;;  %893 = vmatprep.mubr.f32.mxu1 %v396_v15 }
  0x9a   : > { %669 = vmatmul.mubr.f32.gmra.mxu0 %v393_v16  ;;  %894 = vmatmul.mubr.f32.gmra.mxu1 %v395_v17  ;;  %v287_v17 = vld [vmem:[#allocation2 + $0x10] sm:$0xff] }
  0x9b   : > { %673 = vmatprep.mubr.f32.mxu0 %v398_v18  ;;  %898 = vmatprep.mubr.f32.mxu1 %v400_v19 }
  0x9e   : > { %674 = vmatmul.mubr.f32.gmra.mxu0 %v397_v20  ;;  %899 = vmatmul.mubr.f32.gmra.mxu1 %v399_v21 }
  0x9f   : > { %678 = vmatprep.mubr.f32.mxu0 %v402_v22  ;;  %903 = vmatprep.mubr.f32.mxu1 %v404_v23 }
  0xa2   : > { %679 = vmatmul.mubr.f32.gmra.mxu0 %v401_v24  ;;  %904 = vmatmul.mubr.f32.gmra.mxu1 %v403_v25  ;;  %v288_v25 = vld [vmem:[#allocation2 + $0x18] sm:$0xff] }
  0xa3   : > { %683 = vmatprep.mubr.f32.mxu0 %v406_v26  ;;  %908 = vmatprep.mubr.f32.mxu1 %v408_v27 }
  0xa6   : > { %684 = vmatmul.mubr.f32.gmra.mxu0 %v405_v28  ;;  %909 = vmatmul.mubr.f32.gmra.mxu1 %v407_v29 }
  0xa7   : > { %688 = vmatprep.mubr.f32.mxu0 %v410_v30  ;;  %913 = vmatprep.mubr.f32.mxu1 %v412_v31 }
  0xaa   : > { %689 = vmatmul.mubr.f32.gmra.mxu0 %v409_v32  ;;  %914 = vmatmul.mubr.f32.gmra.mxu1 %v411_v33  ;;  %v289_v33 = vld [vmem:[#allocation2 + $0x20] sm:$0xff] }
  0xab   : > { %693 = vmatprep.mubr.f32.mxu0 %v414_v34  ;;  %918 = vmatprep.mubr.f32.mxu1 %v416_v35 }
  0xae   : > { %694 = vmatmul.mubr.f32.gmra.mxu0 %v413_v36  ;;  %919 = vmatmul.mubr.f32.gmra.mxu1 %v415_v37 }
  0xaf   : > { %698 = vmatprep.mubr.f32.mxu0 %v418_v38  ;;  %923 = vmatprep.mubr.f32.mxu1 %v420_v39 }
  0xb2   : > { %699 = vmatmul.mubr.f32.gmra.mxu0 %v417_v40  ;;  %924 = vmatmul.mubr.f32.gmra.mxu1 %v419_v41  ;;  %v290_v41 = vld [vmem:[#allocation2 + $0x28] sm:$0xff] }
  0xb3   : > { %703 = vmatprep.mubr.f32.mxu0 %v422_v42  ;;  %928 = vmatprep.mubr.f32.mxu1 %v424_v43 }
  0xb6   : > { %704 = vmatmul.mubr.f32.gmra.mxu0 %v421_v44  ;;  %929 = vmatmul.mubr.f32.gmra.mxu1 %v423_v45 }
  0xb7   : > { %708 = vmatprep.mubr.f32.mxu0 %v426_v46  ;;  %933 = vmatprep.mubr.f32.mxu1 %v428_v47 }
  0xba   : > { %709 = vmatmul.mubr.f32.gmra.mxu0 %v425_v48  ;;  %934 = vmatmul.mubr.f32.gmra.mxu1 %v427_v49  ;;  %v291_v49 = vld [vmem:[#allocation2 + $0x30] sm:$0xff] }
  0xbb   : > { %713 = vmatprep.mubr.f32.mxu0 %v430_v50  ;;  %938 = vmatprep.mubr.f32.mxu1 %v432_v51 }
  0xbe   : > { %714 = vmatmul.mubr.f32.gmra.mxu0 %v429_v52  ;;  %939 = vmatmul.mubr.f32.gmra.mxu1 %v431_v53 }
  0xbf   : > { %718 = vmatprep.mubr.f32.mxu0 %v434_v54  ;;  %943 = vmatprep.mubr.f32.mxu1 %v436_v55 }
  0xc2   : > { %719 = vmatmul.mubr.f32.gmra.mxu0 %v433_v56  ;;  %944 = vmatmul.mubr.f32.gmra.mxu1 %v435_v57 }
  0xc3   : > { %723 = vmatprep.mubr.f32.mxu0 %v438_v58  ;;  %948 = vmatprep.mubr.f32.mxu1 %v440_v59  ;;  %v292_v58 = vld [vmem:[#allocation2 + $0x38] sm:$0xff] }
  0xc6   : > { %724 = vmatmul.mubr.f32.gmra.mxu0 %v437_v60  ;;  %949 = vmatmul.mubr.f32.gmra.mxu1 %v439_v61 }
  0xc7   : > { %728 = vmatprep.mubr.f32.mxu0 %v442_v62  ;;  %953 = vmatprep.mubr.f32.mxu1 %v444_v63 }
  0xca   : > { %729 = vmatmul.mubr.f32.gmra.mxu0 %v441_v0  ;;  %954 = vmatmul.mubr.f32.gmra.mxu1 %v443_v1 }
 0x10e   : > { %v575_v3 = vpop.f32.mrf.mxu0  ;;  %v800_v5 = vpop.f32.mrf.mxu1 }
 0x10f   : > { %v801_v6 = vadd.f32 %v800_v5, %v575_v3 }
 0x110   : > { %v577_v7 = vpop.f32.mrf.mxu0  ;;  %v802_v8 = vpop.f32.mrf.mxu1 }
 0x111   : > { %v959_v9 = vadd.f32 %v801_v6, %v285_v4  ;;  %v293_v4 = vld [vmem:[#allocation2 + $0x40] sm:$0xff] }
 0x112   : > { %v580_v2 = vpop.f32.mrf.mxu0  ;;  %v805_v11 = vpop.f32.mrf.mxu1 }
 0x113   : > { %992 = vst.msk [vmem:[#allocation2] sm:$0xff] %vm252_vm0, %v959_v9  ;;  %v806_v12 = vadd.f32 %v805_v11, %v580_v2 }
 0x114   : > { %v582_v13 = vpop.f32.mrf.mxu0  ;;  %v807_v14 = vpop.f32.mrf.mxu1 }
 0x115   : > { %v960_v15 = vadd.f32 %v806_v12, %v286_v10  ;;  %v294_v12 = vld [vmem:[#allocation2 + $0x48] sm:$0xff] }
 0x116   : > { %v585_v16 = vpop.f32.mrf.mxu0  ;;  %v810_v18 = vpop.f32.mrf.mxu1 }
 0x117   : > { %993 = vst.msk [vmem:[#allocation2 + $0x8] sm:$0xff] %vm252_vm0, %v960_v15  ;;  %v811_v19 = vadd.f32 %v810_v18, %v585_v16 }
 0x118   : > { %v587_v20 = vpop.f32.mrf.mxu0  ;;  %v812_v21 = vpop.f32.mrf.mxu1 }
 0x119   : > { %v961_v22 = vadd.f32 %v811_v19, %v287_v17  ;;  %v295_v21 = vld [vmem:[#allocation2 + $0x50] sm:$0xff] }
 0x11a   : > { %v1027_v23 = vld [vmem:[#allocation2] sm:$0xff]  ;;  %v590_v24 = vpop.f32.mrf.mxu0  ;;  %v815_v26 = vpop.f32.mrf.mxu1 }
 0x11b   : > { %1247 = vtanh.f32 %v1027_v23  ;;  %994 = vst.msk [vmem:[#allocation2 + $0x10] sm:$0xff] %vm252_vm0, %v961_v22  ;;  %v816_v27 = vadd.f32 %v815_v26, %v590_v24 }
 0x11c   : > { %v592_v28 = vpop.f32.mrf.mxu0  ;;  %v817_v29 = vpop.f32.mrf.mxu1 }
 0x11d   : > { %v962_v30 = vadd.f32 %v816_v27, %v288_v25 }
 0x11e   : > { %v1028_v31 = vld [vmem:[#allocation2 + $0x8] sm:$0xff]  ;;  %v595_v32 = vpop.f32.mrf.mxu0  ;;  %v820_v34 = vpop.f32.mrf.mxu1 }
 0x11f   : > { %1249 = vtanh.f32 %v1028_v31  ;;  %995 = vst.msk [vmem:[#allocation2 + $0x18] sm:$0xff] %vm252_vm0, %v962_v30  ;;  %v821_v35 = vadd.f32 %v820_v34, %v595_v32  ;;  %v296_v30 = vld [vmem:[#allocation2 + $0x58] sm:$0xff] }
 0x120   : > { %v597_v36 = vpop.f32.mrf.mxu0  ;;  %v822_v37 = vpop.f32.mrf.mxu1 }
 0x121   : > { %v963_v38 = vadd.f32 %v821_v35, %v289_v33 }
 0x122   : > { %v1029_v39 = vld [vmem:[#allocation2 + $0x10] sm:$0xff]  ;;  %v600_v40 = vpop.f32.mrf.mxu0  ;;  %v825_v42 = vpop.f32.mrf.mxu1 }
 0x123   : > { %1251 = vtanh.f32 %v1029_v39  ;;  %996 = vst.msk [vmem:[#allocation2 + $0x20] sm:$0xff] %vm252_vm0, %v963_v38  ;;  %v826_v43 = vadd.f32 %v825_v42, %v600_v40  ;;  %v297_v39 = vld [vmem:[#allocation2 + $0x60] sm:$0xff] }
 0x124   : > { %v602_v44 = vpop.f32.mrf.mxu0  ;;  %v827_v45 = vpop.f32.mrf.mxu1 }
 0x125   : > { %v964_v46 = vadd.f32 %v826_v43, %v290_v41 }
 0x126   : > { %v1030_v47 = vld [vmem:[#allocation2 + $0x18] sm:$0xff]  ;;  %v605_v48 = vpop.f32.mrf.mxu0  ;;  %v830_v50 = vpop.f32.mrf.mxu1 }
 0x127   : > { %1253 = vtanh.f32 %v1030_v47  ;;  %997 = vst.msk [vmem:[#allocation2 + $0x28] sm:$0xff] %vm252_vm0, %v964_v46  ;;  %v831_v51 = vadd.f32 %v830_v50, %v605_v48  ;;  %v298_v48 = vld [vmem:[#allocation2 + $0x68] sm:$0xff] }
 0x128   : > { %v1248_v52 = vpop.eup %1247  ;;  %v607_v53 = vpop.f32.mrf.mxu0 }
 0x129   : > { %v832_v54 = vpop.f32.mrf.mxu1  ;;  %1091 = vst.msk [vmem:[%s1848_s6] sm:$0xff] %vm252_vm0, %v1248_v52  ;;  %v965_v55 = vadd.f32 %v831_v51, %v291_v49 }
 0x12a   : > { %v1031_v56 = vld [vmem:[#allocation2 + $0x20] sm:$0xff]  ;;  %v610_v57 = vpop.f32.mrf.mxu0 }
 0x12b   : > { %v835_v59 = vpop.f32.mrf.mxu1  ;;  %1255 = vtanh.f32 %v1031_v56  ;;  %998 = vst.msk [vmem:[#allocation2 + $0x30] sm:$0xff] %vm252_vm0, %v965_v55 }
 0x12c   : > { %v836_v60 = vadd.f32 %v835_v59, %v610_v57  ;;  %v1250_v61 = vpop.eup %1249  ;;  %v612_v62 = vpop.f32.mrf.mxu0  ;;  %v299_v57 = vld [vmem:[#allocation2 + $0x70] sm:$0xff] }
 0x12d   : > { %v837_v63 = vpop.f32.mrf.mxu1  ;;  %1092 = vst.msk [vmem:[%s1848_s6 + $0x8] sm:$0xff] %vm252_vm0, %v1250_v61 }
 0x12e   : > { %v966_v0 = vadd.f32 %v836_v60, %v292_v58  ;;  %v1032_v1 = vld [vmem:[#allocation2 + $0x28] sm:$0xff]  ;;  %v615_v3 = vpop.f32.mrf.mxu0 }
 0x12f   : > { %v840_v5 = vpop.f32.mrf.mxu1  ;;  %1257 = vtanh.f32 %v1032_v1 }
 0x130   : > { %999 = vst.msk [vmem:[#allocation2 + $0x38] sm:$0xff] %vm252_vm0, %v966_v0  ;;  %v841_v6 = vadd.f32 %v840_v5, %v615_v3  ;;  %v1252_v7 = vpop.eup %1251  ;;  %v617_v8 = vpop.f32.mrf.mxu0  ;;  %v300_v3 = vld [vmem:[#allocation2 + $0x78] sm:$0xff] }
 0x131   : > { %v842_v9 = vpop.f32.mrf.mxu1  ;;  %1093 = vst.msk [vmem:[%s1848_s6 + $0x10] sm:$0xff] %vm252_vm0, %v1252_v7 }
 0x132   : > { %v967_v2 = vadd.f32 %v841_v6, %v293_v4  ;;  %v1033_v10 = vld [vmem:[#allocation2 + $0x30] sm:$0xff]  ;;  %v620_v11 = vpop.f32.mrf.mxu0 }
 0x133   : > { %v845_v13 = vpop.f32.mrf.mxu1  ;;  %1259 = vtanh.f32 %v1033_v10 }
 0x134   : > { %1000 = vst.msk [vmem:[#allocation2 + $0x40] sm:$0xff] %vm252_vm0, %v967_v2  ;;  %v846_v14 = vadd.f32 %v845_v13, %v620_v11  ;;  %v1254_v15 = vpop.eup %1253  ;;  %v622_v16 = vpop.f32.mrf.mxu0  ;;  %v301_v11 = vld [vmem:[#allocation2 + $0x80] sm:$0xff] }
 0x135   : > { %v847_v17 = vpop.f32.mrf.mxu1  ;;  %1094 = vst.msk [vmem:[%s1848_s6 + $0x18] sm:$0xff] %vm252_vm0, %v1254_v15 }
 0x136   : > { %v968_v18 = vadd.f32 %v846_v14, %v294_v12  ;;  %v625_v20 = vpop.f32.mrf.mxu0 }
 0x137   : > { %v1034_v19 = vld [vmem:[#allocation2 + $0x38] sm:$0xff]  ;;  %v850_v22 = vpop.f32.mrf.mxu1 }
 0x138   : > { %1261 = vtanh.f32 %v1034_v19  ;;  %1001 = vst.msk [vmem:[#allocation2 + $0x48] sm:$0xff] %vm252_vm0, %v968_v18  ;;  %v851_v23 = vadd.f32 %v850_v22, %v625_v20  ;;  %v1256_v24 = vpop.eup %1255  ;;  %v627_v25 = vpop.f32.mrf.mxu0  ;;  %v302_v20 = vld [vmem:[#allocation2 + $0x88] sm:$0xff] }
 0x139   : > { %v852_v26 = vpop.f32.mrf.mxu1  ;;  %1095 = vst.msk [vmem:[%s1848_s6 + $0x20] sm:$0xff] %vm252_vm0, %v1256_v24 }
 0x13a   : > { %v969_v27 = vadd.f32 %v851_v23, %v295_v21  ;;  %v630_v29 = vpop.f32.mrf.mxu0 }
 0x13b   : > { %v1035_v28 = vld [vmem:[#allocation2 + $0x40] sm:$0xff]  ;;  %v855_v31 = vpop.f32.mrf.mxu1 }
 0x13c   : > { %1263 = vtanh.f32 %v1035_v28  ;;  %1002 = vst.msk [vmem:[#allocation2 + $0x50] sm:$0xff] %vm252_vm0, %v969_v27  ;;  %v856_v32 = vadd.f32 %v855_v31, %v630_v29  ;;  %v1258_v33 = vpop.eup %1257  ;;  %v632_v34 = vpop.f32.mrf.mxu0  ;;  %v303_v29 = vld [vmem:[#allocation2 + $0x90] sm:$0xff] }
 0x13d   : > { %v857_v35 = vpop.f32.mrf.mxu1  ;;  %1096 = vst.msk [vmem:[%s1848_s6 + $0x28] sm:$0xff] %vm252_vm0, %v1258_v33 }
 0x13e   : > { %v970_v36 = vadd.f32 %v856_v32, %v296_v30  ;;  %v635_v38 = vpop.f32.mrf.mxu0 }
 0x13f   : > { %v1036_v37 = vld [vmem:[#allocation2 + $0x48] sm:$0xff]  ;;  %v860_v40 = vpop.f32.mrf.mxu1 }
 0x140   : > { %1265 = vtanh.f32 %v1036_v37  ;;  %1003 = vst.msk [vmem:[#allocation2 + $0x58] sm:$0xff] %vm252_vm0, %v970_v36  ;;  %v861_v41 = vadd.f32 %v860_v40, %v635_v38  ;;  %v1260_v42 = vpop.eup %1259  ;;  %v637_v43 = vpop.f32.mrf.mxu0  ;;  %v304_v38 = vld [vmem:[#allocation2 + $0x98] sm:$0xff] }
 0x141   : > { %v862_v44 = vpop.f32.mrf.mxu1  ;;  %1097 = vst.msk [vmem:[%s1848_s6 + $0x30] sm:$0xff] %vm252_vm0, %v1260_v42 }
 0x142   : > { %v971_v45 = vadd.f32 %v861_v41, %v297_v39  ;;  %v640_v47 = vpop.f32.mrf.mxu0 }
 0x143   : > { %v1037_v46 = vld [vmem:[#allocation2 + $0x50] sm:$0xff]  ;;  %v865_v49 = vpop.f32.mrf.mxu1 }
 0x144   : > { %1267 = vtanh.f32 %v1037_v46  ;;  %1004 = vst.msk [vmem:[#allocation2 + $0x60] sm:$0xff] %vm252_vm0, %v971_v45  ;;  %v866_v50 = vadd.f32 %v865_v49, %v640_v47  ;;  %v642_v52 = vpop.f32.mrf.mxu0  ;;  %v305_v47 = vld [vmem:[#allocation2 + $0xa0] sm:$0xff] }
 0x145   : > { %v1262_v51 = vpop.eup %1261  ;;  %v867_v53 = vpop.f32.mrf.mxu1 }
 0x146   : > { %1098 = vst.msk [vmem:[%s1848_s6 + $0x38] sm:$0xff] %vm252_vm0, %v1262_v51  ;;  %v972_v54 = vadd.f32 %v866_v50, %v298_v48  ;;  %v645_v56 = vpop.f32.mrf.mxu0 }
 0x147   : > { %v1038_v55 = vld [vmem:[#allocation2 + $0x58] sm:$0xff]  ;;  %v870_v58 = vpop.f32.mrf.mxu1 }
 0x148   : > { %1269 = vtanh.f32 %v1038_v55  ;;  %1005 = vst.msk [vmem:[#allocation2 + $0x68] sm:$0xff] %vm252_vm0, %v972_v54  ;;  %v871_v59 = vadd.f32 %v870_v58, %v645_v56  ;;  %v647_v61 = vpop.f32.mrf.mxu0  ;;  %v306_v56 = vld [vmem:[#allocation2 + $0xa8] sm:$0xff] }
 0x149   : > { %v1264_v60 = vpop.eup %1263  ;;  %v872_v62 = vpop.f32.mrf.mxu1 }
 0x14a   : > { %1099 = vst.msk [vmem:[%s1848_s6 + $0x40] sm:$0xff] %vm252_vm0, %v1264_v60  ;;  %v973_v63 = vadd.f32 %v871_v59, %v299_v57  ;;  %v650_v1 = vpop.f32.mrf.mxu0 }
 0x14b   : > { %v1039_v0 = vld [vmem:[#allocation2 + $0x60] sm:$0xff]  ;;  %v875_v4 = vpop.f32.mrf.mxu1 }
 0x14c   : > { %1271 = vtanh.f32 %v1039_v0  ;;  %1006 = vst.msk [vmem:[#allocation2 + $0x70] sm:$0xff] %vm252_vm0, %v973_v63  ;;  %v876_v5 = vadd.f32 %v875_v4, %v650_v1  ;;  %v652_v7 = vpop.f32.mrf.mxu0  ;;  %v307_v1 = vld [vmem:[#allocation2 + $0xb0] sm:$0xff] }
 0x14d   : > { %v1266_v6 = vpop.eup %1265  ;;  %v877_v8 = vpop.f32.mrf.mxu1 }
 0x14e   : > { %1100 = vst.msk [vmem:[%s1848_s6 + $0x48] sm:$0xff] %vm252_vm0, %v1266_v6  ;;  %v974_v9 = vadd.f32 %v876_v5, %v300_v3  ;;  %v655_v10 = vpop.f32.mrf.mxu0 }
 0x14f   : > { %v1040_v2 = vld [vmem:[#allocation2 + $0x68] sm:$0xff]  ;;  %v880_v12 = vpop.f32.mrf.mxu1 }
 0x150   : > { %1273 = vtanh.f32 %v1040_v2  ;;  %1007 = vst.msk [vmem:[#allocation2 + $0x78] sm:$0xff] %vm252_vm0, %v974_v9  ;;  %v881_v13 = vadd.f32 %v880_v12, %v655_v10  ;;  %v657_v15 = vpop.f32.mrf.mxu0  ;;  %v308_v10 = vld [vmem:[#allocation2 + $0xb8] sm:$0xff] }
 0x151   : > { %v1268_v14 = vpop.eup %1267  ;;  %v882_v16 = vpop.f32.mrf.mxu1 }
 0x152   : > { %1101 = vst.msk [vmem:[%s1848_s6 + $0x50] sm:$0xff] %vm252_vm0, %v1268_v14  ;;  %v975_v17 = vadd.f32 %v881_v13, %v301_v11  ;;  %v660_v19 = vpop.f32.mrf.mxu0 }
 0x153   : > { %v1041_v18 = vld [vmem:[#allocation2 + $0x70] sm:$0xff]  ;;  %v885_v21 = vpop.f32.mrf.mxu1 }
 0x154   : > { %1275 = vtanh.f32 %v1041_v18  ;;  %1008 = vst.msk [vmem:[#allocation2 + $0x80] sm:$0xff] %vm252_vm0, %v975_v17  ;;  %v886_v22 = vadd.f32 %v885_v21, %v660_v19  ;;  %v662_v24 = vpop.f32.mrf.mxu0  ;;  %v309_v19 = vld [vmem:[#allocation2 + $0xc0] sm:$0xff] }
 0x155   : > { %v1270_v23 = vpop.eup %1269  ;;  %v887_v25 = vpop.f32.mrf.mxu1 }
 0x156   : > { %1102 = vst.msk [vmem:[%s1848_s6 + $0x58] sm:$0xff] %vm252_vm0, %v1270_v23  ;;  %v976_v26 = vadd.f32 %v886_v22, %v302_v20  ;;  %v665_v28 = vpop.f32.mrf.mxu0 }
 0x157   : > { %v1042_v27 = vld [vmem:[#allocation2 + $0x78] sm:$0xff]  ;;  %v890_v30 = vpop.f32.mrf.mxu1 }
 0x158   : > { %1277 = vtanh.f32 %v1042_v27  ;;  %1009 = vst.msk [vmem:[#allocation2 + $0x88] sm:$0xff] %vm252_vm0, %v976_v26  ;;  %v891_v31 = vadd.f32 %v890_v30, %v665_v28  ;;  %v667_v33 = vpop.f32.mrf.mxu0  ;;  %v310_v28 = vld [vmem:[#allocation2 + $0xc8] sm:$0xff] }
 0x159   : > { %v1272_v32 = vpop.eup %1271  ;;  %v892_v34 = vpop.f32.mrf.mxu1 }
 0x15a   : > { %1103 = vst.msk [vmem:[%s1848_s6 + $0x60] sm:$0xff] %vm252_vm0, %v1272_v32  ;;  %v977_v35 = vadd.f32 %v891_v31, %v303_v29  ;;  %v670_v37 = vpop.f32.mrf.mxu0 }
 0x15b   : > { %v1043_v36 = vld [vmem:[#allocation2 + $0x80] sm:$0xff]  ;;  %v895_v39 = vpop.f32.mrf.mxu1 }
 0x15c   : > { %1279 = vtanh.f32 %v1043_v36  ;;  %1010 = vst.msk [vmem:[#allocation2 + $0x90] sm:$0xff] %vm252_vm0, %v977_v35  ;;  %v896_v40 = vadd.f32 %v895_v39, %v670_v37  ;;  %v672_v42 = vpop.f32.mrf.mxu0  ;;  %v311_v37 = vld [vmem:[#allocation2 + $0xd0] sm:$0xff] }
 0x15d   : > { %v1274_v41 = vpop.eup %1273  ;;  %v897_v43 = vpop.f32.mrf.mxu1 }
 0x15e   : > { %1104 = vst.msk [vmem:[%s1848_s6 + $0x68] sm:$0xff] %vm252_vm0, %v1274_v41  ;;  %v978_v44 = vadd.f32 %v896_v40, %v304_v38  ;;  %v675_v46 = vpop.f32.mrf.mxu0 }
 0x15f   : > { %v1044_v45 = vld [vmem:[#allocation2 + $0x88] sm:$0xff]  ;;  %v900_v48 = vpop.f32.mrf.mxu1 }
 0x160   : > { %1281 = vtanh.f32 %v1044_v45  ;;  %1011 = vst.msk [vmem:[#allocation2 + $0x98] sm:$0xff] %vm252_vm0, %v978_v44  ;;  %v901_v49 = vadd.f32 %v900_v48, %v675_v46  ;;  %v677_v51 = vpop.f32.mrf.mxu0  ;;  %v312_v46 = vld [vmem:[#allocation2 + $0xd8] sm:$0xff] }
 0x161   : > { %v1276_v50 = vpop.eup %1275  ;;  %v902_v52 = vpop.f32.mrf.mxu1 }
 0x162   : > { %1105 = vst.msk [vmem:[%s1848_s6 + $0x70] sm:$0xff] %vm252_vm0, %v1276_v50  ;;  %v979_v53 = vadd.f32 %v901_v49, %v305_v47  ;;  %v680_v55 = vpop.f32.mrf.mxu0 }
 0x163   : > { %v1045_v54 = vld [vmem:[#allocation2 + $0x90] sm:$0xff]  ;;  %v905_v57 = vpop.f32.mrf.mxu1 }
 0x164   : > { %1283 = vtanh.f32 %v1045_v54  ;;  %1012 = vst.msk [vmem:[#allocation2 + $0xa0] sm:$0xff] %vm252_vm0, %v979_v53  ;;  %v906_v58 = vadd.f32 %v905_v57, %v680_v55  ;;  %v682_v60 = vpop.f32.mrf.mxu0  ;;  %v313_v55 = vld [vmem:[#allocation2 + $0xe0] sm:$0xff] }
 0x165   : > { %v1278_v59 = vpop.eup %1277  ;;  %v907_v61 = vpop.f32.mrf.mxu1 }
 0x166   : > { %1106 = vst.msk [vmem:[%s1848_s6 + $0x78] sm:$0xff] %vm252_vm0, %v1278_v59  ;;  %v980_v62 = vadd.f32 %v906_v58, %v306_v56  ;;  %v685_v0 = vpop.f32.mrf.mxu0 }
 0x167   : > { %v1046_v63 = vld [vmem:[#allocation2 + $0x98] sm:$0xff]  ;;  %v910_v3 = vpop.f32.mrf.mxu1 }
 0x168   : > { %1285 = vtanh.f32 %v1046_v63  ;;  %1013 = vst.msk [vmem:[#allocation2 + $0xa8] sm:$0xff] %vm252_vm0, %v980_v62  ;;  %v911_v4 = vadd.f32 %v910_v3, %v685_v0  ;;  %v687_v6 = vpop.f32.mrf.mxu0  ;;  %v314_v0 = vld [vmem:[#allocation2 + $0xe8] sm:$0xff] }
 0x169   : > { %v1280_v5 = vpop.eup %1279  ;;  %v912_v7 = vpop.f32.mrf.mxu1 }
 0x16a   : > { %1107 = vst.msk [vmem:[%s1848_s6 + $0x80] sm:$0xff] %vm252_vm0, %v1280_v5  ;;  %v981_v8 = vadd.f32 %v911_v4, %v307_v1  ;;  %v690_v2 = vpop.f32.mrf.mxu0 }
 0x16b   : > { %v1047_v9 = vld [vmem:[#allocation2 + $0xa0] sm:$0xff]  ;;  %v915_v11 = vpop.f32.mrf.mxu1 }
 0x16c   : > { %1287 = vtanh.f32 %v1047_v9  ;;  %1014 = vst.msk [vmem:[#allocation2 + $0xb0] sm:$0xff] %vm252_vm0, %v981_v8  ;;  %v916_v12 = vadd.f32 %v915_v11, %v690_v2  ;;  %v692_v14 = vpop.f32.mrf.mxu0  ;;  %v315_v2 = vld [vmem:[#allocation2 + $0xf0] sm:$0xff] }
 0x16d   : > { %v1282_v13 = vpop.eup %1281  ;;  %v917_v15 = vpop.f32.mrf.mxu1 }
 0x16e   : > { %1108 = vst.msk [vmem:[%s1848_s6 + $0x88] sm:$0xff] %vm252_vm0, %v1282_v13  ;;  %v982_v16 = vadd.f32 %v916_v12, %v308_v10  ;;  %v695_v18 = vpop.f32.mrf.mxu0 }
 0x16f   : > { %v1048_v17 = vld [vmem:[#allocation2 + $0xa8] sm:$0xff]  ;;  %v920_v20 = vpop.f32.mrf.mxu1 }
 0x170   : > { %1289 = vtanh.f32 %v1048_v17  ;;  %1015 = vst.msk [vmem:[#allocation2 + $0xb8] sm:$0xff] %vm252_vm0, %v982_v16  ;;  %v921_v21 = vadd.f32 %v920_v20, %v695_v18  ;;  %v697_v23 = vpop.f32.mrf.mxu0  ;;  %v316_v18 = vld [vmem:[#allocation2 + $0xf8] sm:$0xff] }
 0x171   : > { %v1284_v22 = vpop.eup %1283  ;;  %v922_v24 = vpop.f32.mrf.mxu1 }
 0x172   : > { %1109 = vst.msk [vmem:[%s1848_s6 + $0x90] sm:$0xff] %vm252_vm0, %v1284_v22  ;;  %v983_v25 = vadd.f32 %v921_v21, %v309_v19  ;;  %v700_v27 = vpop.f32.mrf.mxu0 }
 0x173   : > { %v1049_v26 = vld [vmem:[#allocation2 + $0xb0] sm:$0xff]  ;;  %v925_v29 = vpop.f32.mrf.mxu1 }
 0x174   : > { %1291 = vtanh.f32 %v1049_v26  ;;  %1016 = vst.msk [vmem:[#allocation2 + $0xc0] sm:$0xff] %vm252_vm0, %v983_v25  ;;  %v926_v30 = vadd.f32 %v925_v29, %v700_v27  ;;  %v702_v32 = vpop.f32.mrf.mxu0 }
 0x175   : > { %v1286_v31 = vpop.eup %1285  ;;  %v927_v33 = vpop.f32.mrf.mxu1 }
 0x176   : > { %1110 = vst.msk [vmem:[%s1848_s6 + $0x98] sm:$0xff] %vm252_vm0, %v1286_v31  ;;  %v984_v34 = vadd.f32 %v926_v30, %v310_v28  ;;  %v705_v36 = vpop.f32.mrf.mxu0 }
 0x177   : > { %v1050_v35 = vld [vmem:[#allocation2 + $0xb8] sm:$0xff]  ;;  %v930_v38 = vpop.f32.mrf.mxu1 }
 0x178   : > { %1293 = vtanh.f32 %v1050_v35  ;;  %1017 = vst.msk [vmem:[#allocation2 + $0xc8] sm:$0xff] %vm252_vm0, %v984_v34  ;;  %v931_v39 = vadd.f32 %v930_v38, %v705_v36  ;;  %v707_v41 = vpop.f32.mrf.mxu0 }
 0x179   : > { %v1288_v40 = vpop.eup %1287  ;;  %v932_v42 = vpop.f32.mrf.mxu1 }
 0x17a   : > { %1111 = vst.msk [vmem:[%s1848_s6 + $0xa0] sm:$0xff] %vm252_vm0, %v1288_v40  ;;  %v985_v43 = vadd.f32 %v931_v39, %v311_v37  ;;  %v710_v45 = vpop.f32.mrf.mxu0 }
 0x17b   : > { %v1051_v44 = vld [vmem:[#allocation2 + $0xc0] sm:$0xff]  ;;  %v935_v47 = vpop.f32.mrf.mxu1 }
 0x17c   : > { %1295 = vtanh.f32 %v1051_v44  ;;  %1018 = vst.msk [vmem:[#allocation2 + $0xd0] sm:$0xff] %vm252_vm0, %v985_v43  ;;  %v936_v48 = vadd.f32 %v935_v47, %v710_v45  ;;  %v712_v50 = vpop.f32.mrf.mxu0 }
 0x17d   : > { %v1290_v49 = vpop.eup %1289  ;;  %v937_v51 = vpop.f32.mrf.mxu1 }
 0x17e   : > { %1112 = vst.msk [vmem:[%s1848_s6 + $0xa8] sm:$0xff] %vm252_vm0, %v1290_v49  ;;  %v986_v52 = vadd.f32 %v936_v48, %v312_v46  ;;  %v715_v54 = vpop.f32.mrf.mxu0 }
 0x17f   : > { %v1052_v53 = vld [vmem:[#allocation2 + $0xc8] sm:$0xff]  ;;  %v940_v56 = vpop.f32.mrf.mxu1 }
 0x180   : > { %1297 = vtanh.f32 %v1052_v53  ;;  %1019 = vst.msk [vmem:[#allocation2 + $0xd8] sm:$0xff] %vm252_vm0, %v986_v52  ;;  %v941_v57 = vadd.f32 %v940_v56, %v715_v54  ;;  %v717_v59 = vpop.f32.mrf.mxu0 }
 0x181   : > { %v1292_v58 = vpop.eup %1291  ;;  %v942_v60 = vpop.f32.mrf.mxu1 }
 0x182   : > { %1113 = vst.msk [vmem:[%s1848_s6 + $0xb0] sm:$0xff] %vm252_vm0, %v1292_v58  ;;  %v987_v61 = vadd.f32 %v941_v57, %v313_v55  ;;  %v720_v63 = vpop.f32.mrf.mxu0 }
 0x183   : > { %v1053_v62 = vld [vmem:[#allocation2 + $0xd0] sm:$0xff]  ;;  %v945_v1 = vpop.f32.mrf.mxu1 }
 0x184   : > { %1299 = vtanh.f32 %v1053_v62  ;;  %1020 = vst.msk [vmem:[#allocation2 + $0xe0] sm:$0xff] %vm252_vm0, %v987_v61  ;;  %v946_v3 = vadd.f32 %v945_v1, %v720_v63  ;;  %v722_v5 = vpop.f32.mrf.mxu0 }
 0x185   : > { %v1294_v4 = vpop.eup %1293  ;;  %v947_v6 = vpop.f32.mrf.mxu1 }
 0x186   : > { %1114 = vst.msk [vmem:[%s1848_s6 + $0xb8] sm:$0xff] %vm252_vm0, %v1294_v4  ;;  %v988_v7 = vadd.f32 %v946_v3, %v314_v0  ;;  %v725_v9 = vpop.f32.mrf.mxu0 }
 0x187   : > { %v1054_v8 = vld [vmem:[#allocation2 + $0xd8] sm:$0xff]  ;;  %v950_v10 = vpop.f32.mrf.mxu1 }
 0x188   : > { %1301 = vtanh.f32 %v1054_v8  ;;  %1021 = vst.msk [vmem:[#allocation2 + $0xe8] sm:$0xff] %vm252_vm0, %v988_v7  ;;  %v951_v11 = vadd.f32 %v950_v10, %v725_v9  ;;  %v727_v13 = vpop.f32.mrf.mxu0 }
 0x189   : > { %v1296_v12 = vpop.eup %1295  ;;  %v952_v14 = vpop.f32.mrf.mxu1 }
 0x18a   : > { %1115 = vst.msk [vmem:[%s1848_s6 + $0xc0] sm:$0xff] %vm252_vm0, %v1296_v12  ;;  %v989_v15 = vadd.f32 %v951_v11, %v315_v2  ;;  %v730_v17 = vpop.f32.mrf.mxu0 }
 0x18b   : > { %v1055_v16 = vld [vmem:[#allocation2 + $0xe0] sm:$0xff]  ;;  %v955_v19 = vpop.f32.mrf.mxu1 }
 0x18c   : > { %1303 = vtanh.f32 %v1055_v16  ;;  %1022 = vst.msk [vmem:[#allocation2 + $0xf0] sm:$0xff] %vm252_vm0, %v989_v15  ;;  %v956_v20 = vadd.f32 %v955_v19, %v730_v17  ;;  %v732_v22 = vpop.f32.mrf.mxu0 }
 0x18d   : > { %v1298_v21 = vpop.eup %1297  ;;  %v957_v23 = vpop.f32.mrf.mxu1 }
 0x18e   : > { %1116 = vst.msk [vmem:[%s1848_s6 + $0xc8] sm:$0xff] %vm252_vm0, %v1298_v21  ;;  %v990_v24 = vadd.f32 %v956_v20, %v316_v18 }
 0x18f   : > { %v1056_v25 = vld [vmem:[#allocation2 + $0xe8] sm:$0xff] }
 0x190   : > { %1305 = vtanh.f32 %v1056_v25  ;;  %1023 = vst.msk [vmem:[#allocation2 + $0xf8] sm:$0xff] %vm252_vm0, %v990_v24 }
 0x191   : > { %v1300_v26 = vpop.eup %1299 }
 0x192   : > { %1117 = vst.msk [vmem:[%s1848_s6 + $0xd0] sm:$0xff] %vm252_vm0, %v1300_v26 }
 0x193   : > { %v1057_v27 = vld [vmem:[#allocation2 + $0xf0] sm:$0xff] }
 0x194   : > { %1307 = vtanh.f32 %v1057_v27 }
 0x195   : > { %v1302_v28 = vpop.eup %1301 }
 0x196   : > { %1118 = vst.msk [vmem:[%s1848_s6 + $0xd8] sm:$0xff] %vm252_vm0, %v1302_v28 }
 0x197   : > { %v1058_v29 = vld [vmem:[#allocation2 + $0xf8] sm:$0xff] }
 0x198   : > { %1309 = vtanh.f32 %v1058_v29 }
 0x199   : > { %v1304_v30 = vpop.eup %1303 }
 0x19a   : > { %1119 = vst.msk [vmem:[%s1848_s6 + $0xe0] sm:$0xff] %vm252_vm0, %v1304_v30 }
 0x19d   : > { %v1306_v31 = vpop.eup %1305 }
 0x19e   : > { %1120 = vst.msk [vmem:[%s1848_s6 + $0xe8] sm:$0xff] %vm252_vm0, %v1306_v31 }
 0x1a1   : > { %v1308_v32 = vpop.eup %1307 }
 0x1a2   : > { %1121 = vst.msk [vmem:[%s1848_s6 + $0xf0] sm:$0xff] %vm252_vm0, %v1308_v32 }
 0x1a5   : > { %v1310_v33 = vpop.eup %1309 }
 0x1a6   : > { %1122 = vst.msk [vmem:[%s1848_s6 + $0xf8] sm:$0xff] %vm252_vm0, %v1310_v33 }
 0x1a7 PF: > { %s14_s17 = sadd.s32 1, %s1333_s17   ;;  %s1955_s15 = smov %s1329_s16 }
 0x1a8   : > { %p11_p5 = scmp.ge.s32.totalorder %s14_s17, 4   ;;  %s1956_s16 = smov %s1958_s2 }
 0x1aa   :  { %13 = sbr.rel (!%p11_p5) target bundleno = 2 (0x2), region = 77 }

</bundles_post_ra>
